<compile_context>
chip_gen: v5e
topology: v5e:2x2
jax: 0.10.0
libtpu: 0.0.40
codegen_flags: <defaults>
</compile_context>

<pallas_src>
import jax
import jax.numpy as jnp
from jax.experimental import pallas as pl
from jax.experimental.pallas import tpu as pltpu

BN_EPS = 1e-5
NEG_SLOPE = 0.2
LANE = 128
M_TILE_TARGET = 512                 # rows / grid step (bf16 patches, v7x-safe)
VMEM_LIMIT = 48 * 1024 * 1024       # well above per-step use (~18 MiB worst)


def _round_up(x, m):
    return (x + m - 1) // m * m


def _tile_m(m, target=M_TILE_TARGET):
    tm = target if m >= target else _round_up(m, 8)
    return tm, _round_up(m, tm)


# ------------------------------ Pallas kernels ------------------------------

def _conv_mm_stats_kernel(p_ref, w_ref, b_ref, y_ref, s_ref, ss_ref):
    # y = patches @ W + bias  (bf16 inputs, f32 MXU accumulate); also
    # accumulate per-channel sum / sumsq (f32) across the (arbitrary) M axis.
    y = jnp.dot(p_ref[...], w_ref[...],
                preferred_element_type=jnp.float32) + b_ref[...]
    y_ref[...] = y.astype(y_ref.dtype)

    @pl.when(pl.program_id(0) == 0)
    def _():
        s_ref[...] = jnp.zeros_like(s_ref)
        ss_ref[...] = jnp.zeros_like(ss_ref)

    s_ref[...] += jnp.sum(y, axis=0, keepdims=True)
    ss_ref[...] += jnp.sum(y * y, axis=0, keepdims=True)


def _bn_lrelu_kernel(y_ref, scale_ref, shift_ref, o_ref):
    y = y_ref[...].astype(jnp.float32) * scale_ref[...] + shift_ref[...]
    o_ref[...] = jnp.maximum(y, NEG_SLOPE * y).astype(o_ref.dtype)   # LeakyReLU(0.2)


def _linear_sigmoid_kernel(x_ref, w_ref, b_ref, o_ref):
    y = jnp.dot(x_ref[...], w_ref[...],
                preferred_element_type=jnp.float32) + b_ref[...]
    o_ref[...] = jax.nn.sigmoid(y)


# ------------------------------ layer wrappers ------------------------------

def im2col_nhwc(x, k=4, s=2, p=1):
    # x: (N, H, W, C) -> patches (N*Ho*Wo, k*k*C), K order = (kh, kw, C).
    n, h, w, c = x.shape
    xp = jnp.pad(x, ((0, 0), (p, p), (p, p), (0, 0)))
    ho = (h + 2 * p - k) // s + 1
    wo = (w + 2 * p - k) // s + 1
    cols = []
    for i in range(k):
        for j in range(k):
            cols.append(xp[:, i:i + s * ho:s, j:j + s * wo:s, :])  # (N,Ho,Wo,C)
    stacked = jnp.stack(cols, axis=3)                  # (N, Ho, Wo, k*k, C)
    patches = stacked.reshape(n * ho * wo, k * k * c)
    return patches, ho, wo


def conv_bn_lrelu_layer(x, w, b, g, beta):
    n = x.shape[0]
    cout, cin = w.shape[0], w.shape[1]

    patches, ho, wo = im2col_nhwc(x)                   # (M, 16*cin) bf16
    m, kk = patches.shape
    tm, m_pad = _tile_m(m)
    gm = m_pad // tm
    cp = _round_up(cout, LANE)

    # PyTorch weight (Cout, Cin, kh, kw) -> (kh*kw*Cin, Cout), pad Cout -> cp.
    w2d = w.transpose(2, 3, 1, 0).reshape(kk, cout)
    w2d = jnp.pad(w2d, ((0, 0), (0, cp - cout))).astype(jnp.bfloat16)
    bias_p = jnp.pad(b.reshape(1, cout), ((0, 0), (0, cp - cout)))
    gamma_p = jnp.pad(g.reshape(1, cout), ((0, 0), (0, cp - cout)))   # pad=0
    beta_p = jnp.pad(beta.reshape(1, cout), ((0, 0), (0, cp - cout)))

    patches = jnp.pad(patches, ((0, m_pad - m), (0, 0))).astype(jnp.bfloat16)

    # ---- pass 1: tiled matmul + bias, global sum/sumsq accumulation --------
    ce1 = pl.CostEstimate(
        flops=2 * m_pad * kk * cp + 4 * m_pad * cp,
        transcendentals=0,
        bytes_accessed=m_pad * kk * 2 + kk * cp * 2 + cp * 4
        + m_pad * cp * 2 + 2 * cp * 4)
    y, sums, sumsqs = pl.pallas_call(
        _conv_mm_stats_kernel,
        out_shape=(jax.ShapeDtypeStruct((m_pad, cp), jnp.bfloat16),
                   jax.ShapeDtypeStruct((1, cp), jnp.float32),
                   jax.ShapeDtypeStruct((1, cp), jnp.float32)),
        grid_spec=pltpu.PrefetchScalarGridSpec(
            num_scalar_prefetch=0,
            grid=(gm,),
            in_specs=[pl.BlockSpec((tm, kk), lambda i: (i, 0)),
                      pl.BlockSpec((kk, cp), lambda i: (0, 0)),
                      pl.BlockSpec((1, cp), lambda i: (0, 0))],
            out_specs=[pl.BlockSpec((tm, cp), lambda i: (i, 0)),
                       pl.BlockSpec((1, cp), lambda i: (0, 0)),
                       pl.BlockSpec((1, cp), lambda i: (0, 0))]),
        compiler_params=pltpu.CompilerParams(
            dimension_semantics=("arbitrary",),
            vmem_limit_bytes=VMEM_LIMIT),
        cost_estimate=ce1,
    )(patches, w2d, bias_p)

    # ---- tiny JAX step: global BN stats -> fused scale / shift -------------
    pad_rows = m_pad - m                       # padded rows contribute bias
    s_true = sums - pad_rows * bias_p
    ss_true = sumsqs - pad_rows * bias_p * bias_p
    mean = s_true / m
    var = jnp.maximum(ss_true / m - mean * mean, 0.0)   # biased, as PyTorch BN
    inv = jax.lax.rsqrt(var + BN_EPS)
    scale = gamma_p * inv
    shift = beta_p - mean * scale

    # ---- pass 2: normalize + LeakyReLU, parallel M grid ---------------------
    ce2 = pl.CostEstimate(
        flops=4 * m_pad * cp, transcendentals=0,
        bytes_accessed=2 * m_pad * cp * 2 + 2 * cp * 4)
    out2d = pl.pallas_call(
        _bn_lrelu_kernel,
        out_shape=jax.ShapeDtypeStruct((m_pad, cp), jnp.bfloat16),
        grid_spec=pltpu.PrefetchScalarGridSpec(
            num_scalar_prefetch=0,
            grid=(gm,),
            in_specs=[pl.BlockSpec((tm, cp), lambda i: (i, 0)),
                      pl.BlockSpec((1, cp), lambda i: (0, 0)),
                      pl.BlockSpec((1, cp), lambda i: (0, 0))],
            out_specs=pl.BlockSpec((tm, cp), lambda i: (i, 0))),
        compiler_params=pltpu.CompilerParams(
            dimension_semantics=("parallel",),
            vmem_limit_bytes=VMEM_LIMIT),
        cost_estimate=ce2,
    )(y, scale, shift)

    out2d = out2d[:m, :cout]                   # drop M / channel padding
    return out2d.reshape(n, ho, wo, cout)      # NHWC bf16 for the next layer


def discriminator_forward(img, params):
    # img: (N, C, H, W) as in PyTorch; go NHWC + bf16 once, stay there.
    x = img.transpose(0, 2, 3, 1).astype(jnp.bfloat16)
    for (w, b, g, beta) in params["convs"]:
        x = conv_bn_lrelu_layer(x, w, b, g, beta)

    nb, hf, wf, cf = x.shape
    flat = x.reshape(nb, hf * wf * cf).astype(jnp.float32)   # NHWC flatten
    # Fold nn.Flatten's C-major (C,H,W) ordering into the FC weight instead of
    # transposing the activation: w_hwc[h, w, c] = fc_w[c, h, w].
    fc_w = params["fc_w"].reshape(cf, hf, wf, 1).transpose(1, 2, 0, 3)
    fc_w = fc_w.reshape(hf * wf * cf, 1)

    feat = flat.shape[1]
    ce = pl.CostEstimate(flops=2 * nb * feat + 2 * nb, transcendentals=nb,
                         bytes_accessed=nb * feat * 4 + feat * 4 + nb * 4 + 4)
    return pl.pallas_call(
        _linear_sigmoid_kernel,
        out_shape=jax.ShapeDtypeStruct((nb, 1), jnp.float32),
        cost_estimate=ce,
    )(flat, fc_w, params["fc_b"])


def init_params(key, channels, image_size):
    chans = [channels, 64, 128, 256, 512]
    keys = jax.random.split(key, 5)
    convs = []
    for i in range(4):
        cin, cout = chans[i], chans[i + 1]
        kw, kb = jax.random.split(keys[i])
        w = 0.05 * jax.random.normal(kw, (cout, cin, 4, 4), jnp.float32)
        b = 0.05 * jax.random.normal(kb, (cout,), jnp.float32)
        g = jnp.ones((cout,), jnp.float32)       # BatchNorm2d weight init
        beta = jnp.zeros((cout,), jnp.float32)   # BatchNorm2d bias init
        convs.append((w, b, g, beta))
    feat = 512 * (image_size // 16) ** 2
    kw, kb = jax.random.split(keys[4])
    fc_w = 0.05 * jax.random.normal(kw, (feat, 1), jnp.float32)
    fc_b = 0.05 * jax.random.normal(kb, (1, 1), jnp.float32)
    return {"convs": convs, "fc_w": fc_w, "fc_b": fc_b}


if __name__ == "__main__":
    key = jax.random.PRNGKey(0)
    batch, channels, image_size = 2, 4, 16
    k_img, k_par = jax.random.split(key)
    img = jax.random.normal(
        k_img, (batch, channels, image_size, image_size), jnp.float32)
    params = init_params(k_par, channels, image_size)

    out = jax.jit(discriminator_forward)(img, params)
    out = jax.block_until_ready(out)

    assert out.shape == (batch, 1), out.shape
    assert bool(jnp.all((out >= 0.0) & (out <= 1.0)))
    assert bool(jnp.all(jnp.isfinite(out)))
    print("KERNEL_OK")
</pallas_src>

<mosaic_0001>
module attributes {stable_mosaic.version = 11 : i64} {
  func.func @_conv_mm_stats_kernel(%arg0: i32, %arg1: memref<128x64xbf16, #tpu.memory_space<vmem>>, %arg2: memref<64x128xbf16, #tpu.memory_space<vmem>>, %arg3: memref<1x128xf32, #tpu.memory_space<vmem>>, %arg4: memref<128x128xbf16, #tpu.memory_space<vmem>>, %arg5: memref<1x128xf32, #tpu.memory_space<vmem>>, %arg6: memref<1x128xf32, #tpu.memory_space<vmem>>) attributes {dimension_semantics = [#tpu.dimension_semantics<arbitrary>], iteration_bounds = array<i64: 1>, scalar_prefetch = 0 : i64, scratch_operands = 0 : i64, tpu.core_type = #tpu.core_type<tc>, window_params = [{transform_indices = @transform_0, window_bounds = array<i64: 128, 64>}, {pipeline_mode = #tpu.pipeline_mode<synchronous>, transform_indices = @transform_1, window_bounds = array<i64: 64, 128>}, {pipeline_mode = #tpu.pipeline_mode<synchronous>, transform_indices = @transform_2, window_bounds = array<i64: 1, 128>}, {transform_indices = @transform_3, window_bounds = array<i64: 128, 128>}, {pipeline_mode = #tpu.pipeline_mode<synchronous>, transform_indices = @transform_4, window_bounds = array<i64: 1, 128>}, {pipeline_mode = #tpu.pipeline_mode<synchronous>, transform_indices = @transform_5, window_bounds = array<i64: 1, 128>}]} {
    %c0 = arith.constant 0 : index
    %c0_0 = arith.constant 0 : index
    %0 = vector.load %arg1[%c0, %c0_0] : memref<128x64xbf16, #tpu.memory_space<vmem>>, vector<128x64xbf16>
    %c0_1 = arith.constant 0 : index
    %c0_2 = arith.constant 0 : index
    %1 = vector.load %arg2[%c0_1, %c0_2] : memref<64x128xbf16, #tpu.memory_space<vmem>>, vector<64x128xbf16>
    %cst = arith.constant dense<0.000000e+00> : vector<128x128xf32>
    %2 = tpu.matmul %0, %1, %cst {dimension_numbers = #tpu.dot_dimension_numbers<[1], [0], [0], [1], [0, 0, 1, 1], [], []>} : vector<128x64xbf16>, vector<64x128xbf16>, vector<128x128xf32> -> vector<128x128xf32>
    %c0_3 = arith.constant 0 : index
    %c0_4 = arith.constant 0 : index
    %3 = vector.load %arg3[%c0_3, %c0_4] : memref<1x128xf32, #tpu.memory_space<vmem>>, vector<1x128xf32>
    %4 = vector.broadcast %3 : vector<1x128xf32> to vector<128x128xf32>
    %5 = arith.addf %2, %4 : vector<128x128xf32>
    %6 = arith.truncf %5 : vector<128x128xf32> to vector<128x128xbf16>
    %c0_5 = arith.constant 0 : index
    %c0_6 = arith.constant 0 : index
    %7 = vector.load %arg4[%c0_5, %c0_6] : memref<128x128xbf16, #tpu.memory_space<vmem>>, vector<128x128xbf16>
    tpu.vector_store %arg4[%c0_5, %c0_6], %6 {strides = array<i32>} : memref<128x128xbf16, #tpu.memory_space<vmem>>, vector<128x128xbf16>,
    %c0_i32 = arith.constant 0 : i32
    %8 = arith.cmpi eq, %arg0, %c0_i32 : i32
    %9 = arith.extui %8 : i1 to i32
    %c0_i32_7 = arith.constant 0 : i32
    %10 = arith.cmpi ne, %9, %c0_i32_7 : i32
    scf.if %10 {
      %cst_18 = arith.constant 0.000000e+00 : f32
      %22 = vector.broadcast %cst_18 : f32 to vector<1x128xf32>
      %c0_19 = arith.constant 0 : index
      %c0_20 = arith.constant 0 : index
      %23 = vector.load %arg5[%c0_19, %c0_20] : memref<1x128xf32, #tpu.memory_space<vmem>>, vector<1x128xf32>
      tpu.vector_store %arg5[%c0_19, %c0_20], %22 {strides = array<i32>} : memref<1x128xf32, #tpu.memory_space<vmem>>, vector<1x128xf32>,
      %cst_21 = arith.constant 0.000000e+00 : f32
      %24 = vector.broadcast %cst_21 : f32 to vector<1x128xf32>
      %c0_22 = arith.constant 0 : index
      %c0_23 = arith.constant 0 : index
      %25 = vector.load %arg6[%c0_22, %c0_23] : memref<1x128xf32, #tpu.memory_space<vmem>>, vector<1x128xf32>
      tpu.vector_store %arg6[%c0_22, %c0_23], %24 {strides = array<i32>} : memref<1x128xf32, #tpu.memory_space<vmem>>, vector<1x128xf32>,
    } else {
    }
    %c0_8 = arith.constant 0 : index
    %c0_9 = arith.constant 0 : index
    %11 = vector.load %arg5[%c0_8, %c0_9] : memref<1x128xf32, #tpu.memory_space<vmem>>, vector<1x128xf32>
    %cst_10 = arith.constant dense<0.000000e+00> : vector<128xf32>
    %12 = vector.multi_reduction <add>, %5, %cst_10 [0] : vector<128x128xf32> to vector<128xf32>
    %13 = vector.shape_cast %12 : vector<128xf32> to vector<1x128xf32>
    %14 = arith.addf %11, %13 : vector<1x128xf32>
    %c0_11 = arith.constant 0 : index
    %c0_12 = arith.constant 0 : index
    %15 = vector.load %arg5[%c0_11, %c0_12] : memref<1x128xf32, #tpu.memory_space<vmem>>, vector<1x128xf32>
    tpu.vector_store %arg5[%c0_11, %c0_12], %14 {strides = array<i32>} : memref<1x128xf32, #tpu.memory_space<vmem>>, vector<1x128xf32>,
    %c0_13 = arith.constant 0 : index
    %c0_14 = arith.constant 0 : index
    %16 = vector.load %arg6[%c0_13, %c0_14] : memref<1x128xf32, #tpu.memory_space<vmem>>, vector<1x128xf32>
    %17 = arith.mulf %5, %5 : vector<128x128xf32>
    %cst_15 = arith.constant dense<0.000000e+00> : vector<128xf32>
    %18 = vector.multi_reduction <add>, %17, %cst_15 [0] : vector<128x128xf32> to vector<128xf32>
    %19 = vector.shape_cast %18 : vector<128xf32> to vector<1x128xf32>
    %20 = arith.addf %16, %19 : vector<1x128xf32>
    %c0_16 = arith.constant 0 : index
    %c0_17 = arith.constant 0 : index
    %21 = vector.load %arg6[%c0_16, %c0_17] : memref<1x128xf32, #tpu.memory_space<vmem>>, vector<1x128xf32>
    tpu.vector_store %arg6[%c0_16, %c0_17], %20 {strides = array<i32>} : memref<1x128xf32, #tpu.memory_space<vmem>>, vector<1x128xf32>,
    return
  }
  func.func @transform_0(%arg0: i32) -> (i32, i32) {
    %c0_i32 = arith.constant 0 : i32
    %c0_i32_0 = arith.constant 0 : i32
    return %arg0, %c0_i32 : i32, i32
  }
  func.func @transform_1(%arg0: i32) -> (i32, i32) {
    %c0_i32 = arith.constant 0 : i32
    %c0_i32_0 = arith.constant 0 : i32
    %c0_i32_1 = arith.constant 0 : i32
    return %c0_i32, %c0_i32_0 : i32, i32
  }
  func.func @transform_2(%arg0: i32) -> (i32, i32) {
    %c0_i32 = arith.constant 0 : i32
    %c0_i32_0 = arith.constant 0 : i32
    %c0_i32_1 = arith.constant 0 : i32
    return %c0_i32, %c0_i32_0 : i32, i32
  }
  func.func @transform_3(%arg0: i32) -> (i32, i32) {
    %c0_i32 = arith.constant 0 : i32
    %c0_i32_0 = arith.constant 0 : i32
    return %arg0, %c0_i32 : i32, i32
  }
  func.func @transform_4(%arg0: i32) -> (i32, i32) {
    %c0_i32 = arith.constant 0 : i32
    %c0_i32_0 = arith.constant 0 : i32
    %c0_i32_1 = arith.constant 0 : i32
    return %c0_i32, %c0_i32_0 : i32, i32
  }
  func.func @transform_5(%arg0: i32) -> (i32, i32) {
    %c0_i32 = arith.constant 0 : i32
    %c0_i32_0 = arith.constant 0 : i32
    %c0_i32_1 = arith.constant 0 : i32
    return %c0_i32, %c0_i32_0 : i32, i32
  }
}

module attributes {stable_mosaic.version = 11 : i64} {
  func.func @_bn_lrelu_kernel(%arg0: i32, %arg1: memref<128x128xbf16, #tpu.memory_space<vmem>>, %arg2: memref<1x128xf32, #tpu.memory_space<vmem>>, %arg3: memref<1x128xf32, #tpu.memory_space<vmem>>, %arg4: memref<128x128xbf16, #tpu.memory_space<vmem>>) attributes {dimension_semantics = [#tpu.dimension_semantics<parallel>], iteration_bounds = array<i64: 1>, scalar_prefetch = 0 : i64, scratch_operands = 0 : i64, tpu.core_type = #tpu.core_type<tc>, window_params = [{transform_indices = @transform_0, window_bounds = array<i64: 128, 128>}, {pipeline_mode = #tpu.pipeline_mode<synchronous>, transform_indices = @transform_1, window_bounds = array<i64: 1, 128>}, {pipeline_mode = #tpu.pipeline_mode<synchronous>, transform_indices = @transform_2, window_bounds = array<i64: 1, 128>}, {transform_indices = @transform_3, window_bounds = array<i64: 128, 128>}]} {
    %c0 = arith.constant 0 : index
    %c0_0 = arith.constant 0 : index
    %0 = vector.load %arg1[%c0, %c0_0] : memref<128x128xbf16, #tpu.memory_space<vmem>>, vector<128x128xbf16>
    %1 = arith.extf %0 : vector<128x128xbf16> to vector<128x128xf32>
    %c0_1 = arith.constant 0 : index
    %c0_2 = arith.constant 0 : index
    %2 = vector.load %arg2[%c0_1, %c0_2] : memref<1x128xf32, #tpu.memory_space<vmem>>, vector<1x128xf32>
    %3 = vector.broadcast %2 : vector<1x128xf32> to vector<128x128xf32>
    %4 = arith.mulf %1, %3 : vector<128x128xf32>
    %c0_3 = arith.constant 0 : index
    %c0_4 = arith.constant 0 : index
    %5 = vector.load %arg3[%c0_3, %c0_4] : memref<1x128xf32, #tpu.memory_space<vmem>>, vector<1x128xf32>
    %6 = vector.broadcast %5 : vector<1x128xf32> to vector<128x128xf32>
    %7 = arith.addf %4, %6 : vector<128x128xf32>
    %cst = arith.constant 2.000000e-01 : f32
    %8 = vector.broadcast %cst : f32 to vector<128x128xf32>
    %9 = arith.mulf %8, %7 : vector<128x128xf32>
    %10 = arith.maximumf %7, %9 : vector<128x128xf32>
    %11 = arith.truncf %10 : vector<128x128xf32> to vector<128x128xbf16>
    %c0_5 = arith.constant 0 : index
    %c0_6 = arith.constant 0 : index
    %12 = vector.load %arg4[%c0_5, %c0_6] : memref<128x128xbf16, #tpu.memory_space<vmem>>, vector<128x128xbf16>
    tpu.vector_store %arg4[%c0_5, %c0_6], %11 {strides = array<i32>} : memref<128x128xbf16, #tpu.memory_space<vmem>>, vector<128x128xbf16>,
    return
  }
  func.func @transform_0(%arg0: i32) -> (i32, i32) {
    %c0_i32 = arith.constant 0 : i32
    %c0_i32_0 = arith.constant 0 : i32
    return %arg0, %c0_i32 : i32, i32
  }
  func.func @transform_1(%arg0: i32) -> (i32, i32) {
    %c0_i32 = arith.constant 0 : i32
    %c0_i32_0 = arith.constant 0 : i32
    %c0_i32_1 = arith.constant 0 : i32
    return %c0_i32, %c0_i32_0 : i32, i32
  }
  func.func @transform_2(%arg0: i32) -> (i32, i32) {
    %c0_i32 = arith.constant 0 : i32
    %c0_i32_0 = arith.constant 0 : i32
    %c0_i32_1 = arith.constant 0 : i32
    return %c0_i32, %c0_i32_0 : i32, i32
  }
  func.func @transform_3(%arg0: i32) -> (i32, i32) {
    %c0_i32 = arith.constant 0 : i32
    %c0_i32_0 = arith.constant 0 : i32
    return %arg0, %c0_i32 : i32, i32
  }
}

module attributes {stable_mosaic.version = 11 : i64} {
  func.func @_conv_mm_stats_kernel(%arg0: i32, %arg1: memref<32x1024xbf16, #tpu.memory_space<vmem>>, %arg2: memref<1024x128xbf16, #tpu.memory_space<vmem>>, %arg3: memref<1x128xf32, #tpu.memory_space<vmem>>, %arg4: memref<32x128xbf16, #tpu.memory_space<vmem>>, %arg5: memref<1x128xf32, #tpu.memory_space<vmem>>, %arg6: memref<1x128xf32, #tpu.memory_space<vmem>>) attributes {dimension_semantics = [#tpu.dimension_semantics<arbitrary>], iteration_bounds = array<i64: 1>, scalar_prefetch = 0 : i64, scratch_operands = 0 : i64, tpu.core_type = #tpu.core_type<tc>, window_params = [{transform_indices = @transform_0, window_bounds = array<i64: 32, 1024>}, {pipeline_mode = #tpu.pipeline_mode<synchronous>, transform_indices = @transform_1, window_bounds = array<i64: 1024, 128>}, {pipeline_mode = #tpu.pipeline_mode<synchronous>, transform_indices = @transform_2, window_bounds = array<i64: 1, 128>}, {transform_indices = @transform_3, window_bounds = array<i64: 32, 128>}, {pipeline_mode = #tpu.pipeline_mode<synchronous>, transform_indices = @transform_4, window_bounds = array<i64: 1, 128>}, {pipeline_mode = #tpu.pipeline_mode<synchronous>, transform_indices = @transform_5, window_bounds = array<i64: 1, 128>}]} {
    %c0 = arith.constant 0 : index
    %c0_0 = arith.constant 0 : index
    %0 = vector.load %arg1[%c0, %c0_0] : memref<32x1024xbf16, #tpu.memory_space<vmem>>, vector<32x1024xbf16>
    %c0_1 = arith.constant 0 : index
    %c0_2 = arith.constant 0 : index
    %1 = vector.load %arg2[%c0_1, %c0_2] : memref<1024x128xbf16, #tpu.memory_space<vmem>>, vector<1024x128xbf16>
    %cst = arith.constant dense<0.000000e+00> : vector<32x128xf32>
    %2 = tpu.matmul %0, %1, %cst {dimension_numbers = #tpu.dot_dimension_numbers<[1], [0], [0], [1], [0, 0, 1, 1], [], []>} : vector<32x1024xbf16>, vector<1024x128xbf16>, vector<32x128xf32> -> vector<32x128xf32>
    %c0_3 = arith.constant 0 : index
    %c0_4 = arith.constant 0 : index
    %3 = vector.load %arg3[%c0_3, %c0_4] : memref<1x128xf32, #tpu.memory_space<vmem>>, vector<1x128xf32>
    %4 = vector.broadcast %3 : vector<1x128xf32> to vector<32x128xf32>
    %5 = arith.addf %2, %4 : vector<32x128xf32>
    %6 = arith.truncf %5 : vector<32x128xf32> to vector<32x128xbf16>
    %c0_5 = arith.constant 0 : index
    %c0_6 = arith.constant 0 : index
    %7 = vector.load %arg4[%c0_5, %c0_6] : memref<32x128xbf16, #tpu.memory_space<vmem>>, vector<32x128xbf16>
    tpu.vector_store %arg4[%c0_5, %c0_6], %6 {strides = array<i32>} : memref<32x128xbf16, #tpu.memory_space<vmem>>, vector<32x128xbf16>,
    %c0_i32 = arith.constant 0 : i32
    %8 = arith.cmpi eq, %arg0, %c0_i32 : i32
    %9 = arith.extui %8 : i1 to i32
    %c0_i32_7 = arith.constant 0 : i32
    %10 = arith.cmpi ne, %9, %c0_i32_7 : i32
    scf.if %10 {
      %cst_18 = arith.constant 0.000000e+00 : f32
      %22 = vector.broadcast %cst_18 : f32 to vector<1x128xf32>
      %c0_19 = arith.constant 0 : index
      %c0_20 = arith.constant 0 : index
      %23 = vector.load %arg5[%c0_19, %c0_20] : memref<1x128xf32, #tpu.memory_space<vmem>>, vector<1x128xf32>
      tpu.vector_store %arg5[%c0_19, %c0_20], %22 {strides = array<i32>} : memref<1x128xf32, #tpu.memory_space<vmem>>, vector<1x128xf32>,
      %cst_21 = arith.constant 0.000000e+00 : f32
      %24 = vector.broadcast %cst_21 : f32 to vector<1x128xf32>
      %c0_22 = arith.constant 0 : index
      %c0_23 = arith.constant 0 : index
      %25 = vector.load %arg6[%c0_22, %c0_23] : memref<1x128xf32, #tpu.memory_space<vmem>>, vector<1x128xf32>
      tpu.vector_store %arg6[%c0_22, %c0_23], %24 {strides = array<i32>} : memref<1x128xf32, #tpu.memory_space<vmem>>, vector<1x128xf32>,
    } else {
    }
    %c0_8 = arith.constant 0 : index
    %c0_9 = arith.constant 0 : index
    %11 = vector.load %arg5[%c0_8, %c0_9] : memref<1x128xf32, #tpu.memory_space<vmem>>, vector<1x128xf32>
    %cst_10 = arith.constant dense<0.000000e+00> : vector<128xf32>
    %12 = vector.multi_reduction <add>, %5, %cst_10 [0] : vector<32x128xf32> to vector<128xf32>
    %13 = vector.shape_cast %12 : vector<128xf32> to vector<1x128xf32>
    %14 = arith.addf %11, %13 : vector<1x128xf32>
    %c0_11 = arith.constant 0 : index
    %c0_12 = arith.constant 0 : index
    %15 = vector.load %arg5[%c0_11, %c0_12] : memref<1x128xf32, #tpu.memory_space<vmem>>, vector<1x128xf32>
    tpu.vector_store %arg5[%c0_11, %c0_12], %14 {strides = array<i32>} : memref<1x128xf32, #tpu.memory_space<vmem>>, vector<1x128xf32>,
    %c0_13 = arith.constant 0 : index
    %c0_14 = arith.constant 0 : index
    %16 = vector.load %arg6[%c0_13, %c0_14] : memref<1x128xf32, #tpu.memory_space<vmem>>, vector<1x128xf32>
    %17 = arith.mulf %5, %5 : vector<32x128xf32>
    %cst_15 = arith.constant dense<0.000000e+00> : vector<128xf32>
    %18 = vector.multi_reduction <add>, %17, %cst_15 [0] : vector<32x128xf32> to vector<128xf32>
    %19 = vector.shape_cast %18 : vector<128xf32> to vector<1x128xf32>
    %20 = arith.addf %16, %19 : vector<1x128xf32>
    %c0_16 = arith.constant 0 : index
    %c0_17 = arith.constant 0 : index
    %21 = vector.load %arg6[%c0_16, %c0_17] : memref<1x128xf32, #tpu.memory_space<vmem>>, vector<1x128xf32>
    tpu.vector_store %arg6[%c0_16, %c0_17], %20 {strides = array<i32>} : memref<1x128xf32, #tpu.memory_space<vmem>>, vector<1x128xf32>,
    return
  }
  func.func @transform_0(%arg0: i32) -> (i32, i32) {
    %c0_i32 = arith.constant 0 : i32
    %c0_i32_0 = arith.constant 0 : i32
    return %arg0, %c0_i32 : i32, i32
  }
  func.func @transform_1(%arg0: i32) -> (i32, i32) {
    %c0_i32 = arith.constant 0 : i32
    %c0_i32_0 = arith.constant 0 : i32
    %c0_i32_1 = arith.constant 0 : i32
    return %c0_i32, %c0_i32_0 : i32, i32
  }
  func.func @transform_2(%arg0: i32) -> (i32, i32) {
    %c0_i32 = arith.constant 0 : i32
    %c0_i32_0 = arith.constant 0 : i32
    %c0_i32_1 = arith.constant 0 : i32
    return %c0_i32, %c0_i32_0 : i32, i32
  }
  func.func @transform_3(%arg0: i32) -> (i32, i32) {
    %c0_i32 = arith.constant 0 : i32
    %c0_i32_0 = arith.constant 0 : i32
    return %arg0, %c0_i32 : i32, i32
  }
  func.func @transform_4(%arg0: i32) -> (i32, i32) {
    %c0_i32 = arith.constant 0 : i32
    %c0_i32_0 = arith.constant 0 : i32
    %c0_i32_1 = arith.constant 0 : i32
    return %c0_i32, %c0_i32_0 : i32, i32
  }
  func.func @transform_5(%arg0: i32) -> (i32, i32) {
    %c0_i32 = arith.constant 0 : i32
    %c0_i32_0 = arith.constant 0 : i32
    %c0_i32_1 = arith.constant 0 : i32
    return %c0_i32, %c0_i32_0 : i32, i32
  }
}

module attributes {stable_mosaic.version = 11 : i64} {
  func.func @_bn_lrelu_kernel(%arg0: i32, %arg1: memref<32x128xbf16, #tpu.memory_space<vmem>>, %arg2: memref<1x128xf32, #tpu.memory_space<vmem>>, %arg3: memref<1x128xf32, #tpu.memory_space<vmem>>, %arg4: memref<32x128xbf16, #tpu.memory_space<vmem>>) attributes {dimension_semantics = [#tpu.dimension_semantics<parallel>], iteration_bounds = array<i64: 1>, scalar_prefetch = 0 : i64, scratch_operands = 0 : i64, tpu.core_type = #tpu.core_type<tc>, window_params = [{transform_indices = @transform_0, window_bounds = array<i64: 32, 128>}, {pipeline_mode = #tpu.pipeline_mode<synchronous>, transform_indices = @transform_1, window_bounds = array<i64: 1, 128>}, {pipeline_mode = #tpu.pipeline_mode<synchronous>, transform_indices = @transform_2, window_bounds = array<i64: 1, 128>}, {transform_indices = @transform_3, window_bounds = array<i64: 32, 128>}]} {
    %c0 = arith.constant 0 : index
    %c0_0 = arith.constant 0 : index
    %0 = vector.load %arg1[%c0, %c0_0] : memref<32x128xbf16, #tpu.memory_space<vmem>>, vector<32x128xbf16>
    %1 = arith.extf %0 : vector<32x128xbf16> to vector<32x128xf32>
    %c0_1 = arith.constant 0 : index
    %c0_2 = arith.constant 0 : index
    %2 = vector.load %arg2[%c0_1, %c0_2] : memref<1x128xf32, #tpu.memory_space<vmem>>, vector<1x128xf32>
    %3 = vector.broadcast %2 : vector<1x128xf32> to vector<32x128xf32>
    %4 = arith.mulf %1, %3 : vector<32x128xf32>
    %c0_3 = arith.constant 0 : index
    %c0_4 = arith.constant 0 : index
    %5 = vector.load %arg3[%c0_3, %c0_4] : memref<1x128xf32, #tpu.memory_space<vmem>>, vector<1x128xf32>
    %6 = vector.broadcast %5 : vector<1x128xf32> to vector<32x128xf32>
    %7 = arith.addf %4, %6 : vector<32x128xf32>
    %cst = arith.constant 2.000000e-01 : f32
    %8 = vector.broadcast %cst : f32 to vector<32x128xf32>
    %9 = arith.mulf %8, %7 : vector<32x128xf32>
    %10 = arith.maximumf %7, %9 : vector<32x128xf32>
    %11 = arith.truncf %10 : vector<32x128xf32> to vector<32x128xbf16>
    %c0_5 = arith.constant 0 : index
    %c0_6 = arith.constant 0 : index
    %12 = vector.load %arg4[%c0_5, %c0_6] : memref<32x128xbf16, #tpu.memory_space<vmem>>, vector<32x128xbf16>
    tpu.vector_store %arg4[%c0_5, %c0_6], %11 {strides = array<i32>} : memref<32x128xbf16, #tpu.memory_space<vmem>>, vector<32x128xbf16>,
    return
  }
  func.func @transform_0(%arg0: i32) -> (i32, i32) {
    %c0_i32 = arith.constant 0 : i32
    %c0_i32_0 = arith.constant 0 : i32
    return %arg0, %c0_i32 : i32, i32
  }
  func.func @transform_1(%arg0: i32) -> (i32, i32) {
    %c0_i32 = arith.constant 0 : i32
    %c0_i32_0 = arith.constant 0 : i32
    %c0_i32_1 = arith.constant 0 : i32
    return %c0_i32, %c0_i32_0 : i32, i32
  }
  func.func @transform_2(%arg0: i32) -> (i32, i32) {
    %c0_i32 = arith.constant 0 : i32
    %c0_i32_0 = arith.constant 0 : i32
    %c0_i32_1 = arith.constant 0 : i32
    return %c0_i32, %c0_i32_0 : i32, i32
  }
  func.func @transform_3(%arg0: i32) -> (i32, i32) {
    %c0_i32 = arith.constant 0 : i32
    %c0_i32_0 = arith.constant 0 : i32
    return %arg0, %c0_i32 : i32, i32
  }
}

module attributes {stable_mosaic.version = 11 : i64} {
  func.func @_conv_mm_stats_kernel(%arg0: i32, %arg1: memref<8x2048xbf16, #tpu.memory_space<vmem>>, %arg2: memref<2048x256xbf16, #tpu.memory_space<vmem>>, %arg3: memref<1x256xf32, #tpu.memory_space<vmem>>, %arg4: memref<8x256xbf16, #tpu.memory_space<vmem>>, %arg5: memref<1x256xf32, #tpu.memory_space<vmem>>, %arg6: memref<1x256xf32, #tpu.memory_space<vmem>>) attributes {dimension_semantics = [#tpu.dimension_semantics<arbitrary>], iteration_bounds = array<i64: 1>, scalar_prefetch = 0 : i64, scratch_operands = 0 : i64, tpu.core_type = #tpu.core_type<tc>, window_params = [{transform_indices = @transform_0, window_bounds = array<i64: 8, 2048>}, {pipeline_mode = #tpu.pipeline_mode<synchronous>, transform_indices = @transform_1, window_bounds = array<i64: 2048, 256>}, {pipeline_mode = #tpu.pipeline_mode<synchronous>, transform_indices = @transform_2, window_bounds = array<i64: 1, 256>}, {transform_indices = @transform_3, window_bounds = array<i64: 8, 256>}, {pipeline_mode = #tpu.pipeline_mode<synchronous>, transform_indices = @transform_4, window_bounds = array<i64: 1, 256>}, {pipeline_mode = #tpu.pipeline_mode<synchronous>, transform_indices = @transform_5, window_bounds = array<i64: 1, 256>}]} {
    %c0 = arith.constant 0 : index
    %c0_0 = arith.constant 0 : index
    %0 = vector.load %arg1[%c0, %c0_0] : memref<8x2048xbf16, #tpu.memory_space<vmem>>, vector<8x2048xbf16>
    %c0_1 = arith.constant 0 : index
    %c0_2 = arith.constant 0 : index
    %1 = vector.load %arg2[%c0_1, %c0_2] : memref<2048x256xbf16, #tpu.memory_space<vmem>>, vector<2048x256xbf16>
    %cst = arith.constant dense<0.000000e+00> : vector<8x256xf32>
    %2 = tpu.matmul %0, %1, %cst {dimension_numbers = #tpu.dot_dimension_numbers<[1], [0], [0], [1], [0, 0, 1, 1], [], []>} : vector<8x2048xbf16>, vector<2048x256xbf16>, vector<8x256xf32> -> vector<8x256xf32>
    %c0_3 = arith.constant 0 : index
    %c0_4 = arith.constant 0 : index
    %3 = vector.load %arg3[%c0_3, %c0_4] : memref<1x256xf32, #tpu.memory_space<vmem>>, vector<1x256xf32>
    %4 = vector.broadcast %3 : vector<1x256xf32> to vector<8x256xf32>
    %5 = arith.addf %2, %4 : vector<8x256xf32>
    %6 = arith.truncf %5 : vector<8x256xf32> to vector<8x256xbf16>
    %c0_5 = arith.constant 0 : index
    %c0_6 = arith.constant 0 : index
    %7 = vector.load %arg4[%c0_5, %c0_6] : memref<8x256xbf16, #tpu.memory_space<vmem>>, vector<8x256xbf16>
    tpu.vector_store %arg4[%c0_5, %c0_6], %6 {strides = array<i32>} : memref<8x256xbf16, #tpu.memory_space<vmem>>, vector<8x256xbf16>,
    %c0_i32 = arith.constant 0 : i32
    %8 = arith.cmpi eq, %arg0, %c0_i32 : i32
    %9 = arith.extui %8 : i1 to i32
    %c0_i32_7 = arith.constant 0 : i32
    %10 = arith.cmpi ne, %9, %c0_i32_7 : i32
    scf.if %10 {
      %cst_18 = arith.constant 0.000000e+00 : f32
      %22 = vector.broadcast %cst_18 : f32 to vector<1x256xf32>
      %c0_19 = arith.constant 0 : index
      %c0_20 = arith.constant 0 : index
      %23 = vector.load %arg5[%c0_19, %c0_20] : memref<1x256xf32, #tpu.memory_space<vmem>>, vector<1x256xf32>
      tpu.vector_store %arg5[%c0_19, %c0_20], %22 {strides = array<i32>} : memref<1x256xf32, #tpu.memory_space<vmem>>, vector<1x256xf32>,
      %cst_21 = arith.constant 0.000000e+00 : f32
      %24 = vector.broadcast %cst_21 : f32 to vector<1x256xf32>
      %c0_22 = arith.constant 0 : index
      %c0_23 = arith.constant 0 : index
      %25 = vector.load %arg6[%c0_22, %c0_23] : memref<1x256xf32, #tpu.memory_space<vmem>>, vector<1x256xf32>
      tpu.vector_store %arg6[%c0_22, %c0_23], %24 {strides = array<i32>} : memref<1x256xf32, #tpu.memory_space<vmem>>, vector<1x256xf32>,
    } else {
    }
    %c0_8 = arith.constant 0 : index
    %c0_9 = arith.constant 0 : index
    %11 = vector.load %arg5[%c0_8, %c0_9] : memref<1x256xf32, #tpu.memory_space<vmem>>, vector<1x256xf32>
    %cst_10 = arith.constant dense<0.000000e+00> : vector<256xf32>
    %12 = vector.multi_reduction <add>, %5, %cst_10 [0] : vector<8x256xf32> to vector<256xf32>
    %13 = vector.shape_cast %12 : vector<256xf32> to vector<1x256xf32>
    %14 = arith.addf %11, %13 : vector<1x256xf32>
    %c0_11 = arith.constant 0 : index
    %c0_12 = arith.constant 0 : index
    %15 = vector.load %arg5[%c0_11, %c0_12] : memref<1x256xf32, #tpu.memory_space<vmem>>, vector<1x256xf32>
    tpu.vector_store %arg5[%c0_11, %c0_12], %14 {strides = array<i32>} : memref<1x256xf32, #tpu.memory_space<vmem>>, vector<1x256xf32>,
    %c0_13 = arith.constant 0 : index
    %c0_14 = arith.constant 0 : index
    %16 = vector.load %arg6[%c0_13, %c0_14] : memref<1x256xf32, #tpu.memory_space<vmem>>, vector<1x256xf32>
    %17 = arith.mulf %5, %5 : vector<8x256xf32>
    %cst_15 = arith.constant dense<0.000000e+00> : vector<256xf32>
    %18 = vector.multi_reduction <add>, %17, %cst_15 [0] : vector<8x256xf32> to vector<256xf32>
    %19 = vector.shape_cast %18 : vector<256xf32> to vector<1x256xf32>
    %20 = arith.addf %16, %19 : vector<1x256xf32>
    %c0_16 = arith.constant 0 : index
    %c0_17 = arith.constant 0 : index
    %21 = vector.load %arg6[%c0_16, %c0_17] : memref<1x256xf32, #tpu.memory_space<vmem>>, vector<1x256xf32>
    tpu.vector_store %arg6[%c0_16, %c0_17], %20 {strides = array<i32>} : memref<1x256xf32, #tpu.memory_space<vmem>>, vector<1x256xf32>,
    return
  }
  func.func @transform_0(%arg0: i32) -> (i32, i32) {
    %c0_i32 = arith.constant 0 : i32
    %c0_i32_0 = arith.constant 0 : i32
    return %arg0, %c0_i32 : i32, i32
  }
  func.func @transform_1(%arg0: i32) -> (i32, i32) {
    %c0_i32 = arith.constant 0 : i32
    %c0_i32_0 = arith.constant 0 : i32
    %c0_i32_1 = arith.constant 0 : i32
    return %c0_i32, %c0_i32_0 : i32, i32
  }
  func.func @transform_2(%arg0: i32) -> (i32, i32) {
    %c0_i32 = arith.constant 0 : i32
    %c0_i32_0 = arith.constant 0 : i32
    %c0_i32_1 = arith.constant 0 : i32
    return %c0_i32, %c0_i32_0 : i32, i32
  }
  func.func @transform_3(%arg0: i32) -> (i32, i32) {
    %c0_i32 = arith.constant 0 : i32
    %c0_i32_0 = arith.constant 0 : i32
    return %arg0, %c0_i32 : i32, i32
  }
  func.func @transform_4(%arg0: i32) -> (i32, i32) {
    %c0_i32 = arith.constant 0 : i32
    %c0_i32_0 = arith.constant 0 : i32
    %c0_i32_1 = arith.constant 0 : i32
    return %c0_i32, %c0_i32_0 : i32, i32
  }
  func.func @transform_5(%arg0: i32) -> (i32, i32) {
    %c0_i32 = arith.constant 0 : i32
    %c0_i32_0 = arith.constant 0 : i32
    %c0_i32_1 = arith.constant 0 : i32
    return %c0_i32, %c0_i32_0 : i32, i32
  }
}

module attributes {stable_mosaic.version = 11 : i64} {
  func.func @_bn_lrelu_kernel(%arg0: i32, %arg1: memref<8x256xbf16, #tpu.memory_space<vmem>>, %arg2: memref<1x256xf32, #tpu.memory_space<vmem>>, %arg3: memref<1x256xf32, #tpu.memory_space<vmem>>, %arg4: memref<8x256xbf16, #tpu.memory_space<vmem>>) attributes {dimension_semantics = [#tpu.dimension_semantics<parallel>], iteration_bounds = array<i64: 1>, scalar_prefetch = 0 : i64, scratch_operands = 0 : i64, tpu.core_type = #tpu.core_type<tc>, window_params = [{transform_indices = @transform_0, window_bounds = array<i64: 8, 256>}, {pipeline_mode = #tpu.pipeline_mode<synchronous>, transform_indices = @transform_1, window_bounds = array<i64: 1, 256>}, {pipeline_mode = #tpu.pipeline_mode<synchronous>, transform_indices = @transform_2, window_bounds = array<i64: 1, 256>}, {transform_indices = @transform_3, window_bounds = array<i64: 8, 256>}]} {
    %c0 = arith.constant 0 : index
    %c0_0 = arith.constant 0 : index
    %0 = vector.load %arg1[%c0, %c0_0] : memref<8x256xbf16, #tpu.memory_space<vmem>>, vector<8x256xbf16>
    %1 = arith.extf %0 : vector<8x256xbf16> to vector<8x256xf32>
    %c0_1 = arith.constant 0 : index
    %c0_2 = arith.constant 0 : index
    %2 = vector.load %arg2[%c0_1, %c0_2] : memref<1x256xf32, #tpu.memory_space<vmem>>, vector<1x256xf32>
    %3 = vector.broadcast %2 : vector<1x256xf32> to vector<8x256xf32>
    %4 = arith.mulf %1, %3 : vector<8x256xf32>
    %c0_3 = arith.constant 0 : index
    %c0_4 = arith.constant 0 : index
    %5 = vector.load %arg3[%c0_3, %c0_4] : memref<1x256xf32, #tpu.memory_space<vmem>>, vector<1x256xf32>
    %6 = vector.broadcast %5 : vector<1x256xf32> to vector<8x256xf32>
    %7 = arith.addf %4, %6 : vector<8x256xf32>
    %cst = arith.constant 2.000000e-01 : f32
    %8 = vector.broadcast %cst : f32 to vector<8x256xf32>
    %9 = arith.mulf %8, %7 : vector<8x256xf32>
    %10 = arith.maximumf %7, %9 : vector<8x256xf32>
    %11 = arith.truncf %10 : vector<8x256xf32> to vector<8x256xbf16>
    %c0_5 = arith.constant 0 : index
    %c0_6 = arith.constant 0 : index
    %12 = vector.load %arg4[%c0_5, %c0_6] : memref<8x256xbf16, #tpu.memory_space<vmem>>, vector<8x256xbf16>
    tpu.vector_store %arg4[%c0_5, %c0_6], %11 {strides = array<i32>} : memref<8x256xbf16, #tpu.memory_space<vmem>>, vector<8x256xbf16>,
    return
  }
  func.func @transform_0(%arg0: i32) -> (i32, i32) {
    %c0_i32 = arith.constant 0 : i32
    %c0_i32_0 = arith.constant 0 : i32
    return %arg0, %c0_i32 : i32, i32
  }
  func.func @transform_1(%arg0: i32) -> (i32, i32) {
    %c0_i32 = arith.constant 0 : i32
    %c0_i32_0 = arith.constant 0 : i32
    %c0_i32_1 = arith.constant 0 : i32
    return %c0_i32, %c0_i32_0 : i32, i32
  }
  func.func @transform_2(%arg0: i32) -> (i32, i32) {
    %c0_i32 = arith.constant 0 : i32
    %c0_i32_0 = arith.constant 0 : i32
    %c0_i32_1 = arith.constant 0 : i32
    return %c0_i32, %c0_i32_0 : i32, i32
  }
  func.func @transform_3(%arg0: i32) -> (i32, i32) {
    %c0_i32 = arith.constant 0 : i32
    %c0_i32_0 = arith.constant 0 : i32
    return %arg0, %c0_i32 : i32, i32
  }
}

module attributes {stable_mosaic.version = 11 : i64} {
  func.func @_conv_mm_stats_kernel(%arg0: i32, %arg1: memref<8x4096xbf16, #tpu.memory_space<vmem>>, %arg2: memref<4096x512xbf16, #tpu.memory_space<vmem>>, %arg3: memref<1x512xf32, #tpu.memory_space<vmem>>, %arg4: memref<8x512xbf16, #tpu.memory_space<vmem>>, %arg5: memref<1x512xf32, #tpu.memory_space<vmem>>, %arg6: memref<1x512xf32, #tpu.memory_space<vmem>>) attributes {dimension_semantics = [#tpu.dimension_semantics<arbitrary>], iteration_bounds = array<i64: 1>, scalar_prefetch = 0 : i64, scratch_operands = 0 : i64, tpu.core_type = #tpu.core_type<tc>, window_params = [{transform_indices = @transform_0, window_bounds = array<i64: 8, 4096>}, {pipeline_mode = #tpu.pipeline_mode<synchronous>, transform_indices = @transform_1, window_bounds = array<i64: 4096, 512>}, {pipeline_mode = #tpu.pipeline_mode<synchronous>, transform_indices = @transform_2, window_bounds = array<i64: 1, 512>}, {transform_indices = @transform_3, window_bounds = array<i64: 8, 512>}, {pipeline_mode = #tpu.pipeline_mode<synchronous>, transform_indices = @transform_4, window_bounds = array<i64: 1, 512>}, {pipeline_mode = #tpu.pipeline_mode<synchronous>, transform_indices = @transform_5, window_bounds = array<i64: 1, 512>}]} {
    %c0 = arith.constant 0 : index
    %c0_0 = arith.constant 0 : index
    %0 = vector.load %arg1[%c0, %c0_0] : memref<8x4096xbf16, #tpu.memory_space<vmem>>, vector<8x4096xbf16>
    %c0_1 = arith.constant 0 : index
    %c0_2 = arith.constant 0 : index
    %1 = vector.load %arg2[%c0_1, %c0_2] : memref<4096x512xbf16, #tpu.memory_space<vmem>>, vector<4096x512xbf16>
    %cst = arith.constant dense<0.000000e+00> : vector<8x512xf32>
    %2 = tpu.matmul %0, %1, %cst {dimension_numbers = #tpu.dot_dimension_numbers<[1], [0], [0], [1], [0, 0, 1, 1], [], []>} : vector<8x4096xbf16>, vector<4096x512xbf16>, vector<8x512xf32> -> vector<8x512xf32>
    %c0_3 = arith.constant 0 : index
    %c0_4 = arith.constant 0 : index
    %3 = vector.load %arg3[%c0_3, %c0_4] : memref<1x512xf32, #tpu.memory_space<vmem>>, vector<1x512xf32>
    %4 = vector.broadcast %3 : vector<1x512xf32> to vector<8x512xf32>
    %5 = arith.addf %2, %4 : vector<8x512xf32>
    %6 = arith.truncf %5 : vector<8x512xf32> to vector<8x512xbf16>
    %c0_5 = arith.constant 0 : index
    %c0_6 = arith.constant 0 : index
    %7 = vector.load %arg4[%c0_5, %c0_6] : memref<8x512xbf16, #tpu.memory_space<vmem>>, vector<8x512xbf16>
    tpu.vector_store %arg4[%c0_5, %c0_6], %6 {strides = array<i32>} : memref<8x512xbf16, #tpu.memory_space<vmem>>, vector<8x512xbf16>,
    %c0_i32 = arith.constant 0 : i32
    %8 = arith.cmpi eq, %arg0, %c0_i32 : i32
    %9 = arith.extui %8 : i1 to i32
    %c0_i32_7 = arith.constant 0 : i32
    %10 = arith.cmpi ne, %9, %c0_i32_7 : i32
    scf.if %10 {
      %cst_18 = arith.constant 0.000000e+00 : f32
      %22 = vector.broadcast %cst_18 : f32 to vector<1x512xf32>
      %c0_19 = arith.constant 0 : index
      %c0_20 = arith.constant 0 : index
      %23 = vector.load %arg5[%c0_19, %c0_20] : memref<1x512xf32, #tpu.memory_space<vmem>>, vector<1x512xf32>
      tpu.vector_store %arg5[%c0_19, %c0_20], %22 {strides = array<i32>} : memref<1x512xf32, #tpu.memory_space<vmem>>, vector<1x512xf32>,
      %cst_21 = arith.constant 0.000000e+00 : f32
      %24 = vector.broadcast %cst_21 : f32 to vector<1x512xf32>
      %c0_22 = arith.constant 0 : index
      %c0_23 = arith.constant 0 : index
      %25 = vector.load %arg6[%c0_22, %c0_23] : memref<1x512xf32, #tpu.memory_space<vmem>>, vector<1x512xf32>
      tpu.vector_store %arg6[%c0_22, %c0_23], %24 {strides = array<i32>} : memref<1x512xf32, #tpu.memory_space<vmem>>, vector<1x512xf32>,
    } else {
    }
    %c0_8 = arith.constant 0 : index
    %c0_9 = arith.constant 0 : index
    %11 = vector.load %arg5[%c0_8, %c0_9] : memref<1x512xf32, #tpu.memory_space<vmem>>, vector<1x512xf32>
    %cst_10 = arith.constant dense<0.000000e+00> : vector<512xf32>
    %12 = vector.multi_reduction <add>, %5, %cst_10 [0] : vector<8x512xf32> to vector<512xf32>
    %13 = vector.shape_cast %12 : vector<512xf32> to vector<1x512xf32>
    %14 = arith.addf %11, %13 : vector<1x512xf32>
    %c0_11 = arith.constant 0 : index
    %c0_12 = arith.constant 0 : index
    %15 = vector.load %arg5[%c0_11, %c0_12] : memref<1x512xf32, #tpu.memory_space<vmem>>, vector<1x512xf32>
    tpu.vector_store %arg5[%c0_11, %c0_12], %14 {strides = array<i32>} : memref<1x512xf32, #tpu.memory_space<vmem>>, vector<1x512xf32>,
    %c0_13 = arith.constant 0 : index
    %c0_14 = arith.constant 0 : index
    %16 = vector.load %arg6[%c0_13, %c0_14] : memref<1x512xf32, #tpu.memory_space<vmem>>, vector<1x512xf32>
    %17 = arith.mulf %5, %5 : vector<8x512xf32>
    %cst_15 = arith.constant dense<0.000000e+00> : vector<512xf32>
    %18 = vector.multi_reduction <add>, %17, %cst_15 [0] : vector<8x512xf32> to vector<512xf32>
    %19 = vector.shape_cast %18 : vector<512xf32> to vector<1x512xf32>
    %20 = arith.addf %16, %19 : vector<1x512xf32>
    %c0_16 = arith.constant 0 : index
    %c0_17 = arith.constant 0 : index
    %21 = vector.load %arg6[%c0_16, %c0_17] : memref<1x512xf32, #tpu.memory_space<vmem>>, vector<1x512xf32>
    tpu.vector_store %arg6[%c0_16, %c0_17], %20 {strides = array<i32>} : memref<1x512xf32, #tpu.memory_space<vmem>>, vector<1x512xf32>,
    return
  }
  func.func @transform_0(%arg0: i32) -> (i32, i32) {
    %c0_i32 = arith.constant 0 : i32
    %c0_i32_0 = arith.constant 0 : i32
    return %arg0, %c0_i32 : i32, i32
  }
  func.func @transform_1(%arg0: i32) -> (i32, i32) {
    %c0_i32 = arith.constant 0 : i32
    %c0_i32_0 = arith.constant 0 : i32
    %c0_i32_1 = arith.constant 0 : i32
    return %c0_i32, %c0_i32_0 : i32, i32
  }
  func.func @transform_2(%arg0: i32) -> (i32, i32) {
    %c0_i32 = arith.constant 0 : i32
    %c0_i32_0 = arith.constant 0 : i32
    %c0_i32_1 = arith.constant 0 : i32
    return %c0_i32, %c0_i32_0 : i32, i32
  }
  func.func @transform_3(%arg0: i32) -> (i32, i32) {
    %c0_i32 = arith.constant 0 : i32
    %c0_i32_0 = arith.constant 0 : i32
    return %arg0, %c0_i32 : i32, i32
  }
  func.func @transform_4(%arg0: i32) -> (i32, i32) {
    %c0_i32 = arith.constant 0 : i32
    %c0_i32_0 = arith.constant 0 : i32
    %c0_i32_1 = arith.constant 0 : i32
    return %c0_i32, %c0_i32_0 : i32, i32
  }
  func.func @transform_5(%arg0: i32) -> (i32, i32) {
    %c0_i32 = arith.constant 0 : i32
    %c0_i32_0 = arith.constant 0 : i32
    %c0_i32_1 = arith.constant 0 : i32
    return %c0_i32, %c0_i32_0 : i32, i32
  }
}

module attributes {stable_mosaic.version = 11 : i64} {
  func.func @_bn_lrelu_kernel(%arg0: i32, %arg1: memref<8x512xbf16, #tpu.memory_space<vmem>>, %arg2: memref<1x512xf32, #tpu.memory_space<vmem>>, %arg3: memref<1x512xf32, #tpu.memory_space<vmem>>, %arg4: memref<8x512xbf16, #tpu.memory_space<vmem>>) attributes {dimension_semantics = [#tpu.dimension_semantics<parallel>], iteration_bounds = array<i64: 1>, scalar_prefetch = 0 : i64, scratch_operands = 0 : i64, tpu.core_type = #tpu.core_type<tc>, window_params = [{transform_indices = @transform_0, window_bounds = array<i64: 8, 512>}, {pipeline_mode = #tpu.pipeline_mode<synchronous>, transform_indices = @transform_1, window_bounds = array<i64: 1, 512>}, {pipeline_mode = #tpu.pipeline_mode<synchronous>, transform_indices = @transform_2, window_bounds = array<i64: 1, 512>}, {transform_indices = @transform_3, window_bounds = array<i64: 8, 512>}]} {
    %c0 = arith.constant 0 : index
    %c0_0 = arith.constant 0 : index
    %0 = vector.load %arg1[%c0, %c0_0] : memref<8x512xbf16, #tpu.memory_space<vmem>>, vector<8x512xbf16>
    %1 = arith.extf %0 : vector<8x512xbf16> to vector<8x512xf32>
    %c0_1 = arith.constant 0 : index
    %c0_2 = arith.constant 0 : index
    %2 = vector.load %arg2[%c0_1, %c0_2] : memref<1x512xf32, #tpu.memory_space<vmem>>, vector<1x512xf32>
    %3 = vector.broadcast %2 : vector<1x512xf32> to vector<8x512xf32>
    %4 = arith.mulf %1, %3 : vector<8x512xf32>
    %c0_3 = arith.constant 0 : index
    %c0_4 = arith.constant 0 : index
    %5 = vector.load %arg3[%c0_3, %c0_4] : memref<1x512xf32, #tpu.memory_space<vmem>>, vector<1x512xf32>
    %6 = vector.broadcast %5 : vector<1x512xf32> to vector<8x512xf32>
    %7 = arith.addf %4, %6 : vector<8x512xf32>
    %cst = arith.constant 2.000000e-01 : f32
    %8 = vector.broadcast %cst : f32 to vector<8x512xf32>
    %9 = arith.mulf %8, %7 : vector<8x512xf32>
    %10 = arith.maximumf %7, %9 : vector<8x512xf32>
    %11 = arith.truncf %10 : vector<8x512xf32> to vector<8x512xbf16>
    %c0_5 = arith.constant 0 : index
    %c0_6 = arith.constant 0 : index
    %12 = vector.load %arg4[%c0_5, %c0_6] : memref<8x512xbf16, #tpu.memory_space<vmem>>, vector<8x512xbf16>
    tpu.vector_store %arg4[%c0_5, %c0_6], %11 {strides = array<i32>} : memref<8x512xbf16, #tpu.memory_space<vmem>>, vector<8x512xbf16>,
    return
  }
  func.func @transform_0(%arg0: i32) -> (i32, i32) {
    %c0_i32 = arith.constant 0 : i32
    %c0_i32_0 = arith.constant 0 : i32
    return %arg0, %c0_i32 : i32, i32
  }
  func.func @transform_1(%arg0: i32) -> (i32, i32) {
    %c0_i32 = arith.constant 0 : i32
    %c0_i32_0 = arith.constant 0 : i32
    %c0_i32_1 = arith.constant 0 : i32
    return %c0_i32, %c0_i32_0 : i32, i32
  }
  func.func @transform_2(%arg0: i32) -> (i32, i32) {
    %c0_i32 = arith.constant 0 : i32
    %c0_i32_0 = arith.constant 0 : i32
    %c0_i32_1 = arith.constant 0 : i32
    return %c0_i32, %c0_i32_0 : i32, i32
  }
  func.func @transform_3(%arg0: i32) -> (i32, i32) {
    %c0_i32 = arith.constant 0 : i32
    %c0_i32_0 = arith.constant 0 : i32
    return %arg0, %c0_i32 : i32, i32
  }
}

module attributes {stable_mosaic.version = 11 : i64} {
  func.func @_linear_sigmoid_kernel(%arg0: memref<2x512xf32, #tpu.memory_space<vmem>>, %arg1: memref<512x1xf32, #tpu.memory_space<vmem>>, %arg2: memref<1x1xf32, #tpu.memory_space<vmem>>, %arg3: memref<2x1xf32, #tpu.memory_space<vmem>>) attributes {dimension_semantics = [], scalar_prefetch = 0 : i64, scratch_operands = 0 : i64, tpu.core_type = #tpu.core_type<tc>} {
    %c0 = arith.constant 0 : index
    %c0_0 = arith.constant 0 : index
    %0 = vector.load %arg0[%c0, %c0_0] : memref<2x512xf32, #tpu.memory_space<vmem>>, vector<2x512xf32>
    %c0_1 = arith.constant 0 : index
    %c0_2 = arith.constant 0 : index
    %1 = vector.load %arg1[%c0_1, %c0_2] : memref<512x1xf32, #tpu.memory_space<vmem>>, vector<512x1xf32>
    %cst = arith.constant dense<0.000000e+00> : vector<2x1xf32>
    %2 = tpu.matmul %0, %1, %cst {dimension_numbers = #tpu.dot_dimension_numbers<[1], [0], [0], [1], [0, 0, 1, 1], [], []>} : vector<2x512xf32>, vector<512x1xf32>, vector<2x1xf32> -> vector<2x1xf32>
    %c0_3 = arith.constant 0 : index
    %c0_4 = arith.constant 0 : index
    %3 = vector.load %arg2[%c0_3, %c0_4] : memref<1x1xf32, #tpu.memory_space<vmem>>, vector<1x1xf32>
    %4 = vector.broadcast %3 : vector<1x1xf32> to vector<2x1xf32>
    %5 = arith.addf %2, %4 : vector<2x1xf32>
    %6 = arith.negf %5 : vector<2x1xf32>
    %7 = math.exp %6 : vector<2x1xf32>
    %cst_5 = arith.constant 1.000000e+00 : f32
    %8 = vector.broadcast %cst_5 : f32 to vector<2x1xf32>
    %9 = arith.addf %8, %7 : vector<2x1xf32>
    %10 = arith.divf %8, %9 : vector<2x1xf32>
    %c0_6 = arith.constant 0 : index
    %c0_7 = arith.constant 0 : index
    %11 = vector.load %arg3[%c0_6, %c0_7] : memref<2x1xf32, #tpu.memory_space<vmem>>, vector<2x1xf32>
    tpu.vector_store %arg3[%c0_6, %c0_7], %10 {strides = array<i32>} : memref<2x1xf32, #tpu.memory_space<vmem>>, vector<2x1xf32>,
    return
  }
}

</mosaic_0001>

<bundles_post_ra>
// kernel: discriminator_forward.9
= control target key start
LH: loop header
LB: loop body
LE: loop exit
PB: predicated region body
PF: predicated region fallthrough
CT: control target
= control target key end

     0   :  { %vm110_vm0 = vcmask 523264   ;;  %v427_v39 = vmov 0.0   ;;  %s577_s1 = inlined_call_operand.vmem [shape: bf16[64,128], index: 1, kind: input, shape index: {}]   ;;  %s578_s2 = inlined_call_operand.vmem [shape: f32[1,128], index: 2, kind: input, shape index: {}]   ;;  %s579_s0 = inlined_call_operand.vmem [shape: bf16[128,64], index: 0, kind: input, shape index: {}]   ;;  %s580_s3 = inlined_call_operand.vmem [shape: bf16[128,128], index: 3, kind: output, shape index: {0}]   ;;  %s581_s4 = inlined_call_operand.vmem [shape: f32[1,128], index: 4, kind: output, shape index: {1}]   ;;  %s582_s5 = inlined_call_operand.vmem [shape: f32[1,128], index: 5, kind: output, shape index: {2}]  }
   0x1   :  { %v365_v0 = vld [vmem:[%s577_s1 + $0x18] sm:$0xff]  ;;  %v364_v1 = vld [vmem:[%s577_s1 + $0x10] sm:$0xff]  ;;  %v363_v2 = vld [vmem:[%s577_s1 + $0x8] sm:$0xff]  ;;  %220 = vst [vmem:[%s581_s4] sm:$0x1] %v427_v39 }
   0x2   :  { %139 = vmatpush.bf16.msra.mxu0 %v365_v0  ;;  %413 = vmatpush.bf16.msra.mxu1 %v365_v0  ;;  %v362_v3 = vld [vmem:[%s577_s1] sm:$0xff]  ;;  %v356_v5 = vld [vmem:[%s579_s0 + $0x10] sm:$0xff]  ;;  %v355_v8 = vld [vmem:[%s579_s0 + $0x8] sm:$0xff]  ;;  %221 = vst [vmem:[%s582_s5] sm:$0x1] %v427_v39 }
   0x3   :  { %414 = vmatpush.bf16.msra.mxu2 %v365_v0  ;;  %415 = vmatpush.bf16.msra.mxu3 %v365_v0  ;;  %v354_v4 = vld [vmem:[%s579_s0] sm:$0xff]  ;;  %v360_v7 = vld [vmem:[%s579_s0 + $0x30] sm:$0xff]  ;;  %v357_v9 = vld [vmem:[%s579_s0 + $0x18] sm:$0xff] }
   0x4   :  { %v358_v6 = vld [vmem:[%s579_s0 + $0x20] sm:$0xff]  ;;  %v359_v10 = vld [vmem:[%s579_s0 + $0x28] sm:$0xff]  ;;  %v361_v11 = vld [vmem:[%s579_s0 + $0x38] sm:$0xff] }
   0x5   :  { %v505_v14 = vld [vmem:[%s578_s2] ss:$0 sm:$0xff] }
   0x6   :  { %140 = vmatpush.bf16.msra.mxu0 %v364_v1  ;;  %416 = vmatpush.bf16.msra.mxu1 %v364_v1 }
   0x7   :  { %417 = vmatpush.bf16.msra.mxu2 %v364_v1  ;;  %418 = vmatpush.bf16.msra.mxu3 %v364_v1 }
   0xa   :  { %141 = vmatpush.bf16.msra.mxu0 %v363_v2  ;;  %419 = vmatpush.bf16.msra.mxu1 %v363_v2 }
   0xb   :  { %420 = vmatpush.bf16.msra.mxu2 %v363_v2  ;;  %421 = vmatpush.bf16.msra.mxu3 %v363_v2 }
   0xe   :  { %142 = vmatpush.bf16.msra.mxu0 %v362_v3  ;;  %422 = vmatpush.bf16.msra.mxu1 %v362_v3 }
   0xf   :  { %423 = vmatpush.bf16.msra.mxu2 %v362_v3  ;;  %424 = vmatpush.bf16.msra.mxu3 %v362_v3 }
  0x11   :  { %346 = vmatmul.msk.bf16.vlgmr.msra.gmra.mxu0 %vm110_vm0, %v354_v4  ;;  %348 = vmatmul.msk.bf16.vlgmr.msra.gmra.mxu1 %vm110_vm0, %v356_v5 }
  0x12   :  { %350 = vmatmul.msk.bf16.vlgmr.msra.gmra.mxu2 %vm110_vm0, %v358_v6  ;;  %352 = vmatmul.msk.bf16.vlgmr.msra.gmra.mxu3 %vm110_vm0, %v360_v7 }
  0x21   :  { %347 = vmatmul.msk.bf16.gmra.mxu0 %vm110_vm0, %v355_v8  ;;  %349 = vmatmul.msk.bf16.gmra.mxu1 %vm110_vm0, %v357_v9 }
  0x22   :  { %351 = vmatmul.msk.bf16.gmra.mxu2 %vm110_vm0, %v359_v10  ;;  %353 = vmatmul.msk.bf16.gmra.mxu3 %vm110_vm0, %v361_v11 }
  0x8e   :  { %v144_v12 = vpop.f32.mrf.mxu0  ;;  %v154_v13 = vpop.f32.mrf.mxu1 }
  0x8f   :  { %v155_v15 = vadd.f32 %v505_v14, %v154_v13  ;;  %v145_v20 = vadd.f32 %v505_v14, %v144_v12 }
  0x91   :  { %v247_v37 = vmul.f32 %v145_v20, %v145_v20  ;;  %v251_v55 = vmul.f32 %v155_v15, %v155_v15 }
  0x95   :  { %v164_v16 = vpop.f32.mrf.mxu2  ;;  %v174_v17 = vpop.f32.mrf.mxu3 }
  0x96   :  { %v146_v18 = vpop.f32.mrf.mxu0  ;;  %v156_v19 = vpop.f32.mrf.mxu1  ;;  %v165_v25 = vadd.f32 %v505_v14, %v164_v16  ;;  %v519_v26 = vadd.f32 %v505_v14, %v174_v17 }
  0x97   :  { %v147_v21 = vadd.f32 %v505_v14, %v146_v18  ;;  %v157_v22 = vadd.f32 %v505_v14, %v156_v19 }
  0x98   :  { %v255_v11 = vmul.f32 %v165_v25, %v165_v25 }
  0x99   :  { %v369_v23 = vpack.c.bf16 %v147_v21, %v145_v20  ;;  %v379_v24 = vpack.c.bf16 %v157_v22, %v155_v15  ;;  %v248_v36 = vmul.f32 %v147_v21, %v147_v21  ;;  %v223_v40 = vadd.f32 %v147_v21, %v145_v20 }
  0x9a   :  { %v252_v60 = vmul.f32 %v157_v22, %v157_v22 }
  0x9b   :  { %370 = vst [vmem:[%s580_s3] sm:$0xff] %v369_v23   ;;  %v263_v44 = vadd.f32 %v248_v36, %v247_v37  ;;  %v259_v23 = vmul.f32 %v519_v26, %v519_v26 }
  0x9c   :  { %407 = vst [vmem:[%s580_s3 + $0x10] sm:$0xff] %v379_v24  }
  0x9d   :  { %v166_v27 = vpop.f32.mrf.mxu2  ;;  %v176_v28 = vpop.f32.mrf.mxu3 }
  0x9e   :  { %v149_v29 = vpop.f32.mrf.mxu0  ;;  %v159_v30 = vpop.f32.mrf.mxu1  ;;  %v167_v31 = vadd.f32 %v505_v14, %v166_v27  ;;  %v523_v32 = vadd.f32 %v505_v14, %v176_v28 }
  0x9f   :  { %v150_v33 = vadd.f32 %v505_v14, %v149_v29  ;;  %v160_v41 = vadd.f32 %v505_v14, %v159_v30 }
  0xa0   :  { %v389_v34 = vpack.c.bf16 %v167_v31, %v165_v25  ;;  %v399_v35 = vpack.c.bf16 %v523_v32, %v519_v26  ;;  %v260_v27 = vmul.f32 %v523_v32, %v523_v32 }
  0xa1   :  { %v249_v38 = vmul.f32 %v150_v33, %v150_v33  ;;  %v224_v47 = vadd.f32 %v223_v40, %v150_v33  ;;  %v253_v3 = vmul.f32 %v160_v41, %v160_v41 }
  0xa2   :  { %409 = vst [vmem:[%s580_s3 + $0x20] sm:$0xff] %v389_v34  }
  0xa3   :  { %411 = vst [vmem:[%s580_s3 + $0x30] sm:$0xff] %v399_v35   ;;  %v264_v50 = vadd.f32 %v263_v44, %v249_v38 }
  0xa5   :  { %v169_v42 = vpop.f32.mrf.mxu2  ;;  %v179_v43 = vpop.f32.mrf.mxu3 }
  0xa6   :  { %v151_v45 = vpop.f32.mrf.mxu0  ;;  %v161_v46 = vpop.f32.mrf.mxu1  ;;  %v170_v58 = vadd.f32 %v505_v14, %v169_v42  ;;  %v180_v59 = vadd.f32 %v505_v14, %v179_v43 }
  0xa7   :  { %v152_v48 = vadd.f32 %v505_v14, %v151_v45  ;;  %v162_v49 = vadd.f32 %v505_v14, %v161_v46 }
  0xa8   :  { %v257_v18 = vmul.f32 %v170_v58, %v170_v58 }
  0xa9   :  { %v374_v51 = vpack.c.bf16 %v152_v48, %v150_v33  ;;  %v225_v52 = vadd.f32 %v224_v47, %v152_v48  ;;  %v250_v53 = vmul.f32 %v152_v48, %v152_v48  ;;  %v384_v54 = vpack.c.bf16 %v162_v49, %v160_v41  ;;  %v246_v48 = vld [vmem:[%s582_s5] sm:$0x1] }
  0xaa   :  { %v254_v9 = vmul.f32 %v162_v49, %v162_v49 }
  0xab   :  { %406 = vst [vmem:[%s580_s3 + $0x8] sm:$0xff] %v374_v51   ;;  %v226_v56 = vadd.f32 %v225_v52, %v155_v15  ;;  %v265_v57 = vadd.f32 %v264_v50, %v250_v53 }
  0xac   :  { %408 = vst [vmem:[%s580_s3 + $0x18] sm:$0xff] %v384_v54  }
  0xad   :  { %v266_v61 = vadd.f32 %v265_v57, %v251_v55  ;;  %v227_v62 = vadd.f32 %v226_v56, %v157_v22  ;;  %v171_v63 = vpop.f32.mrf.mxu2  ;;  %v181_v0 = vpop.f32.mrf.mxu3 }
  0xae   :  { %v172_v1 = vadd.f32 %v505_v14, %v171_v63  ;;  %v182_v2 = vadd.f32 %v505_v14, %v181_v0  ;;  %v256_v14 = vmul.f32 %v167_v31, %v167_v31 }
  0xaf   :  { %v228_v4 = vadd.f32 %v227_v62, %v160_v41  ;;  %v267_v5 = vadd.f32 %v266_v61, %v252_v60 }
  0xb0   :  { %v394_v6 = vpack.c.bf16 %v172_v1, %v170_v58  ;;  %v404_v7 = vpack.c.bf16 %v182_v2, %v180_v59  ;;  %v258_v22 = vmul.f32 %v172_v1, %v172_v1  ;;  %v262_v36 = vmul.f32 %v182_v2, %v182_v2 }
  0xb1   :  { %v229_v8 = vadd.f32 %v228_v4, %v162_v49  ;;  %v268_v10 = vadd.f32 %v267_v5, %v253_v3 }
  0xb2   :  { %410 = vst [vmem:[%s580_s3 + $0x28] sm:$0xff] %v394_v6  }
  0xb3   :  { %v230_v12 = vadd.f32 %v229_v8, %v165_v25  ;;  %v269_v13 = vadd.f32 %v268_v10, %v254_v9  ;;  %412 = vst [vmem:[%s580_s3 + $0x38] sm:$0xff] %v404_v7  }
  0xb5   :  { %v270_v15 = vadd.f32 %v269_v13, %v255_v11  ;;  %v231_v16 = vadd.f32 %v230_v12, %v167_v31  ;;  %v261_v31 = vmul.f32 %v180_v59, %v180_v59 }
  0xb7   :  { %v232_v17 = vadd.f32 %v231_v16, %v170_v58  ;;  %v271_v19 = vadd.f32 %v270_v15, %v256_v14 }
  0xb9   :  { %v272_v20 = vadd.f32 %v271_v19, %v257_v18  ;;  %v233_v21 = vadd.f32 %v232_v17, %v172_v1 }
  0xbb   :  { %v234_v24 = vadd.f32 %v233_v21, %v519_v26  ;;  %v273_v25 = vadd.f32 %v272_v20, %v258_v22 }
  0xbd   :  { %v274_v28 = vadd.f32 %v273_v25, %v259_v23  ;;  %v235_v29 = vadd.f32 %v234_v24, %v523_v32  ;;  %v222_v32 = vld [vmem:[%s581_s4] sm:$0x1] }
  0xbf   :  { %v236_v30 = vadd.f32 %v235_v29, %v180_v59  ;;  %v275_v33 = vadd.f32 %v274_v28, %v260_v27 }
  0xc1   :  { %v276_v34 = vadd.f32 %v275_v33, %v261_v31  ;;  %v237_v35 = vadd.f32 %v236_v30, %v182_v2 }
  0xc3   :  { %v238_v37 = vrot.slane %v237_v35, 4  ;;  %v277_v38 = vadd.f32 %v276_v34, %v262_v36 }
  0xc5   :  { %v239_v39 = vadd.f32 %v238_v37, %v237_v35  ;;  %v278_v40 = vrot.slane %v277_v38, 4 }
  0xc7   :  { %v240_v41 = vrot.slane %v239_v39, 2  ;;  %v279_v42 = vadd.f32 %v278_v40, %v277_v38 }
  0xc9   :  { %v241_v26 = vadd.f32 %v240_v41, %v239_v39  ;;  %v280_v43 = vrot.slane %v279_v42, 2 }
  0xcb   :  { %v242_v44 = vrot.slane %v241_v26, 1  ;;  %v281_v45 = vadd.f32 %v280_v43, %v279_v42 }
  0xcd   :  { %v243_v46 = vadd.f32 %v242_v44, %v241_v26  ;;  %v282_v47 = vrot.slane %v281_v45, 1 }
  0xcf   :  { %v244_v49 = vadd.f32 %v243_v46, %v222_v32  ;;  %v283_v50 = vadd.f32 %v282_v47, %v281_v45 }
  0xd1   :  { %245 = vst [vmem:[%s581_s4] sm:$0x1] %v244_v49  ;;  %v284_v51 = vadd.f32 %v283_v50, %v246_v48 }
  0xd3   :  { %285 = vst [vmem:[%s582_s5] sm:$0x1] %v284_v51 }

// kernel: discriminator_forward.10
= control target key start
LH: loop header
LB: loop body
LE: loop exit
PB: predicated region body
PF: predicated region fallthrough
CT: control target
= control target key end

     0   :  { %s352_s0 = inlined_call_operand.vmem [shape: bf16[128,128], index: 0, kind: input, shape index: {}]   ;;  %s353_s1 = inlined_call_operand.vmem [shape: f32[1,128], index: 1, kind: input, shape index: {}]   ;;  %s354_s2 = inlined_call_operand.vmem [shape: f32[1,128], index: 2, kind: input, shape index: {}]   ;;  %s355_s3 = inlined_call_operand.vmem [shape: bf16[128,128], index: 3, kind: output, shape index: {}]  }
   0x1   :  { %v155_v0 = vld [vmem:[%s352_s0] sm:$0xff]   ;;  %v226_v5 = vld [vmem:[%s352_s0 + $0x8] sm:$0xff]   ;;  %v227_v8 = vld [vmem:[%s352_s0 + $0x10] sm:$0xff]  }
   0x2   :  { %v268_v1 = vld [vmem:[%s353_s1] ss:$0 sm:$0xff]  ;;  %v156_v2 = vunpack.c.l.bf16 %v155_v0  ;;  %v157_v3 = vunpack.c.h.bf16 %v155_v0  ;;  %v160_v6 = vunpack.c.l.bf16 %v226_v5  ;;  %v161_v7 = vunpack.c.h.bf16 %v226_v5  ;;  %v228_v9 = vld [vmem:[%s352_s0 + $0x18] sm:$0xff]   ;;  %v230_v43 = vld [vmem:[%s352_s0 + $0x28] sm:$0xff]  }
   0x3   :  { %v273_v4 = vld [vmem:[%s354_s2] ss:$0 sm:$0xff]  ;;  %v164_v12 = vunpack.c.l.bf16 %v227_v8  ;;  %v165_v13 = vunpack.c.h.bf16 %v227_v8  ;;  %v168_v16 = vunpack.c.l.bf16 %v228_v9  ;;  %v169_v17 = vunpack.c.h.bf16 %v228_v9  ;;  %v231_v48 = vld [vmem:[%s352_s0 + $0x30] sm:$0xff]   ;;  %v232_v53 = vld [vmem:[%s352_s0 + $0x38] sm:$0xff]  }
   0x4   :  { %v50_v10 = vmul.f32 %v268_v1, %v156_v2  ;;  %v51_v11 = vmul.f32 %v268_v1, %v157_v3  ;;  %v52_v14 = vmul.f32 %v268_v1, %v160_v6  ;;  %v53_v15 = vmul.f32 %v268_v1, %v161_v7  ;;  %v229_v34 = vld [vmem:[%s352_s0 + $0x20] sm:$0xff]  }
   0x5   :  { %v54_v20 = vmul.f32 %v268_v1, %v164_v12  ;;  %v55_v21 = vmul.f32 %v268_v1, %v165_v13  ;;  %v56_v24 = vmul.f32 %v268_v1, %v168_v16  ;;  %v57_v25 = vmul.f32 %v268_v1, %v169_v17 }
   0x6   :  { %v70_v18 = vadd.f32 %v273_v4, %v50_v10  ;;  %v71_v19 = vadd.f32 %v273_v4, %v51_v11  ;;  %v72_v22 = vadd.f32 %v273_v4, %v52_v14  ;;  %v73_v23 = vadd.f32 %v273_v4, %v53_v15 }
   0x7   :  { %v74_v28 = vadd.f32 %v273_v4, %v54_v20  ;;  %v75_v29 = vadd.f32 %v273_v4, %v55_v21  ;;  %v76_v32 = vadd.f32 %v273_v4, %v56_v24  ;;  %v77_v33 = vadd.f32 %v273_v4, %v57_v25 }
   0x8   :  { %v86_v26 = vmul.f32 0.2, %v70_v18  ;;  %v87_v27 = vmul.f32 0.2, %v71_v19  ;;  %v88_v30 = vmul.f32 0.2, %v72_v22  ;;  %v172_v47 = vunpack.c.l.bf16 %v229_v34 }
   0x9   :  { %v89_v31 = vmul.f32 0.2, %v73_v23  ;;  %v90_v37 = vmul.f32 0.2, %v74_v28  ;;  %v91_v38 = vmul.f32 0.2, %v75_v29  ;;  %v173_v52 = vunpack.c.h.bf16 %v229_v34 }
   0xa   :  { %v102_v35 = vmax.f32 %v70_v18, %v86_v26  ;;  %v103_v36 = vmax.f32 %v71_v19, %v87_v27  ;;  %v104_v39 = vmax.f32 %v72_v22, %v88_v30  ;;  %v92_v41 = vmul.f32 0.2, %v76_v32 }
   0xb   :  { %v105_v40 = vmax.f32 %v73_v23, %v89_v31  ;;  %v93_v42 = vmul.f32 0.2, %v77_v33  ;;  %v106_v45 = vmax.f32 %v74_v28, %v90_v37  ;;  %v107_v46 = vmax.f32 %v75_v29, %v91_v38 }
   0xc   :  { %v189_v44 = vpack.c.bf16 %v103_v36, %v102_v35  ;;  %v108_v50 = vmax.f32 %v76_v32, %v92_v41  ;;  %v58_v55 = vmul.f32 %v268_v1, %v172_v47  ;;  %v176_v56 = vunpack.c.l.bf16 %v230_v43 }
   0xd   :  { %v194_v49 = vpack.c.bf16 %v105_v40, %v104_v39  ;;  %v109_v51 = vmax.f32 %v77_v33, %v93_v42  ;;  %v199_v54 = vpack.c.bf16 %v107_v46, %v106_v45  ;;  %v177_v57 = vunpack.c.h.bf16 %v230_v43 }
   0xe   :  { %190 = vst [vmem:[%s355_s3] sm:$0xff] %v189_v44   ;;  %v59_v59 = vmul.f32 %v268_v1, %v173_v52  ;;  %v180_v60 = vunpack.c.l.bf16 %v231_v48  ;;  %v181_v61 = vunpack.c.h.bf16 %v231_v48  ;;  %v78_v62 = vadd.f32 %v273_v4, %v58_v55 }
   0xf   :  { %233 = vst [vmem:[%s355_s3 + $0x8] sm:$0xff] %v194_v49   ;;  %v204_v58 = vpack.c.bf16 %v109_v51, %v108_v50  ;;  %v60_v63 = vmul.f32 %v268_v1, %v176_v56  ;;  %v61_v0 = vmul.f32 %v268_v1, %v177_v57  ;;  %v184_v2 = vunpack.c.l.bf16 %v232_v53 }
  0x10   :  { %234 = vst [vmem:[%s355_s3 + $0x10] sm:$0xff] %v199_v54   ;;  %v79_v3 = vadd.f32 %v273_v4, %v59_v59  ;;  %v62_v5 = vmul.f32 %v268_v1, %v180_v60  ;;  %v63_v6 = vmul.f32 %v268_v1, %v181_v61  ;;  %v185_v7 = vunpack.c.h.bf16 %v232_v53 }
  0x11   :  { %235 = vst [vmem:[%s355_s3 + $0x18] sm:$0xff] %v204_v58   ;;  %v94_v8 = vmul.f32 0.2, %v78_v62  ;;  %v80_v9 = vadd.f32 %v273_v4, %v60_v63  ;;  %v81_v10 = vadd.f32 %v273_v4, %v61_v0  ;;  %v64_v11 = vmul.f32 %v268_v1, %v184_v2 }
  0x12   :  { %v95_v12 = vmul.f32 0.2, %v79_v3  ;;  %v82_v13 = vadd.f32 %v273_v4, %v62_v5  ;;  %v83_v14 = vadd.f32 %v273_v4, %v63_v6  ;;  %v65_v15 = vmul.f32 %v268_v1, %v185_v7 }
  0x13   :  { %v110_v16 = vmax.f32 %v78_v62, %v94_v8  ;;  %v96_v17 = vmul.f32 0.2, %v80_v9  ;;  %v97_v18 = vmul.f32 0.2, %v81_v10  ;;  %v84_v19 = vadd.f32 %v273_v4, %v64_v11 }
  0x14   :  { %v111_v20 = vmax.f32 %v79_v3, %v95_v12  ;;  %v98_v21 = vmul.f32 0.2, %v82_v13  ;;  %v99_v22 = vmul.f32 0.2, %v83_v14  ;;  %v85_v23 = vadd.f32 %v273_v4, %v65_v15 }
  0x15   :  { %v112_v24 = vmax.f32 %v80_v9, %v96_v17  ;;  %v113_v25 = vmax.f32 %v81_v10, %v97_v18  ;;  %v100_v26 = vmul.f32 0.2, %v84_v19 }
  0x16   :  { %v209_v27 = vpack.c.bf16 %v111_v20, %v110_v16  ;;  %v114_v28 = vmax.f32 %v82_v13, %v98_v21  ;;  %v115_v29 = vmax.f32 %v83_v14, %v99_v22  ;;  %v101_v30 = vmul.f32 0.2, %v85_v23 }
  0x17   :  { %v214_v31 = vpack.c.bf16 %v113_v25, %v112_v24  ;;  %v116_v32 = vmax.f32 %v84_v19, %v100_v26 }
  0x18   :  { %236 = vst [vmem:[%s355_s3 + $0x20] sm:$0xff] %v209_v27   ;;  %v219_v1 = vpack.c.bf16 %v115_v29, %v114_v28  ;;  %v117_v33 = vmax.f32 %v85_v23, %v101_v30 }
  0x19   :  { %237 = vst [vmem:[%s355_s3 + $0x28] sm:$0xff] %v214_v31  }
  0x1a   :  { %238 = vst [vmem:[%s355_s3 + $0x30] sm:$0xff] %v219_v1   ;;  %v224_v4 = vpack.c.bf16 %v117_v33, %v116_v32 }
  0x1c   :  { %239 = vst [vmem:[%s355_s3 + $0x38] sm:$0xff] %v224_v4  }

// kernel: discriminator_forward.12
= control target key start
LH: loop header
LB: loop body
LE: loop exit
PB: predicated region body
PF: predicated region fallthrough
CT: control target
= control target key end

     0   :  { %s118_s0 = inlined_call_operand.vmem [shape: bf16[32,128], index: 0, kind: input, shape index: {}]   ;;  %s119_s1 = inlined_call_operand.vmem [shape: f32[1,128], index: 1, kind: input, shape index: {}]   ;;  %s120_s2 = inlined_call_operand.vmem [shape: f32[1,128], index: 2, kind: input, shape index: {}]   ;;  %s121_s3 = inlined_call_operand.vmem [shape: bf16[32,128], index: 3, kind: output, shape index: {}]  }
   0x1   :  { %v59_v0 = vld [vmem:[%s118_s0] sm:$0xff]   ;;  %v76_v5 = vld [vmem:[%s118_s0 + $0x8] sm:$0xff]  }
   0x2   :  { %v78_v1 = vld [vmem:[%s119_s1] ss:$0 sm:$0xff]  ;;  %v60_v2 = vunpack.c.l.bf16 %v59_v0  ;;  %v61_v3 = vunpack.c.h.bf16 %v59_v0  ;;  %v64_v6 = vunpack.c.l.bf16 %v76_v5  ;;  %v65_v7 = vunpack.c.h.bf16 %v76_v5 }
   0x3   :  { %v79_v4 = vld [vmem:[%s120_s2] ss:$0 sm:$0xff] }
   0x4   :  { %v26_v8 = vmul.f32 %v78_v1, %v60_v2  ;;  %v27_v9 = vmul.f32 %v78_v1, %v61_v3  ;;  %v28_v10 = vmul.f32 %v78_v1, %v64_v6  ;;  %v29_v11 = vmul.f32 %v78_v1, %v65_v7 }
   0x6   :  { %v34_v12 = vadd.f32 %v79_v4, %v26_v8  ;;  %v35_v13 = vadd.f32 %v79_v4, %v27_v9  ;;  %v36_v14 = vadd.f32 %v79_v4, %v28_v10  ;;  %v37_v15 = vadd.f32 %v79_v4, %v29_v11 }
   0x8   :  { %v38_v16 = vmul.f32 0.2, %v34_v12  ;;  %v39_v17 = vmul.f32 0.2, %v35_v13  ;;  %v40_v18 = vmul.f32 0.2, %v36_v14 }
   0x9   :  { %v41_v19 = vmul.f32 0.2, %v37_v15 }
   0xa   :  { %v42_v20 = vmax.f32 %v34_v12, %v38_v16  ;;  %v43_v21 = vmax.f32 %v35_v13, %v39_v17  ;;  %v44_v22 = vmax.f32 %v36_v14, %v40_v18 }
   0xb   :  { %v45_v23 = vmax.f32 %v37_v15, %v41_v19 }
   0xc   :  { %v69_v24 = vpack.c.bf16 %v43_v21, %v42_v20 }
   0xd   :  { %v74_v25 = vpack.c.bf16 %v45_v23, %v44_v22 }
   0xe   :  { %70 = vst [vmem:[%s121_s3] sm:$0xff] %v69_v24  }
   0xf   :  { %77 = vst [vmem:[%s121_s3 + $0x8] sm:$0xff] %v74_v25  }

// kernel: discriminator_forward.11
= control target key start
LH: loop header
LB: loop body
LE: loop exit
PB: predicated region body
PF: predicated region fallthrough
CT: control target
= control target key end

     0   :  { %s1594_s1 = inlined_call_operand.vmem [shape: bf16[1024,128], index: 1, kind: input, shape index: {}]   ;;  %s1595_s0 = inlined_call_operand.vmem [shape: bf16[32,1024], index: 0, kind: input, shape index: {}]   ;;  %s1596_s2 = inlined_call_operand.vmem [shape: f32[1,128], index: 2, kind: input, shape index: {}]   ;;  %s1597_s4 = inlined_call_operand.vmem [shape: f32[1,128], index: 4, kind: output, shape index: {1}]   ;;  %s1598_s5 = inlined_call_operand.vmem [shape: f32[1,128], index: 5, kind: output, shape index: {2}]   ;;  %s1599_s3 = inlined_call_operand.vmem [shape: bf16[32,128], index: 3, kind: output, shape index: {0}]  }
   0x1   :  { %v1178_v0 = vld [vmem:[%s1594_s1 + $0x38] sm:$0xff]  ;;  %v1177_v4 = vld [vmem:[%s1594_s1 + $0x30] sm:$0xff]  ;;  %v1176_v8 = vld [vmem:[%s1594_s1 + $0x28] sm:$0xff] }
   0x2   :  { %v1186_v1 = vld [vmem:[%s1594_s1 + $0x78] sm:$0xff]  ;;  %629 = vmatpush.bf16.msra.mxu0 %v1178_v0  ;;  %v1185_v5 = vld [vmem:[%s1594_s1 + $0x70] sm:$0xff]  ;;  %v1184_v9 = vld [vmem:[%s1594_s1 + $0x68] sm:$0xff] }
   0x3   :  { %v1194_v2 = vld [vmem:[%s1594_s1 + $0xb8] sm:$0xff]  ;;  %648 = vmatpush.bf16.msra.mxu1 %v1186_v1  ;;  %v1193_v6 = vld [vmem:[%s1594_s1 + $0xb0] sm:$0xff]  ;;  %v1192_v10 = vld [vmem:[%s1594_s1 + $0xa8] sm:$0xff] }
   0x4   :  { %v1202_v3 = vld [vmem:[%s1594_s1 + $0xf8] sm:$0xff]  ;;  %667 = vmatpush.bf16.msra.mxu2 %v1194_v2  ;;  %v1201_v7 = vld [vmem:[%s1594_s1 + $0xf0] sm:$0xff]  ;;  %v1200_v11 = vld [vmem:[%s1594_s1 + $0xe8] sm:$0xff] }
   0x5   :  { %686 = vmatpush.bf16.msra.mxu3 %v1202_v3  ;;  %v1175_v12 = vld [vmem:[%s1594_s1 + $0x20] sm:$0xff]  ;;  %v1174_v16 = vld [vmem:[%s1594_s1 + $0x18] sm:$0xff]  ;;  %v1173_v20 = vld [vmem:[%s1594_s1 + $0x10] sm:$0xff] }
   0x6   :  { %630 = vmatpush.bf16.msra.mxu0 %v1177_v4  ;;  %v1183_v13 = vld [vmem:[%s1594_s1 + $0x60] sm:$0xff]  ;;  %v1182_v17 = vld [vmem:[%s1594_s1 + $0x58] sm:$0xff]  ;;  %v1181_v21 = vld [vmem:[%s1594_s1 + $0x50] sm:$0xff] }
   0x7   :  { %649 = vmatpush.bf16.msra.mxu1 %v1185_v5  ;;  %v1191_v14 = vld [vmem:[%s1594_s1 + $0xa0] sm:$0xff]  ;;  %v1190_v18 = vld [vmem:[%s1594_s1 + $0x98] sm:$0xff]  ;;  %v1189_v22 = vld [vmem:[%s1594_s1 + $0x90] sm:$0xff] }
   0x8   :  { %668 = vmatpush.bf16.msra.mxu2 %v1193_v6  ;;  %v1199_v15 = vld [vmem:[%s1594_s1 + $0xe0] sm:$0xff]  ;;  %v1198_v19 = vld [vmem:[%s1594_s1 + $0xd8] sm:$0xff]  ;;  %v1197_v23 = vld [vmem:[%s1594_s1 + $0xd0] sm:$0xff] }
   0x9   :  { %687 = vmatpush.bf16.msra.mxu3 %v1201_v7  ;;  %v1172_v24 = vld [vmem:[%s1594_s1 + $0x8] sm:$0xff]  ;;  %v1171_v28 = vld [vmem:[%s1594_s1] sm:$0xff]  ;;  %v1226_v40 = vld [vmem:[%s1594_s1 + $0x1b8] sm:$0xff] }
   0xa   :  { %631 = vmatpush.bf16.msra.mxu0 %v1176_v8  ;;  %v1180_v25 = vld [vmem:[%s1594_s1 + $0x48] sm:$0xff]  ;;  %v1179_v29 = vld [vmem:[%s1594_s1 + $0x40] sm:$0xff]  ;;  %v1210_v41 = vld [vmem:[%s1594_s1 + $0x138] sm:$0xff] }
   0xb   :  { %650 = vmatpush.bf16.msra.mxu1 %v1184_v9  ;;  %v1188_v26 = vld [vmem:[%s1594_s1 + $0x88] sm:$0xff]  ;;  %v1187_v30 = vld [vmem:[%s1594_s1 + $0x80] sm:$0xff]  ;;  %v1218_v46 = vld [vmem:[%s1594_s1 + $0x178] sm:$0xff] }
   0xc   :  { %669 = vmatpush.bf16.msra.mxu2 %v1192_v10  ;;  %v1196_v27 = vld [vmem:[%s1594_s1 + $0xc8] sm:$0xff]  ;;  %v1195_v31 = vld [vmem:[%s1594_s1 + $0xc0] sm:$0xff]  ;;  %v1234_v47 = vld [vmem:[%s1594_s1 + $0x1f8] sm:$0xff] }
   0xd   :  { %688 = vmatpush.bf16.msra.mxu3 %v1200_v11  ;;  %v837_v32 = vld [vmem:[%s1595_s0] sm:$0xf]  ;;  %v1155_v34 = vld [vmem:[%s1595_s0 + $0x4] sm:$0xf]  ;;  %v845_v36 = vld [vmem:[%s1595_s0 + $0x8] sm:$0xf] }
   0xe   :  { %632 = vmatpush.bf16.msra.mxu0 %v1175_v12  ;;  %v1159_v33 = vld [vmem:[%s1595_s0 + $0x1c] sm:$0xf0]  ;;  %v839_v35 = vld [vmem:[%s1595_s0 + $0x20] sm:$0xf0]  ;;  %v1160_v37 = vld [vmem:[%s1595_s0 + $0x24] sm:$0xf0] }
   0xf   :  { %651 = vmatpush.bf16.msra.mxu1 %v1183_v13  ;;  %v1156_v38 = vld [vmem:[%s1595_s0 + $0xc] sm:$0xf]  ;;  %v838_v42 = vor.u32 %v1159_v33, %v837_v32  ;;  %v842_v43 = vor.u32 %v1155_v34, %v839_v35  ;;  %v846_v44 = vor.u32 %v1160_v37, %v845_v36  ;;  %v1225_v48 = vld [vmem:[%s1594_s1 + $0x1b0] sm:$0xff]  ;;  %v1223_v56 = vld [vmem:[%s1594_s1 + $0x1a0] sm:$0xff] }
  0x10   :  { %670 = vmatpush.bf16.msra.mxu2 %v1191_v14  ;;  %v847_v39 = vld [vmem:[%s1595_s0 + $0x28] sm:$0xf0]  ;;  %v1209_v49 = vld [vmem:[%s1594_s1 + $0x130] sm:$0xff]  ;;  %v1207_v57 = vld [vmem:[%s1594_s1 + $0x120] sm:$0xff] }
  0x11   :  { %689 = vmatpush.bf16.msra.mxu3 %v1199_v15  ;;  %v850_v45 = vor.u32 %v1156_v38, %v847_v39  ;;  %v1217_v50 = vld [vmem:[%s1594_s1 + $0x170] sm:$0xff]  ;;  %v1224_v52 = vld [vmem:[%s1594_s1 + $0x1a8] sm:$0xff]  ;;  %v1215_v58 = vld [vmem:[%s1594_s1 + $0x160] sm:$0xff] }
  0x12   :  { %633 = vmatpush.bf16.msra.mxu0 %v1174_v16  ;;  %v1233_v51 = vld [vmem:[%s1594_s1 + $0x1f0] sm:$0xff]  ;;  %v1208_v53 = vld [vmem:[%s1594_s1 + $0x128] sm:$0xff]  ;;  %v1231_v59 = vld [vmem:[%s1594_s1 + $0x1e0] sm:$0xff] }
  0x13   :  { %652 = vmatpush.bf16.msra.mxu1 %v1182_v17  ;;  %v1216_v54 = vld [vmem:[%s1594_s1 + $0x168] sm:$0xff]  ;;  %v869_v60 = vld [vmem:[%s1595_s0 + $0x40] sm:$0xf]  ;;  %v1163_v62 = vld [vmem:[%s1595_s0 + $0x44] sm:$0xf] }
  0x14   :  { %671 = vmatpush.bf16.msra.mxu2 %v1190_v18  ;;  %v1232_v55 = vld [vmem:[%s1594_s1 + $0x1e8] sm:$0xff]  ;;  %v1167_v61 = vld [vmem:[%s1595_s0 + $0x5c] sm:$0xf0]  ;;  %v871_v63 = vld [vmem:[%s1595_s0 + $0x60] sm:$0xf0] }
  0x15   :  { %690 = vmatpush.bf16.msra.mxu3 %v1198_v19  ;;  %v877_v0 = vld [vmem:[%s1595_s0 + $0x48] sm:$0xf]  ;;  %v1164_v2 = vld [vmem:[%s1595_s0 + $0x4c] sm:$0xf]  ;;  %v1222_v4 = vld [vmem:[%s1594_s1 + $0x198] sm:$0xff]  ;;  %v870_v6 = vor.u32 %v1167_v61, %v869_v60  ;;  %v874_v7 = vor.u32 %v1163_v62, %v871_v63 }
  0x16   :  { %634 = vmatpush.bf16.msra.mxu0 %v1173_v20  ;;  %v1168_v1 = vld [vmem:[%s1595_s0 + $0x64] sm:$0xf0]  ;;  %v879_v3 = vld [vmem:[%s1595_s0 + $0x68] sm:$0xf0]  ;;  %v1206_v5 = vld [vmem:[%s1594_s1 + $0x118] sm:$0xff] }
  0x17   :  { %653 = vmatpush.bf16.msra.mxu1 %v1181_v21  ;;  %v878_v8 = vor.u32 %v1168_v1, %v877_v0  ;;  %v882_v9 = vor.u32 %v1164_v2, %v879_v3  ;;  %v1214_v10 = vld [vmem:[%s1594_s1 + $0x158] sm:$0xff]  ;;  %v1221_v12 = vld [vmem:[%s1594_s1 + $0x190] sm:$0xff]  ;;  %v1220_v16 = vld [vmem:[%s1594_s1 + $0x188] sm:$0xff] }
  0x18   :  { %672 = vmatpush.bf16.msra.mxu2 %v1189_v22  ;;  %v1230_v11 = vld [vmem:[%s1594_s1 + $0x1d8] sm:$0xff]  ;;  %v1205_v13 = vld [vmem:[%s1594_s1 + $0x110] sm:$0xff]  ;;  %v1204_v17 = vld [vmem:[%s1594_s1 + $0x108] sm:$0xff] }
  0x19   :  { %691 = vmatpush.bf16.msra.mxu3 %v1197_v23  ;;  %v1213_v14 = vld [vmem:[%s1594_s1 + $0x150] sm:$0xff]  ;;  %v1212_v18 = vld [vmem:[%s1594_s1 + $0x148] sm:$0xff]  ;;  %v1219_v20 = vld [vmem:[%s1594_s1 + $0x180] sm:$0xff] }
  0x1a   :  { %635 = vmatpush.bf16.msra.mxu0 %v1172_v24  ;;  %v1229_v15 = vld [vmem:[%s1594_s1 + $0x1d0] sm:$0xff]  ;;  %v1228_v19 = vld [vmem:[%s1594_s1 + $0x1c8] sm:$0xff]  ;;  %v1203_v21 = vld [vmem:[%s1594_s1 + $0x100] sm:$0xff] }
  0x1b   :  { %654 = vmatpush.bf16.msra.mxu1 %v1180_v25  ;;  %v1211_v22 = vld [vmem:[%s1594_s1 + $0x140] sm:$0xff]  ;;  %v853_v24 = vld [vmem:[%s1595_s0 + $0x10] sm:$0xf]  ;;  %v1165_v38 = vld [vmem:[%s1595_s0 + $0x54] sm:$0xf] }
  0x1c   :  { %673 = vmatpush.bf16.msra.mxu2 %v1188_v26  ;;  %v1227_v23 = vld [vmem:[%s1594_s1 + $0x1c0] sm:$0xff]  ;;  %v1161_v25 = vld [vmem:[%s1595_s0 + $0x2c] sm:$0xf0]  ;;  %v1157_v26 = vld [vmem:[%s1595_s0 + $0x14] sm:$0xf] }
  0x1d   :  { %692 = vmatpush.bf16.msra.mxu3 %v1196_v27  ;;  %v855_v27 = vld [vmem:[%s1595_s0 + $0x30] sm:$0xf0]  ;;  %v854_v32 = vor.u32 %v1161_v25, %v853_v24  ;;  %v885_v36 = vld [vmem:[%s1595_s0 + $0x50] sm:$0xf] }
  0x1e   :  { %636 = vmatpush.bf16.msra.mxu0 %v1171_v28  ;;  %v861_v28 = vld [vmem:[%s1595_s0 + $0x18] sm:$0xf]  ;;  %v858_v33 = vor.u32 %v1157_v26, %v855_v27  ;;  %v1169_v37 = vld [vmem:[%s1595_s0 + $0x6c] sm:$0xf0]  ;;  %v887_v39 = vld [vmem:[%s1595_s0 + $0x70] sm:$0xf0] }
  0x1f   :  { %655 = vmatpush.bf16.msra.mxu1 %v1179_v29  ;;  %v1162_v29 = vld [vmem:[%s1595_s0 + $0x34] sm:$0xf0] }
  0x20   :  { %674 = vmatpush.bf16.msra.mxu2 %v1187_v30  ;;  %v1158_v30 = vld [vmem:[%s1595_s0 + $0x1c] sm:$0xf]  ;;  %v862_v34 = vor.u32 %v1162_v29, %v861_v28 }
  0x21   :  { %693 = vmatpush.bf16.msra.mxu3 %v1195_v31  ;;  %637 = vmatmul.bf16.vlgmr.msra.gmra.mxu0 %v838_v42  ;;  %v863_v31 = vld [vmem:[%s1595_s0 + $0x38] sm:$0xf0] }
  0x22   :  { %705 = vmatpush.bf16.msrb.mxu0 %v1210_v41  ;;  %656 = vmatmul.bf16.vlgmr.msra.gmra.mxu1 %v842_v43  ;;  %v866_v35 = vor.u32 %v1158_v30, %v863_v31  ;;  %v1170_v41 = vld [vmem:[%s1595_s0 + $0x74] sm:$0xf0]  ;;  %v1166_v42 = vld [vmem:[%s1595_s0 + $0x5c] sm:$0xf] }
  0x23   :  { %675 = vmatmul.bf16.vlgmr.msra.gmra.mxu2 %v846_v44  ;;  %724 = vmatpush.bf16.msrb.mxu1 %v1218_v46  ;;  %v895_v43 = vld [vmem:[%s1595_s0 + $0x78] sm:$0xf0]  ;;  %v886_v44 = vor.u32 %v1169_v37, %v885_v36 }
  0x24   :  { %743 = vmatpush.bf16.msrb.mxu2 %v1226_v40  ;;  %694 = vmatmul.bf16.vlgmr.msra.gmra.mxu3 %v850_v45  ;;  %v893_v40 = vld [vmem:[%s1595_s0 + $0x58] sm:$0xf]  ;;  %v890_v45 = vor.u32 %v1165_v38, %v887_v39 }
  0x25   :  { %762 = vmatpush.bf16.msrb.mxu3 %v1234_v47  ;;  %v894_v46 = vor.u32 %v1170_v41, %v893_v40  ;;  %v898_v47 = vor.u32 %v1166_v42, %v895_v43 }
  0x26   :  { %706 = vmatpush.bf16.msrb.mxu0 %v1209_v49 }
  0x27   :  { %725 = vmatpush.bf16.msrb.mxu1 %v1217_v50 }
  0x28   :  { %744 = vmatpush.bf16.msrb.mxu2 %v1225_v48 }
  0x29   :  { %763 = vmatpush.bf16.msrb.mxu3 %v1233_v51 }
  0x2a   :  { %707 = vmatpush.bf16.msrb.mxu0 %v1208_v53 }
  0x2b   :  { %726 = vmatpush.bf16.msrb.mxu1 %v1216_v54 }
  0x2c   :  { %745 = vmatpush.bf16.msrb.mxu2 %v1224_v52 }
  0x2d   :  { %764 = vmatpush.bf16.msrb.mxu3 %v1232_v55 }
  0x2e   :  { %708 = vmatpush.bf16.msrb.mxu0 %v1207_v57 }
  0x2f   :  { %727 = vmatpush.bf16.msrb.mxu1 %v1215_v58  ;;  %v1247_v58 = vld [vmem:[%s1596_s2] ss:$0 sm:$0xff] }
  0x30   :  { %746 = vmatpush.bf16.msrb.mxu2 %v1223_v56 }
  0x31   :  { %765 = vmatpush.bf16.msrb.mxu3 %v1231_v59  ;;  %642 = vmatmul.bf16.gmra.mxu0 %v870_v6 }
  0x32   :  { %709 = vmatpush.bf16.msrb.mxu0 %v1206_v5  ;;  %661 = vmatmul.bf16.gmra.mxu1 %v874_v7 }
  0x33   :  { %680 = vmatmul.bf16.gmra.mxu2 %v878_v8  ;;  %728 = vmatpush.bf16.msrb.mxu1 %v1214_v10 }
  0x34   :  { %747 = vmatpush.bf16.msrb.mxu2 %v1222_v4  ;;  %699 = vmatmul.bf16.gmra.mxu3 %v882_v9 }
  0x35   :  { %766 = vmatpush.bf16.msrb.mxu3 %v1230_v11 }
  0x36   :  { %710 = vmatpush.bf16.msrb.mxu0 %v1205_v13 }
  0x37   :  { %729 = vmatpush.bf16.msrb.mxu1 %v1213_v14 }
  0x38   :  { %748 = vmatpush.bf16.msrb.mxu2 %v1221_v12  ;;  %v1248_v12 = vmov 0.0  }
  0x39   :  { %767 = vmatpush.bf16.msrb.mxu3 %v1229_v15  ;;  %793 = vst [vmem:[%s1597_s4] sm:$0x1] %v1248_v12 }
  0x3a   :  { %711 = vmatpush.bf16.msrb.mxu0 %v1204_v17  ;;  %794 = vst [vmem:[%s1598_s5] sm:$0x1] %v1248_v12 }
  0x3b   :  { %730 = vmatpush.bf16.msrb.mxu1 %v1212_v18 }
  0x3c   :  { %749 = vmatpush.bf16.msrb.mxu2 %v1220_v16 }
  0x3d   :  { %768 = vmatpush.bf16.msrb.mxu3 %v1228_v19 }
  0x3e   :  { %712 = vmatpush.bf16.msrb.mxu0 %v1203_v21 }
  0x3f   :  { %731 = vmatpush.bf16.msrb.mxu1 %v1211_v22 }
  0x40   :  { %750 = vmatpush.bf16.msrb.mxu2 %v1219_v20 }
  0x41   :  { %769 = vmatpush.bf16.msrb.mxu3 %v1227_v23  ;;  %713 = vmatmul.bf16.vlgmr.msrb.gmra.mxu0 %v854_v32 }
  0x42   :  { %732 = vmatmul.bf16.vlgmr.msrb.gmra.mxu1 %v858_v33 }
  0x43   :  { %751 = vmatmul.bf16.vlgmr.msrb.gmra.mxu2 %v862_v34 }
  0x44   :  { %770 = vmatmul.bf16.vlgmr.msrb.gmra.mxu3 %v866_v35 }
  0x51   :  { %718 = vmatmul.bf16.gmra.mxu0 %v886_v44 }
  0x52   :  { %737 = vmatmul.bf16.gmra.mxu1 %v890_v45 }
  0x53   :  { %756 = vmatmul.bf16.gmra.mxu2 %v894_v46 }
  0x54   :  { %775 = vmatmul.bf16.gmra.mxu3 %v898_v47 }
  0x9e   :  { %v638_v48 = vpop.f32.mrf.mxu0 }
  0x9f   :  { %v657_v49 = vpop.f32.mrf.mxu1  ;;  %v639_v63 = vadd.f32 %v1247_v58, %v638_v48 }
  0xa1   :  { %v658_v0 = vadd.f32 %v657_v49, %v639_v63 }
  0xa6   :  { %v676_v50 = vpop.f32.mrf.mxu2  ;;  %v640_v52 = vpop.f32.mrf.mxu0 }
  0xa7   :  { %v695_v51 = vpop.f32.mrf.mxu3  ;;  %v659_v53 = vpop.f32.mrf.mxu1  ;;  %v641_v1 = vadd.f32 %v1247_v58, %v640_v52  ;;  %v677_v6 = vadd.f32 %v676_v50, %v658_v0 }
  0xa9   :  { %v660_v7 = vadd.f32 %v659_v53, %v641_v1  ;;  %v696_v10 = vadd.f32 %v695_v51, %v677_v6 }
  0xae   :  { %v678_v54 = vpop.f32.mrf.mxu2  ;;  %v643_v56 = vpop.f32.mrf.mxu0 }
  0xaf   :  { %v697_v55 = vpop.f32.mrf.mxu3  ;;  %v662_v57 = vpop.f32.mrf.mxu1  ;;  %v679_v8 = vadd.f32 %v678_v54, %v660_v7  ;;  %v644_v9 = vadd.f32 %v1247_v58, %v643_v56  ;;  %v795_v7 = vld [vmem:[%s1597_s4] sm:$0x1] }
  0xb1   :  { %v698_v13 = vadd.f32 %v697_v55, %v679_v8  ;;  %v663_v14 = vadd.f32 %v662_v57, %v644_v9 }
  0xb6   :  { %v681_v59 = vpop.f32.mrf.mxu2  ;;  %v645_v61 = vpop.f32.mrf.mxu0 }
  0xb7   :  { %v700_v60 = vpop.f32.mrf.mxu3  ;;  %v664_v62 = vpop.f32.mrf.mxu1  ;;  %v682_v20 = vadd.f32 %v681_v59, %v663_v14  ;;  %v646_v22 = vadd.f32 %v1247_v58, %v645_v61 }
  0xb9   :  { %v701_v26 = vadd.f32 %v700_v60, %v682_v20  ;;  %v665_v30 = vadd.f32 %v664_v62, %v646_v22 }
  0xbe   :  { %v683_v2 = vpop.f32.mrf.mxu2  ;;  %v714_v4 = vpop.f32.mrf.mxu0 }
  0xbf   :  { %v702_v3 = vpop.f32.mrf.mxu3  ;;  %v733_v5 = vpop.f32.mrf.mxu1  ;;  %v715_v15 = vadd.f32 %v714_v4, %v696_v10  ;;  %v684_v35 = vadd.f32 %v683_v2, %v665_v30  ;;  %v807_v10 = vld [vmem:[%s1598_s5] sm:$0x1] }
  0xc1   :  { %v734_v21 = vadd.f32 %v733_v5, %v715_v15  ;;  %v703_v39 = vadd.f32 %v702_v3, %v684_v35 }
  0xc6   :  { %v752_v11 = vpop.f32.mrf.mxu2  ;;  %v716_v17 = vpop.f32.mrf.mxu0 }
  0xc7   :  { %v771_v16 = vpop.f32.mrf.mxu3  ;;  %v735_v18 = vpop.f32.mrf.mxu1  ;;  %v717_v19 = vadd.f32 %v716_v17, %v698_v13  ;;  %v753_v23 = vadd.f32 %v752_v11, %v734_v21 }
  0xc9   :  { %v736_v24 = vadd.f32 %v735_v18, %v717_v19  ;;  %v772_v31 = vadd.f32 %v771_v16, %v753_v23 }
  0xcb   :  { %v808_v49 = vmul.f32 %v772_v31, %v772_v31 }
  0xce   :  { %v754_v25 = vpop.f32.mrf.mxu2  ;;  %v719_v29 = vpop.f32.mrf.mxu0 }
  0xcf   :  { %v755_v27 = vadd.f32 %v754_v25, %v736_v24  ;;  %v773_v28 = vpop.f32.mrf.mxu3  ;;  %v720_v33 = vadd.f32 %v719_v29, %v701_v26  ;;  %v738_v34 = vpop.f32.mrf.mxu1 }
  0xd1   :  { %v774_v32 = vadd.f32 %v773_v28, %v755_v27  ;;  %v739_v37 = vadd.f32 %v738_v34, %v720_v33 }
  0xd3   :  { %v1238_v36 = vpack.c.bf16 %v774_v32, %v772_v31  ;;  %v809_v46 = vmul.f32 %v774_v32, %v774_v32  ;;  %v796_v50 = vadd.f32 %v774_v32, %v772_v31 }
  0xd5   :  { %1239 = vst [vmem:[%s1599_s3] sm:$0xff] %v1238_v36   ;;  %v812_v54 = vadd.f32 %v809_v46, %v808_v49 }
  0xd6   :  { %v757_v38 = vpop.f32.mrf.mxu2  ;;  %v721_v42 = vpop.f32.mrf.mxu0 }
  0xd7   :  { %v758_v40 = vadd.f32 %v757_v38, %v739_v37  ;;  %v776_v41 = vpop.f32.mrf.mxu3  ;;  %v722_v43 = vadd.f32 %v721_v42, %v703_v39  ;;  %v740_v45 = vpop.f32.mrf.mxu1 }
  0xd9   :  { %v777_v44 = vadd.f32 %v776_v41, %v758_v40  ;;  %v741_v47 = vadd.f32 %v740_v45, %v722_v43 }
  0xdb   :  { %v810_v51 = vmul.f32 %v777_v44, %v777_v44  ;;  %v797_v55 = vadd.f32 %v796_v50, %v777_v44 }
  0xdd   :  { %v813_v57 = vadd.f32 %v812_v54, %v810_v51 }
  0xde   :  { %v759_v48 = vpop.f32.mrf.mxu2 }
  0xdf   :  { %v760_v52 = vadd.f32 %v759_v48, %v741_v47  ;;  %v778_v53 = vpop.f32.mrf.mxu3 }
  0xe1   :  { %v779_v56 = vadd.f32 %v778_v53, %v760_v52 }
  0xe3   :  { %v1243_v58 = vpack.c.bf16 %v779_v56, %v777_v44  ;;  %v798_v59 = vadd.f32 %v797_v55, %v779_v56  ;;  %v811_v60 = vmul.f32 %v779_v56, %v779_v56 }
  0xe5   :  { %1245 = vst [vmem:[%s1599_s3 + $0x8] sm:$0xff] %v1243_v58   ;;  %v799_v61 = vrot.slane %v798_v59, 4  ;;  %v814_v62 = vadd.f32 %v813_v57, %v811_v60 }
  0xe7   :  { %v800_v63 = vadd.f32 %v799_v61, %v798_v59  ;;  %v815_v0 = vrot.slane %v814_v62, 4 }
  0xe9   :  { %v801_v1 = vrot.slane %v800_v63, 2  ;;  %v816_v2 = vadd.f32 %v815_v0, %v814_v62 }
  0xeb   :  { %v802_v3 = vadd.f32 %v801_v1, %v800_v63  ;;  %v817_v4 = vrot.slane %v816_v2, 2 }
  0xed   :  { %v803_v5 = vrot.slane %v802_v3, 1  ;;  %v818_v6 = vadd.f32 %v817_v4, %v816_v2 }
  0xef   :  { %v804_v8 = vadd.f32 %v803_v5, %v802_v3  ;;  %v819_v9 = vrot.slane %v818_v6, 1 }
  0xf1   :  { %v805_v11 = vadd.f32 %v804_v8, %v795_v7  ;;  %v820_v12 = vadd.f32 %v819_v9, %v818_v6 }
  0xf3   :  { %806 = vst [vmem:[%s1597_s4] sm:$0x1] %v805_v11  ;;  %v821_v13 = vadd.f32 %v820_v12, %v807_v10 }
  0xf5   :  { %822 = vst [vmem:[%s1598_s5] sm:$0x1] %v821_v13 }

// kernel: discriminator_forward.14
= control target key start
LH: loop header
LB: loop body
LE: loop exit
PB: predicated region body
PF: predicated region fallthrough
CT: control target
= control target key end

     0   :  { %s75_s0 = inlined_call_operand.vmem [shape: bf16[8,256], index: 0, kind: input, shape index: {}]   ;;  %s76_s1 = inlined_call_operand.vmem [shape: f32[1,256], index: 1, kind: input, shape index: {}]   ;;  %s77_s2 = inlined_call_operand.vmem [shape: f32[1,256], index: 2, kind: input, shape index: {}]   ;;  %s78_s3 = inlined_call_operand.vmem [shape: bf16[8,256], index: 3, kind: output, shape index: {}]  }
   0x1   :  { %v14_v0 = vld [vmem:[%s75_s0] sm:$0xff] }
   0x2   :  { %v17_v1 = vld [vmem:[%s76_s1] sm:$0x3]  ;;  %v15_v3 = vunpack.c.l.bf16 %v14_v0  ;;  %v16_v4 = vunpack.c.h.bf16 %v14_v0 }
   0x3   :  { %v25_v2 = vld [vmem:[%s77_s2] sm:$0x3]  ;;  %v19_v5 = vperm.slane %v17_v1, 0  ;;  %v20_v6 = vperm.slane %v17_v1, 1 }
   0x4   :  { %v27_v7 = vperm.slane %v25_v2, 0  ;;  %v28_v8 = vperm.slane %v25_v2, 1 }
   0x5   :  { %v23_v9 = vmul.f32 %v19_v5, %v15_v3  ;;  %v24_v10 = vmul.f32 %v20_v6, %v16_v4 }
   0x7   :  { %v31_v11 = vadd.f32 %v27_v7, %v23_v9  ;;  %v32_v12 = vadd.f32 %v28_v8, %v24_v10 }
   0x9   :  { %v33_v13 = vmul.f32 0.2, %v31_v11  ;;  %v34_v14 = vmul.f32 0.2, %v32_v12 }
   0xb   :  { %v35_v15 = vmax.f32 %v31_v11, %v33_v13  ;;  %v36_v16 = vmax.f32 %v32_v12, %v34_v14 }
   0xd   :  { %v37_v17 = vpack.c.bf16 %v36_v16, %v35_v15 }
   0xf   :  { %38 = vst [vmem:[%s78_s3] sm:$0xff] %v37_v17 }

// kernel: discriminator_forward.13
= control target key start
LH: loop header
LB: loop body
LE: loop exit
PB: predicated region body
PF: predicated region fallthrough
CT: control target
= control target key end

     0   :  { %vm2067_vm1 = vcmask 1040384   ;;  %s5099_s1 = inlined_call_operand.vmem [shape: bf16[2048,256], index: 1, kind: input, shape index: {}]   ;;  %s5100_s0 = inlined_call_operand.vmem [shape: bf16[8,2048], index: 0, kind: input, shape index: {}]   ;;  %s5101_s2 = inlined_call_operand.vmem [shape: f32[1,256], index: 2, kind: input, shape index: {}]   ;;  %s5102_s4 = inlined_call_operand.vmem [shape: f32[1,256], index: 4, kind: output, shape index: {1}]   ;;  %s5103_s5 = inlined_call_operand.vmem [shape: f32[1,256], index: 5, kind: output, shape index: {2}]   ;;  %s5104_s3 = inlined_call_operand.vmem [shape: bf16[8,256], index: 3, kind: output, shape index: {0}]  }
   0x1   :  { %v2168_v0 = vld [vmem:[%s5099_s1 + $0x70] sm:$0xf]  ;;  %v3149_v1 = vld [vmem:[%s5099_s1 + $0x74] sm:$0xf0]  ;;  %v2160_v11 = vld [vmem:[%s5099_s1 + $0x60] sm:$0xf] }
   0x2   :  { %v2232_v2 = vld [vmem:[%s5099_s1 + $0xf0] sm:$0xf]  ;;  %v2169_v3 = vor.u32 %v3149_v1, %v2168_v0  ;;  %v3165_v4 = vld [vmem:[%s5099_s1 + $0xf4] sm:$0xf0]  ;;  %v3147_v13 = vld [vmem:[%s5099_s1 + $0x64] sm:$0xf0] }
   0x3   :  { %v2296_v5 = vld [vmem:[%s5099_s1 + $0x170] sm:$0xf]  ;;  %v3181_v6 = vld [vmem:[%s5099_s1 + $0x174] sm:$0xf0]  ;;  %v2233_v7 = vor.u32 %v3165_v4, %v2232_v2  ;;  %v2224_v14 = vld [vmem:[%s5099_s1 + $0xe0] sm:$0xf]  ;;  %v2161_v16 = vor.u32 %v3147_v13, %v2160_v11 }
   0x4   :  { %v2297_v8 = vor.u32 %v3181_v6, %v2296_v5  ;;  %v2360_v9 = vld [vmem:[%s5099_s1 + $0x1f0] sm:$0xf]  ;;  %v3197_v10 = vld [vmem:[%s5099_s1 + $0x1f4] sm:$0xf0]  ;;  %1623 = vmatpush.bf16.msra.mxu0 %v2169_v3  ;;  %v3163_v15 = vld [vmem:[%s5099_s1 + $0xe4] sm:$0xf0] }
   0x5   :  { %v2361_v12 = vor.u32 %v3197_v10, %v2360_v9  ;;  %1636 = vmatpush.bf16.msra.mxu1 %v2233_v7  ;;  %v2225_v17 = vor.u32 %v3163_v15, %v2224_v14  ;;  %v2288_v18 = vld [vmem:[%s5099_s1 + $0x160] sm:$0xf]  ;;  %v3179_v19 = vld [vmem:[%s5099_s1 + $0x164] sm:$0xf0]  ;;  %v2152_v23 = vld [vmem:[%s5099_s1 + $0x50] sm:$0xf] }
   0x6   :  { %1649 = vmatpush.bf16.msra.mxu2 %v2297_v8  ;;  %v2352_v20 = vld [vmem:[%s5099_s1 + $0x1e0] sm:$0xf]  ;;  %v2289_v21 = vor.u32 %v3179_v19, %v2288_v18  ;;  %v3195_v22 = vld [vmem:[%s5099_s1 + $0x1e4] sm:$0xf0]  ;;  %v3145_v24 = vld [vmem:[%s5099_s1 + $0x54] sm:$0xf0] }
   0x7   :  { %1662 = vmatpush.bf16.msra.mxu3 %v2361_v12  ;;  %v2353_v25 = vor.u32 %v3195_v22, %v2352_v20  ;;  %v2216_v26 = vld [vmem:[%s5099_s1 + $0xd0] sm:$0xf]  ;;  %v3161_v27 = vld [vmem:[%s5099_s1 + $0xd4] sm:$0xf0]  ;;  %v2153_v29 = vor.u32 %v3145_v24, %v2152_v23  ;;  %v2144_v35 = vld [vmem:[%s5099_s1 + $0x40] sm:$0xf] }
   0x8   :  { %v2280_v28 = vld [vmem:[%s5099_s1 + $0x150] sm:$0xf]  ;;  %1624 = vmatpush.bf16.msra.mxu0 %v2161_v16  ;;  %v3177_v30 = vld [vmem:[%s5099_s1 + $0x154] sm:$0xf0]  ;;  %v2217_v33 = vor.u32 %v3161_v27, %v2216_v26  ;;  %v3143_v36 = vld [vmem:[%s5099_s1 + $0x44] sm:$0xf0] }
   0x9   :  { %v2344_v31 = vld [vmem:[%s5099_s1 + $0x1d0] sm:$0xf]  ;;  %v3193_v32 = vld [vmem:[%s5099_s1 + $0x1d4] sm:$0xf0]  ;;  %1637 = vmatpush.bf16.msra.mxu1 %v2225_v17  ;;  %v2281_v34 = vor.u32 %v3177_v30, %v2280_v28  ;;  %v2208_v37 = vld [vmem:[%s5099_s1 + $0xc0] sm:$0xf]  ;;  %v2145_v44 = vor.u32 %v3143_v36, %v2144_v35 }
   0xa   :  { %1650 = vmatpush.bf16.msra.mxu2 %v2289_v21  ;;  %v2345_v38 = vor.u32 %v3193_v32, %v2344_v31  ;;  %v3159_v39 = vld [vmem:[%s5099_s1 + $0xc4] sm:$0xf0]  ;;  %v2272_v40 = vld [vmem:[%s5099_s1 + $0x140] sm:$0xf]  ;;  %v2136_v47 = vld [vmem:[%s5099_s1 + $0x30] sm:$0xf] }
   0xb   :  { %1663 = vmatpush.bf16.msra.mxu3 %v2353_v25  ;;  %v3175_v41 = vld [vmem:[%s5099_s1 + $0x144] sm:$0xf0]  ;;  %v2336_v42 = vld [vmem:[%s5099_s1 + $0x1c0] sm:$0xf]  ;;  %v2209_v45 = vor.u32 %v3159_v39, %v2208_v37  ;;  %v3141_v48 = vld [vmem:[%s5099_s1 + $0x34] sm:$0xf0] }
   0xc   :  { %v3191_v43 = vld [vmem:[%s5099_s1 + $0x1c4] sm:$0xf0]  ;;  %1625 = vmatpush.bf16.msra.mxu0 %v2153_v29  ;;  %v2273_v46 = vor.u32 %v3175_v41, %v2272_v40  ;;  %v2200_v49 = vld [vmem:[%s5099_s1 + $0xb0] sm:$0xf]  ;;  %v3157_v51 = vld [vmem:[%s5099_s1 + $0xb4] sm:$0xf0]  ;;  %v2137_v56 = vor.u32 %v3141_v48, %v2136_v47 }
   0xd   :  { %1638 = vmatpush.bf16.msra.mxu1 %v2217_v33  ;;  %v2337_v50 = vor.u32 %v3191_v43, %v2336_v42  ;;  %v2264_v52 = vld [vmem:[%s5099_s1 + $0x130] sm:$0xf]  ;;  %v3173_v53 = vld [vmem:[%s5099_s1 + $0x134] sm:$0xf0]  ;;  %v2201_v57 = vor.u32 %v3157_v51, %v2200_v49  ;;  %v2128_v59 = vld [vmem:[%s5099_s1 + $0x20] sm:$0xf] }
   0xe   :  { %1651 = vmatpush.bf16.msra.mxu2 %v2281_v34  ;;  %v2328_v54 = vld [vmem:[%s5099_s1 + $0x1b0] sm:$0xf]  ;;  %v3189_v55 = vld [vmem:[%s5099_s1 + $0x1b4] sm:$0xf0]  ;;  %v2265_v58 = vor.u32 %v3173_v53, %v2264_v52  ;;  %v3139_v60 = vld [vmem:[%s5099_s1 + $0x24] sm:$0xf0] }
   0xf   :  { %1664 = vmatpush.bf16.msra.mxu3 %v2345_v38  ;;  %v2192_v61 = vld [vmem:[%s5099_s1 + $0xa0] sm:$0xf]  ;;  %v2329_v62 = vor.u32 %v3189_v55, %v2328_v54  ;;  %v3155_v63 = vld [vmem:[%s5099_s1 + $0xa4] sm:$0xf0]  ;;  %v2129_v4 = vor.u32 %v3139_v60, %v2128_v59  ;;  %v2120_v7 = vld [vmem:[%s5099_s1 + $0x10] sm:$0xf] }
  0x10   :  { %1626 = vmatpush.bf16.msra.mxu0 %v2145_v44  ;;  %v2256_v0 = vld [vmem:[%s5099_s1 + $0x120] sm:$0xf]  ;;  %v3171_v1 = vld [vmem:[%s5099_s1 + $0x124] sm:$0xf0]  ;;  %v2193_v5 = vor.u32 %v3155_v63, %v2192_v61  ;;  %v3137_v8 = vld [vmem:[%s5099_s1 + $0x14] sm:$0xf0] }
  0x11   :  { %1639 = vmatpush.bf16.msra.mxu1 %v2209_v45  ;;  %v2320_v2 = vld [vmem:[%s5099_s1 + $0x1a0] sm:$0xf]  ;;  %v3187_v3 = vld [vmem:[%s5099_s1 + $0x1a4] sm:$0xf0]  ;;  %v2257_v6 = vor.u32 %v3171_v1, %v2256_v0  ;;  %v2184_v9 = vld [vmem:[%s5099_s1 + $0x90] sm:$0xf]  ;;  %v2121_v16 = vor.u32 %v3137_v8, %v2120_v7 }
  0x12   :  { %1652 = vmatpush.bf16.msra.mxu2 %v2273_v46  ;;  %v2321_v10 = vor.u32 %v3187_v3, %v2320_v2  ;;  %v3153_v11 = vld [vmem:[%s5099_s1 + $0x94] sm:$0xf0]  ;;  %v2248_v12 = vld [vmem:[%s5099_s1 + $0x110] sm:$0xf]  ;;  %v2112_v17 = vld [vmem:[%s5099_s1] sm:$0xf] }
  0x13   :  { %1665 = vmatpush.bf16.msra.mxu3 %v2337_v50  ;;  %v3169_v13 = vld [vmem:[%s5099_s1 + $0x114] sm:$0xf0]  ;;  %v2312_v14 = vld [vmem:[%s5099_s1 + $0x190] sm:$0xf]  ;;  %v3135_v18 = vld [vmem:[%s5099_s1 + $0x4] sm:$0xf0]  ;;  %v2185_v19 = vor.u32 %v3153_v11, %v2184_v9 }
  0x14   :  { %1627 = vmatpush.bf16.msra.mxu0 %v2137_v56  ;;  %v3185_v15 = vld [vmem:[%s5099_s1 + $0x194] sm:$0xf0]  ;;  %v2249_v20 = vor.u32 %v3169_v13, %v2248_v12  ;;  %v2176_v21 = vld [vmem:[%s5099_s1 + $0x80] sm:$0xf]  ;;  %v3151_v22 = vld [vmem:[%s5099_s1 + $0x84] sm:$0xf0]  ;;  %v2113_v31 = vor.u32 %v3135_v18, %v2112_v17 }
  0x15   :  { %1640 = vmatpush.bf16.msra.mxu1 %v2201_v57  ;;  %v2240_v23 = vld [vmem:[%s5099_s1 + $0x100] sm:$0xf]  ;;  %v2313_v24 = vor.u32 %v3185_v15, %v2312_v14  ;;  %v3167_v25 = vld [vmem:[%s5099_s1 + $0x104] sm:$0xf0]  ;;  %v2424_v28 = vld [vmem:[%s5099_s1 + $0x270] sm:$0xf]  ;;  %v2177_v35 = vor.u32 %v3151_v22, %v2176_v21 }
  0x16   :  { %1653 = vmatpush.bf16.msra.mxu2 %v2265_v58  ;;  %v2304_v26 = vld [vmem:[%s5099_s1 + $0x180] sm:$0xf]  ;;  %v3183_v27 = vld [vmem:[%s5099_s1 + $0x184] sm:$0xf0]  ;;  %v3213_v29 = vld [vmem:[%s5099_s1 + $0x274] sm:$0xf0]  ;;  %v2241_v36 = vor.u32 %v3167_v25, %v2240_v23 }
  0x17   :  { %1666 = vmatpush.bf16.msra.mxu3 %v2329_v62  ;;  %v2488_v30 = vld [vmem:[%s5099_s1 + $0x2f0] sm:$0xf]  ;;  %v3229_v32 = vld [vmem:[%s5099_s1 + $0x2f4] sm:$0xf0]  ;;  %v2305_v39 = vor.u32 %v3183_v27, %v2304_v26  ;;  %v2425_v40 = vor.u32 %v3213_v29, %v2424_v28  ;;  %v2416_v43 = vld [vmem:[%s5099_s1 + $0x260] sm:$0xf] }
  0x18   :  { %1628 = vmatpush.bf16.msra.mxu0 %v2129_v4  ;;  %v2552_v33 = vld [vmem:[%s5099_s1 + $0x370] sm:$0xf]  ;;  %v3245_v34 = vld [vmem:[%s5099_s1 + $0x374] sm:$0xf0]  ;;  %v2489_v41 = vor.u32 %v3229_v32, %v2488_v30  ;;  %v3211_v44 = vld [vmem:[%s5099_s1 + $0x264] sm:$0xf0] }
  0x19   :  { %1641 = vmatpush.bf16.msra.mxu1 %v2193_v5  ;;  %v2616_v37 = vld [vmem:[%s5099_s1 + $0x3f0] sm:$0xf]  ;;  %v3261_v38 = vld [vmem:[%s5099_s1 + $0x3f4] sm:$0xf0]  ;;  %v2553_v42 = vor.u32 %v3245_v34, %v2552_v33  ;;  %v2480_v45 = vld [vmem:[%s5099_s1 + $0x2e0] sm:$0xf]  ;;  %v2417_v52 = vor.u32 %v3211_v44, %v2416_v43 }
  0x1a   :  { %1654 = vmatpush.bf16.msra.mxu2 %v2257_v6  ;;  %v2617_v46 = vor.u32 %v3261_v38, %v2616_v37  ;;  %v3227_v47 = vld [vmem:[%s5099_s1 + $0x2e4] sm:$0xf0]  ;;  %v2544_v48 = vld [vmem:[%s5099_s1 + $0x360] sm:$0xf]  ;;  %v2408_v53 = vld [vmem:[%s5099_s1 + $0x250] sm:$0xf] }
  0x1b   :  { %1667 = vmatpush.bf16.msra.mxu3 %v2321_v10  ;;  %v3243_v49 = vld [vmem:[%s5099_s1 + $0x364] sm:$0xf0]  ;;  %v2608_v50 = vld [vmem:[%s5099_s1 + $0x3e0] sm:$0xf]  ;;  %v2481_v54 = vor.u32 %v3227_v47, %v2480_v45  ;;  %v3209_v56 = vld [vmem:[%s5099_s1 + $0x254] sm:$0xf0] }
  0x1c   :  { %1629 = vmatpush.bf16.msra.mxu0 %v2121_v16  ;;  %v3259_v51 = vld [vmem:[%s5099_s1 + $0x3e4] sm:$0xf0]  ;;  %v2545_v55 = vor.u32 %v3243_v49, %v2544_v48  ;;  %v2472_v57 = vld [vmem:[%s5099_s1 + $0x2d0] sm:$0xf]  ;;  %v3225_v58 = vld [vmem:[%s5099_s1 + $0x2d4] sm:$0xf0]  ;;  %v2409_v0 = vor.u32 %v3209_v56, %v2408_v53 }
  0x1d   :  { %1642 = vmatpush.bf16.msra.mxu1 %v2185_v19  ;;  %v2609_v59 = vor.u32 %v3259_v51, %v2608_v50  ;;  %v2536_v60 = vld [vmem:[%s5099_s1 + $0x350] sm:$0xf]  ;;  %v3241_v61 = vld [vmem:[%s5099_s1 + $0x354] sm:$0xf0]  ;;  %v2473_v1 = vor.u32 %v3225_v58, %v2472_v57  ;;  %v18_v2 = vld [vmem:[%s5100_s0 + $0x8] sm:$0xff] }
  0x1e   :  { %1655 = vmatpush.bf16.msra.mxu2 %v2249_v20  ;;  %v2600_v62 = vld [vmem:[%s5099_s1 + $0x3d0] sm:$0xf]  ;;  %v3257_v63 = vld [vmem:[%s5099_s1 + $0x3d4] sm:$0xf0]  ;;  %v17_v3 = vld [vmem:[%s5100_s0] sm:$0xff]  ;;  %v2537_v4 = vor.u32 %v3241_v61, %v2536_v60  ;;  %v297_v8 = vunpack.c.l.b16 %v18_v2  ;;  %v298_v10 = vunpack.c.h.b16 %v18_v2 }
  0x1f   :  { %1668 = vmatpush.bf16.msra.mxu3 %v2313_v24  ;;  %v2400_v5 = vld [vmem:[%s5099_s1 + $0x240] sm:$0xf]  ;;  %v3207_v6 = vld [vmem:[%s5099_s1 + $0x244] sm:$0xf0]  ;;  %v295_v9 = vunpack.c.l.b16 %v17_v3  ;;  %v2601_v11 = vor.u32 %v3257_v63, %v2600_v62  ;;  %v296_v15 = vunpack.c.h.b16 %v17_v3  ;;  %v2392_v25 = vld [vmem:[%s5099_s1 + $0x230] sm:$0xf] }
  0x20   :  { %1630 = vmatpush.bf16.msra.mxu0 %v2113_v31  ;;  %v2464_v7 = vld [vmem:[%s5099_s1 + $0x2c0] sm:$0xf]  ;;  %v3223_v12 = vld [vmem:[%s5099_s1 + $0x2c4] sm:$0xf0]  ;;  %v3716_v18 = vpack.c.b16 %v297_v8, %v297_v8  ;;  %v3720_v20 = vpack.c.b16 %v298_v10, %v298_v10  ;;  %v2401_v21 = vor.u32 %v3207_v6, %v2400_v5  ;;  %v3205_v26 = vld [vmem:[%s5099_s1 + $0x234] sm:$0xf0] }
  0x21   :  { %1643 = vmatpush.bf16.msra.mxu1 %v2177_v35  ;;  %v2528_v13 = vld [vmem:[%s5099_s1 + $0x340] sm:$0xf]  ;;  %v3239_v14 = vld [vmem:[%s5099_s1 + $0x344] sm:$0xf0]  ;;  %v3718_v19 = vpack.c.b16 %v295_v9, %v295_v9  ;;  %v3722_v22 = vpack.c.b16 %v296_v15, %v296_v15  ;;  %v2465_v23 = vor.u32 %v3223_v12, %v2464_v7  ;;  %v2456_v27 = vld [vmem:[%s5099_s1 + $0x2b0] sm:$0xf]  ;;  %v2393_v34 = vor.u32 %v3205_v26, %v2392_v25 }
  0x22   :  { %1656 = vmatpush.bf16.msra.mxu2 %v2241_v36  ;;  %v2592_v16 = vld [vmem:[%s5099_s1 + $0x3c0] sm:$0xf]  ;;  %v3255_v17 = vld [vmem:[%s5099_s1 + $0x3c4] sm:$0xf0]  ;;  %v2529_v24 = vor.u32 %v3239_v14, %v2528_v13  ;;  %v3221_v29 = vld [vmem:[%s5099_s1 + $0x2b4] sm:$0xf0] }
  0x23   :  { %1669 = vmatpush.bf16.msra.mxu3 %v2305_v39  ;;  %v2593_v28 = vor.u32 %v3255_v17, %v2592_v16  ;;  %v2520_v30 = vld [vmem:[%s5099_s1 + $0x330] sm:$0xf]  ;;  %v3237_v31 = vld [vmem:[%s5099_s1 + $0x334] sm:$0xf0]  ;;  %1631 = vmatmul.bf16.vlgmr.msra.gmra.mxu0 %v3718_v19  ;;  %v2457_v35 = vor.u32 %v3221_v29, %v2456_v27  ;;  %v2384_v37 = vld [vmem:[%s5099_s1 + $0x220] sm:$0xf] }
  0x24   :  { %1675 = vmatpush.bf16.msrb.mxu0 %v2425_v40  ;;  %v2584_v32 = vld [vmem:[%s5099_s1 + $0x3b0] sm:$0xf]  ;;  %v3253_v33 = vld [vmem:[%s5099_s1 + $0x3b4] sm:$0xf0]  ;;  %1644 = vmatmul.bf16.vlgmr.msra.gmra.mxu1 %v3722_v22  ;;  %v2521_v36 = vor.u32 %v3237_v31, %v2520_v30  ;;  %v3203_v38 = vld [vmem:[%s5099_s1 + $0x224] sm:$0xf0] }
  0x25   :  { %1688 = vmatpush.bf16.msrb.mxu1 %v2489_v41  ;;  %1657 = vmatmul.bf16.vlgmr.msra.gmra.mxu2 %v3716_v18  ;;  %v2448_v39 = vld [vmem:[%s5099_s1 + $0x2a0] sm:$0xf]  ;;  %v2585_v40 = vor.u32 %v3253_v33, %v2584_v32  ;;  %v3219_v41 = vld [vmem:[%s5099_s1 + $0x2a4] sm:$0xf0]  ;;  %v2376_v49 = vld [vmem:[%s5099_s1 + $0x210] sm:$0xf] }
  0x26   :  { %1701 = vmatpush.bf16.msrb.mxu2 %v2553_v42  ;;  %1670 = vmatmul.bf16.vlgmr.msra.gmra.mxu3 %v3720_v20  ;;  %v2512_v42 = vld [vmem:[%s5099_s1 + $0x320] sm:$0xf]  ;;  %v3235_v43 = vld [vmem:[%s5099_s1 + $0x324] sm:$0xf0]  ;;  %v2449_v47 = vor.u32 %v3219_v41, %v2448_v39  ;;  %v3201_v50 = vld [vmem:[%s5099_s1 + $0x214] sm:$0xf0] }
  0x27   :  { %1714 = vmatpush.bf16.msrb.mxu3 %v2617_v46  ;;  %v2576_v44 = vld [vmem:[%s5099_s1 + $0x3a0] sm:$0xf]  ;;  %v3251_v45 = vld [vmem:[%s5099_s1 + $0x3a4] sm:$0xf0]  ;;  %v2385_v46 = vor.u32 %v3203_v38, %v2384_v37  ;;  %v2513_v48 = vor.u32 %v3235_v43, %v2512_v42  ;;  %v2440_v51 = vld [vmem:[%s5099_s1 + $0x290] sm:$0xf] }
  0x28   :  { %1676 = vmatpush.bf16.msrb.mxu0 %v2417_v52  ;;  %v2577_v52 = vor.u32 %v3251_v45, %v2576_v44  ;;  %v3217_v53 = vld [vmem:[%s5099_s1 + $0x294] sm:$0xf0]  ;;  %v2568_v56 = vld [vmem:[%s5099_s1 + $0x390] sm:$0xf]  ;;  %v2368_v58 = vld [vmem:[%s5099_s1 + $0x200] sm:$0xf] }
  0x29   :  { %1689 = vmatpush.bf16.msrb.mxu1 %v2481_v54  ;;  %v2504_v54 = vld [vmem:[%s5099_s1 + $0x310] sm:$0xf]  ;;  %v3249_v57 = vld [vmem:[%s5099_s1 + $0x394] sm:$0xf0]  ;;  %v3199_v60 = vld [vmem:[%s5099_s1 + $0x204] sm:$0xf0]  ;;  %v2441_v63 = vor.u32 %v3217_v53, %v2440_v51 }
  0x2a   :  { %1702 = vmatpush.bf16.msrb.mxu2 %v2545_v55  ;;  %v3233_v55 = vld [vmem:[%s5099_s1 + $0x314] sm:$0xf0]  ;;  %v2432_v61 = vld [vmem:[%s5099_s1 + $0x280] sm:$0xf]  ;;  %v3215_v62 = vld [vmem:[%s5099_s1 + $0x284] sm:$0xf0] }
  0x2b   :  { %1715 = vmatpush.bf16.msrb.mxu3 %v2609_v59  ;;  %v2377_v59 = vor.u32 %v3201_v50, %v2376_v49  ;;  %v3231_v2 = vld [vmem:[%s5099_s1 + $0x304] sm:$0xf0]  ;;  %v20_v3 = vld [vmem:[%s5100_s0 + $0x18] sm:$0xff]  ;;  %v2560_v5 = vld [vmem:[%s5099_s1 + $0x380] sm:$0xf]  ;;  %v2433_v16 = vor.u32 %v3215_v62, %v2432_v61 }
  0x2c   :  { %1677 = vmatpush.bf16.msrb.mxu0 %v2409_v0  ;;  %v2505_v0 = vor.u32 %v3233_v55, %v2504_v54  ;;  %v3247_v6 = vld [vmem:[%s5099_s1 + $0x384] sm:$0xf0]  ;;  %v19_v7 = vld [vmem:[%s5100_s0 + $0x10] sm:$0xff]  ;;  %v3277_v9 = vld [vmem:[%s5099_s1 + $0x474] sm:$0xf0]  ;;  %v301_v15 = vunpack.c.l.b16 %v20_v3  ;;  %v302_v25 = vunpack.c.h.b16 %v20_v3 }
  0x2d   :  { %1690 = vmatpush.bf16.msrb.mxu1 %v2473_v1  ;;  %v2496_v1 = vld [vmem:[%s5099_s1 + $0x300] sm:$0xf]  ;;  %v2680_v8 = vld [vmem:[%s5099_s1 + $0x470] sm:$0xf]  ;;  %v3293_v12 = vld [vmem:[%s5099_s1 + $0x4f4] sm:$0xf0]  ;;  %v2561_v26 = vor.u32 %v3247_v6, %v2560_v5 }
  0x2e   :  { %1703 = vmatpush.bf16.msrb.mxu2 %v2537_v4  ;;  %v2569_v4 = vor.u32 %v3249_v57, %v2568_v56  ;;  %v2744_v10 = vld [vmem:[%s5099_s1 + $0x4f0] sm:$0xf]  ;;  %v3309_v14 = vld [vmem:[%s5099_s1 + $0x574] sm:$0xf0]  ;;  %v2497_v17 = vor.u32 %v3231_v2, %v2496_v1  ;;  %v2681_v27 = vor.u32 %v3277_v9, %v2680_v8  ;;  %v2672_v31 = vld [vmem:[%s5099_s1 + $0x460] sm:$0xf]  ;;  %v3872_v38 = vpack.c.b16 %v301_v15, %v301_v15 }
  0x2f   :  { %1716 = vmatpush.bf16.msrb.mxu3 %v2601_v11  ;;  %v2369_v11 = vor.u32 %v3199_v60, %v2368_v58  ;;  %v2808_v13 = vld [vmem:[%s5099_s1 + $0x570] sm:$0xf]  ;;  %v2745_v29 = vor.u32 %v3293_v12, %v2744_v10  ;;  %v3275_v32 = vld [vmem:[%s5099_s1 + $0x464] sm:$0xf0]  ;;  %v2736_v33 = vld [vmem:[%s5099_s1 + $0x4e0] sm:$0xf]  ;;  %v3882_v42 = vpack.c.b16 %v302_v25, %v302_v25 }
  0x30   :  { %1678 = vmatpush.bf16.msrb.mxu0 %v2401_v21  ;;  %v2872_v21 = vld [vmem:[%s5099_s1 + $0x5f0] sm:$0xf]  ;;  %v2809_v30 = vor.u32 %v3309_v14, %v2808_v13  ;;  %v3307_v37 = vld [vmem:[%s5099_s1 + $0x564] sm:$0xf0]  ;;  %v2864_v39 = vld [vmem:[%s5099_s1 + $0x5e0] sm:$0xf]  ;;  %v2673_v43 = vor.u32 %v3275_v32, %v2672_v31 }
  0x31   :  { %1691 = vmatpush.bf16.msrb.mxu1 %v2465_v23  ;;  %v3325_v23 = vld [vmem:[%s5099_s1 + $0x5f4] sm:$0xf0]  ;;  %v2728_v49 = vld [vmem:[%s5099_s1 + $0x4d0] sm:$0xf]  ;;  %v3271_v60 = vld [vmem:[%s5099_s1 + $0x444] sm:$0xf0] }
  0x32   :  { %1704 = vmatpush.bf16.msrb.mxu2 %v2529_v24  ;;  %v299_v24 = vunpack.c.l.b16 %v19_v7  ;;  %v3289_v51 = vld [vmem:[%s5099_s1 + $0x4d4] sm:$0xf0]  ;;  %v2856_v54 = vld [vmem:[%s5099_s1 + $0x5d0] sm:$0xf]  ;;  %v2720_v61 = vld [vmem:[%s5099_s1 + $0x4c0] sm:$0xf] }
  0x33   :  { %1717 = vmatpush.bf16.msrb.mxu3 %v2593_v28  ;;  %v300_v28 = vunpack.c.h.b16 %v19_v7  ;;  %v3305_v53 = vld [vmem:[%s5099_s1 + $0x554] sm:$0xf0]  ;;  %v2729_v57 = vor.u32 %v3289_v51, %v2728_v49  ;;  %v3303_v1 = vld [vmem:[%s5099_s1 + $0x544] sm:$0xf0]  ;;  %v2848_v2 = vld [vmem:[%s5099_s1 + $0x5c0] sm:$0xf] }
  0x34   :  { %1679 = vmatpush.bf16.msrb.mxu0 %v2393_v34  ;;  %v2873_v34 = vor.u32 %v3325_v23, %v2872_v21  ;;  %v3880_v41 = vpack.c.b16 %v299_v24, %v299_v24  ;;  %v3321_v55 = vld [vmem:[%s5099_s1 + $0x5d4] sm:$0xf0]  ;;  %v3319_v3 = vld [vmem:[%s5099_s1 + $0x5c4] sm:$0xf0]  ;;  %v2648_v7 = vld [vmem:[%s5099_s1 + $0x430] sm:$0xf] }
  0x35   :  { %1692 = vmatpush.bf16.msrb.mxu1 %v2457_v35  ;;  %v3291_v35 = vld [vmem:[%s5099_s1 + $0x4e4] sm:$0xf0]  ;;  %v3884_v44 = vpack.c.b16 %v300_v28, %v300_v28  ;;  %v2857_v62 = vor.u32 %v3321_v55, %v2856_v54  ;;  %v3269_v8 = vld [vmem:[%s5099_s1 + $0x434] sm:$0xf0]  ;;  %v2712_v9 = vld [vmem:[%s5099_s1 + $0x4b0] sm:$0xf]  ;;  %v2849_v10 = vor.u32 %v3319_v3, %v2848_v2 }
  0x36   :  { %1705 = vmatpush.bf16.msrb.mxu2 %v2521_v36  ;;  %v2800_v36 = vld [vmem:[%s5099_s1 + $0x560] sm:$0xf]  ;;  %v2737_v45 = vor.u32 %v3291_v35, %v2736_v33  ;;  %v2776_v12 = vld [vmem:[%s5099_s1 + $0x530] sm:$0xf]  ;;  %v3301_v13 = vld [vmem:[%s5099_s1 + $0x534] sm:$0xf0] }
  0x37   :  { %1718 = vmatpush.bf16.msrb.mxu3 %v2585_v40  ;;  %v3323_v40 = vld [vmem:[%s5099_s1 + $0x5e4] sm:$0xf0]  ;;  %v2840_v14 = vld [vmem:[%s5099_s1 + $0x5b0] sm:$0xf]  ;;  %v3317_v15 = vld [vmem:[%s5099_s1 + $0x5b4] sm:$0xf0]  ;;  %v2777_v21 = vor.u32 %v3301_v13, %v2776_v12 }
  0x38   :  { %1680 = vmatpush.bf16.msrb.mxu0 %v2385_v46  ;;  %v2801_v46 = vor.u32 %v3307_v37, %v2800_v36  ;;  %v2865_v50 = vor.u32 %v3323_v40, %v2864_v39  ;;  %v2640_v23 = vld [vmem:[%s5099_s1 + $0x420] sm:$0xf]  ;;  %v3267_v24 = vld [vmem:[%s5099_s1 + $0x424] sm:$0xf0]  ;;  %v2632_v35 = vld [vmem:[%s5099_s1 + $0x410] sm:$0xf] }
  0x39   :  { %1693 = vmatpush.bf16.msrb.mxu1 %v2449_v47  ;;  %v2664_v47 = vld [vmem:[%s5099_s1 + $0x450] sm:$0xf]  ;;  %v2704_v25 = vld [vmem:[%s5099_s1 + $0x4a0] sm:$0xf]  ;;  %v3315_v31 = vld [vmem:[%s5099_s1 + $0x5a4] sm:$0xf0]  ;;  %v2641_v32 = vor.u32 %v3267_v24, %v2640_v23 }
  0x3a   :  { %1706 = vmatpush.bf16.msrb.mxu2 %v2513_v48  ;;  %v3273_v48 = vld [vmem:[%s5099_s1 + $0x454] sm:$0xf0]  ;;  %v2768_v28 = vld [vmem:[%s5099_s1 + $0x520] sm:$0xf]  ;;  %v2696_v37 = vld [vmem:[%s5099_s1 + $0x490] sm:$0xf] }
  0x3b   :  { %1719 = vmatpush.bf16.msrb.mxu3 %v2577_v52  ;;  %v2792_v52 = vld [vmem:[%s5099_s1 + $0x550] sm:$0xf]  ;;  %v2665_v56 = vor.u32 %v3273_v48, %v2664_v47  ;;  %v3265_v36 = vld [vmem:[%s5099_s1 + $0x414] sm:$0xf0]  ;;  %v2624_v48 = vld [vmem:[%s5099_s1 + $0x400] sm:$0xf] }
  0x3c   :  { %1681 = vmatpush.bf16.msrb.mxu0 %v2377_v59  ;;  %v2793_v58 = vor.u32 %v3305_v53, %v2792_v52  ;;  %v2656_v59 = vld [vmem:[%s5099_s1 + $0x440] sm:$0xf]  ;;  %v3281_v40 = vld [vmem:[%s5099_s1 + $0x494] sm:$0xf0]  ;;  %v2633_v49 = vor.u32 %v3265_v36, %v2632_v35  ;;  %v3279_v52 = vld [vmem:[%s5099_s1 + $0x484] sm:$0xf0] }
  0x3d   :  { %1694 = vmatpush.bf16.msrb.mxu1 %v2441_v63  ;;  %v3287_v63 = vld [vmem:[%s5099_s1 + $0x4c4] sm:$0xf0]  ;;  %v3313_v47 = vld [vmem:[%s5099_s1 + $0x594] sm:$0xf0]  ;;  %v2688_v51 = vld [vmem:[%s5099_s1 + $0x480] sm:$0xf]  ;;  %v2697_v53 = vor.u32 %v3281_v40, %v2696_v37 }
  0x3e   :  { %1707 = vmatpush.bf16.msrb.mxu2 %v2505_v0  ;;  %v2784_v0 = vld [vmem:[%s5099_s1 + $0x540] sm:$0xf]  ;;  %v2721_v5 = vor.u32 %v3287_v63, %v2720_v61  ;;  %v22_v61 = vld [vmem:[%s5100_s0 + $0x28] sm:$0xff]  ;;  %v3341_v63 = vld [vmem:[%s5099_s1 + $0x674] sm:$0xf0] }
  0x3f   :  { %1720 = vmatpush.bf16.msrb.mxu3 %v2569_v4  ;;  %v2657_v4 = vor.u32 %v3271_v60, %v2656_v59  ;;  %v2785_v6 = vor.u32 %v3303_v1, %v2784_v0  ;;  %v2752_v55 = vld [vmem:[%s5099_s1 + $0x500] sm:$0xf]  ;;  %v3311_v60 = vld [vmem:[%s5099_s1 + $0x584] sm:$0xf0]  ;;  %v3000_v0 = vld [vmem:[%s5099_s1 + $0x6f0] sm:$0xf] }
  0x40   :  { %1682 = vmatpush.bf16.msrb.mxu0 %v2369_v11  ;;  %v3285_v11 = vld [vmem:[%s5099_s1 + $0x4b4] sm:$0xf0]  ;;  %v2816_v59 = vld [vmem:[%s5099_s1 + $0x580] sm:$0xf]  ;;  %v3064_v3 = vld [vmem:[%s5099_s1 + $0x770] sm:$0xf] }
  0x41   :  { %1695 = vmatpush.bf16.msrb.mxu1 %v2433_v16  ;;  %v2649_v16 = vor.u32 %v3269_v8, %v2648_v7  ;;  %v3357_v2 = vld [vmem:[%s5099_s1 + $0x6f4] sm:$0xf0]  ;;  %v3128_v8 = vld [vmem:[%s5099_s1 + $0x7f0] sm:$0xf]  ;;  %v2817_v12 = vor.u32 %v3311_v60, %v2816_v59  ;;  %v2992_v23 = vld [vmem:[%s5099_s1 + $0x6e0] sm:$0xf] }
  0x42   :  { %1708 = vmatpush.bf16.msrb.mxu2 %v2497_v17  ;;  %v2713_v17 = vor.u32 %v3285_v11, %v2712_v9  ;;  %v3389_v9 = vld [vmem:[%s5099_s1 + $0x7f4] sm:$0xf0]  ;;  %v2920_v37 = vld [vmem:[%s5099_s1 + $0x650] sm:$0xf]  ;;  %v3367_v59 = vld [vmem:[%s5099_s1 + $0x744] sm:$0xf0] }
  0x43   :  { %1721 = vmatpush.bf16.msrb.mxu3 %v2561_v26  ;;  %1683 = vmatmul.bf16.vlgmr.msrb.gmra.mxu0 %v3880_v41  ;;  %v2841_v26 = vor.u32 %v3317_v15, %v2840_v14  ;;  %v306_v14 = vunpack.c.h.b16 %v22_v61  ;;  %v3001_v15 = vor.u32 %v3357_v2, %v3000_v0  ;;  %v3129_v24 = vor.u32 %v3389_v9, %v3128_v8  ;;  %v2984_v40 = vld [vmem:[%s5099_s1 + $0x6d0] sm:$0xf]  ;;  %v3104_v60 = vld [vmem:[%s5099_s1 + $0x7c0] sm:$0xf]  ;;  %v3333_v2 = vld [vmem:[%s5099_s1 + $0x634] sm:$0xf0] }
  0x44   :  { %1727 = vmatpush.bf16.msra.mxu0 %v2681_v27  ;;  %1696 = vmatmul.bf16.vlgmr.msrb.gmra.mxu1 %v3884_v44  ;;  %v3283_v27 = vld [vmem:[%s5099_s1 + $0x4a4] sm:$0xf0]  ;;  %v3096_v8 = vld [vmem:[%s5099_s1 + $0x7b0] sm:$0xf]  ;;  %v3381_v9 = vld [vmem:[%s5099_s1 + $0x7b4] sm:$0xf0] }
  0x45   :  { %1740 = vmatpush.bf16.msra.mxu1 %v2745_v29  ;;  %1709 = vmatmul.bf16.vlgmr.msrb.gmra.mxu2 %v3872_v38  ;;  %v3299_v29 = vld [vmem:[%s5099_s1 + $0x524] sm:$0xf0]  ;;  %v2705_v33 = vor.u32 %v3283_v27, %v2704_v25  ;;  %v3056_v27 = vld [vmem:[%s5099_s1 + $0x760] sm:$0xf] }
  0x46   :  { %1753 = vmatpush.bf16.msra.mxu2 %v2809_v30  ;;  %1722 = vmatmul.bf16.vlgmr.msrb.gmra.mxu3 %v3882_v42  ;;  %v2832_v30 = vld [vmem:[%s5099_s1 + $0x5a0] sm:$0xf] }
  0x47   :  { %1766 = vmatpush.bf16.msra.mxu3 %v2873_v34  ;;  %v2769_v34 = vor.u32 %v3299_v29, %v2768_v28  ;;  %v2833_v39 = vor.u32 %v3315_v31, %v2832_v30  ;;  %v3371_v28 = vld [vmem:[%s5099_s1 + $0x764] sm:$0xf0]  ;;  %v3120_v31 = vld [vmem:[%s5099_s1 + $0x7e0] sm:$0xf] }
  0x48   :  { %1728 = vmatpush.bf16.msra.mxu0 %v2673_v43  ;;  %v2760_v43 = vld [vmem:[%s5099_s1 + $0x510] sm:$0xf]  ;;  %v3057_v36 = vor.u32 %v3371_v28, %v3056_v27 }
  0x49   :  { %1741 = vmatpush.bf16.msra.mxu1 %v2737_v45  ;;  %v3297_v45 = vld [vmem:[%s5099_s1 + $0x514] sm:$0xf0] }
  0x4a   :  { %1754 = vmatpush.bf16.msra.mxu2 %v2801_v46  ;;  %v2824_v46 = vld [vmem:[%s5099_s1 + $0x590] sm:$0xf]  ;;  %v2761_v54 = vor.u32 %v3297_v45, %v2760_v43  ;;  %v3353_v45 = vld [vmem:[%s5099_s1 + $0x6d4] sm:$0xf0] }
  0x4b   :  { %1767 = vmatpush.bf16.msra.mxu3 %v2865_v50  ;;  %v3263_v50 = vld [vmem:[%s5099_s1 + $0x404] sm:$0xf0] }
  0x4c   :  { %1729 = vmatpush.bf16.msra.mxu0 %v2665_v56  ;;  %v3295_v56 = vld [vmem:[%s5099_s1 + $0x504] sm:$0xf0]  ;;  %v2625_v1 = vor.u32 %v3263_v50, %v2624_v48  ;;  %v3112_v48 = vld [vmem:[%s5099_s1 + $0x7d0] sm:$0xf] }
  0x4d   :  { %1742 = vmatpush.bf16.msra.mxu1 %v2729_v57  ;;  %v21_v57 = vld [vmem:[%s5100_s0 + $0x20] sm:$0xff]  ;;  %v2753_v7 = vor.u32 %v3295_v56, %v2752_v55 }
  0x4e   :  { %1755 = vmatpush.bf16.msra.mxu2 %v2793_v58  ;;  %v2825_v58 = vor.u32 %v3313_v47, %v2824_v46  ;;  %v304_v11 = vunpack.c.h.b16 %v21_v57  ;;  %v3048_v46 = vld [vmem:[%s5099_s1 + $0x750] sm:$0xf]  ;;  %v3369_v47 = vld [vmem:[%s5099_s1 + $0x754] sm:$0xf0]  ;;  %v2976_v55 = vld [vmem:[%s5099_s1 + $0x6c0] sm:$0xf] }
  0x4f   :  { %1768 = vmatpush.bf16.msra.mxu3 %v2857_v62  ;;  %v2936_v62 = vld [vmem:[%s5099_s1 + $0x670] sm:$0xf] }
  0x50   :  { %1730 = vmatpush.bf16.msra.mxu0 %v2657_v4  ;;  %v3373_v4 = vld [vmem:[%s5099_s1 + $0x774] sm:$0xf0]  ;;  %v2937_v13 = vor.u32 %v3341_v63, %v2936_v62  ;;  %v4086_v30 = vpack.c.b16 %v304_v11, %v304_v11 }
  0x51   :  { %1743 = vmatpush.bf16.msra.mxu1 %v2721_v5  ;;  %v303_v5 = vunpack.c.l.b16 %v21_v57  ;;  %v3351_v57 = vld [vmem:[%s5099_s1 + $0x6c4] sm:$0xf0] }
  0x52   :  { %1756 = vmatpush.bf16.msra.mxu2 %v2785_v6  ;;  %v2689_v6 = vor.u32 %v3279_v52, %v2688_v51  ;;  %v2985_v51 = vor.u32 %v3353_v45, %v2984_v40  ;;  %v3049_v52 = vor.u32 %v3369_v47, %v3048_v46  ;;  %v2977_v63 = vor.u32 %v3351_v57, %v2976_v55  ;;  %v3361_v40 = vld [vmem:[%s5099_s1 + $0x714] sm:$0xf0]  ;;  %v2880_v46 = vld [vmem:[%s5099_s1 + $0x600] sm:$0xf]  ;;  %v23_v55 = vld [vmem:[%s5100_s0 + $0x30] sm:$0xff] }
  0x53   :  { %1769 = vmatpush.bf16.msra.mxu3 %v2849_v10  ;;  %v305_v10 = vunpack.c.l.b16 %v22_v61  ;;  %v4073_v25 = vpack.c.b16 %v303_v5, %v303_v5  ;;  %v3383_v61 = vld [vmem:[%s5099_s1 + $0x7c4] sm:$0xf0]  ;;  %v3349_v5 = vld [vmem:[%s5099_s1 + $0x6b4] sm:$0xf0]  ;;  %v3072_v57 = vld [vmem:[%s5099_s1 + $0x780] sm:$0xf] }
  0x54   :  { %1731 = vmatpush.bf16.msra.mxu0 %v2649_v16  ;;  %v3065_v16 = vor.u32 %v3373_v4, %v3064_v3  ;;  %v2968_v3 = vld [vmem:[%s5099_s1 + $0x6b0] sm:$0xf]  ;;  %v3105_v4 = vor.u32 %v3383_v61, %v3104_v60  ;;  %v3377_v45 = vld [vmem:[%s5099_s1 + $0x794] sm:$0xf0]  ;;  %v3148_v60 = vld [vmem:[%s5099_s1 + $0x74] sm:$0xf] }
  0x55   :  { %1744 = vmatpush.bf16.msra.mxu1 %v2713_v17  ;;  %v2928_v17 = vld [vmem:[%s5099_s1 + $0x660] sm:$0xf]  ;;  %v4084_v29 = vpack.c.b16 %v305_v10, %v305_v10  ;;  %v2969_v11 = vor.u32 %v3349_v5, %v2968_v3  ;;  %v2170_v61 = vld [vmem:[%s5099_s1 + $0x78] sm:$0xf0]  ;;  %v307_v3 = vunpack.c.l.b16 %v23_v55 }
  0x56   :  { %1757 = vmatpush.bf16.msra.mxu2 %v2777_v21  ;;  %v3339_v21 = vld [vmem:[%s5099_s1 + $0x664] sm:$0xf0] }
  0x57   :  { %1770 = vmatpush.bf16.msra.mxu3 %v2841_v26  ;;  %v3355_v26 = vld [vmem:[%s5099_s1 + $0x6e4] sm:$0xf0] }
  0x58   :  { %1732 = vmatpush.bf16.msra.mxu0 %v2641_v32  ;;  %v3387_v32 = vld [vmem:[%s5099_s1 + $0x7e4] sm:$0xf0]  ;;  %v2993_v35 = vor.u32 %v3355_v26, %v2992_v23 }
  0x59   :  { %1745 = vmatpush.bf16.msra.mxu1 %v2705_v33  ;;  %v4094_v33 = vpack.c.b16 %v306_v14, %v306_v14  ;;  %v3121_v43 = vor.u32 %v3387_v32, %v3120_v31  ;;  %v3331_v14 = vld [vmem:[%s5099_s1 + $0x624] sm:$0xf0]  ;;  %v2888_v32 = vld [vmem:[%s5099_s1 + $0x610] sm:$0xf] }
  0x5a   :  { %1758 = vmatpush.bf16.msra.mxu2 %v2769_v34  ;;  %v2929_v34 = vor.u32 %v3339_v21, %v2928_v17  ;;  %v3347_v17 = vld [vmem:[%s5099_s1 + $0x6a4] sm:$0xf0]  ;;  %v3024_v21 = vld [vmem:[%s5099_s1 + $0x720] sm:$0xf] }
  0x5b   :  { %1771 = vmatpush.bf16.msra.mxu3 %v2833_v39  ;;  %v3337_v39 = vld [vmem:[%s5099_s1 + $0x654] sm:$0xf0]  ;;  %v3363_v23 = vld [vmem:[%s5099_s1 + $0x724] sm:$0xf0] }
  0x5c   :  { %1733 = vmatpush.bf16.msra.mxu0 %v2633_v49  ;;  %v3385_v49 = vld [vmem:[%s5099_s1 + $0x7d4] sm:$0xf0]  ;;  %v2921_v50 = vor.u32 %v3337_v39, %v2920_v37  ;;  %v3379_v26 = vld [vmem:[%s5099_s1 + $0x7a4] sm:$0xf0]  ;;  %v3025_v31 = vor.u32 %v3363_v23, %v3024_v21  ;;  %v3016_v39 = vld [vmem:[%s5099_s1 + $0x710] sm:$0xf]  ;;  %v4283_v23 = vpack.c.b16 %v307_v3, %v307_v3 }
  0x5d   :  { %1746 = vmatpush.bf16.msra.mxu1 %v2697_v53  ;;  %v2912_v53 = vld [vmem:[%s5099_s1 + $0x640] sm:$0xf]  ;;  %v3113_v56 = vor.u32 %v3385_v49, %v3112_v48  ;;  %v3345_v37 = vld [vmem:[%s5099_s1 + $0x694] sm:$0xf0]  ;;  %v3327_v48 = vld [vmem:[%s5099_s1 + $0x604] sm:$0xf0] }
  0x5e   :  { %1759 = vmatpush.bf16.msra.mxu2 %v2761_v54  ;;  %v3335_v54 = vld [vmem:[%s5099_s1 + $0x644] sm:$0xf0]  ;;  %v2944_v49 = vld [vmem:[%s5099_s1 + $0x680] sm:$0xf]  ;;  %v3140_v3 = vld [vmem:[%s5099_s1 + $0x34] sm:$0xf] }
  0x5f   :  { %1772 = vmatpush.bf16.msra.mxu3 %v2825_v58  ;;  %v3040_v58 = vld [vmem:[%s5099_s1 + $0x740] sm:$0xf]  ;;  %v2913_v62 = vor.u32 %v3335_v54, %v2912_v53  ;;  %v3359_v54 = vld [vmem:[%s5099_s1 + $0x704] sm:$0xf0] }
  0x60   :  { %1734 = vmatpush.bf16.msra.mxu0 %v2625_v1  ;;  %v3041_v0 = vor.u32 %v3367_v59, %v3040_v58  ;;  %v2904_v1 = vld [vmem:[%s5099_s1 + $0x630] sm:$0xf]  ;;  %v3008_v53 = vld [vmem:[%s5099_s1 + $0x700] sm:$0xf]  ;;  %v3375_v58 = vld [vmem:[%s5099_s1 + $0x784] sm:$0xf0] }
  0x61   :  { %1747 = vmatpush.bf16.msra.mxu1 %v2689_v6  ;;  %v3032_v6 = vld [vmem:[%s5099_s1 + $0x730] sm:$0xf]  ;;  %v2905_v10 = vor.u32 %v3333_v2, %v2904_v1  ;;  %v24_v59 = vld [vmem:[%s5100_s0 + $0x38] sm:$0xff]  ;;  %v3180_v1 = vld [vmem:[%s5099_s1 + $0x174] sm:$0xf]  ;;  %v3009_v5 = vor.u32 %v3359_v54, %v3008_v53 }
  0x62   :  { %1760 = vmatpush.bf16.msra.mxu2 %v2753_v7  ;;  %v3365_v7 = vld [vmem:[%s5099_s1 + $0x734] sm:$0xf0]  ;;  %v2298_v2 = vld [vmem:[%s5099_s1 + $0x178] sm:$0xf0] }
  0x63   :  { %1773 = vmatpush.bf16.msra.mxu3 %v2817_v12  ;;  %1735 = vmatmul.bf16.vlgmr.msra.gmra.mxu0 %v4073_v25  ;;  %v3033_v12 = vor.u32 %v3365_v7, %v3032_v6  ;;  %v3196_v6 = vld [vmem:[%s5099_s1 + $0x1f4] sm:$0xf]  ;;  %v2362_v7 = vld [vmem:[%s5099_s1 + $0x1f8] sm:$0xf0] }
  0x64   :  { %1779 = vmatpush.bf16.msrb.mxu0 %v2937_v13  ;;  %1748 = vmatmul.bf16.vlgmr.msra.gmra.mxu1 %v4086_v30  ;;  %v2896_v13 = vld [vmem:[%s5099_s1 + $0x620] sm:$0xf]  ;;  %v2365_v21 = vor.u32 %v3196_v6, %v2362_v7  ;;  %v2202_v7 = vld [vmem:[%s5099_s1 + $0xb8] sm:$0xf0] }
  0x65   :  { %1792 = vmatpush.bf16.msrb.mxu1 %v3001_v15  ;;  %1761 = vmatmul.bf16.vlgmr.msra.gmra.mxu2 %v4084_v29  ;;  %v2960_v15 = vld [vmem:[%s5099_s1 + $0x6a0] sm:$0xf]  ;;  %v2897_v27 = vor.u32 %v3331_v14, %v2896_v13  ;;  %v2301_v14 = vor.u32 %v3180_v1, %v2298_v2 }
  0x66   :  { %1805 = vmatpush.bf16.msrb.mxu2 %v3065_v16  ;;  %1774 = vmatmul.bf16.vlgmr.msra.gmra.mxu3 %v4094_v33  ;;  %v3097_v16 = vor.u32 %v3381_v9, %v3096_v8  ;;  %v2961_v28 = vor.u32 %v3347_v17, %v2960_v15  ;;  %v309_v8 = vunpack.c.l.b16 %v24_v59  ;;  %v308_v9 = vunpack.c.h.b16 %v23_v55  ;;  %v3146_v15 = vld [vmem:[%s5099_s1 + $0x64] sm:$0xf] }
  0x67   :  { %1818 = vmatpush.bf16.msrb.mxu3 %v3129_v24  ;;  %v3088_v24 = vld [vmem:[%s5099_s1 + $0x7a0] sm:$0xf]  ;;  %v3162_v17 = vld [vmem:[%s5099_s1 + $0xe4] sm:$0xf] }
  0x68   :  { %1780 = vmatpush.bf16.msrb.mxu0 %v2929_v34  ;;  %v3329_v34 = vld [vmem:[%s5099_s1 + $0x614] sm:$0xf0]  ;;  %v3142_v55 = vld [vmem:[%s5099_s1 + $0x44] sm:$0xf] }
  0x69   :  { %1793 = vmatpush.bf16.msrb.mxu1 %v2993_v35  ;;  %v2952_v35 = vld [vmem:[%s5099_s1 + $0x690] sm:$0xf]  ;;  %v2889_v47 = vor.u32 %v3329_v34, %v2888_v32  ;;  %v3194_v32 = vld [vmem:[%s5099_s1 + $0x1e4] sm:$0xf]  ;;  %v2354_v34 = vld [vmem:[%s5099_s1 + $0x1e8] sm:$0xf0] }
  0x6a   :  { %1806 = vmatpush.bf16.msrb.mxu2 %v3057_v36  ;;  %v3089_v36 = vor.u32 %v3379_v26, %v3088_v24  ;;  %v2226_v24 = vld [vmem:[%s5099_s1 + $0xe8] sm:$0xf0]  ;;  %v3178_v26 = vld [vmem:[%s5099_s1 + $0x164] sm:$0xf] }
  0x6b   :  { %1819 = vmatpush.bf16.msrb.mxu3 %v3121_v43  ;;  %v3080_v43 = vld [vmem:[%s5099_s1 + $0x790] sm:$0xf] }
  0x6c   :  { %1781 = vmatpush.bf16.msrb.mxu0 %v2921_v50  ;;  %v3343_v50 = vld [vmem:[%s5099_s1 + $0x684] sm:$0xf0] }
  0x6d   :  { %1794 = vmatpush.bf16.msrb.mxu1 %v2985_v51  ;;  %v2953_v51 = vor.u32 %v3345_v37, %v2952_v35  ;;  %v2229_v37 = vor.u32 %v3162_v17, %v2226_v24  ;;  %v3154_v17 = vld [vmem:[%s5099_s1 + $0xa4] sm:$0xf]  ;;  %v2194_v24 = vld [vmem:[%s5099_s1 + $0xa8] sm:$0xf0] }
  0x6e   :  { %1807 = vmatpush.bf16.msrb.mxu2 %v3049_v52  ;;  %v3017_v52 = vor.u32 %v3361_v40, %v3016_v39  ;;  %v3144_v40 = vld [vmem:[%s5099_s1 + $0x54] sm:$0xf] }
  0x6f   :  { %1820 = vmatpush.bf16.msrb.mxu3 %v3113_v56  ;;  %v3081_v56 = vor.u32 %v3377_v45, %v3080_v43  ;;  %v2154_v43 = vld [vmem:[%s5099_s1 + $0x58] sm:$0xf0]  ;;  %v3160_v45 = vld [vmem:[%s5099_s1 + $0xd4] sm:$0xf] }
  0x70   :  { %1782 = vmatpush.bf16.msrb.mxu0 %v2913_v62  ;;  %v3164_v62 = vld [vmem:[%s5099_s1 + $0xf4] sm:$0xf] }
  0x71   :  { %1795 = vmatpush.bf16.msrb.mxu1 %v2977_v63  ;;  %v2881_v63 = vor.u32 %v3327_v48, %v2880_v46  ;;  %v2357_v46 = vor.u32 %v3194_v32, %v2354_v34  ;;  %v3176_v48 = vld [vmem:[%s5099_s1 + $0x154] sm:$0xf]  ;;  %v3186_v32 = vld [vmem:[%s5099_s1 + $0x1a4] sm:$0xf]  ;;  %v2322_v34 = vld [vmem:[%s5099_s1 + $0x1a8] sm:$0xf0] }
  0x72   :  { %1808 = vmatpush.bf16.msrb.mxu2 %v3041_v0  ;;  %v2234_v0 = vld [vmem:[%s5099_s1 + $0xf8] sm:$0xf0] }
  0x73   :  { %1821 = vmatpush.bf16.msrb.mxu3 %v3105_v4  ;;  %v2945_v4 = vor.u32 %v3343_v50, %v2944_v49  ;;  %v2237_v13 = vor.u32 %v3164_v62, %v2234_v0  ;;  %v2282_v49 = vld [vmem:[%s5099_s1 + $0x158] sm:$0xf0]  ;;  %v3192_v50 = vld [vmem:[%s5099_s1 + $0x1d4] sm:$0xf]  ;;  %v3190_v62 = vld [vmem:[%s5099_s1 + $0x1c4] sm:$0xf] }
  0x74   :  { %1783 = vmatpush.bf16.msrb.mxu0 %v2905_v10  ;;  %v3073_v10 = vor.u32 %v3375_v58, %v3072_v57  ;;  %v2285_v54 = vor.u32 %v3176_v48, %v2282_v49  ;;  %v3158_v57 = vld [vmem:[%s5099_s1 + $0xc4] sm:$0xf]  ;;  %v3168_v48 = vld [vmem:[%s5099_s1 + $0x114] sm:$0xf]  ;;  %v2250_v49 = vld [vmem:[%s5099_s1 + $0x118] sm:$0xf0] }
  0x75   :  { %1796 = vmatpush.bf16.msrb.mxu1 %v2969_v11  ;;  %v2173_v11 = vor.u32 %v3148_v60, %v2170_v61  ;;  %v3174_v60 = vld [vmem:[%s5099_s1 + $0x144] sm:$0xf]  ;;  %v2274_v61 = vld [vmem:[%s5099_s1 + $0x148] sm:$0xf0] }
  0x76   :  { %1809 = vmatpush.bf16.msrb.mxu2 %v3033_v12  ;;  %v310_v12 = vunpack.c.h.b16 %v24_v59  ;;  %v2210_v59 = vld [vmem:[%s5099_s1 + $0xc8] sm:$0xf0]  ;;  %v2277_v2 = vor.u32 %v3174_v60, %v2274_v61 }
  0x77   :  { %1822 = vmatpush.bf16.msrb.mxu3 %v3097_v16  ;;  %v2162_v16 = vld [vmem:[%s5099_s1 + $0x68] sm:$0xf0]  ;;  %v2213_v1 = vor.u32 %v3158_v57, %v2210_v59  ;;  %v3150_v57 = vld [vmem:[%s5099_s1 + $0x84] sm:$0xf] }
  0x78   :  { %1784 = vmatpush.bf16.msrb.mxu0 %v2897_v27  ;;  %v2290_v27 = vld [vmem:[%s5099_s1 + $0x168] sm:$0xf0]  ;;  %v4304_v35 = vpack.c.b16 %v310_v12, %v310_v12  ;;  %v3166_v59 = vld [vmem:[%s5099_s1 + $0x104] sm:$0xf] }
  0x79   :  { %1797 = vmatpush.bf16.msrb.mxu1 %v2961_v28  ;;  %v4294_v28 = vpack.c.b16 %v309_v8, %v309_v8  ;;  %v2293_v39 = vor.u32 %v3178_v26, %v2290_v27  ;;  %v3172_v8 = vld [vmem:[%s5099_s1 + $0x134] sm:$0xf]  ;;  %v3170_v26 = vld [vmem:[%s5099_s1 + $0x124] sm:$0xf]  ;;  %v2258_v27 = vld [vmem:[%s5099_s1 + $0x128] sm:$0xf0] }
  0x7a   :  { %1810 = vmatpush.bf16.msrb.mxu2 %v3025_v31  ;;  %v4296_v31 = vpack.c.b16 %v308_v9, %v308_v9  ;;  %v2266_v9 = vld [vmem:[%s5099_s1 + $0x138] sm:$0xf0]  ;;  %v2242_v61 = vld [vmem:[%s5099_s1 + $0x108] sm:$0xf0] }
  0x7b   :  { %1823 = vmatpush.bf16.msrb.mxu3 %v3089_v36  ;;  %v2165_v36 = vor.u32 %v3146_v15, %v2162_v16  ;;  %v3138_v15 = vld [vmem:[%s5099_s1 + $0x24] sm:$0xf]  ;;  %v2130_v16 = vld [vmem:[%s5099_s1 + $0x28] sm:$0xf0] }
  0x7c   :  { %1785 = vmatpush.bf16.msrb.mxu0 %v2889_v47  ;;  %v2218_v47 = vld [vmem:[%s5099_s1 + $0xd8] sm:$0xf0] }
  0x7d   :  { %1798 = vmatpush.bf16.msrb.mxu1 %v2953_v51  ;;  %v2346_v51 = vld [vmem:[%s5099_s1 + $0x1d8] sm:$0xf0]  ;;  %v2221_v53 = vor.u32 %v3160_v45, %v2218_v47  ;;  %v3152_v45 = vld [vmem:[%s5099_s1 + $0x94] sm:$0xf] }
  0x7e   :  { %1811 = vmatpush.bf16.msrb.mxu2 %v3017_v52  ;;  %v2157_v52 = vor.u32 %v3144_v40, %v2154_v43  ;;  %v2349_v58 = vor.u32 %v3192_v50, %v2346_v51  ;;  %v3136_v40 = vld [vmem:[%s5099_s1 + $0x14] sm:$0xf]  ;;  %v2122_v43 = vld [vmem:[%s5099_s1 + $0x18] sm:$0xf0] }
  0x7f   :  { %1824 = vmatpush.bf16.msrb.mxu3 %v3081_v56  ;;  %v2146_v56 = vld [vmem:[%s5099_s1 + $0x48] sm:$0xf0]  ;;  %v2186_v47 = vld [vmem:[%s5099_s1 + $0x98] sm:$0xf0]  ;;  %v3184_v50 = vld [vmem:[%s5099_s1 + $0x194] sm:$0xf] }
  0x80   :  { %1786 = vmatpush.bf16.msrb.mxu0 %v2881_v63  ;;  %v2338_v63 = vld [vmem:[%s5099_s1 + $0x1c8] sm:$0xf0]  ;;  %v2149_v0 = vor.u32 %v3142_v55, %v2146_v56  ;;  %v2314_v51 = vld [vmem:[%s5099_s1 + $0x198] sm:$0xf0]  ;;  %v2189_v55 = vor.u32 %v3152_v45, %v2186_v47  ;;  %v2253_v56 = vor.u32 %v3168_v48, %v2250_v49  ;;  %v3224_v45 = vld [vmem:[%s5099_s1 + $0x2d4] sm:$0xf] }
  0x81   :  { %1799 = vmatpush.bf16.msrb.mxu1 %v2945_v4  ;;  %v2138_v4 = vld [vmem:[%s5099_s1 + $0x38] sm:$0xf0]  ;;  %v2341_v6 = vor.u32 %v3190_v62, %v2338_v63  ;;  %v2317_v60 = vor.u32 %v3184_v50, %v2314_v51  ;;  %v3182_v62 = vld [vmem:[%s5099_s1 + $0x184] sm:$0xf]  ;;  %v2306_v63 = vld [vmem:[%s5099_s1 + $0x188] sm:$0xf0] }
  0x82   :  { %1812 = vmatpush.bf16.msrb.mxu2 %v3009_v5  ;;  %v3156_v5 = vld [vmem:[%s5099_s1 + $0xb4] sm:$0xf]  ;;  %v2141_v12 = vor.u32 %v3140_v3, %v2138_v4  ;;  %v2490_v4 = vld [vmem:[%s5099_s1 + $0x2f8] sm:$0xf0] }
  0x83   :  { %1825 = vmatpush.bf16.msrb.mxu3 %v3073_v10  ;;  %1787 = vmatmul.bf16.vlgmr.msrb.gmra.mxu0 %v4283_v23  ;;  %v3188_v10 = vld [vmem:[%s5099_s1 + $0x1b4] sm:$0xf]  ;;  %v2474_v47 = vld [vmem:[%s5099_s1 + $0x2d8] sm:$0xf0] }
  0x84   :  { %1831 = vmatpush.bf16.msra.mxu0 %v2173_v11  ;;  %1800 = vmatmul.bf16.vlgmr.msrb.gmra.mxu1 %v4296_v31  ;;  %v2330_v11 = vld [vmem:[%s5099_s1 + $0x1b8] sm:$0xf0]  ;;  %v3240_v48 = vld [vmem:[%s5099_s1 + $0x354] sm:$0xf] }
  0x85   :  { %1844 = vmatpush.bf16.msra.mxu1 %v2237_v13  ;;  %1813 = vmatmul.bf16.vlgmr.msrb.gmra.mxu2 %v4294_v28  ;;  %v2205_v13 = vor.u32 %v3156_v5, %v2202_v7  ;;  %v3244_v5 = vld [vmem:[%s5099_s1 + $0x374] sm:$0xf]  ;;  %v2538_v49 = vld [vmem:[%s5099_s1 + $0x358] sm:$0xf0] }
  0x86   :  { %1857 = vmatpush.bf16.msra.mxu2 %v2301_v14  ;;  %1826 = vmatmul.bf16.vlgmr.msrb.gmra.mxu3 %v4304_v35  ;;  %v2269_v14 = vor.u32 %v3172_v8, %v2266_v9  ;;  %v2245_v8 = vor.u32 %v3166_v59, %v2242_v61  ;;  %v3260_v9 = vld [vmem:[%s5099_s1 + $0x3f4] sm:$0xf]  ;;  %v2602_v51 = vld [vmem:[%s5099_s1 + $0x3d8] sm:$0xf0]  ;;  %v2594_v59 = vld [vmem:[%s5099_s1 + $0x3c8] sm:$0xf0] }
  0x87   :  { %1870 = vmatpush.bf16.msra.mxu3 %v2365_v21  ;;  %v2333_v21 = vor.u32 %v3188_v10, %v2330_v11  ;;  %v2618_v10 = vld [vmem:[%s5099_s1 + $0x3f8] sm:$0xf0]  ;;  %v2309_v11 = vor.u32 %v3182_v62, %v2306_v63  ;;  %v3256_v50 = vld [vmem:[%s5099_s1 + $0x3d4] sm:$0xf] }
  0x88   :  { %1832 = vmatpush.bf16.msra.mxu0 %v2165_v36  ;;  %v2133_v36 = vor.u32 %v3138_v15, %v2130_v16  ;;  %v3210_v15 = vld [vmem:[%s5099_s1 + $0x264] sm:$0xf]  ;;  %v2418_v16 = vld [vmem:[%s5099_s1 + $0x268] sm:$0xf0]  ;;  %v3204_v61 = vld [vmem:[%s5099_s1 + $0x234] sm:$0xf] }
  0x89   :  { %1845 = vmatpush.bf16.msra.mxu1 %v2229_v37  ;;  %v2197_v37 = vor.u32 %v3154_v17, %v2194_v24  ;;  %v3226_v17 = vld [vmem:[%s5099_s1 + $0x2e4] sm:$0xf]  ;;  %v2482_v24 = vld [vmem:[%s5099_s1 + $0x2e8] sm:$0xf0] }
  0x8a   :  { %1858 = vmatpush.bf16.msra.mxu2 %v2293_v39  ;;  %v2261_v39 = vor.u32 %v3170_v26, %v2258_v27  ;;  %v3242_v26 = vld [vmem:[%s5099_s1 + $0x364] sm:$0xf]  ;;  %v2546_v27 = vld [vmem:[%s5099_s1 + $0x368] sm:$0xf0] }
  0x8b   :  { %1871 = vmatpush.bf16.msra.mxu3 %v2357_v46  ;;  %v2325_v46 = vor.u32 %v3186_v32, %v2322_v34  ;;  %v3258_v32 = vld [vmem:[%s5099_s1 + $0x3e4] sm:$0xf]  ;;  %v2610_v34 = vld [vmem:[%s5099_s1 + $0x3e8] sm:$0xf0] }
  0x8c   :  { %1833 = vmatpush.bf16.msra.mxu0 %v2157_v52  ;;  %v2125_v52 = vor.u32 %v3136_v40, %v2122_v43  ;;  %v3208_v40 = vld [vmem:[%s5099_s1 + $0x254] sm:$0xf]  ;;  %v2410_v43 = vld [vmem:[%s5099_s1 + $0x258] sm:$0xf0] }
  0x8d   :  { %1846 = vmatpush.bf16.msra.mxu1 %v2221_v53  ;;  %v3134_v53 = vld [vmem:[%s5099_s1 + $0x4] sm:$0xf] }
  0x8e   :  { %1859 = vmatpush.bf16.msra.mxu2 %v2285_v54  ;;  %v2114_v54 = vld [vmem:[%s5099_s1 + $0x8] sm:$0xf0] }
  0x8f   :  { %1872 = vmatpush.bf16.msra.mxu3 %v2349_v58  ;;  %v2178_v58 = vld [vmem:[%s5099_s1 + $0x88] sm:$0xf0]  ;;  %v2117_v3 = vor.u32 %v3134_v53, %v2114_v54  ;;  %v2477_v53 = vor.u32 %v3224_v45, %v2474_v47  ;;  %v3206_v54 = vld [vmem:[%s5099_s1 + $0x244] sm:$0xf] }
  0x90   :  { %1834 = vmatpush.bf16.msra.mxu0 %v2149_v0  ;;  %v3212_v0 = vld [vmem:[%s5099_s1 + $0x274] sm:$0xf]  ;;  %v2181_v7 = vor.u32 %v3150_v57, %v2178_v58  ;;  %v2530_v57 = vld [vmem:[%s5099_s1 + $0x348] sm:$0xf0]  ;;  %v3254_v58 = vld [vmem:[%s5099_s1 + $0x3c4] sm:$0xf] }
  0x91   :  { %1847 = vmatpush.bf16.msra.mxu1 %v2213_v1  ;;  %v2426_v1 = vld [vmem:[%s5099_s1 + $0x278] sm:$0xf0] }
  0x92   :  { %1860 = vmatpush.bf16.msra.mxu2 %v2277_v2  ;;  %v3228_v2 = vld [vmem:[%s5099_s1 + $0x2f4] sm:$0xf] }
  0x93   :  { %1873 = vmatpush.bf16.msra.mxu3 %v2341_v6  ;;  %v2554_v6 = vld [vmem:[%s5099_s1 + $0x378] sm:$0xf0] }
  0x94   :  { %1835 = vmatpush.bf16.msra.mxu0 %v2141_v12  ;;  %v2429_v12 = vor.u32 %v3212_v0, %v2426_v1  ;;  %v2394_v0 = vld [vmem:[%s5099_s1 + $0x238] sm:$0xf0]  ;;  %v3220_v1 = vld [vmem:[%s5099_s1 + $0x2b4] sm:$0xf] }
  0x95   :  { %1848 = vmatpush.bf16.msra.mxu1 %v2205_v13  ;;  %v2493_v13 = vor.u32 %v3228_v2, %v2490_v4  ;;  %v2458_v2 = vld [vmem:[%s5099_s1 + $0x2b8] sm:$0xf0]  ;;  %v3236_v4 = vld [vmem:[%s5099_s1 + $0x334] sm:$0xf] }
  0x96   :  { %1861 = vmatpush.bf16.msra.mxu2 %v2269_v14  ;;  %v2557_v14 = vor.u32 %v3244_v5, %v2554_v6  ;;  %v2522_v5 = vld [vmem:[%s5099_s1 + $0x338] sm:$0xf0]  ;;  %v4575_v6 = vld [vmem:[%s5101_s2] sm:$0x3] }
  0x97   :  { %1874 = vmatpush.bf16.msra.mxu3 %v2333_v21  ;;  %v2621_v21 = vor.u32 %v3260_v9, %v2618_v10  ;;  %v2397_v9 = vor.u32 %v3204_v61, %v2394_v0  ;;  %v3202_v10 = vld [vmem:[%s5099_s1 + $0x224] sm:$0xf] }
  0x98   :  { %1836 = vmatpush.bf16.msra.mxu0 %v2133_v36  ;;  %v2421_v36 = vor.u32 %v3210_v15, %v2418_v16  ;;  %v283_v15 = vperm.slane %v4575_v6, 0  ;;  %v3246_v61 = vld [vmem:[%s5099_s1 + $0x384] sm:$0xf] }
  0x99   :  { %1849 = vmatpush.bf16.msra.mxu1 %v2197_v37  ;;  %v2485_v37 = vor.u32 %v3226_v17, %v2482_v24  ;;  %v2450_v17 = vld [vmem:[%s5099_s1 + $0x2a8] sm:$0xf0] }
  0x9a   :  { %1862 = vmatpush.bf16.msra.mxu2 %v2261_v39  ;;  %v2549_v39 = vor.u32 %v3242_v26, %v2546_v27  ;;  %v2514_v24 = vld [vmem:[%s5099_s1 + $0x328] sm:$0xf0]  ;;  %v3250_v26 = vld [vmem:[%s5099_s1 + $0x3a4] sm:$0xf] }
  0x9b   :  { %1875 = vmatpush.bf16.msra.mxu3 %v2325_v46  ;;  %v2613_v46 = vor.u32 %v3258_v32, %v2610_v34  ;;  %v2578_v27 = vld [vmem:[%s5099_s1 + $0x3a8] sm:$0xf0] }
  0x9c   :  { %1837 = vmatpush.bf16.msra.mxu0 %v2125_v52  ;;  %v2413_v52 = vor.u32 %v3208_v40, %v2410_v43  ;;  %v2378_v40 = vld [vmem:[%s5099_s1 + $0x218] sm:$0xf0]  ;;  %v3216_v43 = vld [vmem:[%s5099_s1 + $0x294] sm:$0xf]  ;;  %v2581_v47 = vor.u32 %v3250_v26, %v2578_v27  ;;  %v3274_v26 = vld [vmem:[%s5099_s1 + $0x464] sm:$0xf] }
  0x9d   :  { %1850 = vmatpush.bf16.msra.mxu1 %v2189_v55  ;;  %v2402_v55 = vld [vmem:[%s5099_s1 + $0x248] sm:$0xf0] }
  0x9e   :  { %1863 = vmatpush.bf16.msra.mxu2 %v2253_v56  ;;  %v3238_v56 = vld [vmem:[%s5099_s1 + $0x344] sm:$0xf]  ;;  %v2674_v27 = vld [vmem:[%s5099_s1 + $0x468] sm:$0xf0] }
  0x9f   :  { %1876 = vmatpush.bf16.msra.mxu3 %v2317_v60  ;;  %v2405_v60 = vor.u32 %v3206_v54, %v2402_v55  ;;  %v2533_v63 = vor.u32 %v3238_v56, %v2530_v57  ;;  %v3198_v54 = vld [vmem:[%s5099_s1 + $0x204] sm:$0xf]  ;;  %v2370_v55 = vld [vmem:[%s5099_s1 + $0x208] sm:$0xf0] }
  0xa0   :  { %1838 = vmatpush.bf16.msra.mxu0 %v2117_v3  ;;  %v2597_v3 = vor.u32 %v3254_v58, %v2594_v59  ;;  %v1632_v34 = vpop.f32.mrf.mxu0  ;;  %v2434_v56 = vld [vmem:[%s5099_s1 + $0x288] sm:$0xf0]  ;;  %v3230_v57 = vld [vmem:[%s5099_s1 + $0x304] sm:$0xf] }
  0xa1   :  { %1851 = vmatpush.bf16.msra.mxu1 %v2181_v7  ;;  %v3252_v7 = vld [vmem:[%s5099_s1 + $0x3b4] sm:$0xf]  ;;  %v1633_v45 = vadd.f32 %v1632_v34, %v283_v15 }
  0xa2   :  { %1864 = vmatpush.bf16.msra.mxu2 %v2245_v8  ;;  %v2586_v8 = vld [vmem:[%s5099_s1 + $0x3b8] sm:$0xf0] }
  0xa3   :  { %1877 = vmatpush.bf16.msra.mxu3 %v2309_v11  ;;  %1839 = vmatmul.bf16.vlgmr.msra.gmra.mxu0 %v3718_v19  ;;  %v3222_v19 = vld [vmem:[%s5099_s1 + $0x2c4] sm:$0xf]  ;;  %v2461_v11 = vor.u32 %v3220_v1, %v2458_v2  ;;  %v2589_v16 = vor.u32 %v3252_v7, %v2586_v8  ;;  %v3276_v1 = vld [vmem:[%s5099_s1 + $0x474] sm:$0xf]  ;;  %v2682_v2 = vld [vmem:[%s5099_s1 + $0x478] sm:$0xf0] }
  0xa4   :  { %1883 = vmatpush.bf16.msrb.mxu0 %v2429_v12  ;;  %1852 = vmatmul.bf16.vlgmr.msra.gmra.mxu1 %v3722_v22  ;;  %v2466_v22 = vld [vmem:[%s5099_s1 + $0x2c8] sm:$0xf0]  ;;  %v2525_v12 = vor.u32 %v3236_v4, %v2522_v5  ;;  %v2373_v4 = vor.u32 %v3198_v54, %v2370_v55  ;;  %v2746_v5 = vld [vmem:[%s5099_s1 + $0x4f8] sm:$0xf0]  ;;  %v3308_v7 = vld [vmem:[%s5099_s1 + $0x574] sm:$0xf] }
  0xa5   :  { %1896 = vmatpush.bf16.msrb.mxu1 %v2493_v13  ;;  %1865 = vmatmul.bf16.vlgmr.msra.gmra.mxu2 %v3716_v18  ;;  %v2541_v18 = vor.u32 %v3240_v48, %v2538_v49  ;;  %v2469_v62 = vor.u32 %v3222_v19, %v2466_v22  ;;  %v2386_v13 = vld [vmem:[%s5099_s1 + $0x228] sm:$0xf0]  ;;  %v2442_v48 = vld [vmem:[%s5099_s1 + $0x298] sm:$0xf0]  ;;  %v3232_v49 = vld [vmem:[%s5099_s1 + $0x314] sm:$0xf] }
  0xa6   :  { %1909 = vmatpush.bf16.msrb.mxu2 %v2557_v14  ;;  %1878 = vmatmul.bf16.vlgmr.msra.gmra.mxu3 %v3720_v20  ;;  %v2605_v20 = vor.u32 %v3256_v50, %v2602_v51  ;;  %v3218_v14 = vld [vmem:[%s5099_s1 + $0x2a4] sm:$0xf]  ;;  %v2389_v32 = vor.u32 %v3202_v10, %v2386_v13  ;;  %v2506_v50 = vld [vmem:[%s5099_s1 + $0x318] sm:$0xf0]  ;;  %v3248_v51 = vld [vmem:[%s5099_s1 + $0x394] sm:$0xf]  ;;  %v2445_v19 = vor.u32 %v3216_v43, %v2442_v48 }
  0xa7   :  { %1922 = vmatpush.bf16.msrb.mxu3 %v2621_v21  ;;  %v3234_v21 = vld [vmem:[%s5099_s1 + $0x324] sm:$0xf]  ;;  %v2810_v8 = vld [vmem:[%s5099_s1 + $0x578] sm:$0xf0]  ;;  %v3324_v13 = vld [vmem:[%s5099_s1 + $0x5f4] sm:$0xf] }
  0xa8   :  { %1884 = vmatpush.bf16.msrb.mxu0 %v2421_v36  ;;  %v2453_v36 = vor.u32 %v3218_v14, %v2450_v17  ;;  %v3214_v22 = vld [vmem:[%s5099_s1 + $0x284] sm:$0xf]  ;;  %v1658_v58 = vpop.f32.mrf.mxu2  ;;  %v1634_v10 = vpop.f32.mrf.mxu0  ;;  %v2874_v14 = vld [vmem:[%s5099_s1 + $0x5f8] sm:$0xf0]  ;;  %v2685_v17 = vor.u32 %v3276_v1, %v2682_v2  ;;  %v2866_v43 = vld [vmem:[%s5099_s1 + $0x5e8] sm:$0xf0] }
  0xa9   :  { %1897 = vmatpush.bf16.msrb.mxu1 %v2485_v37  ;;  %v2517_v37 = vor.u32 %v3234_v21, %v2514_v24  ;;  %v1671_v0 = vpop.f32.mrf.mxu3  ;;  %v2813_v24 = vor.u32 %v3308_v7, %v2810_v8  ;;  %v2877_v34 = vor.u32 %v3324_v13, %v2874_v14  ;;  %v3304_v54 = vld [vmem:[%s5099_s1 + $0x554] sm:$0xf]  ;;  %v2794_v55 = vld [vmem:[%s5099_s1 + $0x558] sm:$0xf0] }
  0xaa   :  { %1910 = vmatpush.bf16.msrb.mxu2 %v2549_v39  ;;  %v3200_v39 = vld [vmem:[%s5099_s1 + $0x214] sm:$0xf]  ;;  %v2778_v13 = vld [vmem:[%s5099_s1 + $0x538] sm:$0xf0] }
  0xab   :  { %1923 = vmatpush.bf16.msrb.mxu3 %v2613_v46  ;;  %v1645_v46 = vpop.f32.mrf.mxu1  ;;  %v3316_v14 = vld [vmem:[%s5099_s1 + $0x5b4] sm:$0xf] }
  0xac   :  { %1885 = vmatpush.bf16.msrb.mxu0 %v2413_v52  ;;  %v2570_v52 = vld [vmem:[%s5099_s1 + $0x398] sm:$0xf0] }
  0xad   :  { %1898 = vmatpush.bf16.msrb.mxu1 %v2477_v53  ;;  %v1646_v53 = vadd.f32 %v1645_v46, %v1633_v45  ;;  %v2573_v59 = vor.u32 %v3248_v51, %v2570_v52  ;;  %v2677_v46 = vor.u32 %v3274_v26, %v2674_v27  ;;  %v2666_v51 = vld [vmem:[%s5099_s1 + $0x458] sm:$0xf0]  ;;  %v3288_v52 = vld [vmem:[%s5099_s1 + $0x4d4] sm:$0xf]  ;;  %v2642_v26 = vld [vmem:[%s5099_s1 + $0x428] sm:$0xf0] }
  0xae   :  { %1911 = vmatpush.bf16.msrb.mxu2 %v2541_v18  ;;  %v2381_v18 = vor.u32 %v3200_v39, %v2378_v40  ;;  %v2802_v39 = vld [vmem:[%s5099_s1 + $0x568] sm:$0xf0]  ;;  %v3322_v40 = vld [vmem:[%s5099_s1 + $0x5e4] sm:$0xf] }
  0xaf   :  { %1924 = vmatpush.bf16.msrb.mxu3 %v2605_v20  ;;  %v2509_v20 = vor.u32 %v3232_v49, %v2506_v50  ;;  %v3272_v50 = vld [vmem:[%s5099_s1 + $0x454] sm:$0xf]  ;;  %v3282_v27 = vld [vmem:[%s5099_s1 + $0x4a4] sm:$0xf] }
  0xb0   :  { %1886 = vmatpush.bf16.msrb.mxu0 %v2405_v60  ;;  %v2498_v60 = vld [vmem:[%s5099_s1 + $0x308] sm:$0xf0]  ;;  %v1660_v45 = vpop.f32.mrf.mxu2 }
  0xb1   :  { %1899 = vmatpush.bf16.msrb.mxu1 %v2469_v62  ;;  %v2562_v62 = vld [vmem:[%s5099_s1 + $0x388] sm:$0xf0]  ;;  %v3314_v45 = vld [vmem:[%s5099_s1 + $0x5a4] sm:$0xf] }
  0xb2   :  { %1912 = vmatpush.bf16.msrb.mxu2 %v2533_v63  ;;  %v1659_v63 = vadd.f32 %v1658_v58, %v1646_v53  ;;  %v2869_v53 = vor.u32 %v3322_v40, %v2866_v43  ;;  %v2658_v58 = vld [vmem:[%s5099_s1 + $0x448] sm:$0xf0] }
  0xb3   :  { %1925 = vmatpush.bf16.msrb.mxu3 %v2597_v3  ;;  %v3292_v3 = vld [vmem:[%s5099_s1 + $0x4f4] sm:$0xf]  ;;  %v1647_v15 = vpop.f32.mrf.mxu1 }
  0xb4   :  { %1887 = vmatpush.bf16.msrb.mxu0 %v2397_v9  ;;  %v4674_v9 = vadd.f32 %v1671_v0, %v1659_v63  ;;  %v2749_v21 = vor.u32 %v3292_v3, %v2746_v5  ;;  %v3268_v3 = vld [vmem:[%s5099_s1 + $0x434] sm:$0xf] }
  0xb5   :  { %1900 = vmatpush.bf16.msrb.mxu1 %v2461_v11  ;;  %v2437_v11 = vor.u32 %v3214_v22, %v2434_v56  ;;  %v2797_v56 = vor.u32 %v3304_v54, %v2794_v55  ;;  %v3284_v5 = vld [vmem:[%s5099_s1 + $0x4b4] sm:$0xf] }
  0xb6   :  { %1913 = vmatpush.bf16.msrb.mxu2 %v2525_v12  ;;  %v2501_v12 = vor.u32 %v3230_v57, %v2498_v60  ;;  %v3270_v57 = vld [vmem:[%s5099_s1 + $0x444] sm:$0xf]  ;;  %v2786_v60 = vld [vmem:[%s5099_s1 + $0x548] sm:$0xf0] }
  0xb7   :  { %1926 = vmatpush.bf16.msrb.mxu3 %v2589_v16  ;;  %v2565_v16 = vor.u32 %v3246_v61, %v2562_v62  ;;  %v3318_v61 = vld [vmem:[%s5099_s1 + $0x5c4] sm:$0xf]  ;;  %v2850_v62 = vld [vmem:[%s5099_s1 + $0x5c8] sm:$0xf0]  ;;  %v2661_v63 = vor.u32 %v3270_v57, %v2658_v58 }
  0xb8   :  { %1888 = vmatpush.bf16.msrb.mxu0 %v2389_v32  ;;  %v3290_v32 = vld [vmem:[%s5099_s1 + $0x4e4] sm:$0xf]  ;;  %v2853_v10 = vor.u32 %v3318_v61, %v2850_v62 }
  0xb9   :  { %1901 = vmatpush.bf16.msrb.mxu1 %v2453_v36  ;;  %v2738_v36 = vld [vmem:[%s5099_s1 + $0x4e8] sm:$0xf0]  ;;  %v3262_v58 = vld [vmem:[%s5099_s1 + $0x404] sm:$0xf] }
  0xba   :  { %1914 = vmatpush.bf16.msrb.mxu2 %v2517_v37  ;;  %v3306_v37 = vld [vmem:[%s5099_s1 + $0x564] sm:$0xf]  ;;  %v2741_v48 = vor.u32 %v3290_v32, %v2738_v36  ;;  %v2706_v36 = vld [vmem:[%s5099_s1 + $0x4a8] sm:$0xf0] }
  0xbb   :  { %1927 = vmatpush.bf16.msrb.mxu3 %v2581_v47  ;;  %v1673_v47 = vpop.f32.mrf.mxu3  ;;  %v2805_v49 = vor.u32 %v3306_v37, %v2802_v39  ;;  %v3298_v37 = vld [vmem:[%s5099_s1 + $0x524] sm:$0xf]  ;;  %v2770_v39 = vld [vmem:[%s5099_s1 + $0x528] sm:$0xf0] }
  0xbc   :  { %1889 = vmatpush.bf16.msrb.mxu0 %v2381_v18  ;;  %v2730_v18 = vld [vmem:[%s5099_s1 + $0x4d8] sm:$0xf0]  ;;  %v3294_v61 = vld [vmem:[%s5099_s1 + $0x504] sm:$0xf] }
  0xbd   :  { %1902 = vmatpush.bf16.msrb.mxu1 %v2445_v19  ;;  %v3320_v19 = vld [vmem:[%s5099_s1 + $0x5d4] sm:$0xf]  ;;  %v2733_v22 = vor.u32 %v3288_v52, %v2730_v18 }
  0xbe   :  { %1915 = vmatpush.bf16.msrb.mxu2 %v2509_v20  ;;  %v2669_v20 = vor.u32 %v3272_v50, %v2666_v51  ;;  %v2709_v50 = vor.u32 %v3282_v27, %v2706_v36  ;;  %v2773_v51 = vor.u32 %v3298_v37, %v2770_v39  ;;  %v3264_v52 = vld [vmem:[%s5099_s1 + $0x414] sm:$0xf]  ;;  %v2930_v27 = vld [vmem:[%s5099_s1 + $0x668] sm:$0xf0]  ;;  %v3370_v37 = vld [vmem:[%s5099_s1 + $0x764] sm:$0xf] }
  0xbf   :  { %1928 = vmatpush.bf16.msrb.mxu3 %v2573_v59  ;;  %v3302_v59 = vld [vmem:[%s5099_s1 + $0x544] sm:$0xf]  ;;  %v3280_v18 = vld [vmem:[%s5099_s1 + $0x494] sm:$0xf]  ;;  %v2994_v36 = vld [vmem:[%s5099_s1 + $0x6e8] sm:$0xf0] }
  0xc0   :  { %1890 = vmatpush.bf16.msrb.mxu0 %v2373_v4  ;;  %v1684_v0 = vpop.f32.mrf.mxu0  ;;  %v2789_v2 = vor.u32 %v3302_v59, %v2786_v60  ;;  %v2650_v4 = vld [vmem:[%s5099_s1 + $0x438] sm:$0xf0]  ;;  %v3278_v59 = vld [vmem:[%s5099_s1 + $0x484] sm:$0xf]  ;;  %v2690_v60 = vld [vmem:[%s5099_s1 + $0x488] sm:$0xf0] }
  0xc1   :  { %1903 = vmatpush.bf16.msrb.mxu1 %v2437_v11  ;;  %v1685_v7 = vadd.f32 %v1684_v0, %v4674_v9  ;;  %v1697_v8 = vpop.f32.mrf.mxu1  ;;  %v2714_v11 = vld [vmem:[%s5099_s1 + $0x4b8] sm:$0xf0]  ;;  %v2754_v0 = vld [vmem:[%s5099_s1 + $0x508] sm:$0xf0] }
  0xc2   :  { %1916 = vmatpush.bf16.msrb.mxu2 %v2501_v12  ;;  %v3300_v12 = vld [vmem:[%s5099_s1 + $0x534] sm:$0xf]  ;;  %v2842_v9 = vld [vmem:[%s5099_s1 + $0x5b8] sm:$0xf0]  ;;  %v3058_v39 = vld [vmem:[%s5099_s1 + $0x768] sm:$0xf0] }
  0xc3   :  { %1929 = vmatpush.bf16.msrb.mxu3 %v2565_v16  ;;  %1891 = vmatmul.bf16.vlgmr.msrb.gmra.mxu0 %v3880_v41  ;;  %v3286_v41 = vld [vmem:[%s5099_s1 + $0x4c4] sm:$0xf]  ;;  %v1698_v15 = vadd.f32 %v1697_v8, %v1685_v7  ;;  %v2653_v16 = vor.u32 %v3268_v3, %v2650_v4  ;;  %v3340_v4 = vld [vmem:[%s5099_s1 + $0x674] sm:$0xf] }
  0xc4   :  { %1935 = vmatpush.bf16.msra.mxu0 %v2685_v17  ;;  %1904 = vmatmul.bf16.vlgmr.msrb.gmra.mxu1 %v3884_v44  ;;  %v2722_v44 = vld [vmem:[%s5099_s1 + $0x4c8] sm:$0xf0]  ;;  %v2717_v17 = vor.u32 %v3284_v5, %v2714_v11  ;;  %v2938_v5 = vld [vmem:[%s5099_s1 + $0x678] sm:$0xf0]  ;;  %v3356_v7 = vld [vmem:[%s5099_s1 + $0x6f4] sm:$0xf] }
  0xc5   :  { %1948 = vmatpush.bf16.msra.mxu1 %v2749_v21  ;;  %1917 = vmatmul.bf16.vlgmr.msrb.gmra.mxu2 %v3872_v38  ;;  %v2858_v38 = vld [vmem:[%s5099_s1 + $0x5d8] sm:$0xf0]  ;;  %v2725_v1 = vor.u32 %v3286_v41, %v2722_v44  ;;  %v2781_v21 = vor.u32 %v3300_v12, %v2778_v13  ;;  %v2626_v41 = vld [vmem:[%s5099_s1 + $0x408] sm:$0xf0]  ;;  %v3372_v11 = vld [vmem:[%s5099_s1 + $0x774] sm:$0xf]  ;;  %v2693_v13 = vor.u32 %v3278_v59, %v2690_v60 }
  0xc6   :  { %1961 = vmatpush.bf16.msra.mxu2 %v2813_v24  ;;  %1930 = vmatmul.bf16.vlgmr.msrb.gmra.mxu3 %v3882_v42  ;;  %v2861_v42 = vor.u32 %v3320_v19, %v2858_v38  ;;  %v3266_v24 = vld [vmem:[%s5099_s1 + $0x424] sm:$0xf]  ;;  %v2698_v19 = vld [vmem:[%s5099_s1 + $0x498] sm:$0xf0]  ;;  %v3296_v38 = vld [vmem:[%s5099_s1 + $0x514] sm:$0xf]  ;;  %v2629_v8 = vor.u32 %v3262_v58, %v2626_v41 }
  0xc7   :  { %1974 = vmatpush.bf16.msra.mxu3 %v2877_v34  ;;  %v2845_v34 = vor.u32 %v3316_v14, %v2842_v9  ;;  %v2645_v47 = vor.u32 %v3266_v24, %v2642_v26  ;;  %v3066_v12 = vld [vmem:[%s5099_s1 + $0x778] sm:$0xf0]  ;;  %v2757_v14 = vor.u32 %v3294_v61, %v2754_v0  ;;  %v3388_v9 = vld [vmem:[%s5099_s1 + $0x7f4] sm:$0xf]  ;;  %v3338_v26 = vld [vmem:[%s5099_s1 + $0x664] sm:$0xf] }
  0xc8   :  { %1936 = vmatpush.bf16.msra.mxu0 %v2677_v46  ;;  %v1710_v32 = vpop.f32.mrf.mxu2  ;;  %v2834_v46 = vld [vmem:[%s5099_s1 + $0x5a8] sm:$0xf0]  ;;  %v3069_v24 = vor.u32 %v3372_v11, %v3066_v12  ;;  %v3332_v0 = vld [vmem:[%s5099_s1 + $0x634] sm:$0xf] }
  0xc9   :  { %1949 = vmatpush.bf16.msra.mxu1 %v2741_v48  ;;  %v1711_v40 = vadd.f32 %v1710_v32, %v1698_v15  ;;  %v1723_v43 = vpop.f32.mrf.mxu3  ;;  %v1699_v54 = vpop.f32.mrf.mxu1  ;;  %v2837_v55 = vor.u32 %v3314_v45, %v2834_v46  ;;  %v3130_v15 = vld [vmem:[%s5099_s1 + $0x7f8] sm:$0xf0]  ;;  %v3354_v32 = vld [vmem:[%s5099_s1 + $0x6e4] sm:$0xf]  ;;  %v2933_v45 = vor.u32 %v3338_v26, %v2930_v27  ;;  %v3042_v58 = vld [vmem:[%s5099_s1 + $0x748] sm:$0xf0] }
  0xca   :  { %1962 = vmatpush.bf16.msra.mxu2 %v2805_v49  ;;  %v1686_v49 = vpop.f32.mrf.mxu0  ;;  %v2997_v46 = vor.u32 %v3354_v32, %v2994_v36  ;;  %v3050_v54 = vld [vmem:[%s5099_s1 + $0x758] sm:$0xf0]  ;;  %v3026_v26 = vld [vmem:[%s5099_s1 + $0x728] sm:$0xf0] }
  0xcb   :  { %1975 = vmatpush.bf16.msra.mxu3 %v2869_v53  ;;  %v4807_v48 = vadd.f32 %v1723_v43, %v1711_v40  ;;  %v2634_v53 = vld [vmem:[%s5099_s1 + $0x418] sm:$0xf0]  ;;  %v3386_v40 = vld [vmem:[%s5099_s1 + $0x7e4] sm:$0xf]  ;;  %v3122_v43 = vld [vmem:[%s5099_s1 + $0x7e8] sm:$0xf0] }
  0xcc   :  { %1937 = vmatpush.bf16.msra.mxu0 %v2669_v20  ;;  %v2762_v20 = vld [vmem:[%s5099_s1 + $0x518] sm:$0xf0]  ;;  %v2637_v57 = vor.u32 %v3264_v52, %v2634_v53  ;;  %v3336_v49 = vld [vmem:[%s5099_s1 + $0x654] sm:$0xf]  ;;  %v3125_v52 = vor.u32 %v3386_v40, %v3122_v43  ;;  %v3090_v36 = vld [vmem:[%s5099_s1 + $0x7a8] sm:$0xf0] }
  0xcd   :  { %1950 = vmatpush.bf16.msra.mxu1 %v2733_v22  ;;  %v3312_v22 = vld [vmem:[%s5099_s1 + $0x594] sm:$0xf]  ;;  %v2765_v44 = vor.u32 %v3296_v38, %v2762_v20  ;;  %v2986_v53 = vld [vmem:[%s5099_s1 + $0x6d8] sm:$0xf0] }
  0xce   :  { %1963 = vmatpush.bf16.msra.mxu2 %v2797_v56  ;;  %v2826_v56 = vld [vmem:[%s5099_s1 + $0x598] sm:$0xf0] }
  0xcf   :  { %1976 = vmatpush.bf16.msra.mxu3 %v2861_v42  ;;  %v2701_v42 = vor.u32 %v3280_v18, %v2698_v19  ;;  %v3368_v18 = vld [vmem:[%s5099_s1 + $0x754] sm:$0xf] }
  0xd0   :  { %1938 = vmatpush.bf16.msra.mxu0 %v2661_v63  ;;  %v1712_v62 = vpop.f32.mrf.mxu2  ;;  %v2829_v63 = vor.u32 %v3312_v22, %v2826_v56  ;;  %v3053_v20 = vor.u32 %v3368_v18, %v3050_v54  ;;  %v3350_v22 = vld [vmem:[%s5099_s1 + $0x6c4] sm:$0xf]  ;;  %v2978_v56 = vld [vmem:[%s5099_s1 + $0x6c8] sm:$0xf0]  ;;  %v3018_v18 = vld [vmem:[%s5099_s1 + $0x718] sm:$0xf0] }
  0xd1   :  { %1951 = vmatpush.bf16.msra.mxu1 %v2725_v1  ;;  %v3310_v1 = vld [vmem:[%s5099_s1 + $0x584] sm:$0xf]  ;;  %v1725_v3 = vpop.f32.mrf.mxu3  ;;  %v2981_v62 = vor.u32 %v3350_v22, %v2978_v56  ;;  %v3376_v54 = vld [vmem:[%s5099_s1 + $0x794] sm:$0xf] }
  0xd2   :  { %1964 = vmatpush.bf16.msra.mxu2 %v2789_v2  ;;  %v2818_v2 = vld [vmem:[%s5099_s1 + $0x588] sm:$0xf0]  ;;  %v3358_v56 = vld [vmem:[%s5099_s1 + $0x704] sm:$0xf] }
  0xd3   :  { %1977 = vmatpush.bf16.msra.mxu3 %v2853_v10  ;;  %v3002_v10 = vld [vmem:[%s5099_s1 + $0x6f8] sm:$0xf0] }
  0xd4   :  { %1939 = vmatpush.bf16.msra.mxu0 %v2653_v16  ;;  %v2821_v16 = vor.u32 %v3310_v1, %v2818_v2  ;;  %v2906_v1 = vld [vmem:[%s5099_s1 + $0x638] sm:$0xf0]  ;;  %v3348_v2 = vld [vmem:[%s5099_s1 + $0x6b4] sm:$0xf] }
  0xd5   :  { %1952 = vmatpush.bf16.msra.mxu1 %v2717_v17  ;;  %v2941_v17 = vor.u32 %v3340_v4, %v2938_v5  ;;  %v2970_v4 = vld [vmem:[%s5099_s1 + $0x6b8] sm:$0xf0]  ;;  %v3364_v5 = vld [vmem:[%s5099_s1 + $0x734] sm:$0xf]  ;;  %v2909_v11 = vor.u32 %v3332_v0, %v2906_v1 }
  0xd6   :  { %1965 = vmatpush.bf16.msra.mxu2 %v2781_v21  ;;  %v3005_v21 = vor.u32 %v3356_v7, %v3002_v10  ;;  %v3034_v7 = vld [vmem:[%s5099_s1 + $0x738] sm:$0xf0]  ;;  %v2973_v12 = vor.u32 %v3348_v2, %v2970_v4 }
  0xd7   :  { %1978 = vmatpush.bf16.msra.mxu3 %v2845_v34  ;;  %v3133_v34 = vor.u32 %v3388_v9, %v3130_v15  ;;  %v3098_v10 = vld [vmem:[%s5099_s1 + $0x7b8] sm:$0xf0]  ;;  %v2898_v9 = vld [vmem:[%s5099_s1 + $0x628] sm:$0xf0]  ;;  %v3346_v15 = vld [vmem:[%s5099_s1 + $0x6a4] sm:$0xf] }
  0xd8   :  { %1940 = vmatpush.bf16.msra.mxu0 %v2645_v47  ;;  %v3061_v47 = vor.u32 %v3370_v37, %v3058_v39 }
  0xd9   :  { %1953 = vmatpush.bf16.msra.mxu1 %v2709_v50  ;;  %v2922_v50 = vld [vmem:[%s5099_s1 + $0x658] sm:$0xf0] }
  0xda   :  { %1966 = vmatpush.bf16.msra.mxu2 %v2773_v51  ;;  %v3352_v51 = vld [vmem:[%s5099_s1 + $0x6d4] sm:$0xf]  ;;  %v2925_v19 = vor.u32 %v3336_v49, %v2922_v50  ;;  %v2890_v49 = vld [vmem:[%s5099_s1 + $0x618] sm:$0xf0] }
  0xdb   :  { %1979 = vmatpush.bf16.msra.mxu3 %v2837_v55  ;;  %v3114_v55 = vld [vmem:[%s5099_s1 + $0x7d8] sm:$0xf0]  ;;  %v2989_v38 = vor.u32 %v3352_v51, %v2986_v53  ;;  %v3344_v50 = vld [vmem:[%s5099_s1 + $0x694] sm:$0xf] }
  0xdc   :  { %1941 = vmatpush.bf16.msra.mxu0 %v2637_v57  ;;  %v3366_v57 = vld [vmem:[%s5099_s1 + $0x744] sm:$0xf]  ;;  %v3360_v53 = vld [vmem:[%s5099_s1 + $0x714] sm:$0xf] }
  0xdd   :  { %1954 = vmatpush.bf16.msra.mxu1 %v2701_v42  ;;  %v3382_v42 = vld [vmem:[%s5099_s1 + $0x7c4] sm:$0xf] }
  0xde   :  { %1967 = vmatpush.bf16.msra.mxu2 %v2765_v44  ;;  %v3106_v44 = vld [vmem:[%s5099_s1 + $0x7c8] sm:$0xf0] }
  0xdf   :  { %1980 = vmatpush.bf16.msra.mxu3 %v2829_v63  ;;  %v3045_v63 = vor.u32 %v3366_v57, %v3042_v58  ;;  %v3010_v57 = vld [vmem:[%s5099_s1 + $0x708] sm:$0xf0] }
  0xe0   :  { %1942 = vmatpush.bf16.msra.mxu0 %v2629_v8  ;;  %v1736_v41 = vpop.f32.mrf.mxu0  ;;  %v3380_v8 = vld [vmem:[%s5099_s1 + $0x7b4] sm:$0xf] }
  0xe1   :  { %1955 = vmatpush.bf16.msra.mxu1 %v2693_v13  ;;  %v1737_v59 = vadd.f32 %v1736_v41, %v4807_v48  ;;  %v1749_v61 = vpop.f32.mrf.mxu1  ;;  %v3109_v48 = vor.u32 %v3382_v42, %v3106_v44  ;;  %v3037_v13 = vor.u32 %v3364_v5, %v3034_v7  ;;  %v3374_v41 = vld [vmem:[%s5099_s1 + $0x784] sm:$0xf]  ;;  %v3074_v42 = vld [vmem:[%s5099_s1 + $0x788] sm:$0xf0] }
  0xe2   :  { %1968 = vmatpush.bf16.msra.mxu2 %v2757_v14  ;;  %v3330_v14 = vld [vmem:[%s5099_s1 + $0x624] sm:$0xf] }
  0xe3   :  { %1981 = vmatpush.bf16.msra.mxu3 %v2821_v16  ;;  %1943 = vmatmul.bf16.vlgmr.msra.gmra.mxu0 %v4073_v25  ;;  %v3384_v25 = vld [vmem:[%s5099_s1 + $0x7d4] sm:$0xf]  ;;  %v1750_v3 = vadd.f32 %v1749_v61, %v1737_v59  ;;  %v3101_v16 = vor.u32 %v3380_v8, %v3098_v10  ;;  %v2901_v39 = vor.u32 %v3330_v14, %v2898_v9 }
  0xe4   :  { %1987 = vmatpush.bf16.msrb.mxu0 %v2941_v17  ;;  %1956 = vmatmul.bf16.vlgmr.msra.gmra.mxu1 %v4086_v30  ;;  %v2914_v30 = vld [vmem:[%s5099_s1 + $0x648] sm:$0xf0]  ;;  %v3013_v61 = vor.u32 %v3358_v56, %v3010_v57 }
  0xe5   :  { %2000 = vmatpush.bf16.msrb.mxu1 %v3005_v21  ;;  %1969 = vmatmul.bf16.vlgmr.msra.gmra.mxu2 %v4084_v29  ;;  %v3334_v29 = vld [vmem:[%s5099_s1 + $0x644] sm:$0xf]  ;;  %v2962_v21 = vld [vmem:[%s5099_s1 + $0x6a8] sm:$0xf0] }
  0xe6   :  { %2013 = vmatpush.bf16.msrb.mxu2 %v3069_v24  ;;  %1982 = vmatmul.bf16.vlgmr.msra.gmra.mxu3 %v4094_v33  ;;  %v3117_v33 = vor.u32 %v3384_v25, %v3114_v55  ;;  %v2917_v60 = vor.u32 %v3334_v29, %v2914_v30  ;;  %v3362_v24 = vld [vmem:[%s5099_s1 + $0x724] sm:$0xf]  ;;  %v3082_v25 = vld [vmem:[%s5099_s1 + $0x798] sm:$0xf0]  ;;  %v2882_v29 = vld [vmem:[%s5099_s1 + $0x608] sm:$0xf0] }
  0xe7   :  { %2026 = vmatpush.bf16.msrb.mxu3 %v3133_v34  ;;  %v3378_v34 = vld [vmem:[%s5099_s1 + $0x7a4] sm:$0xf]  ;;  %v3085_v22 = vor.u32 %v3376_v54, %v3082_v25  ;;  %v3391_v54 = vmov 0.0  }
  0xe8   :  { %1988 = vmatpush.bf16.msrb.mxu0 %v2933_v45  ;;  %v1762_v17 = vpop.f32.mrf.mxu2  ;;  %v1738_v37 = vpop.f32.mrf.mxu0  ;;  %v2965_v45 = vor.u32 %v3346_v15, %v2962_v21  ;;  %v3093_v51 = vor.u32 %v3378_v34, %v3090_v36  ;;  %v3342_v30 = vld [vmem:[%s5099_s1 + $0x684] sm:$0xf] }
  0xe9   :  { %2001 = vmatpush.bf16.msrb.mxu1 %v2997_v46  ;;  %v1763_v27 = vadd.f32 %v1762_v17, %v1750_v3  ;;  %v1775_v32 = vpop.f32.mrf.mxu3  ;;  %v1751_v40 = vpop.f32.mrf.mxu1  ;;  %v3029_v46 = vor.u32 %v3362_v24, %v3026_v26 }
  0xea   :  { %2014 = vmatpush.bf16.msrb.mxu2 %v3061_v47  ;;  %v3328_v47 = vld [vmem:[%s5099_s1 + $0x614] sm:$0xf] }
  0xeb   :  { %2027 = vmatpush.bf16.msrb.mxu3 %v3125_v52  ;;  %v1776_v43 = vadd.f32 %v1775_v32, %v1763_v27  ;;  %v2954_v52 = vld [vmem:[%s5099_s1 + $0x698] sm:$0xf0]  ;;  %v2893_v55 = vor.u32 %v3328_v47, %v2890_v49 }
  0xec   :  { %1989 = vmatpush.bf16.msrb.mxu0 %v2925_v19  ;;  %v2957_v19 = vor.u32 %v3344_v50, %v2954_v52  ;;  %v2045_v52 = vlaneseq }
  0xed   :  { %2002 = vmatpush.bf16.msrb.mxu1 %v2989_v38  ;;  %v3021_v38 = vor.u32 %v3360_v53, %v3018_v18 }
  0xee   :  { %2015 = vmatpush.bf16.msrb.mxu2 %v3053_v20  ;;  %v3326_v20 = vld [vmem:[%s5099_s1 + $0x604] sm:$0xf]  ;;  %vm5061_vm0 = vcmp.lt.s32.totalorder %v2045_v52, 256 }
  0xef   :  { %2028 = vmatpush.bf16.msrb.mxu3 %v3117_v33  ;;  %v2946_v33 = vld [vmem:[%s5099_s1 + $0x688] sm:$0xf0]  ;;  %v2885_v59 = vor.u32 %v3326_v20, %v2882_v29  ;;  %2049 = vst.msk [vmem:[%s5102_s4] sm:$0x3] %vm5061_vm0, %v3391_v54 }
  0xf0   :  { %1990 = vmatpush.bf16.msrb.mxu0 %v2917_v60  ;;  %v1764_v58 = vpop.f32.mrf.mxu2  ;;  %v2949_v60 = vor.u32 %v3342_v30, %v2946_v33  ;;  %2050 = vst.msk [vmem:[%s5103_s5] sm:$0x3] %vm5061_vm0, %v3391_v54 }
  0xf1   :  { %2003 = vmatpush.bf16.msrb.mxu1 %v2981_v62  ;;  %v1777_v44 = vpop.f32.mrf.mxu3  ;;  %v3077_v62 = vor.u32 %v3374_v41, %v3074_v42 }
  0xf2   :  { %2016 = vmatpush.bf16.msrb.mxu2 %v3045_v63 }
  0xf3   :  { %2029 = vmatpush.bf16.msrb.mxu3 %v3109_v48 }
  0xf4   :  { %1991 = vmatpush.bf16.msrb.mxu0 %v2909_v11 }
  0xf5   :  { %2004 = vmatpush.bf16.msrb.mxu1 %v2973_v12 }
  0xf6   :  { %2017 = vmatpush.bf16.msrb.mxu2 %v3037_v13 }
  0xf7   :  { %2030 = vmatpush.bf16.msrb.mxu3 %v3101_v16 }
  0xf8   :  { %1992 = vmatpush.bf16.msrb.mxu0 %v2901_v39 }
  0xf9   :  { %2005 = vmatpush.bf16.msrb.mxu1 %v2965_v45 }
  0xfa   :  { %2018 = vmatpush.bf16.msrb.mxu2 %v3029_v46 }
  0xfb   :  { %2031 = vmatpush.bf16.msrb.mxu3 %v3093_v51 }
  0xfc   :  { %1993 = vmatpush.bf16.msrb.mxu0 %v2893_v55 }
  0xfd   :  { %2006 = vmatpush.bf16.msrb.mxu1 %v2957_v19 }
  0xfe   :  { %2019 = vmatpush.bf16.msrb.mxu2 %v3021_v38 }
  0xff   :  { %2032 = vmatpush.bf16.msrb.mxu3 %v3085_v22 }
 0x100   :  { %1994 = vmatpush.bf16.msrb.mxu0 %v2885_v59  ;;  %v1788_v63 = vpop.f32.mrf.mxu0 }
 0x101   :  { %2007 = vmatpush.bf16.msrb.mxu1 %v2949_v60  ;;  %v1789_v0 = vadd.f32 %v1788_v63, %v1776_v43  ;;  %v1801_v1 = vpop.f32.mrf.mxu1 }
 0x102   :  { %2020 = vmatpush.bf16.msrb.mxu2 %v3013_v61 }
 0x103   :  { %2033 = vmatpush.bf16.msrb.mxu3 %v3077_v62  ;;  %1995 = vmatmul.bf16.vlgmr.msrb.gmra.mxu0 %v4283_v23  ;;  %v1802_v2 = vadd.f32 %v1801_v1, %v1789_v0  ;;  %v284_v23 = vperm.slane %v4575_v6, 1 }
 0x104   :  { %2008 = vmatmul.bf16.vlgmr.msrb.gmra.mxu1 %v4296_v31 }
 0x105   :  { %2021 = vmatmul.bf16.vlgmr.msrb.gmra.mxu2 %v4294_v28 }
 0x106   :  { %2034 = vmatmul.bf16.vlgmr.msrb.gmra.mxu3 %v4304_v35 }
 0x108   :  { %v1814_v48 = vpop.f32.mrf.mxu2  ;;  %v1790_v5 = vpop.f32.mrf.mxu0 }
 0x109   :  { %v1815_v3 = vadd.f32 %v1814_v48, %v1802_v2  ;;  %v1827_v4 = vpop.f32.mrf.mxu3  ;;  %v1803_v7 = vpop.f32.mrf.mxu1 }
 0x10b   :  { %v5058_v8 = vadd.f32 %v1827_v4, %v1815_v3 }
 0x10d   :  { %v2077_v56 = vmul.f32 %v5058_v8, %v5058_v8  ;;  %v2052_v58 = vrot.slane %v5058_v8, 4 }
 0x10f   :  { %v2079_v41 = vrot.slane %v2077_v56, 4  ;;  %v2053_v59 = vadd.f32 %v2052_v58, %v5058_v8 }
 0x110   :  { %v1816_v10 = vpop.f32.mrf.mxu2 }
 0x111   :  { %v1829_v11 = vpop.f32.mrf.mxu3  ;;  %v2080_v0 = vadd.f32 %v2079_v41, %v2077_v56  ;;  %v2054_v2 = vrot.slane %v2053_v59, 2 }
 0x113   :  { %v2081_v5 = vrot.slane %v2080_v0, 2 }
 0x120   :  { %v1840_v31 = vpop.f32.mrf.mxu0 }
 0x121   :  { %v1841_v12 = vadd.f32 %v1840_v31, %v284_v23  ;;  %v1853_v28 = vpop.f32.mrf.mxu1  ;;  %v2055_v23 = vadd.f32 %v2054_v2, %v2053_v59 }
 0x123   :  { %v1854_v13 = vadd.f32 %v1853_v28, %v1841_v12 }
 0x128   :  { %v1866_v35 = vpop.f32.mrf.mxu2  ;;  %v1842_v16 = vpop.f32.mrf.mxu0 }
 0x129   :  { %v1867_v14 = vadd.f32 %v1866_v35, %v1854_v13  ;;  %v1879_v9 = vpop.f32.mrf.mxu3  ;;  %v1855_v17 = vpop.f32.mrf.mxu1  ;;  %v2082_v13 = vadd.f32 %v2081_v5, %v2080_v0 }
 0x12b   :  { %v1880_v15 = vadd.f32 %v1879_v9, %v1867_v14  ;;  %v2056_v9 = vrot.slane %v2055_v23, 1  ;;  %v2083_v16 = vrot.slane %v2082_v13, 1 }
 0x130   :  { %v1868_v21 = vpop.f32.mrf.mxu2 }
 0x131   :  { %v1881_v24 = vpop.f32.mrf.mxu3 }
 0x132   :  { %v2057_v24 = vadd.f32 %v2056_v9, %v2055_v23 }
 0x140   :  { %v1892_v26 = vpop.f32.mrf.mxu0 }
 0x141   :  { %v1905_v27 = vpop.f32.mrf.mxu1  ;;  %v1893_v45 = vadd.f32 %v1892_v26, %v1880_v15  ;;  %v2051_v26 = vld [vmem:[%s5102_s4] sm:$0x3] }
 0x143   :  { %v1906_v50 = vadd.f32 %v1905_v27, %v1893_v45 }
 0x148   :  { %v1918_v32 = vpop.f32.mrf.mxu2  ;;  %v1894_v36 = vpop.f32.mrf.mxu0 }
 0x149   :  { %v1931_v34 = vpop.f32.mrf.mxu3  ;;  %v1907_v37 = vpop.f32.mrf.mxu1  ;;  %v1919_v53 = vadd.f32 %v1918_v32, %v1906_v50 }
 0x14a   :  { %v2076_v37 = vld [vmem:[%s5103_s5] sm:$0x3] }
 0x14b   :  { %v1932_v19 = vadd.f32 %v1931_v34, %v1919_v53  ;;  %v2084_v34 = vadd.f32 %v2083_v16, %v2082_v13 }
 0x150   :  { %v1920_v39 = vpop.f32.mrf.mxu2 }
 0x151   :  { %v1933_v6 = vpop.f32.mrf.mxu3 }
 0x160   :  { %v1944_v40 = vpop.f32.mrf.mxu0 }
 0x161   :  { %v1957_v43 = vpop.f32.mrf.mxu1  ;;  %v1945_v38 = vadd.f32 %v1944_v40, %v1932_v19 }
 0x163   :  { %v1958_v20 = vadd.f32 %v1957_v43, %v1945_v38 }
 0x168   :  { %v1970_v46 = vpop.f32.mrf.mxu2  ;;  %v1946_v49 = vpop.f32.mrf.mxu0 }
 0x169   :  { %v1983_v47 = vpop.f32.mrf.mxu3  ;;  %v1959_v51 = vpop.f32.mrf.mxu1  ;;  %v1971_v29 = vadd.f32 %v1970_v46, %v1958_v20 }
 0x16b   :  { %v1984_v30 = vadd.f32 %v1983_v47, %v1971_v29 }
 0x170   :  { %v1972_v25 = vpop.f32.mrf.mxu2 }
 0x171   :  { %v1985_v55 = vpop.f32.mrf.mxu3 }
 0x180   :  { %v1996_v22 = vpop.f32.mrf.mxu0 }
 0x181   :  { %v2009_v33 = vpop.f32.mrf.mxu1  ;;  %v1997_v57 = vadd.f32 %v1996_v22, %v1984_v30 }
 0x183   :  { %v2010_v42 = vadd.f32 %v2009_v33, %v1997_v57 }
 0x188   :  { %v2022_v44 = vpop.f32.mrf.mxu2  ;;  %v1998_v62 = vpop.f32.mrf.mxu0 }
 0x189   :  { %v2023_v60 = vadd.f32 %v2022_v44, %v2010_v42  ;;  %v2035_v61 = vpop.f32.mrf.mxu3  ;;  %v2011_v63 = vpop.f32.mrf.mxu1 }
 0x18b   :  { %v2036_v1 = vadd.f32 %v2035_v61, %v2023_v60 }
 0x18d   :  { %v2039_v48 = vpack.c.bf16 %v2036_v1, %v5058_v8  ;;  %v2058_v3 = vrot.slane %v2036_v1, 4  ;;  %v2078_v4 = vmul.f32 %v2036_v1, %v2036_v1 }
 0x18f   :  { %2040 = vst [vmem:[%s5104_s3] sm:$0xff] %v2039_v48  ;;  %v2059_v7 = vadd.f32 %v2058_v3, %v2036_v1  ;;  %v2085_v10 = vrot.slane %v2078_v4, 4 }
 0x190   :  { %v2024_v11 = vpop.f32.mrf.mxu2 }
 0x191   :  { %v2060_v31 = vrot.slane %v2059_v7, 2  ;;  %v2086_v12 = vadd.f32 %v2085_v10, %v2078_v4  ;;  %v2037_v28 = vpop.f32.mrf.mxu3 }
 0x193   :  { %v2061_v35 = vadd.f32 %v2060_v31, %v2059_v7  ;;  %v2087_v14 = vrot.slane %v2086_v12, 2 }
 0x195   :  { %v2062_v15 = vrot.slane %v2061_v35, 1  ;;  %v2088_v8 = vadd.f32 %v2087_v14, %v2086_v12 }
 0x197   :  { %v2063_v17 = vadd.f32 %v2062_v15, %v2061_v35  ;;  %v2089_v21 = vrot.slane %v2088_v8, 1 }
 0x199   :  { %v2066_v27 = vrot.slane %v2063_v17, 7  ;;  %v2090_v32 = vadd.f32 %v2089_v21, %v2088_v8 }
 0x19b   :  { %v2068_v36 = vsel %vm2067_vm1, %v2057_v24, %v2066_v27  ;;  %v2093_v39 = vrot.slane %v2090_v32, 7 }
 0x19c   :  { %v2070_v6 = vadd.f32 %v2068_v36, %v2051_v26 }
 0x19d   :  { %v2094_v40 = vsel %vm2067_vm1, %v2084_v34, %v2093_v39 }
 0x19e   :  { %2075 = vst.msk [vmem:[%s5102_s4] sm:$0x3] %vm5061_vm0, %v2070_v6  ;;  %v2096_v43 = vadd.f32 %v2094_v40, %v2076_v37 }
 0x1a0   :  { %2097 = vst.msk [vmem:[%s5103_s5] sm:$0x3] %vm5061_vm0, %v2096_v43 }

// kernel: discriminator_forward.16
= control target key start
LH: loop header
LB: loop body
LE: loop exit
PB: predicated region body
PF: predicated region fallthrough
CT: control target
= control target key end

     0   :  { %s102_s0 = inlined_call_operand.vmem [shape: bf16[8,512], index: 0, kind: input, shape index: {}]   ;;  %s103_s1 = inlined_call_operand.vmem [shape: f32[1,512], index: 1, kind: input, shape index: {}]   ;;  %s104_s2 = inlined_call_operand.vmem [shape: f32[1,512], index: 2, kind: input, shape index: {}]   ;;  %s105_s3 = inlined_call_operand.vmem [shape: bf16[8,512], index: 3, kind: output, shape index: {}]  }
   0x1   :  { %v14_v0 = vld [vmem:[%s102_s0] sm:$0xff]  ;;  %v15_v7 = vld [vmem:[%s102_s0 + $0x8] sm:$0xff] }
   0x2   :  { %v20_v1 = vld [vmem:[%s103_s1] sm:$0xf]  ;;  %v16_v3 = vunpack.c.l.bf16 %v14_v0  ;;  %v17_v4 = vunpack.c.h.bf16 %v14_v0  ;;  %v18_v10 = vunpack.c.l.bf16 %v15_v7  ;;  %v19_v11 = vunpack.c.h.bf16 %v15_v7 }
   0x3   :  { %v34_v2 = vld [vmem:[%s104_s2] sm:$0xf]  ;;  %v22_v5 = vperm.slane %v20_v1, 0  ;;  %v23_v6 = vperm.slane %v20_v1, 1  ;;  %v24_v14 = vperm.slane %v20_v1, 2  ;;  %v25_v15 = vperm.slane %v20_v1, 3 }
   0x4   :  { %v36_v8 = vperm.slane %v34_v2, 0  ;;  %v37_v9 = vperm.slane %v34_v2, 1  ;;  %v38_v16 = vperm.slane %v34_v2, 2  ;;  %v39_v17 = vperm.slane %v34_v2, 3 }
   0x5   :  { %v30_v12 = vmul.f32 %v22_v5, %v16_v3  ;;  %v31_v13 = vmul.f32 %v23_v6, %v17_v4  ;;  %v32_v20 = vmul.f32 %v24_v14, %v18_v10  ;;  %v33_v21 = vmul.f32 %v25_v15, %v19_v11 }
   0x7   :  { %v44_v18 = vadd.f32 %v36_v8, %v30_v12  ;;  %v45_v19 = vadd.f32 %v37_v9, %v31_v13  ;;  %v46_v24 = vadd.f32 %v38_v16, %v32_v20  ;;  %v47_v25 = vadd.f32 %v39_v17, %v33_v21 }
   0x9   :  { %v48_v22 = vmul.f32 0.2, %v44_v18  ;;  %v49_v23 = vmul.f32 0.2, %v45_v19  ;;  %v50_v28 = vmul.f32 0.2, %v46_v24 }
   0xa   :  { %v51_v29 = vmul.f32 0.2, %v47_v25 }
   0xb   :  { %v52_v26 = vmax.f32 %v44_v18, %v48_v22  ;;  %v53_v27 = vmax.f32 %v45_v19, %v49_v23  ;;  %v54_v31 = vmax.f32 %v46_v24, %v50_v28 }
   0xc   :  { %v55_v32 = vmax.f32 %v47_v25, %v51_v29 }
   0xd   :  { %v56_v30 = vpack.c.bf16 %v53_v27, %v52_v26 }
   0xe   :  { %v57_v33 = vpack.c.bf16 %v55_v32, %v54_v31 }
   0xf   :  { %58 = vst [vmem:[%s105_s3] sm:$0xff] %v56_v30 }
  0x10   :  { %59 = vst [vmem:[%s105_s3 + $0x8] sm:$0xff] %v57_v33 }

// kernel: discriminator_forward.17
= control target key start
LH: loop header
LB: loop body
LE: loop exit
PB: predicated region body
PF: predicated region fallthrough
CT: control target
= control target key end

     0   :  { %vm194_vm3 = vcmask 1024   ;;  %s427_s1 = inlined_call_operand.vmem [shape: f32[512,1], index: 1, kind: input, shape index: {}]   ;;  %s428_s2 = inlined_call_operand.<no memory space> [shape: f32[1,1], index: 2, kind: input, shape index: {}]   ;;  %s429_s0 = inlined_call_operand.vmem [shape: f32[2,512], index: 0, kind: input, shape index: {}]   ;;  %s430_s3 = inlined_call_operand.vmem [shape: f32[2,1], index: 3, kind: output, shape index: {}]  }
   0x1   :  { %v64_v0 = vld [vmem:[%s427_s1 + $0x178] sm:$0xff]  ;;  %v63_v2 = vld [vmem:[%s427_s1 + $0x170] sm:$0xff]  ;;  %v62_v6 = vld [vmem:[%s427_s1 + $0x168] sm:$0xff]  ;;  %v8_v11 = vstv %s428_s2 }
   0x2   :  { %v32_v1 = vld [vmem:[%s427_s1 + $0x78] sm:$0xff]  ;;  %135 = vmatpush.msra.mxu2 %v64_v0  ;;  %v31_v4 = vld [vmem:[%s427_s1 + $0x70] sm:$0xff]  ;;  %v30_v8 = vld [vmem:[%s427_s1 + $0x68] sm:$0xff]  ;;  %9 = vst [vmem:[#allocation2] sm:$0x1] %v8_v11 }
   0x3   :  { %95 = vmatpush.msra.mxu0 %v32_v1  ;;  %v80_v3 = vld [vmem:[%s427_s1 + $0x1f8] sm:$0xff]  ;;  %v79_v7 = vld [vmem:[%s427_s1 + $0x1f0] sm:$0xff]  ;;  %v78_v10 = vld [vmem:[%s427_s1 + $0x1e8] sm:$0xff] }
   0x4   :  { %v48_v5 = vld [vmem:[%s427_s1 + $0xf8] sm:$0xff]  ;;  %155 = vmatpush.msra.mxu3 %v80_v3  ;;  %136 = vmatpush.msra.mxu2 %v63_v2  ;;  %v47_v9 = vld [vmem:[%s427_s1 + $0xf0] sm:$0xff]  ;;  %v61_v12 = vld [vmem:[%s427_s1 + $0x160] sm:$0xff] }
   0x5   :  { %115 = vmatpush.msra.mxu1 %v48_v5  ;;  %96 = vmatpush.msra.mxu0 %v31_v4  ;;  %v29_v13 = vld [vmem:[%s427_s1 + $0x60] sm:$0xff]  ;;  %v46_v14 = vld [vmem:[%s427_s1 + $0xe8] sm:$0xff]  ;;  %v60_v17 = vld [vmem:[%s427_s1 + $0x158] sm:$0xff] }
   0x6   :  { %156 = vmatpush.msra.mxu3 %v79_v7  ;;  %137 = vmatpush.msra.mxu2 %v62_v6  ;;  %v77_v15 = vld [vmem:[%s427_s1 + $0x1e0] sm:$0xff]  ;;  %v28_v18 = vld [vmem:[%s427_s1 + $0x58] sm:$0xff]  ;;  %v59_v21 = vld [vmem:[%s427_s1 + $0x150] sm:$0xff] }
   0x7   :  { %116 = vmatpush.msra.mxu1 %v47_v9  ;;  %97 = vmatpush.msra.mxu0 %v30_v8  ;;  %v45_v16 = vld [vmem:[%s427_s1 + $0xe0] sm:$0xff]  ;;  %v76_v19 = vld [vmem:[%s427_s1 + $0x1d8] sm:$0xff]  ;;  %v27_v22 = vld [vmem:[%s427_s1 + $0x50] sm:$0xff] }
   0x8   :  { %157 = vmatpush.msra.mxu3 %v78_v10  ;;  %138 = vmatpush.msra.mxu2 %v61_v12  ;;  %v44_v20 = vld [vmem:[%s427_s1 + $0xd8] sm:$0xff]  ;;  %v75_v23 = vld [vmem:[%s427_s1 + $0x1d0] sm:$0xff]  ;;  %v58_v25 = vld [vmem:[%s427_s1 + $0x148] sm:$0xff] }
   0x9   :  { %117 = vmatpush.msra.mxu1 %v46_v14  ;;  %98 = vmatpush.msra.mxu0 %v29_v13  ;;  %v43_v24 = vld [vmem:[%s427_s1 + $0xd0] sm:$0xff]  ;;  %v26_v26 = vld [vmem:[%s427_s1 + $0x48] sm:$0xff]  ;;  %v57_v29 = vld [vmem:[%s427_s1 + $0x140] sm:$0xff] }
   0xa   :  { %158 = vmatpush.msra.mxu3 %v77_v15  ;;  %139 = vmatpush.msra.mxu2 %v60_v17  ;;  %v74_v27 = vld [vmem:[%s427_s1 + $0x1c8] sm:$0xff]  ;;  %v25_v30 = vld [vmem:[%s427_s1 + $0x40] sm:$0xff]  ;;  %v56_v33 = vld [vmem:[%s427_s1 + $0x138] sm:$0xff] }
   0xb   :  { %118 = vmatpush.msra.mxu1 %v45_v16  ;;  %99 = vmatpush.msra.mxu0 %v28_v18  ;;  %v42_v28 = vld [vmem:[%s427_s1 + $0xc8] sm:$0xff]  ;;  %v73_v31 = vld [vmem:[%s427_s1 + $0x1c0] sm:$0xff]  ;;  %v24_v34 = vld [vmem:[%s427_s1 + $0x38] sm:$0xff] }
   0xc   :  { %159 = vmatpush.msra.mxu3 %v76_v19  ;;  %140 = vmatpush.msra.mxu2 %v59_v21  ;;  %v41_v32 = vld [vmem:[%s427_s1 + $0xc0] sm:$0xff]  ;;  %v72_v35 = vld [vmem:[%s427_s1 + $0x1b8] sm:$0xff]  ;;  %v55_v37 = vld [vmem:[%s427_s1 + $0x130] sm:$0xff] }
   0xd   :  { %119 = vmatpush.msra.mxu1 %v44_v20  ;;  %100 = vmatpush.msra.mxu0 %v27_v22  ;;  %v40_v36 = vld [vmem:[%s427_s1 + $0xb8] sm:$0xff]  ;;  %v23_v38 = vld [vmem:[%s427_s1 + $0x30] sm:$0xff]  ;;  %v54_v41 = vld [vmem:[%s427_s1 + $0x128] sm:$0xff] }
   0xe   :  { %160 = vmatpush.msra.mxu3 %v75_v23  ;;  %141 = vmatpush.msra.mxu2 %v58_v25  ;;  %v71_v39 = vld [vmem:[%s427_s1 + $0x1b0] sm:$0xff]  ;;  %v22_v42 = vld [vmem:[%s427_s1 + $0x28] sm:$0xff]  ;;  %v53_v45 = vld [vmem:[%s427_s1 + $0x120] sm:$0xff] }
   0xf   :  { %120 = vmatpush.msra.mxu1 %v43_v24  ;;  %101 = vmatpush.msra.mxu0 %v26_v26  ;;  %v39_v40 = vld [vmem:[%s427_s1 + $0xb0] sm:$0xff]  ;;  %v70_v43 = vld [vmem:[%s427_s1 + $0x1a8] sm:$0xff]  ;;  %v21_v46 = vld [vmem:[%s427_s1 + $0x20] sm:$0xff] }
  0x10   :  { %161 = vmatpush.msra.mxu3 %v74_v27  ;;  %142 = vmatpush.msra.mxu2 %v57_v29  ;;  %v38_v44 = vld [vmem:[%s427_s1 + $0xa8] sm:$0xff]  ;;  %v16_v47 = vld [vmem:[%s429_s0] sm:$0xff]  ;;  %v52_v50 = vld [vmem:[%s427_s1 + $0x118] sm:$0xff] }
  0x11   :  { %121 = vmatpush.msra.mxu1 %v42_v28  ;;  %102 = vmatpush.msra.mxu0 %v25_v30  ;;  %v69_v48 = vld [vmem:[%s427_s1 + $0x1a0] sm:$0xff]  ;;  %86 = vst [vmem:[#allocation1] ss:$4 sm:$0xff] %v16_v47  ;;  %v20_v51 = vld [vmem:[%s427_s1 + $0x18] sm:$0xff]  ;;  %v51_v54 = vld [vmem:[%s427_s1 + $0x110] sm:$0xff] }
  0x12   :  { %162 = vmatpush.msra.mxu3 %v73_v31  ;;  %143 = vmatpush.msra.mxu2 %v56_v33  ;;  %v37_v49 = vld [vmem:[%s427_s1 + $0xa0] sm:$0xff]  ;;  %v68_v52 = vld [vmem:[%s427_s1 + $0x198] sm:$0xff]  ;;  %v19_v55 = vld [vmem:[%s427_s1 + $0x10] sm:$0xff] }
  0x13   :  { %122 = vmatpush.msra.mxu1 %v41_v32  ;;  %103 = vmatpush.msra.mxu0 %v24_v34  ;;  %v36_v53 = vld [vmem:[%s427_s1 + $0x98] sm:$0xff]  ;;  %v67_v56 = vld [vmem:[%s427_s1 + $0x190] sm:$0xff]  ;;  %v50_v58 = vld [vmem:[%s427_s1 + $0x108] sm:$0xff] }
  0x14   :  { %163 = vmatpush.msra.mxu3 %v72_v35  ;;  %144 = vmatpush.msra.mxu2 %v55_v37  ;;  %v35_v57 = vld [vmem:[%s427_s1 + $0x90] sm:$0xff]  ;;  %v18_v59 = vld [vmem:[%s427_s1 + $0x8] sm:$0xff]  ;;  %v49_v62 = vld [vmem:[%s427_s1 + $0x100] sm:$0xff] }
  0x15   :  { %123 = vmatpush.msra.mxu1 %v40_v36  ;;  %104 = vmatpush.msra.mxu0 %v23_v38  ;;  %v66_v60 = vld [vmem:[%s427_s1 + $0x188] sm:$0xff]  ;;  %v17_v63 = vld [vmem:[%s427_s1] sm:$0xff] }
  0x16   :  { %164 = vmatpush.msra.mxu3 %v71_v39  ;;  %145 = vmatpush.msra.mxu2 %v54_v41  ;;  %v34_v61 = vld [vmem:[%s427_s1 + $0x88] sm:$0xff]  ;;  %v65_v1 = vld [vmem:[%s427_s1 + $0x180] sm:$0xff] }
  0x17   :  { %124 = vmatpush.msra.mxu1 %v39_v40  ;;  %105 = vmatpush.msra.mxu0 %v22_v42  ;;  %v33_v4 = vld [vmem:[%s427_s1 + $0x80] sm:$0xff]  ;;  %v201_v6 = vld [vmem:[#allocation2] ss:$0 sm:$0xff] }
  0x18   :  { %165 = vmatpush.msra.mxu3 %v70_v43  ;;  %146 = vmatpush.msra.mxu2 %v53_v45  ;;  %v89_v0 = vld.sshfl [vmem:[#allocation1 + $0x10] sm:$0xff pattern:$0x73625140]  ;;  %v87_v2 = vld.sshfl [vmem:[#allocation1] sm:$0xff pattern:$0x73625140] }
  0x19   :  { %125 = vmatpush.msra.mxu1 %v38_v44  ;;  %106 = vmatpush.msra.mxu0 %v21_v46  ;;  %v90_v3 = vld.sshfl [vmem:[#allocation1 + $0x18] sm:$0xff pattern:$0x73625140]  ;;  %v88_v5 = vld.sshfl [vmem:[#allocation1 + $0x8] sm:$0xff pattern:$0x73625140] }
  0x1a   :  { %166 = vmatpush.msra.mxu3 %v69_v48  ;;  %147 = vmatpush.msra.mxu2 %v52_v50 }
  0x1b   :  { %126 = vmatpush.msra.mxu1 %v37_v49  ;;  %107 = vmatpush.msra.mxu0 %v20_v51 }
  0x1c   :  { %167 = vmatpush.msra.mxu3 %v68_v52  ;;  %148 = vmatpush.msra.mxu2 %v51_v54 }
  0x1d   :  { %127 = vmatpush.msra.mxu1 %v36_v53  ;;  %108 = vmatpush.msra.mxu0 %v19_v55 }
  0x1e   :  { %168 = vmatpush.msra.mxu3 %v67_v56  ;;  %149 = vmatpush.msra.mxu2 %v50_v58 }
  0x1f   :  { %128 = vmatpush.msra.mxu1 %v35_v57  ;;  %109 = vmatpush.msra.mxu0 %v18_v59 }
  0x20   :  { %169 = vmatpush.msra.mxu3 %v66_v60  ;;  %150 = vmatpush.msra.mxu2 %v49_v62 }
  0x21   :  { %129 = vmatpush.msra.mxu1 %v34_v61  ;;  %110 = vmatpush.msra.mxu0 %v17_v63 }
  0x22   :  { %151 = vmatmul.f32.vlgmr.msra.gmra.mxu2 %v89_v0  ;;  %170 = vmatpush.msra.mxu3 %v65_v1 }
  0x23   :  { %111 = vmatmul.f32.vlgmr.msra.gmra.mxu0 %v87_v2  ;;  %171 = vmatmul.f32.vlgmr.msra.gmra.mxu3 %v90_v3 }
  0x24   :  { %130 = vmatpush.msra.mxu1 %v33_v4 }
  0x25   :  { %131 = vmatmul.f32.vlgmr.msra.gmra.mxu1 %v88_v5 }
  0xa0   :  { %v112_v7 = vpop.f32.mrf.mxu0 }
  0xa1   :  { %v113_v8 = vadd.f32 %v201_v6, %v112_v7 }
  0xa2   :  { %v132_v9 = vpop.f32.mrf.mxu1 }
  0xa3   :  { %v133_v10 = vadd.f32 %v132_v9, %v113_v8 }
  0xa5   :  { %v152_v11 = vpop.f32.mrf.mxu2 }
  0xa6   :  { %v153_v12 = vadd.f32 %v152_v11, %v133_v10  ;;  %v172_v13 = vpop.f32.mrf.mxu3 }
  0xa8   :  { %v173_v14 = vadd.f32 %v172_v13, %v153_v12 }
  0xaa   :  { %v200_v15 = vmul.f32 -1.442695, %v173_v14 }
  0xac   :  { %202 = vpow2.f32 %v200_v15 }
  0xb2   :  { %v203_v16 = vpop.eup %202 }
  0xb3   :  { %v178_v17 = vadd.f32 1.0, %v203_v16 }
  0xb5   :  { %204 = vrcp.f32 %v178_v17  ;;  %v190_v21 = vand.u32 2147483648, %v178_v17  ;;  %v188_v23 = vand.u32 2147483647, %v178_v17  ;;  %vm184_vm1 = vweird.f32 %v178_v17 }
  0xb7   :  { %v191_v25 = vor.u32 1.1754944e-38, %v190_v21  ;;  %vm189_vm4 = vcmp.eq.f32.partialorder %v188_v23, 8.507059e+37 }
  0xbb   :  { %v205_v18 = vpop.eup %204 }
  0xbc   :  { %v180_v19 = vmul.f32 %v205_v18, %v178_v17  ;;  %vm185_vm0 = vweird.f32 %v205_v18 }
  0xbd   :  { %vm186_vm2 = vmor %vm184_vm1, %vm185_vm0 }
  0xbe   :  { %v181_v20 = vsub.f32 1.0, %v180_v19 }
  0xc0   :  { %v182_v22 = vmul.f32 %v205_v18, %v181_v20 }
  0xc2   :  { %v183_v24 = vadd.f32 %v205_v18, %v182_v22 }
  0xc4   :  { %v187_v26 = vsel %vm186_vm2, %v205_v18, %v183_v24 }
  0xc5   :  { %v192_v27 = vsel %vm189_vm4, %v191_v25, %v187_v26 }
  0xc6   :  { %195 = vst.msk [vmem:[%s430_s3] sm:$0x3] %vm194_vm3, %v192_v27 }

// kernel: discriminator_forward.15
= control target key start
LH: loop header
LB: loop body
LE: loop exit
PB: predicated region body
PF: predicated region fallthrough
CT: control target
= control target key end

     0   :  { %vm8009_vm1 = vcmask 1040384   ;;  %vm8011_vm2 = vcmask 1042434   ;;  %vm8013_vm3 = vcmask 1041408   ;;  %s19771_s1 = inlined_call_operand.vmem [shape: bf16[4096,512], index: 1, kind: input, shape index: {}]   ;;  %s19772_s0 = inlined_call_operand.vmem [shape: bf16[8,4096], index: 0, kind: input, shape index: {}]   ;;  %s19773_s2 = inlined_call_operand.vmem [shape: f32[1,512], index: 2, kind: input, shape index: {}]   ;;  %s19774_s3 = inlined_call_operand.vmem [shape: bf16[8,512], index: 3, kind: output, shape index: {0}]   ;;  %s19775_s4 = inlined_call_operand.vmem [shape: f32[1,512], index: 4, kind: output, shape index: {1}]   ;;  %s19776_s5 = inlined_call_operand.vmem [shape: f32[1,512], index: 5, kind: output, shape index: {2}]  }
   0x1   :  { %v8190_v0 = vld [vmem:[%s19771_s1 + $0xe0] sm:$0xf]  ;;  %v12202_v1 = vld [vmem:[%s19771_s1 + $0xec] sm:$0xf0] }
   0x2   :  { %v8318_v2 = vld [vmem:[%s19771_s1 + $0x1e0] sm:$0xf]  ;;  %v8191_v3 = vor.u32 %v12202_v1, %v8190_v0  ;;  %v12234_v4 = vld [vmem:[%s19771_s1 + $0x1ec] sm:$0xf0] }
   0x3   :  { %v8446_v5 = vld [vmem:[%s19771_s1 + $0x2e0] sm:$0xf]  ;;  %v12266_v6 = vld [vmem:[%s19771_s1 + $0x2ec] sm:$0xf0]  ;;  %v8319_v7 = vor.u32 %v12234_v4, %v8318_v2 }
   0x4   :  { %v8447_v8 = vor.u32 %v12266_v6, %v8446_v5  ;;  %v8574_v9 = vld [vmem:[%s19771_s1 + $0x3e0] sm:$0xf]  ;;  %v12298_v10 = vld [vmem:[%s19771_s1 + $0x3ec] sm:$0xf0]  ;;  %6299 = vmatpush.bf16.msra.mxu0 %v8191_v3 }
   0x5   :  { %v8174_v11 = vld [vmem:[%s19771_s1 + $0xc0] sm:$0xf]  ;;  %v8575_v12 = vor.u32 %v12298_v10, %v8574_v9  ;;  %v12198_v13 = vld [vmem:[%s19771_s1 + $0xcc] sm:$0xf0]  ;;  %6312 = vmatpush.bf16.msra.mxu1 %v8319_v7 }
   0x6   :  { %v8302_v14 = vld [vmem:[%s19771_s1 + $0x1c0] sm:$0xf]  ;;  %v12230_v15 = vld [vmem:[%s19771_s1 + $0x1cc] sm:$0xf0]  ;;  %6325 = vmatpush.bf16.msra.mxu2 %v8447_v8  ;;  %v8175_v16 = vor.u32 %v12198_v13, %v8174_v11 }
   0x7   :  { %v8303_v17 = vor.u32 %v12230_v15, %v8302_v14  ;;  %v8430_v18 = vld [vmem:[%s19771_s1 + $0x2c0] sm:$0xf]  ;;  %v12262_v19 = vld [vmem:[%s19771_s1 + $0x2cc] sm:$0xf0]  ;;  %6338 = vmatpush.bf16.msra.mxu3 %v8575_v12 }
   0x8   :  { %v8558_v20 = vld [vmem:[%s19771_s1 + $0x3c0] sm:$0xf]  ;;  %v8431_v21 = vor.u32 %v12262_v19, %v8430_v18  ;;  %v12294_v22 = vld [vmem:[%s19771_s1 + $0x3cc] sm:$0xf0]  ;;  %6300 = vmatpush.bf16.msra.mxu0 %v8175_v16 }
   0x9   :  { %v8158_v23 = vld [vmem:[%s19771_s1 + $0xa0] sm:$0xf]  ;;  %v12194_v24 = vld [vmem:[%s19771_s1 + $0xac] sm:$0xf0]  ;;  %v8559_v25 = vor.u32 %v12294_v22, %v8558_v20  ;;  %6313 = vmatpush.bf16.msra.mxu1 %v8303_v17 }
   0xa   :  { %v8286_v26 = vld [vmem:[%s19771_s1 + $0x1a0] sm:$0xf]  ;;  %v12226_v27 = vld [vmem:[%s19771_s1 + $0x1ac] sm:$0xf0]  ;;  %v8159_v29 = vor.u32 %v12194_v24, %v8158_v23  ;;  %6326 = vmatpush.bf16.msra.mxu2 %v8431_v21 }
   0xb   :  { %v8414_v28 = vld [vmem:[%s19771_s1 + $0x2a0] sm:$0xf]  ;;  %v12258_v30 = vld [vmem:[%s19771_s1 + $0x2ac] sm:$0xf0]  ;;  %v8287_v33 = vor.u32 %v12226_v27, %v8286_v26  ;;  %6339 = vmatpush.bf16.msra.mxu3 %v8559_v25 }
   0xc   :  { %v8542_v31 = vld [vmem:[%s19771_s1 + $0x3a0] sm:$0xf]  ;;  %v12290_v32 = vld [vmem:[%s19771_s1 + $0x3ac] sm:$0xf0]  ;;  %v8415_v34 = vor.u32 %v12258_v30, %v8414_v28  ;;  %6301 = vmatpush.bf16.msra.mxu0 %v8159_v29 }
   0xd   :  { %v8142_v35 = vld [vmem:[%s19771_s1 + $0x80] sm:$0xf]  ;;  %v12190_v36 = vld [vmem:[%s19771_s1 + $0x8c] sm:$0xf0]  ;;  %v8543_v38 = vor.u32 %v12290_v32, %v8542_v31  ;;  %6314 = vmatpush.bf16.msra.mxu1 %v8287_v33 }
   0xe   :  { %v8270_v37 = vld [vmem:[%s19771_s1 + $0x180] sm:$0xf]  ;;  %v12222_v39 = vld [vmem:[%s19771_s1 + $0x18c] sm:$0xf0]  ;;  %v8143_v44 = vor.u32 %v12190_v36, %v8142_v35  ;;  %6327 = vmatpush.bf16.msra.mxu2 %v8415_v34 }
   0xf   :  { %v8398_v40 = vld [vmem:[%s19771_s1 + $0x280] sm:$0xf]  ;;  %v12254_v41 = vld [vmem:[%s19771_s1 + $0x28c] sm:$0xf0]  ;;  %v8271_v45 = vor.u32 %v12222_v39, %v8270_v37  ;;  %6340 = vmatpush.bf16.msra.mxu3 %v8543_v38 }
  0x10   :  { %v8526_v42 = vld [vmem:[%s19771_s1 + $0x380] sm:$0xf]  ;;  %v12286_v43 = vld [vmem:[%s19771_s1 + $0x38c] sm:$0xf0]  ;;  %v8399_v46 = vor.u32 %v12254_v41, %v8398_v40  ;;  %6302 = vmatpush.bf16.msra.mxu0 %v8143_v44 }
  0x11   :  { %v8126_v47 = vld [vmem:[%s19771_s1 + $0x60] sm:$0xf]  ;;  %v12186_v48 = vld [vmem:[%s19771_s1 + $0x6c] sm:$0xf0]  ;;  %v8527_v50 = vor.u32 %v12286_v43, %v8526_v42  ;;  %6315 = vmatpush.bf16.msra.mxu1 %v8271_v45 }
  0x12   :  { %v8254_v49 = vld [vmem:[%s19771_s1 + $0x160] sm:$0xf]  ;;  %v12218_v51 = vld [vmem:[%s19771_s1 + $0x16c] sm:$0xf0]  ;;  %v8127_v56 = vor.u32 %v12186_v48, %v8126_v47  ;;  %6328 = vmatpush.bf16.msra.mxu2 %v8399_v46 }
  0x13   :  { %v8382_v52 = vld [vmem:[%s19771_s1 + $0x260] sm:$0xf]  ;;  %v12250_v53 = vld [vmem:[%s19771_s1 + $0x26c] sm:$0xf0]  ;;  %v8255_v57 = vor.u32 %v12218_v51, %v8254_v49  ;;  %6341 = vmatpush.bf16.msra.mxu3 %v8527_v50 }
  0x14   :  { %v8510_v54 = vld [vmem:[%s19771_s1 + $0x360] sm:$0xf]  ;;  %v12282_v55 = vld [vmem:[%s19771_s1 + $0x36c] sm:$0xf0]  ;;  %v8383_v58 = vor.u32 %v12250_v53, %v8382_v52  ;;  %6303 = vmatpush.bf16.msra.mxu0 %v8127_v56 }
  0x15   :  { %v8110_v59 = vld [vmem:[%s19771_s1 + $0x40] sm:$0xf]  ;;  %v12182_v60 = vld [vmem:[%s19771_s1 + $0x4c] sm:$0xf0]  ;;  %v8511_v62 = vor.u32 %v12282_v55, %v8510_v54  ;;  %6316 = vmatpush.bf16.msra.mxu1 %v8255_v57 }
  0x16   :  { %v8238_v61 = vld [vmem:[%s19771_s1 + $0x140] sm:$0xf]  ;;  %v12214_v63 = vld [vmem:[%s19771_s1 + $0x14c] sm:$0xf0]  ;;  %v8111_v4 = vor.u32 %v12182_v60, %v8110_v59  ;;  %6329 = vmatpush.bf16.msra.mxu2 %v8383_v58 }
  0x17   :  { %v8366_v0 = vld [vmem:[%s19771_s1 + $0x240] sm:$0xf]  ;;  %v12246_v1 = vld [vmem:[%s19771_s1 + $0x24c] sm:$0xf0]  ;;  %v8239_v5 = vor.u32 %v12214_v63, %v8238_v61  ;;  %6342 = vmatpush.bf16.msra.mxu3 %v8511_v62 }
  0x18   :  { %v8494_v2 = vld [vmem:[%s19771_s1 + $0x340] sm:$0xf]  ;;  %v12278_v3 = vld [vmem:[%s19771_s1 + $0x34c] sm:$0xf0]  ;;  %v8367_v6 = vor.u32 %v12246_v1, %v8366_v0  ;;  %6304 = vmatpush.bf16.msra.mxu0 %v8111_v4 }
  0x19   :  { %v8094_v7 = vld [vmem:[%s19771_s1 + $0x20] sm:$0xf]  ;;  %v12178_v8 = vld [vmem:[%s19771_s1 + $0x2c] sm:$0xf0]  ;;  %v8495_v10 = vor.u32 %v12278_v3, %v8494_v2  ;;  %6317 = vmatpush.bf16.msra.mxu1 %v8239_v5  ;;  %v18_v2 = vld [vmem:[%s19772_s0 + $0x8] sm:$0xff] }
  0x1a   :  { %v8222_v9 = vld [vmem:[%s19771_s1 + $0x120] sm:$0xf]  ;;  %v12210_v11 = vld [vmem:[%s19771_s1 + $0x12c] sm:$0xf0]  ;;  %v8095_v16 = vor.u32 %v12178_v8, %v8094_v7  ;;  %6330 = vmatpush.bf16.msra.mxu2 %v8367_v6  ;;  %v1085_v8 = vunpack.c.l.b16 %v18_v2 }
  0x1b   :  { %v8350_v12 = vld [vmem:[%s19771_s1 + $0x220] sm:$0xf]  ;;  %v12242_v13 = vld [vmem:[%s19771_s1 + $0x22c] sm:$0xf0]  ;;  %v8223_v19 = vor.u32 %v12210_v11, %v8222_v9  ;;  %6343 = vmatpush.bf16.msra.mxu3 %v8495_v10  ;;  %v1086_v10 = vunpack.c.h.b16 %v18_v2 }
  0x1c   :  { %v8478_v14 = vld [vmem:[%s19771_s1 + $0x320] sm:$0xf]  ;;  %v12274_v15 = vld [vmem:[%s19771_s1 + $0x32c] sm:$0xf0]  ;;  %v8351_v20 = vor.u32 %v12242_v13, %v8350_v12  ;;  %6305 = vmatpush.bf16.msra.mxu0 %v8095_v16 }
  0x1d   :  { %v8078_v17 = vld [vmem:[%s19771_s1] sm:$0xf]  ;;  %v12174_v18 = vld [vmem:[%s19771_s1 + $0xc] sm:$0xf0]  ;;  %v8479_v24 = vor.u32 %v12274_v15, %v8478_v14  ;;  %6318 = vmatpush.bf16.msra.mxu1 %v8223_v19 }
  0x1e   :  { %v8206_v21 = vld [vmem:[%s19771_s1 + $0x100] sm:$0xf]  ;;  %v12206_v22 = vld [vmem:[%s19771_s1 + $0x10c] sm:$0xf0]  ;;  %v8079_v31 = vor.u32 %v12174_v18, %v8078_v17  ;;  %6331 = vmatpush.bf16.msra.mxu2 %v8351_v20  ;;  %v13525_v18 = vpack.c.b16 %v1085_v8, %v1085_v8  ;;  %v13529_v20 = vpack.c.b16 %v1086_v10, %v1086_v10 }
  0x1f   :  { %v8334_v23 = vld [vmem:[%s19771_s1 + $0x200] sm:$0xf]  ;;  %v12238_v25 = vld [vmem:[%s19771_s1 + $0x20c] sm:$0xf0]  ;;  %v8207_v35 = vor.u32 %v12206_v22, %v8206_v21  ;;  %6344 = vmatpush.bf16.msra.mxu3 %v8479_v24 }
  0x20   :  { %v8462_v26 = vld [vmem:[%s19771_s1 + $0x300] sm:$0xf]  ;;  %v12270_v27 = vld [vmem:[%s19771_s1 + $0x30c] sm:$0xf0]  ;;  %v8335_v36 = vor.u32 %v12238_v25, %v8334_v23  ;;  %6306 = vmatpush.bf16.msra.mxu0 %v8079_v31 }
  0x21   :  { %v8702_v28 = vld [vmem:[%s19771_s1 + $0x4e0] sm:$0xf]  ;;  %v12330_v29 = vld [vmem:[%s19771_s1 + $0x4ec] sm:$0xf0]  ;;  %v8463_v39 = vor.u32 %v12270_v27, %v8462_v26  ;;  %6319 = vmatpush.bf16.msra.mxu1 %v8207_v35 }
  0x22   :  { %v8830_v30 = vld [vmem:[%s19771_s1 + $0x5e0] sm:$0xf]  ;;  %v12362_v32 = vld [vmem:[%s19771_s1 + $0x5ec] sm:$0xf0]  ;;  %v8703_v40 = vor.u32 %v12330_v29, %v8702_v28  ;;  %6332 = vmatpush.bf16.msra.mxu2 %v8335_v36 }
  0x23   :  { %v8958_v33 = vld [vmem:[%s19771_s1 + $0x6e0] sm:$0xf]  ;;  %v12394_v34 = vld [vmem:[%s19771_s1 + $0x6ec] sm:$0xf0]  ;;  %v8831_v41 = vor.u32 %v12362_v32, %v8830_v30  ;;  %6345 = vmatpush.bf16.msra.mxu3 %v8463_v39 }
  0x24   :  { %v9086_v37 = vld [vmem:[%s19771_s1 + $0x7e0] sm:$0xf]  ;;  %v12426_v38 = vld [vmem:[%s19771_s1 + $0x7ec] sm:$0xf0]  ;;  %v8959_v42 = vor.u32 %v12394_v34, %v8958_v33  ;;  %6351 = vmatpush.bf16.msrb.mxu0 %v8703_v40 }
  0x25   :  { %v8686_v43 = vld [vmem:[%s19771_s1 + $0x4c0] sm:$0xf]  ;;  %v12326_v44 = vld [vmem:[%s19771_s1 + $0x4cc] sm:$0xf0]  ;;  %v9087_v46 = vor.u32 %v12426_v38, %v9086_v37  ;;  %6364 = vmatpush.bf16.msrb.mxu1 %v8831_v41  ;;  %6333 = vmatmul.bf16.vlgmr.msra.gmra.mxu2 %v13525_v18 }
  0x26   :  { %v8814_v45 = vld [vmem:[%s19771_s1 + $0x5c0] sm:$0xf]  ;;  %v12358_v47 = vld [vmem:[%s19771_s1 + $0x5cc] sm:$0xf0]  ;;  %v8687_v52 = vor.u32 %v12326_v44, %v8686_v43  ;;  %6377 = vmatpush.bf16.msrb.mxu2 %v8959_v42  ;;  %6346 = vmatmul.bf16.vlgmr.msra.gmra.mxu3 %v13529_v20 }
  0x27   :  { %v8942_v48 = vld [vmem:[%s19771_s1 + $0x6c0] sm:$0xf]  ;;  %v12390_v49 = vld [vmem:[%s19771_s1 + $0x6cc] sm:$0xf0]  ;;  %v8815_v54 = vor.u32 %v12358_v47, %v8814_v45  ;;  %6390 = vmatpush.bf16.msrb.mxu3 %v9087_v46 }
  0x28   :  { %v9070_v50 = vld [vmem:[%s19771_s1 + $0x7c0] sm:$0xf]  ;;  %v12422_v51 = vld [vmem:[%s19771_s1 + $0x7cc] sm:$0xf0]  ;;  %v8943_v55 = vor.u32 %v12390_v49, %v8942_v48  ;;  %6352 = vmatpush.bf16.msrb.mxu0 %v8687_v52 }
  0x29   :  { %v8670_v53 = vld [vmem:[%s19771_s1 + $0x4a0] sm:$0xf]  ;;  %v12322_v56 = vld [vmem:[%s19771_s1 + $0x4ac] sm:$0xf0]  ;;  %v9071_v59 = vor.u32 %v12422_v51, %v9070_v50  ;;  %6365 = vmatpush.bf16.msrb.mxu1 %v8815_v54 }
  0x2a   :  { %v8798_v57 = vld [vmem:[%s19771_s1 + $0x5a0] sm:$0xf]  ;;  %v12354_v58 = vld [vmem:[%s19771_s1 + $0x5ac] sm:$0xf0]  ;;  %v8671_v0 = vor.u32 %v12322_v56, %v8670_v53  ;;  %6378 = vmatpush.bf16.msrb.mxu2 %v8943_v55 }
  0x2b   :  { %v8926_v60 = vld [vmem:[%s19771_s1 + $0x6a0] sm:$0xf]  ;;  %v12386_v61 = vld [vmem:[%s19771_s1 + $0x6ac] sm:$0xf0]  ;;  %v8799_v1 = vor.u32 %v12354_v58, %v8798_v57  ;;  %6391 = vmatpush.bf16.msrb.mxu3 %v9071_v59 }
  0x2c   :  { %v9054_v62 = vld [vmem:[%s19771_s1 + $0x7a0] sm:$0xf]  ;;  %v12418_v63 = vld [vmem:[%s19771_s1 + $0x7ac] sm:$0xf0]  ;;  %v8927_v4 = vor.u32 %v12386_v61, %v8926_v60  ;;  %6353 = vmatpush.bf16.msrb.mxu0 %v8671_v0 }
  0x2d   :  { %v17_v3 = vld [vmem:[%s19772_s0] sm:$0xff]  ;;  %v12318_v6 = vld [vmem:[%s19771_s1 + $0x48c] sm:$0xf0]  ;;  %v9055_v11 = vor.u32 %v12418_v63, %v9054_v62  ;;  %6366 = vmatpush.bf16.msrb.mxu1 %v8799_v1 }
  0x2e   :  { %v8654_v5 = vld [vmem:[%s19771_s1 + $0x480] sm:$0xf]  ;;  %v1083_v9 = vunpack.c.l.b16 %v17_v3  ;;  %v12350_v12 = vld [vmem:[%s19771_s1 + $0x58c] sm:$0xf0]  ;;  %v1084_v15 = vunpack.c.h.b16 %v17_v3  ;;  %6379 = vmatpush.bf16.msrb.mxu2 %v8927_v4  ;;  %v20_v3 = vld [vmem:[%s19772_s0 + $0x18] sm:$0xff] }
  0x2f   :  { %v8782_v7 = vld [vmem:[%s19771_s1 + $0x580] sm:$0xf]  ;;  %v12382_v14 = vld [vmem:[%s19771_s1 + $0x68c] sm:$0xf0]  ;;  %v8655_v21 = vor.u32 %v12318_v6, %v8654_v5  ;;  %6392 = vmatpush.bf16.msrb.mxu3 %v9055_v11 }
  0x30   :  { %v8910_v13 = vld [vmem:[%s19771_s1 + $0x680] sm:$0xf]  ;;  %v12414_v17 = vld [vmem:[%s19771_s1 + $0x78c] sm:$0xf0]  ;;  %v13527_v19 = vpack.c.b16 %v1083_v9, %v1083_v9  ;;  %v13531_v22 = vpack.c.b16 %v1084_v15, %v1084_v15  ;;  %v8783_v23 = vor.u32 %v12350_v12, %v8782_v7  ;;  %v1089_v15 = vunpack.c.l.b16 %v20_v3 }
  0x31   :  { %v9038_v16 = vld [vmem:[%s19771_s1 + $0x780] sm:$0xf]  ;;  %v8911_v24 = vor.u32 %v12382_v14, %v8910_v13  ;;  %v12314_v26 = vld [vmem:[%s19771_s1 + $0x46c] sm:$0xf0]  ;;  %6354 = vmatpush.bf16.msrb.mxu0 %v8655_v21 }
  0x32   :  { %v8638_v25 = vld [vmem:[%s19771_s1 + $0x460] sm:$0xf]  ;;  %v9039_v28 = vor.u32 %v12414_v17, %v9038_v16  ;;  %v12346_v29 = vld [vmem:[%s19771_s1 + $0x56c] sm:$0xf0]  ;;  %6307 = vmatmul.bf16.vlgmr.msra.gmra.mxu0 %v13527_v19  ;;  %6320 = vmatmul.bf16.vlgmr.msra.gmra.mxu1 %v13531_v22 }
  0x33   :  { %v8766_v27 = vld [vmem:[%s19771_s1 + $0x560] sm:$0xf]  ;;  %v12378_v31 = vld [vmem:[%s19771_s1 + $0x66c] sm:$0xf0]  ;;  %v8639_v34 = vor.u32 %v12314_v26, %v8638_v25  ;;  %6367 = vmatpush.bf16.msrb.mxu1 %v8783_v23  ;;  %6380 = vmatpush.bf16.msrb.mxu2 %v8911_v24  ;;  %v1090_v25 = vunpack.c.h.b16 %v20_v3 }
  0x34   :  { %v8894_v30 = vld [vmem:[%s19771_s1 + $0x660] sm:$0xf]  ;;  %v12410_v33 = vld [vmem:[%s19771_s1 + $0x76c] sm:$0xf0]  ;;  %v8767_v35 = vor.u32 %v12346_v29, %v8766_v27  ;;  %6393 = vmatpush.bf16.msrb.mxu3 %v9039_v28 }
  0x35   :  { %v9022_v32 = vld [vmem:[%s19771_s1 + $0x760] sm:$0xf]  ;;  %v8895_v36 = vor.u32 %v12378_v31, %v8894_v30  ;;  %v12310_v38 = vld [vmem:[%s19771_s1 + $0x44c] sm:$0xf0]  ;;  %6355 = vmatpush.bf16.msrb.mxu0 %v8639_v34 }
  0x36   :  { %v8622_v37 = vld [vmem:[%s19771_s1 + $0x440] sm:$0xf]  ;;  %v9023_v40 = vor.u32 %v12410_v33, %v9022_v32  ;;  %v12342_v41 = vld [vmem:[%s19771_s1 + $0x54c] sm:$0xf0] }
  0x37   :  { %v8750_v39 = vld [vmem:[%s19771_s1 + $0x540] sm:$0xf]  ;;  %v12374_v43 = vld [vmem:[%s19771_s1 + $0x64c] sm:$0xf0]  ;;  %v8623_v46 = vor.u32 %v12310_v38, %v8622_v37  ;;  %6368 = vmatpush.bf16.msrb.mxu1 %v8767_v35  ;;  %6381 = vmatpush.bf16.msrb.mxu2 %v8895_v36  ;;  %v13681_v38 = vpack.c.b16 %v1089_v15, %v1089_v15 }
  0x38   :  { %v8878_v42 = vld [vmem:[%s19771_s1 + $0x640] sm:$0xf]  ;;  %v12406_v45 = vld [vmem:[%s19771_s1 + $0x74c] sm:$0xf0]  ;;  %v8751_v47 = vor.u32 %v12342_v41, %v8750_v39  ;;  %6394 = vmatpush.bf16.msrb.mxu3 %v9023_v40 }
  0x39   :  { %v9006_v44 = vld [vmem:[%s19771_s1 + $0x740] sm:$0xf]  ;;  %v8879_v48 = vor.u32 %v12374_v43, %v8878_v42  ;;  %v12306_v50 = vld [vmem:[%s19771_s1 + $0x42c] sm:$0xf0]  ;;  %6356 = vmatpush.bf16.msrb.mxu0 %v8623_v46  ;;  %v13691_v42 = vpack.c.b16 %v1090_v25, %v1090_v25 }
  0x3a   :  { %v8606_v49 = vld [vmem:[%s19771_s1 + $0x420] sm:$0xf]  ;;  %v9007_v52 = vor.u32 %v12406_v45, %v9006_v44  ;;  %v12338_v53 = vld [vmem:[%s19771_s1 + $0x52c] sm:$0xf0] }
  0x3b   :  { %v8734_v51 = vld [vmem:[%s19771_s1 + $0x520] sm:$0xf]  ;;  %v12370_v55 = vld [vmem:[%s19771_s1 + $0x62c] sm:$0xf0]  ;;  %v8607_v59 = vor.u32 %v12306_v50, %v8606_v49  ;;  %6369 = vmatpush.bf16.msrb.mxu1 %v8751_v47  ;;  %6382 = vmatpush.bf16.msrb.mxu2 %v8879_v48 }
  0x3c   :  { %v8862_v54 = vld [vmem:[%s19771_s1 + $0x620] sm:$0xf]  ;;  %v12402_v57 = vld [vmem:[%s19771_s1 + $0x72c] sm:$0xf0]  ;;  %v8735_v63 = vor.u32 %v12338_v53, %v8734_v51  ;;  %6395 = vmatpush.bf16.msrb.mxu3 %v9007_v52 }
  0x3d   :  { %v8990_v56 = vld [vmem:[%s19771_s1 + $0x720] sm:$0xf]  ;;  %v12302_v60 = vld [vmem:[%s19771_s1 + $0x40c] sm:$0xf0]  ;;  %v8863_v0 = vor.u32 %v12370_v55, %v8862_v54  ;;  %6357 = vmatpush.bf16.msrb.mxu0 %v8607_v59 }
  0x3e   :  { %v8590_v58 = vld [vmem:[%s19771_s1 + $0x400] sm:$0xf]  ;;  %v12334_v62 = vld [vmem:[%s19771_s1 + $0x50c] sm:$0xf0]  ;;  %v8991_v4 = vor.u32 %v12402_v57, %v8990_v56 }
  0x3f   :  { %v8718_v61 = vld [vmem:[%s19771_s1 + $0x500] sm:$0xf]  ;;  %v12366_v2 = vld [vmem:[%s19771_s1 + $0x60c] sm:$0xf0]  ;;  %v8591_v11 = vor.u32 %v12302_v60, %v8590_v58  ;;  %6370 = vmatpush.bf16.msrb.mxu1 %v8735_v63  ;;  %6383 = vmatpush.bf16.msrb.mxu2 %v8863_v0 }
  0x40   :  { %v8846_v1 = vld [vmem:[%s19771_s1 + $0x600] sm:$0xf]  ;;  %v12398_v6 = vld [vmem:[%s19771_s1 + $0x70c] sm:$0xf0]  ;;  %v8719_v16 = vor.u32 %v12334_v62, %v8718_v61  ;;  %6396 = vmatpush.bf16.msrb.mxu3 %v8991_v4 }
  0x41   :  { %v8974_v5 = vld [vmem:[%s19771_s1 + $0x700] sm:$0xf]  ;;  %v19_v7 = vld [vmem:[%s19772_s0 + $0x10] sm:$0xff]  ;;  %v8847_v17 = vor.u32 %v12366_v2, %v8846_v1  ;;  %6358 = vmatpush.bf16.msrb.mxu0 %v8591_v11 }
  0x42   :  { %v9214_v8 = vld [vmem:[%s19771_s1 + $0x8e0] sm:$0xf]  ;;  %v12458_v9 = vld [vmem:[%s19771_s1 + $0x8ec] sm:$0xf0]  ;;  %v1087_v24 = vunpack.c.l.b16 %v19_v7  ;;  %v8975_v26 = vor.u32 %v12398_v6, %v8974_v5  ;;  %v1088_v28 = vunpack.c.h.b16 %v19_v7 }
  0x43   :  { %v9342_v10 = vld [vmem:[%s19771_s1 + $0x9e0] sm:$0xf]  ;;  %v12490_v12 = vld [vmem:[%s19771_s1 + $0x9ec] sm:$0xf0]  ;;  %v9215_v27 = vor.u32 %v12458_v9, %v9214_v8  ;;  %6371 = vmatpush.bf16.msrb.mxu1 %v8719_v16  ;;  %6384 = vmatpush.bf16.msrb.mxu2 %v8847_v17 }
  0x44   :  { %v9470_v13 = vld [vmem:[%s19771_s1 + $0xae0] sm:$0xf]  ;;  %v12522_v14 = vld [vmem:[%s19771_s1 + $0xaec] sm:$0xf0]  ;;  %v9343_v29 = vor.u32 %v12490_v12, %v9342_v10  ;;  %v13689_v41 = vpack.c.b16 %v1087_v24, %v1087_v24  ;;  %6397 = vmatpush.bf16.msrb.mxu3 %v8975_v26  ;;  %v13693_v44 = vpack.c.b16 %v1088_v28, %v1088_v28 }
  0x45   :  { %v9598_v21 = vld [vmem:[%s19771_s1 + $0xbe0] sm:$0xf]  ;;  %v12554_v23 = vld [vmem:[%s19771_s1 + $0xbec] sm:$0xf0]  ;;  %v9471_v30 = vor.u32 %v12522_v14, %v9470_v13  ;;  %6403 = vmatpush.bf16.msra.mxu0 %v9215_v27 }
  0x46   :  { %v9198_v31 = vld [vmem:[%s19771_s1 + $0x8c0] sm:$0xf]  ;;  %v12454_v32 = vld [vmem:[%s19771_s1 + $0x8cc] sm:$0xf0]  ;;  %v9599_v34 = vor.u32 %v12554_v23, %v9598_v21  ;;  %6385 = vmatmul.bf16.vlgmr.msrb.gmra.mxu2 %v13681_v38  ;;  %6359 = vmatmul.bf16.vlgmr.msrb.gmra.mxu0 %v13689_v41 }
  0x47   :  { %v9326_v33 = vld [vmem:[%s19771_s1 + $0x9c0] sm:$0xf]  ;;  %v12486_v35 = vld [vmem:[%s19771_s1 + $0x9cc] sm:$0xf0]  ;;  %v9199_v43 = vor.u32 %v12454_v32, %v9198_v31  ;;  %6416 = vmatpush.bf16.msra.mxu1 %v9343_v29  ;;  %6429 = vmatpush.bf16.msra.mxu2 %v9471_v30 }
  0x48   :  { %v9454_v36 = vld [vmem:[%s19771_s1 + $0xac0] sm:$0xf]  ;;  %v12518_v37 = vld [vmem:[%s19771_s1 + $0xacc] sm:$0xf0]  ;;  %v9327_v45 = vor.u32 %v12486_v35, %v9326_v33  ;;  %6442 = vmatpush.bf16.msra.mxu3 %v9599_v34  ;;  %6372 = vmatmul.bf16.vlgmr.msrb.gmra.mxu1 %v13693_v44 }
  0x49   :  { %v9582_v39 = vld [vmem:[%s19771_s1 + $0xbc0] sm:$0xf]  ;;  %v12550_v40 = vld [vmem:[%s19771_s1 + $0xbcc] sm:$0xf0]  ;;  %v9455_v46 = vor.u32 %v12518_v37, %v9454_v36  ;;  %6398 = vmatmul.bf16.vlgmr.msrb.gmra.mxu3 %v13691_v42  ;;  %6404 = vmatpush.bf16.msra.mxu0 %v9199_v43 }
  0x4a   :  { %v9182_v47 = vld [vmem:[%s19771_s1 + $0x8a0] sm:$0xf]  ;;  %v12450_v48 = vld [vmem:[%s19771_s1 + $0x8ac] sm:$0xf0]  ;;  %v9583_v50 = vor.u32 %v12550_v40, %v9582_v39 }
  0x4b   :  { %v9310_v49 = vld [vmem:[%s19771_s1 + $0x9a0] sm:$0xf]  ;;  %v12482_v51 = vld [vmem:[%s19771_s1 + $0x9ac] sm:$0xf0]  ;;  %v9183_v56 = vor.u32 %v12450_v48, %v9182_v47  ;;  %6417 = vmatpush.bf16.msra.mxu1 %v9327_v45  ;;  %6430 = vmatpush.bf16.msra.mxu2 %v9455_v46 }
  0x4c   :  { %v9438_v52 = vld [vmem:[%s19771_s1 + $0xaa0] sm:$0xf]  ;;  %v12514_v53 = vld [vmem:[%s19771_s1 + $0xaac] sm:$0xf0]  ;;  %v9311_v57 = vor.u32 %v12482_v51, %v9310_v49  ;;  %6443 = vmatpush.bf16.msra.mxu3 %v9583_v50 }
  0x4d   :  { %v9566_v54 = vld [vmem:[%s19771_s1 + $0xba0] sm:$0xf]  ;;  %v12546_v55 = vld [vmem:[%s19771_s1 + $0xbac] sm:$0xf0]  ;;  %v9439_v58 = vor.u32 %v12514_v53, %v9438_v52  ;;  %6405 = vmatpush.bf16.msra.mxu0 %v9183_v56 }
  0x4e   :  { %v9166_v59 = vld [vmem:[%s19771_s1 + $0x880] sm:$0xf]  ;;  %v12446_v60 = vld [vmem:[%s19771_s1 + $0x88c] sm:$0xf0]  ;;  %v9567_v62 = vor.u32 %v12546_v55, %v9566_v54 }
  0x4f   :  { %v9294_v61 = vld [vmem:[%s19771_s1 + $0x980] sm:$0xf]  ;;  %v12478_v63 = vld [vmem:[%s19771_s1 + $0x98c] sm:$0xf0]  ;;  %v9167_v4 = vor.u32 %v12446_v60, %v9166_v59  ;;  %6418 = vmatpush.bf16.msra.mxu1 %v9311_v57  ;;  %6431 = vmatpush.bf16.msra.mxu2 %v9439_v58 }
  0x50   :  { %v9422_v0 = vld [vmem:[%s19771_s1 + $0xa80] sm:$0xf]  ;;  %v12510_v1 = vld [vmem:[%s19771_s1 + $0xa8c] sm:$0xf0]  ;;  %v9295_v5 = vor.u32 %v12478_v63, %v9294_v61  ;;  %6444 = vmatpush.bf16.msra.mxu3 %v9567_v62  ;;  %v22_v61 = vld [vmem:[%s19772_s0 + $0x28] sm:$0xff] }
  0x51   :  { %v9550_v2 = vld [vmem:[%s19771_s1 + $0xb80] sm:$0xf]  ;;  %v12542_v3 = vld [vmem:[%s19771_s1 + $0xb8c] sm:$0xf0]  ;;  %v9423_v6 = vor.u32 %v12510_v1, %v9422_v0  ;;  %6406 = vmatpush.bf16.msra.mxu0 %v9167_v4 }
  0x52   :  { %v9150_v7 = vld [vmem:[%s19771_s1 + $0x860] sm:$0xf]  ;;  %v12442_v8 = vld [vmem:[%s19771_s1 + $0x86c] sm:$0xf0]  ;;  %v9551_v10 = vor.u32 %v12542_v3, %v9550_v2 }
  0x53   :  { %v9278_v9 = vld [vmem:[%s19771_s1 + $0x960] sm:$0xf]  ;;  %v12474_v11 = vld [vmem:[%s19771_s1 + $0x96c] sm:$0xf0]  ;;  %v9151_v16 = vor.u32 %v12442_v8, %v9150_v7  ;;  %6419 = vmatpush.bf16.msra.mxu1 %v9295_v5  ;;  %6432 = vmatpush.bf16.msra.mxu2 %v9423_v6 }
  0x54   :  { %v9406_v12 = vld [vmem:[%s19771_s1 + $0xa60] sm:$0xf]  ;;  %v12506_v13 = vld [vmem:[%s19771_s1 + $0xa6c] sm:$0xf0]  ;;  %v9279_v17 = vor.u32 %v12474_v11, %v9278_v9  ;;  %6445 = vmatpush.bf16.msra.mxu3 %v9551_v10  ;;  %v1093_v10 = vunpack.c.l.b16 %v22_v61 }
  0x55   :  { %v9534_v14 = vld [vmem:[%s19771_s1 + $0xb60] sm:$0xf]  ;;  %v12538_v15 = vld [vmem:[%s19771_s1 + $0xb6c] sm:$0xf0]  ;;  %v9407_v21 = vor.u32 %v12506_v13, %v9406_v12  ;;  %6407 = vmatpush.bf16.msra.mxu0 %v9151_v16 }
  0x56   :  { %v9134_v23 = vld [vmem:[%s19771_s1 + $0x840] sm:$0xf]  ;;  %v12438_v24 = vld [vmem:[%s19771_s1 + $0x84c] sm:$0xf0]  ;;  %v9535_v26 = vor.u32 %v12538_v15, %v9534_v14  ;;  %v1094_v14 = vunpack.c.h.b16 %v22_v61 }
  0x57   :  { %v9262_v25 = vld [vmem:[%s19771_s1 + $0x940] sm:$0xf]  ;;  %v12470_v27 = vld [vmem:[%s19771_s1 + $0x94c] sm:$0xf0]  ;;  %v9135_v32 = vor.u32 %v12438_v24, %v9134_v23  ;;  %6420 = vmatpush.bf16.msra.mxu1 %v9279_v17  ;;  %6433 = vmatpush.bf16.msra.mxu2 %v9407_v21 }
  0x58   :  { %v9390_v28 = vld [vmem:[%s19771_s1 + $0xa40] sm:$0xf]  ;;  %v12502_v29 = vld [vmem:[%s19771_s1 + $0xa4c] sm:$0xf0]  ;;  %v9263_v33 = vor.u32 %v12470_v27, %v9262_v25  ;;  %6446 = vmatpush.bf16.msra.mxu3 %v9535_v26 }
  0x59   :  { %v9518_v30 = vld [vmem:[%s19771_s1 + $0xb40] sm:$0xf]  ;;  %v12534_v31 = vld [vmem:[%s19771_s1 + $0xb4c] sm:$0xf0]  ;;  %v9391_v34 = vor.u32 %v12502_v29, %v9390_v28  ;;  %6408 = vmatpush.bf16.msra.mxu0 %v9135_v32  ;;  %v13893_v29 = vpack.c.b16 %v1093_v10, %v1093_v10 }
  0x5a   :  { %v9118_v35 = vld [vmem:[%s19771_s1 + $0x820] sm:$0xf]  ;;  %v12434_v36 = vld [vmem:[%s19771_s1 + $0x82c] sm:$0xf0]  ;;  %v9519_v39 = vor.u32 %v12534_v31, %v9518_v30 }
  0x5b   :  { %v9246_v37 = vld [vmem:[%s19771_s1 + $0x920] sm:$0xf]  ;;  %v12466_v40 = vld [vmem:[%s19771_s1 + $0x92c] sm:$0xf0]  ;;  %v9119_v49 = vor.u32 %v12434_v36, %v9118_v35  ;;  %6421 = vmatpush.bf16.msra.mxu1 %v9263_v33  ;;  %6434 = vmatpush.bf16.msra.mxu2 %v9391_v34  ;;  %v13903_v33 = vpack.c.b16 %v1094_v14, %v1094_v14 }
  0x5c   :  { %v9374_v43 = vld [vmem:[%s19771_s1 + $0xa20] sm:$0xf]  ;;  %v12498_v45 = vld [vmem:[%s19771_s1 + $0xa2c] sm:$0xf0]  ;;  %v9247_v53 = vor.u32 %v12466_v40, %v9246_v37  ;;  %6447 = vmatpush.bf16.msra.mxu3 %v9519_v39 }
  0x5d   :  { %v9502_v46 = vld [vmem:[%s19771_s1 + $0xb20] sm:$0xf]  ;;  %v12530_v47 = vld [vmem:[%s19771_s1 + $0xb2c] sm:$0xf0]  ;;  %v9375_v54 = vor.u32 %v12498_v45, %v9374_v43  ;;  %6409 = vmatpush.bf16.msra.mxu0 %v9119_v49  ;;  %19778 = vst [vmem:[#allocation2_spill] sm:$0xff] %v13903_v33 }
  0x5e   :  { %v9102_v48 = vld [vmem:[%s19771_s1 + $0x800] sm:$0xf]  ;;  %v12430_v50 = vld [vmem:[%s19771_s1 + $0x80c] sm:$0xf0]  ;;  %v9503_v58 = vor.u32 %v12530_v47, %v9502_v46 }
  0x5f   :  { %v9230_v51 = vld [vmem:[%s19771_s1 + $0x900] sm:$0xf]  ;;  %v12462_v52 = vld [vmem:[%s19771_s1 + $0x90c] sm:$0xf0]  ;;  %v9103_v1 = vor.u32 %v12430_v50, %v9102_v48  ;;  %6422 = vmatpush.bf16.msra.mxu1 %v9247_v53  ;;  %6435 = vmatpush.bf16.msra.mxu2 %v9375_v54 }
  0x60   :  { %v9358_v55 = vld [vmem:[%s19771_s1 + $0xa00] sm:$0xf]  ;;  %v12494_v56 = vld [vmem:[%s19771_s1 + $0xa0c] sm:$0xf0]  ;;  %v9231_v6 = vor.u32 %v12462_v52, %v9230_v51  ;;  %6448 = vmatpush.bf16.msra.mxu3 %v9503_v58 }
  0x61   :  { %v21_v57 = vld [vmem:[%s19772_s0 + $0x20] sm:$0xff]  ;;  %v12526_v60 = vld [vmem:[%s19771_s1 + $0xb0c] sm:$0xf0]  ;;  %v9359_v7 = vor.u32 %v12494_v56, %v9358_v55  ;;  %6410 = vmatpush.bf16.msra.mxu0 %v9103_v1 }
  0x62   :  { %v9486_v59 = vld [vmem:[%s19771_s1 + $0xb00] sm:$0xf]  ;;  %v12586_v63 = vld [vmem:[%s19771_s1 + $0xcec] sm:$0xf0]  ;;  %v1091_v5 = vunpack.c.l.b16 %v21_v57  ;;  %v1092_v11 = vunpack.c.h.b16 %v21_v57 }
  0x63   :  { %v9726_v62 = vld [vmem:[%s19771_s1 + $0xce0] sm:$0xf]  ;;  %v12618_v2 = vld [vmem:[%s19771_s1 + $0xdec] sm:$0xf0]  ;;  %v9487_v12 = vor.u32 %v12526_v60, %v9486_v59  ;;  %6423 = vmatpush.bf16.msra.mxu1 %v9231_v6  ;;  %6436 = vmatpush.bf16.msra.mxu2 %v9359_v7 }
  0x64   :  { %v9854_v0 = vld [vmem:[%s19771_s1 + $0xde0] sm:$0xf]  ;;  %v12650_v4 = vld [vmem:[%s19771_s1 + $0xeec] sm:$0xf0]  ;;  %v9727_v13 = vor.u32 %v12586_v63, %v9726_v62  ;;  %v13882_v25 = vpack.c.b16 %v1091_v5, %v1091_v5  ;;  %v13895_v30 = vpack.c.b16 %v1092_v11, %v1092_v11 }
  0x65   :  { %v9982_v3 = vld [vmem:[%s19771_s1 + $0xee0] sm:$0xf]  ;;  %v12682_v9 = vld [vmem:[%s19771_s1 + $0xfec] sm:$0xf0]  ;;  %v9855_v15 = vor.u32 %v12618_v2, %v9854_v0  ;;  %6449 = vmatpush.bf16.msra.mxu3 %v9487_v12 }
  0x66   :  { %v10110_v8 = vld [vmem:[%s19771_s1 + $0xfe0] sm:$0xf]  ;;  %v9983_v16 = vor.u32 %v12650_v4, %v9982_v3  ;;  %v12582_v21 = vld [vmem:[%s19771_s1 + $0xccc] sm:$0xf0]  ;;  %6455 = vmatpush.bf16.msrb.mxu0 %v9727_v13  ;;  %6437 = vmatmul.bf16.vlgmr.msra.gmra.mxu2 %v13893_v29 }
  0x67   :  { %v9710_v17 = vld [vmem:[%s19771_s1 + $0xcc0] sm:$0xf]  ;;  %v10111_v24 = vor.u32 %v12682_v9, %v10110_v8  ;;  %v12614_v26 = vld [vmem:[%s19771_s1 + $0xdcc] sm:$0xf0]  ;;  %6468 = vmatpush.bf16.msrb.mxu1 %v9855_v15  ;;  %6411 = vmatmul.bf16.vlgmr.msra.gmra.mxu0 %v13882_v25 }
  0x68   :  { %v9838_v23 = vld [vmem:[%s19771_s1 + $0xdc0] sm:$0xf]  ;;  %v12646_v28 = vld [vmem:[%s19771_s1 + $0xecc] sm:$0xf0]  ;;  %v9711_v34 = vor.u32 %v12582_v21, %v9710_v17  ;;  %6481 = vmatpush.bf16.msrb.mxu2 %v9983_v16  ;;  %6424 = vmatmul.bf16.vlgmr.msra.gmra.mxu1 %v13895_v30 }
  0x69   :  { %v9966_v27 = vld [vmem:[%s19771_s1 + $0xec0] sm:$0xf]  ;;  %v12678_v32 = vld [vmem:[%s19771_s1 + $0xfcc] sm:$0xf0]  ;;  %v9839_v35 = vor.u32 %v12614_v26, %v9838_v23  ;;  %6494 = vmatpush.bf16.msrb.mxu3 %v10111_v24 }
  0x6a   :  { %v10094_v31 = vld [vmem:[%s19771_s1 + $0xfc0] sm:$0xf]  ;;  %v9967_v36 = vor.u32 %v12646_v28, %v9966_v27  ;;  %v12578_v39 = vld [vmem:[%s19771_s1 + $0xcac] sm:$0xf0]  ;;  %6450 = vmatmul.bf16.vlgmr.msra.gmra.mxu3 %v13903_v33  ;;  %6456 = vmatpush.bf16.msrb.mxu0 %v9711_v34 }
  0x6b   :  { %v9694_v37 = vld [vmem:[%s19771_s1 + $0xca0] sm:$0xf]  ;;  %v10095_v43 = vor.u32 %v12678_v32, %v10094_v31  ;;  %v12610_v45 = vld [vmem:[%s19771_s1 + $0xdac] sm:$0xf0]  ;;  %6469 = vmatpush.bf16.msrb.mxu1 %v9839_v35 }
  0x6c   :  { %v9822_v40 = vld [vmem:[%s19771_s1 + $0xda0] sm:$0xf]  ;;  %v12642_v47 = vld [vmem:[%s19771_s1 + $0xeac] sm:$0xf0]  ;;  %v9695_v50 = vor.u32 %v12578_v39, %v9694_v37  ;;  %6482 = vmatpush.bf16.msrb.mxu2 %v9967_v36 }
  0x6d   :  { %v9950_v46 = vld [vmem:[%s19771_s1 + $0xea0] sm:$0xf]  ;;  %v12674_v49 = vld [vmem:[%s19771_s1 + $0xfac] sm:$0xf0]  ;;  %v9823_v51 = vor.u32 %v12610_v45, %v9822_v40  ;;  %6495 = vmatpush.bf16.msrb.mxu3 %v10095_v43 }
  0x6e   :  { %v10078_v48 = vld [vmem:[%s19771_s1 + $0xfa0] sm:$0xf]  ;;  %v9951_v52 = vor.u32 %v12642_v47, %v9950_v46  ;;  %v12574_v54 = vld [vmem:[%s19771_s1 + $0xc8c] sm:$0xf0]  ;;  %6457 = vmatpush.bf16.msrb.mxu0 %v9695_v50 }
  0x6f   :  { %v9678_v53 = vld [vmem:[%s19771_s1 + $0xc80] sm:$0xf]  ;;  %v10079_v56 = vor.u32 %v12674_v49, %v10078_v48  ;;  %v12606_v57 = vld [vmem:[%s19771_s1 + $0xd8c] sm:$0xf0]  ;;  %6470 = vmatpush.bf16.msrb.mxu1 %v9823_v51 }
  0x70   :  { %v9806_v55 = vld [vmem:[%s19771_s1 + $0xd80] sm:$0xf]  ;;  %v12638_v59 = vld [vmem:[%s19771_s1 + $0xe8c] sm:$0xf0]  ;;  %v9679_v62 = vor.u32 %v12574_v54, %v9678_v53  ;;  %6483 = vmatpush.bf16.msrb.mxu2 %v9951_v52 }
  0x71   :  { %v9934_v58 = vld [vmem:[%s19771_s1 + $0xe80] sm:$0xf]  ;;  %v12670_v61 = vld [vmem:[%s19771_s1 + $0xf8c] sm:$0xf0]  ;;  %v9807_v63 = vor.u32 %v12606_v57, %v9806_v55  ;;  %6496 = vmatpush.bf16.msrb.mxu3 %v10079_v56 }
  0x72   :  { %v10062_v60 = vld [vmem:[%s19771_s1 + $0xf80] sm:$0xf]  ;;  %v9935_v0 = vor.u32 %v12638_v59, %v9934_v58  ;;  %v12570_v2 = vld [vmem:[%s19771_s1 + $0xc6c] sm:$0xf0]  ;;  %6458 = vmatpush.bf16.msrb.mxu0 %v9679_v62  ;;  %v24_v59 = vld [vmem:[%s19772_s0 + $0x38] sm:$0xff] }
  0x73   :  { %v9662_v1 = vld [vmem:[%s19771_s1 + $0xc60] sm:$0xf]  ;;  %v10063_v4 = vor.u32 %v12670_v61, %v10062_v60  ;;  %v12602_v5 = vld [vmem:[%s19771_s1 + $0xd6c] sm:$0xf0]  ;;  %6471 = vmatpush.bf16.msrb.mxu1 %v9807_v63 }
  0x74   :  { %v9790_v3 = vld [vmem:[%s19771_s1 + $0xd60] sm:$0xf]  ;;  %v12634_v7 = vld [vmem:[%s19771_s1 + $0xe6c] sm:$0xf0]  ;;  %v9663_v10 = vor.u32 %v12570_v2, %v9662_v1  ;;  %6484 = vmatpush.bf16.msrb.mxu2 %v9935_v0 }
  0x75   :  { %v9918_v6 = vld [vmem:[%s19771_s1 + $0xe60] sm:$0xf]  ;;  %v12666_v9 = vld [vmem:[%s19771_s1 + $0xf6c] sm:$0xf0]  ;;  %v9791_v11 = vor.u32 %v12602_v5, %v9790_v3  ;;  %6497 = vmatpush.bf16.msrb.mxu3 %v10063_v4 }
  0x76   :  { %v10046_v8 = vld [vmem:[%s19771_s1 + $0xf60] sm:$0xf]  ;;  %v9919_v12 = vor.u32 %v12634_v7, %v9918_v6  ;;  %v12566_v14 = vld [vmem:[%s19771_s1 + $0xc4c] sm:$0xf0]  ;;  %6459 = vmatpush.bf16.msrb.mxu0 %v9663_v10 }
  0x77   :  { %v9646_v13 = vld [vmem:[%s19771_s1 + $0xc40] sm:$0xf]  ;;  %v10047_v16 = vor.u32 %v12666_v9, %v10046_v8  ;;  %v12598_v17 = vld [vmem:[%s19771_s1 + $0xd4c] sm:$0xf0]  ;;  %6472 = vmatpush.bf16.msrb.mxu1 %v9791_v11  ;;  %v1097_v8 = vunpack.c.l.b16 %v24_v59 }
  0x78   :  { %v9774_v15 = vld [vmem:[%s19771_s1 + $0xd40] sm:$0xf]  ;;  %v12630_v23 = vld [vmem:[%s19771_s1 + $0xe4c] sm:$0xf0]  ;;  %v9647_v27 = vor.u32 %v12566_v14, %v9646_v13  ;;  %6485 = vmatpush.bf16.msrb.mxu2 %v9919_v12  ;;  %v1098_v12 = vunpack.c.h.b16 %v24_v59 }
  0x79   :  { %v9902_v21 = vld [vmem:[%s19771_s1 + $0xe40] sm:$0xf]  ;;  %v12662_v26 = vld [vmem:[%s19771_s1 + $0xf4c] sm:$0xf0]  ;;  %v9775_v28 = vor.u32 %v12598_v17, %v9774_v15  ;;  %6498 = vmatpush.bf16.msrb.mxu3 %v10047_v16 }
  0x7a   :  { %v10030_v24 = vld [vmem:[%s19771_s1 + $0xf40] sm:$0xf]  ;;  %v9903_v31 = vor.u32 %v12630_v23, %v9902_v21  ;;  %v12562_v34 = vld [vmem:[%s19771_s1 + $0xc2c] sm:$0xf0]  ;;  %6460 = vmatpush.bf16.msrb.mxu0 %v9647_v27 }
  0x7b   :  { %v9630_v32 = vld [vmem:[%s19771_s1 + $0xc20] sm:$0xf]  ;;  %v10031_v36 = vor.u32 %v12662_v26, %v10030_v24  ;;  %v12594_v37 = vld [vmem:[%s19771_s1 + $0xd2c] sm:$0xf0]  ;;  %6473 = vmatpush.bf16.msrb.mxu1 %v9775_v28  ;;  %v14103_v28 = vpack.c.b16 %v1097_v8, %v1097_v8 }
  0x7c   :  { %v9758_v35 = vld [vmem:[%s19771_s1 + $0xd20] sm:$0xf]  ;;  %v12626_v40 = vld [vmem:[%s19771_s1 + $0xe2c] sm:$0xf0]  ;;  %v9631_v47 = vor.u32 %v12562_v34, %v9630_v32  ;;  %6486 = vmatpush.bf16.msrb.mxu2 %v9903_v31 }
  0x7d   :  { %v9886_v39 = vld [vmem:[%s19771_s1 + $0xe20] sm:$0xf]  ;;  %v12658_v45 = vld [vmem:[%s19771_s1 + $0xf2c] sm:$0xf0]  ;;  %v9759_v51 = vor.u32 %v12594_v37, %v9758_v35  ;;  %6499 = vmatpush.bf16.msrb.mxu3 %v10031_v36  ;;  %v14113_v35 = vpack.c.b16 %v1098_v12, %v1098_v12 }
  0x7e   :  { %v10014_v43 = vld [vmem:[%s19771_s1 + $0xf20] sm:$0xf]  ;;  %v12558_v48 = vld [vmem:[%s19771_s1 + $0xc0c] sm:$0xf0]  ;;  %v9887_v52 = vor.u32 %v12626_v40, %v9886_v39  ;;  %6461 = vmatpush.bf16.msrb.mxu0 %v9631_v47 }
  0x7f   :  { %v9614_v46 = vld [vmem:[%s19771_s1 + $0xc00] sm:$0xf]  ;;  %v12590_v50 = vld [vmem:[%s19771_s1 + $0xd0c] sm:$0xf0]  ;;  %v10015_v56 = vor.u32 %v12658_v45, %v10014_v43  ;;  %6474 = vmatpush.bf16.msrb.mxu1 %v9759_v51 }
  0x80   :  { %v9742_v49 = vld [vmem:[%s19771_s1 + $0xd00] sm:$0xf]  ;;  %v12622_v54 = vld [vmem:[%s19771_s1 + $0xe0c] sm:$0xf0]  ;;  %v9615_v63 = vor.u32 %v12558_v48, %v9614_v46  ;;  %6487 = vmatpush.bf16.msrb.mxu2 %v9887_v52 }
  0x81   :  { %v9870_v53 = vld [vmem:[%s19771_s1 + $0xe00] sm:$0xf]  ;;  %v23_v55 = vld [vmem:[%s19772_s0 + $0x30] sm:$0xff]  ;;  %v9743_v4 = vor.u32 %v12590_v50, %v9742_v49  ;;  %6500 = vmatpush.bf16.msrb.mxu3 %v10015_v56 }
  0x82   :  { %v9998_v57 = vld [vmem:[%s19771_s1 + $0xf00] sm:$0xf]  ;;  %v12654_v58 = vld [vmem:[%s19771_s1 + $0xf0c] sm:$0xf0]  ;;  %v1095_v3 = vunpack.c.l.b16 %v23_v55  ;;  %v9871_v5 = vor.u32 %v12622_v54, %v9870_v53  ;;  %v1096_v9 = vunpack.c.h.b16 %v23_v55  ;;  %6462 = vmatpush.bf16.msrb.mxu0 %v9615_v63 }
  0x83   :  { %v10238_v60 = vld [vmem:[%s19771_s1 + $0x10e0] sm:$0xf]  ;;  %v12714_v61 = vld [vmem:[%s19771_s1 + $0x10ec] sm:$0xf0]  ;;  %v9999_v10 = vor.u32 %v12654_v58, %v9998_v57  ;;  %6475 = vmatpush.bf16.msrb.mxu1 %v9743_v4 }
  0x84   :  { %v10366_v62 = vld [vmem:[%s19771_s1 + $0x11e0] sm:$0xf]  ;;  %v12746_v0 = vld [vmem:[%s19771_s1 + $0x11ec] sm:$0xf0]  ;;  %v10239_v11 = vor.u32 %v12714_v61, %v10238_v60  ;;  %v14092_v23 = vpack.c.b16 %v1095_v3, %v1095_v3  ;;  %6488 = vmatpush.bf16.msrb.mxu2 %v9871_v5  ;;  %v14105_v31 = vpack.c.b16 %v1096_v9, %v1096_v9 }
  0x85   :  { %v10494_v1 = vld [vmem:[%s19771_s1 + $0x12e0] sm:$0xf]  ;;  %v12778_v2 = vld [vmem:[%s19771_s1 + $0x12ec] sm:$0xf0]  ;;  %v10367_v13 = vor.u32 %v12746_v0, %v10366_v62  ;;  %6501 = vmatpush.bf16.msrb.mxu3 %v9999_v10 }
  0x86   :  { %v10622_v6 = vld [vmem:[%s19771_s1 + $0x13e0] sm:$0xf]  ;;  %v12810_v7 = vld [vmem:[%s19771_s1 + $0x13ec] sm:$0xf0]  ;;  %v10495_v14 = vor.u32 %v12778_v2, %v10494_v1  ;;  %6507 = vmatpush.bf16.msra.mxu0 %v10239_v11  ;;  %6476 = vmatmul.bf16.vlgmr.msrb.gmra.mxu1 %v14105_v31 }
  0x87   :  { %v10222_v15 = vld [vmem:[%s19771_s1 + $0x10c0] sm:$0xf]  ;;  %v12710_v16 = vld [vmem:[%s19771_s1 + $0x10cc] sm:$0xf0]  ;;  %v10623_v21 = vor.u32 %v12810_v7, %v10622_v6  ;;  %6520 = vmatpush.bf16.msra.mxu1 %v10367_v13  ;;  %6463 = vmatmul.bf16.vlgmr.msrb.gmra.mxu0 %v14092_v23 }
  0x88   :  { %v10350_v17 = vld [vmem:[%s19771_s1 + $0x11c0] sm:$0xf]  ;;  %v12742_v24 = vld [vmem:[%s19771_s1 + $0x11cc] sm:$0xf0]  ;;  %v10223_v36 = vor.u32 %v12710_v16, %v10222_v15  ;;  %6533 = vmatpush.bf16.msra.mxu2 %v10495_v14  ;;  %6502 = vmatmul.bf16.vlgmr.msrb.gmra.mxu3 %v14113_v35 }
  0x89   :  { %v10478_v26 = vld [vmem:[%s19771_s1 + $0x12c0] sm:$0xf]  ;;  %v12774_v27 = vld [vmem:[%s19771_s1 + $0x12cc] sm:$0xf0]  ;;  %v10351_v37 = vor.u32 %v12742_v24, %v10350_v17  ;;  %6546 = vmatpush.bf16.msra.mxu3 %v10623_v21  ;;  %6489 = vmatmul.bf16.vlgmr.msrb.gmra.mxu2 %v14103_v28 }
  0x8a   :  { %v10606_v32 = vld [vmem:[%s19771_s1 + $0x13c0] sm:$0xf]  ;;  %v12806_v34 = vld [vmem:[%s19771_s1 + $0x13cc] sm:$0xf0]  ;;  %v10479_v39 = vor.u32 %v12774_v27, %v10478_v26  ;;  %6508 = vmatpush.bf16.msra.mxu0 %v10223_v36 }
  0x8b   :  { %v10206_v40 = vld [vmem:[%s19771_s1 + $0x10a0] sm:$0xf]  ;;  %v12706_v43 = vld [vmem:[%s19771_s1 + $0x10ac] sm:$0xf0]  ;;  %v10607_v46 = vor.u32 %v12806_v34, %v10606_v32  ;;  %6521 = vmatpush.bf16.msra.mxu1 %v10351_v37 }
  0x8c   :  { %v10334_v45 = vld [vmem:[%s19771_s1 + $0x11a0] sm:$0xf]  ;;  %v12738_v47 = vld [vmem:[%s19771_s1 + $0x11ac] sm:$0xf0]  ;;  %v10207_v52 = vor.u32 %v12706_v43, %v10206_v40  ;;  %6534 = vmatpush.bf16.msra.mxu2 %v10479_v39 }
  0x8d   :  { %v10462_v48 = vld [vmem:[%s19771_s1 + $0x12a0] sm:$0xf]  ;;  %v12770_v49 = vld [vmem:[%s19771_s1 + $0x12ac] sm:$0xf0]  ;;  %v10335_v53 = vor.u32 %v12738_v47, %v10334_v45  ;;  %6547 = vmatpush.bf16.msra.mxu3 %v10607_v46 }
  0x8e   :  { %v10590_v50 = vld [vmem:[%s19771_s1 + $0x13a0] sm:$0xf]  ;;  %v12802_v51 = vld [vmem:[%s19771_s1 + $0x13ac] sm:$0xf0]  ;;  %v10463_v54 = vor.u32 %v12770_v49, %v10462_v48  ;;  %6509 = vmatpush.bf16.msra.mxu0 %v10207_v52 }
  0x8f   :  { %v10190_v55 = vld [vmem:[%s19771_s1 + $0x1080] sm:$0xf]  ;;  %v12702_v56 = vld [vmem:[%s19771_s1 + $0x108c] sm:$0xf0]  ;;  %v10591_v58 = vor.u32 %v12802_v51, %v10590_v50  ;;  %6522 = vmatpush.bf16.msra.mxu1 %v10335_v53 }
  0x90   :  { %v10318_v57 = vld [vmem:[%s19771_s1 + $0x1180] sm:$0xf]  ;;  %v12734_v59 = vld [vmem:[%s19771_s1 + $0x118c] sm:$0xf0]  ;;  %v10191_v0 = vor.u32 %v12702_v56, %v10190_v55  ;;  %6535 = vmatpush.bf16.msra.mxu2 %v10463_v54 }
  0x91   :  { %v10446_v60 = vld [vmem:[%s19771_s1 + $0x1280] sm:$0xf]  ;;  %v12766_v61 = vld [vmem:[%s19771_s1 + $0x128c] sm:$0xf0]  ;;  %v10319_v1 = vor.u32 %v12734_v59, %v10318_v57  ;;  %6548 = vmatpush.bf16.msra.mxu3 %v10591_v58 }
  0x92   :  { %v10574_v62 = vld [vmem:[%s19771_s1 + $0x1380] sm:$0xf]  ;;  %v12798_v63 = vld [vmem:[%s19771_s1 + $0x138c] sm:$0xf0]  ;;  %v10447_v2 = vor.u32 %v12766_v61, %v10446_v60  ;;  %6510 = vmatpush.bf16.msra.mxu0 %v10191_v0 }
  0x93   :  { %v10174_v3 = vld [vmem:[%s19771_s1 + $0x1060] sm:$0xf]  ;;  %v12698_v4 = vld [vmem:[%s19771_s1 + $0x106c] sm:$0xf0]  ;;  %v10575_v6 = vor.u32 %v12798_v63, %v10574_v62  ;;  %6523 = vmatpush.bf16.msra.mxu1 %v10319_v1  ;;  %v26_v1 = vld [vmem:[%s19772_s0 + $0x48] sm:$0xff] }
  0x94   :  { %v10302_v5 = vld [vmem:[%s19771_s1 + $0x1160] sm:$0xf]  ;;  %v12730_v7 = vld [vmem:[%s19771_s1 + $0x116c] sm:$0xf0]  ;;  %v10175_v12 = vor.u32 %v12698_v4, %v10174_v3  ;;  %6536 = vmatpush.bf16.msra.mxu2 %v10447_v2 }
  0x95   :  { %v10430_v8 = vld [vmem:[%s19771_s1 + $0x1260] sm:$0xf]  ;;  %v12762_v9 = vld [vmem:[%s19771_s1 + $0x126c] sm:$0xf0]  ;;  %v10303_v13 = vor.u32 %v12730_v7, %v10302_v5  ;;  %6549 = vmatpush.bf16.msra.mxu3 %v10575_v6 }
  0x96   :  { %v10558_v10 = vld [vmem:[%s19771_s1 + $0x1360] sm:$0xf]  ;;  %v12794_v11 = vld [vmem:[%s19771_s1 + $0x136c] sm:$0xf0]  ;;  %v10431_v14 = vor.u32 %v12762_v9, %v10430_v8  ;;  %6511 = vmatpush.bf16.msra.mxu0 %v10175_v12 }
  0x97   :  { %v10158_v15 = vld [vmem:[%s19771_s1 + $0x1040] sm:$0xf]  ;;  %v12694_v16 = vld [vmem:[%s19771_s1 + $0x104c] sm:$0xf0]  ;;  %v10559_v21 = vor.u32 %v12794_v11, %v10558_v10  ;;  %6524 = vmatpush.bf16.msra.mxu1 %v10303_v13 }
  0x98   :  { %v10286_v17 = vld [vmem:[%s19771_s1 + $0x1140] sm:$0xf]  ;;  %v12726_v24 = vld [vmem:[%s19771_s1 + $0x114c] sm:$0xf0]  ;;  %v10159_v36 = vor.u32 %v12694_v16, %v10158_v15  ;;  %6537 = vmatpush.bf16.msra.mxu2 %v10431_v14  ;;  %v1101_v14 = vunpack.c.l.b16 %v26_v1 }
  0x99   :  { %v10414_v26 = vld [vmem:[%s19771_s1 + $0x1240] sm:$0xf]  ;;  %v12758_v27 = vld [vmem:[%s19771_s1 + $0x124c] sm:$0xf0]  ;;  %v10287_v37 = vor.u32 %v12726_v24, %v10286_v17  ;;  %6550 = vmatpush.bf16.msra.mxu3 %v10559_v21  ;;  %v1102_v21 = vunpack.c.h.b16 %v26_v1 }
  0x9a   :  { %v10542_v32 = vld [vmem:[%s19771_s1 + $0x1340] sm:$0xf]  ;;  %v12790_v34 = vld [vmem:[%s19771_s1 + $0x134c] sm:$0xf0]  ;;  %v10415_v39 = vor.u32 %v12758_v27, %v10414_v26  ;;  %6512 = vmatpush.bf16.msra.mxu0 %v10159_v36 }
  0x9b   :  { %v10142_v40 = vld [vmem:[%s19771_s1 + $0x1020] sm:$0xf]  ;;  %v12690_v43 = vld [vmem:[%s19771_s1 + $0x102c] sm:$0xf0]  ;;  %v10543_v46 = vor.u32 %v12790_v34, %v10542_v32  ;;  %6525 = vmatpush.bf16.msra.mxu1 %v10287_v37 }
  0x9c   :  { %v10270_v45 = vld [vmem:[%s19771_s1 + $0x1120] sm:$0xf]  ;;  %v12722_v47 = vld [vmem:[%s19771_s1 + $0x112c] sm:$0xf0]  ;;  %v10143_v53 = vor.u32 %v12690_v43, %v10142_v40  ;;  %6538 = vmatpush.bf16.msra.mxu2 %v10415_v39 }
  0x9d   :  { %v10398_v48 = vld [vmem:[%s19771_s1 + $0x1220] sm:$0xf]  ;;  %v12754_v49 = vld [vmem:[%s19771_s1 + $0x122c] sm:$0xf0]  ;;  %v10271_v57 = vor.u32 %v12722_v47, %v10270_v45  ;;  %6551 = vmatpush.bf16.msra.mxu3 %v10543_v46  ;;  %v14313_v45 = vpack.c.b16 %v1101_v14, %v1101_v14 }
  0x9e   :  { %v10526_v50 = vld [vmem:[%s19771_s1 + $0x1320] sm:$0xf]  ;;  %v12786_v51 = vld [vmem:[%s19771_s1 + $0x132c] sm:$0xf0]  ;;  %v10399_v58 = vor.u32 %v12754_v49, %v10398_v48  ;;  %6513 = vmatpush.bf16.msra.mxu0 %v10143_v53  ;;  %v14323_v49 = vpack.c.b16 %v1102_v21, %v1102_v21 }
  0x9f   :  { %v10126_v52 = vld [vmem:[%s19771_s1 + $0x1000] sm:$0xf]  ;;  %v12686_v54 = vld [vmem:[%s19771_s1 + $0x100c] sm:$0xf0]  ;;  %v10527_v62 = vor.u32 %v12786_v51, %v10526_v50  ;;  %6526 = vmatpush.bf16.msra.mxu1 %v10271_v57 }
  0xa0   :  { %v10254_v55 = vld [vmem:[%s19771_s1 + $0x1100] sm:$0xf]  ;;  %v12718_v56 = vld [vmem:[%s19771_s1 + $0x110c] sm:$0xf0]  ;;  %v10127_v5 = vor.u32 %v12686_v54, %v10126_v52  ;;  %6539 = vmatpush.bf16.msra.mxu2 %v10399_v58 }
  0xa1   :  { %v10382_v59 = vld [vmem:[%s19771_s1 + $0x1200] sm:$0xf]  ;;  %v12750_v60 = vld [vmem:[%s19771_s1 + $0x120c] sm:$0xf0]  ;;  %v10255_v10 = vor.u32 %v12718_v56, %v10254_v55  ;;  %6552 = vmatpush.bf16.msra.mxu3 %v10527_v62 }
  0xa2   :  { %v25_v61 = vld [vmem:[%s19772_s0 + $0x40] sm:$0xff]  ;;  %v12782_v0 = vld [vmem:[%s19771_s1 + $0x130c] sm:$0xf0]  ;;  %v10383_v11 = vor.u32 %v12750_v60, %v10382_v59  ;;  %6514 = vmatpush.bf16.msra.mxu0 %v10127_v5 }
  0xa3   :  { %v10510_v63 = vld [vmem:[%s19771_s1 + $0x1300] sm:$0xf]  ;;  %v12842_v3 = vld [vmem:[%s19771_s1 + $0x14ec] sm:$0xf0]  ;;  %v1099_v9 = vunpack.c.l.b16 %v25_v61  ;;  %v1100_v15 = vunpack.c.h.b16 %v25_v61  ;;  %6527 = vmatpush.bf16.msra.mxu1 %v10255_v10 }
  0xa4   :  { %v10750_v2 = vld [vmem:[%s19771_s1 + $0x14e0] sm:$0xf]  ;;  %v12874_v6 = vld [vmem:[%s19771_s1 + $0x15ec] sm:$0xf0]  ;;  %v10511_v16 = vor.u32 %v12782_v0, %v10510_v63  ;;  %6540 = vmatpush.bf16.msra.mxu2 %v10383_v11 }
  0xa5   :  { %v10878_v4 = vld [vmem:[%s19771_s1 + $0x15e0] sm:$0xf]  ;;  %v12906_v8 = vld [vmem:[%s19771_s1 + $0x16ec] sm:$0xf0]  ;;  %v10751_v17 = vor.u32 %v12842_v3, %v10750_v2  ;;  %v14302_v37 = vpack.c.b16 %v1099_v9, %v1099_v9  ;;  %v14315_v46 = vpack.c.b16 %v1100_v15, %v1100_v15 }
  0xa6   :  { %v11006_v7 = vld [vmem:[%s19771_s1 + $0x16e0] sm:$0xf]  ;;  %v12938_v13 = vld [vmem:[%s19771_s1 + $0x17ec] sm:$0xf0]  ;;  %v10879_v24 = vor.u32 %v12874_v6, %v10878_v4  ;;  %6553 = vmatpush.bf16.msra.mxu3 %v10511_v16 }
  0xa7   :  { %v11134_v12 = vld [vmem:[%s19771_s1 + $0x17e0] sm:$0xf]  ;;  %v11007_v26 = vor.u32 %v12906_v8, %v11006_v7  ;;  %v12838_v32 = vld [vmem:[%s19771_s1 + $0x14cc] sm:$0xf0]  ;;  %6559 = vmatpush.bf16.msrb.mxu0 %v10751_v17  ;;  %6541 = vmatmul.bf16.vlgmr.msra.gmra.mxu2 %v14313_v45 }
  0xa8   :  { %v10734_v27 = vld [vmem:[%s19771_s1 + $0x14c0] sm:$0xf]  ;;  %v11135_v36 = vor.u32 %v12938_v13, %v11134_v12  ;;  %v12870_v39 = vld [vmem:[%s19771_s1 + $0x15cc] sm:$0xf0]  ;;  %6572 = vmatpush.bf16.msrb.mxu1 %v10879_v24  ;;  %6515 = vmatmul.bf16.vlgmr.msra.gmra.mxu0 %v14302_v37 }
  0xa9   :  { %v10862_v34 = vld [vmem:[%s19771_s1 + $0x15c0] sm:$0xf]  ;;  %v12902_v43 = vld [vmem:[%s19771_s1 + $0x16cc] sm:$0xf0]  ;;  %v10735_v50 = vor.u32 %v12838_v32, %v10734_v27  ;;  %6585 = vmatpush.bf16.msrb.mxu2 %v11007_v26  ;;  %6528 = vmatmul.bf16.vlgmr.msra.gmra.mxu1 %v14315_v46 }
  0xaa   :  { %v10990_v40 = vld [vmem:[%s19771_s1 + $0x16c0] sm:$0xf]  ;;  %v12934_v48 = vld [vmem:[%s19771_s1 + $0x17cc] sm:$0xf0]  ;;  %v10863_v51 = vor.u32 %v12870_v39, %v10862_v34  ;;  %6598 = vmatpush.bf16.msrb.mxu3 %v11135_v36 }
  0xab   :  { %v11118_v47 = vld [vmem:[%s19771_s1 + $0x17c0] sm:$0xf]  ;;  %v10991_v52 = vor.u32 %v12902_v43, %v10990_v40  ;;  %v12834_v54 = vld [vmem:[%s19771_s1 + $0x14ac] sm:$0xf0]  ;;  %6554 = vmatmul.bf16.vlgmr.msra.gmra.mxu3 %v14323_v49  ;;  %6560 = vmatpush.bf16.msrb.mxu0 %v10735_v50 }
  0xac   :  { %v10718_v53 = vld [vmem:[%s19771_s1 + $0x14a0] sm:$0xf]  ;;  %v11119_v56 = vor.u32 %v12934_v48, %v11118_v47  ;;  %v12866_v57 = vld [vmem:[%s19771_s1 + $0x15ac] sm:$0xf0]  ;;  %6573 = vmatpush.bf16.msrb.mxu1 %v10863_v51 }
  0xad   :  { %v10846_v55 = vld [vmem:[%s19771_s1 + $0x15a0] sm:$0xf]  ;;  %v12898_v59 = vld [vmem:[%s19771_s1 + $0x16ac] sm:$0xf0]  ;;  %v10719_v62 = vor.u32 %v12834_v54, %v10718_v53  ;;  %6586 = vmatpush.bf16.msrb.mxu2 %v10991_v52 }
  0xae   :  { %v10974_v58 = vld [vmem:[%s19771_s1 + $0x16a0] sm:$0xf]  ;;  %v12930_v61 = vld [vmem:[%s19771_s1 + $0x17ac] sm:$0xf0]  ;;  %v10847_v63 = vor.u32 %v12866_v57, %v10846_v55  ;;  %6599 = vmatpush.bf16.msrb.mxu3 %v11119_v56 }
  0xaf   :  { %v11102_v60 = vld [vmem:[%s19771_s1 + $0x17a0] sm:$0xf]  ;;  %v10975_v0 = vor.u32 %v12898_v59, %v10974_v58  ;;  %v12830_v2 = vld [vmem:[%s19771_s1 + $0x148c] sm:$0xf0]  ;;  %6561 = vmatpush.bf16.msrb.mxu0 %v10719_v62  ;;  %v6308_v57 = vpop.f32.mrf.mxu0 }
  0xb0   :  { %v10702_v1 = vld [vmem:[%s19771_s1 + $0x1480] sm:$0xf]  ;;  %v11103_v4 = vor.u32 %v12930_v61, %v11102_v60  ;;  %v12862_v5 = vld [vmem:[%s19771_s1 + $0x158c] sm:$0xf0]  ;;  %6574 = vmatpush.bf16.msrb.mxu1 %v10847_v63 }
  0xb1   :  { %v10830_v3 = vld [vmem:[%s19771_s1 + $0x1580] sm:$0xf]  ;;  %v12894_v7 = vld [vmem:[%s19771_s1 + $0x168c] sm:$0xf0]  ;;  %v10703_v10 = vor.u32 %v12830_v2, %v10702_v1  ;;  %6587 = vmatpush.bf16.msrb.mxu2 %v10975_v0  ;;  %v6321_v0 = vpop.f32.mrf.mxu1 }
  0xb2   :  { %v10958_v6 = vld [vmem:[%s19771_s1 + $0x1680] sm:$0xf]  ;;  %v12926_v9 = vld [vmem:[%s19771_s1 + $0x178c] sm:$0xf0]  ;;  %v10831_v12 = vor.u32 %v12862_v5, %v10830_v3  ;;  %6600 = vmatpush.bf16.msrb.mxu3 %v11103_v4 }
  0xb3   :  { %v11086_v8 = vld [vmem:[%s19771_s1 + $0x1780] sm:$0xf]  ;;  %v10959_v13 = vor.u32 %v12894_v7, %v10958_v6  ;;  %v12826_v14 = vld [vmem:[%s19771_s1 + $0x146c] sm:$0xf0]  ;;  %6562 = vmatpush.bf16.msrb.mxu0 %v10703_v10 }
  0xb4   :  { %v10686_v11 = vld [vmem:[%s19771_s1 + $0x1460] sm:$0xf]  ;;  %v12858_v16 = vld [vmem:[%s19771_s1 + $0x156c] sm:$0xf0]  ;;  %v11087_v17 = vor.u32 %v12926_v9, %v11086_v8  ;;  %6575 = vmatpush.bf16.msrb.mxu1 %v10831_v12 }
  0xb5   :  { %v10814_v15 = vld [vmem:[%s19771_s1 + $0x1560] sm:$0xf]  ;;  %v12890_v24 = vld [vmem:[%s19771_s1 + $0x166c] sm:$0xf0]  ;;  %v10687_v34 = vor.u32 %v12826_v14, %v10686_v11  ;;  %6588 = vmatpush.bf16.msrb.mxu2 %v10959_v13 }
  0xb6   :  { %v10942_v21 = vld [vmem:[%s19771_s1 + $0x1660] sm:$0xf]  ;;  %v12922_v32 = vld [vmem:[%s19771_s1 + $0x176c] sm:$0xf0]  ;;  %v10815_v39 = vor.u32 %v12858_v16, %v10814_v15  ;;  %6601 = vmatpush.bf16.msrb.mxu3 %v11087_v17 }
  0xb7   :  { %v1057_v26 = vld [vmem:[%s19773_s2] sm:$0xf]  ;;  %v10943_v40 = vor.u32 %v12890_v24, %v10942_v21  ;;  %v12822_v43 = vld [vmem:[%s19771_s1 + $0x144c] sm:$0xf0]  ;;  %6563 = vmatpush.bf16.msrb.mxu0 %v10687_v34  ;;  %v6334_v21 = vpop.f32.mrf.mxu2 }
  0xb8   :  { %v11070_v27 = vld [vmem:[%s19771_s1 + $0x1760] sm:$0xf]  ;;  %v1059_v48 = vperm.slane %v1057_v26, 0  ;;  %v12854_v51 = vld [vmem:[%s19771_s1 + $0x154c] sm:$0xf0]  ;;  %6576 = vmatpush.bf16.msrb.mxu1 %v10815_v39 }
  0xb9   :  { %v10670_v36 = vld [vmem:[%s19771_s1 + $0x1440] sm:$0xf]  ;;  %v11071_v50 = vor.u32 %v12922_v32, %v11070_v27  ;;  %v12886_v53 = vld [vmem:[%s19771_s1 + $0x164c] sm:$0xf0]  ;;  %6589 = vmatpush.bf16.msrb.mxu2 %v10943_v40  ;;  %v28_v32 = vld [vmem:[%s19772_s0 + $0x58] sm:$0xff] }
  0xba   :  { %v10798_v47 = vld [vmem:[%s19771_s1 + $0x1540] sm:$0xf]  ;;  %v12918_v55 = vld [vmem:[%s19771_s1 + $0x174c] sm:$0xf0]  ;;  %v10671_v56 = vor.u32 %v12822_v43, %v10670_v36  ;;  %v6309_v63 = vadd.f32 %v6308_v57, %v1059_v48  ;;  %v6347_v36 = vpop.f32.mrf.mxu3 }
  0xbb   :  { %v10926_v52 = vld [vmem:[%s19771_s1 + $0x1640] sm:$0xf]  ;;  %v10799_v58 = vor.u32 %v12854_v51, %v10798_v47  ;;  %v12818_v61 = vld [vmem:[%s19771_s1 + $0x142c] sm:$0xf0]  ;;  %6602 = vmatpush.bf16.msrb.mxu3 %v11071_v50 }
  0xbc   :  { %v11054_v54 = vld [vmem:[%s19771_s1 + $0x1740] sm:$0xf]  ;;  %v10927_v59 = vor.u32 %v12886_v53, %v10926_v52  ;;  %v12850_v2 = vld [vmem:[%s19771_s1 + $0x152c] sm:$0xf0]  ;;  %v6322_v8 = vadd.f32 %v6321_v0, %v6309_v63  ;;  %6564 = vmatpush.bf16.msrb.mxu0 %v10671_v56  ;;  %v1106_v0 = vunpack.c.h.b16 %v28_v32 }
  0xbd   :  { %v10654_v60 = vld [vmem:[%s19771_s1 + $0x1420] sm:$0xf]  ;;  %v11055_v1 = vor.u32 %v12918_v55, %v11054_v54  ;;  %v12882_v4 = vld [vmem:[%s19771_s1 + $0x162c] sm:$0xf0]  ;;  %6577 = vmatpush.bf16.msrb.mxu1 %v10799_v58  ;;  %v6310_v54 = vpop.f32.mrf.mxu0 }
  0xbe   :  { %v10782_v62 = vld [vmem:[%s19771_s1 + $0x1520] sm:$0xf]  ;;  %v12914_v6 = vld [vmem:[%s19771_s1 + $0x172c] sm:$0xf0]  ;;  %v10655_v9 = vor.u32 %v12818_v61, %v10654_v60  ;;  %6590 = vmatpush.bf16.msrb.mxu2 %v10927_v59  ;;  %v6335_v34 = vadd.f32 %v6334_v21, %v6322_v8  ;;  %v1105_v59 = vunpack.c.l.b16 %v28_v32  ;;  %v6323_v61 = vpop.f32.mrf.mxu1 }
  0xbf   :  { %v10910_v3 = vld [vmem:[%s19771_s1 + $0x1620] sm:$0xf]  ;;  %v12814_v10 = vld [vmem:[%s19771_s1 + $0x140c] sm:$0xf0]  ;;  %v10783_v13 = vor.u32 %v12850_v2, %v10782_v62  ;;  %6603 = vmatpush.bf16.msrb.mxu3 %v11055_v1 }
  0xc0   :  { %v11038_v5 = vld [vmem:[%s19771_s1 + $0x1720] sm:$0xf]  ;;  %v12846_v12 = vld [vmem:[%s19771_s1 + $0x150c] sm:$0xf0]  ;;  %v10911_v14 = vor.u32 %v12882_v4, %v10910_v3  ;;  %6565 = vmatpush.bf16.msrb.mxu0 %v10655_v9  ;;  %v14500_v53 = vadd.f32 %v6347_v36, %v6335_v34 }
  0xc1   :  { %v10638_v7 = vld [vmem:[%s19771_s1 + $0x1400] sm:$0xf]  ;;  %v12878_v16 = vld [vmem:[%s19771_s1 + $0x160c] sm:$0xf0]  ;;  %v11039_v24 = vor.u32 %v12914_v6, %v11038_v5  ;;  %6578 = vmatpush.bf16.msrb.mxu1 %v10783_v13 }
  0xc2   :  { %v10766_v11 = vld [vmem:[%s19771_s1 + $0x1500] sm:$0xf]  ;;  %v27_v17 = vld [vmem:[%s19772_s0 + $0x50] sm:$0xff]  ;;  %v10639_v47 = vor.u32 %v12814_v10, %v10638_v7  ;;  %6591 = vmatpush.bf16.msrb.mxu2 %v10911_v14  ;;  %v6349_v21 = vpop.f32.mrf.mxu3 }
  0xc3   :  { %v10894_v15 = vld [vmem:[%s19771_s1 + $0x1600] sm:$0xf]  ;;  %v12910_v27 = vld [vmem:[%s19771_s1 + $0x170c] sm:$0xf0]  ;;  %v1103_v52 = vunpack.c.l.b16 %v27_v17  ;;  %v10767_v55 = vor.u32 %v12846_v12, %v10766_v11  ;;  %v1104_v60 = vunpack.c.h.b16 %v27_v17  ;;  %6604 = vmatpush.bf16.msrb.mxu3 %v11039_v24  ;;  %v14528_v11 = vpack.c.b16 %v1105_v59, %v1105_v59 }
  0xc4   :  { %v11022_v26 = vld [vmem:[%s19771_s1 + $0x1700] sm:$0xf]  ;;  %v12970_v40 = vld [vmem:[%s19771_s1 + $0x18ec] sm:$0xf0]  ;;  %v10895_v56 = vor.u32 %v12878_v16, %v10894_v15  ;;  %6566 = vmatpush.bf16.msrb.mxu0 %v10639_v47  ;;  %v6336_v15 = vpop.f32.mrf.mxu2  ;;  %v14538_v16 = vpack.c.b16 %v1106_v0, %v1106_v0 }
  0xc5   :  { %v11262_v39 = vld [vmem:[%s19771_s1 + $0x18e0] sm:$0xf]  ;;  %v13002_v48 = vld [vmem:[%s19771_s1 + $0x19ec] sm:$0xf0]  ;;  %v11023_v62 = vor.u32 %v12910_v27, %v11022_v26  ;;  %v14517_v7 = vpack.c.b16 %v1103_v52, %v1103_v52  ;;  %6579 = vmatpush.bf16.msrb.mxu1 %v10767_v55  ;;  %v14530_v12 = vpack.c.b16 %v1104_v60, %v1104_v60  ;;  %v6360_v0 = vpop.f32.mrf.mxu0 }
  0xc6   :  { %v11390_v43 = vld [vmem:[%s19771_s1 + $0x19e0] sm:$0xf]  ;;  %v13034_v51 = vld [vmem:[%s19771_s1 + $0x1aec] sm:$0xf0]  ;;  %v11263_v63 = vor.u32 %v12970_v40, %v11262_v39  ;;  %6592 = vmatpush.bf16.msrb.mxu2 %v10895_v56 }
  0xc7   :  { %v11518_v50 = vld [vmem:[%s19771_s1 + $0x1ae0] sm:$0xf]  ;;  %v13066_v58 = vld [vmem:[%s19771_s1 + $0x1bec] sm:$0xf0]  ;;  %v11391_v1 = vor.u32 %v13002_v48, %v11390_v43  ;;  %6605 = vmatpush.bf16.msrb.mxu3 %v11023_v62  ;;  %6567 = vmatmul.bf16.vlgmr.msrb.gmra.mxu0 %v14517_v7 }
  0xc8   :  { %v11646_v57 = vld [vmem:[%s19771_s1 + $0x1be0] sm:$0xf]  ;;  %v11519_v2 = vor.u32 %v13034_v51, %v11518_v50  ;;  %v12966_v4 = vld [vmem:[%s19771_s1 + $0x18cc] sm:$0xf0]  ;;  %6611 = vmatpush.bf16.msra.mxu0 %v11263_v63  ;;  %6580 = vmatmul.bf16.vlgmr.msrb.gmra.mxu1 %v14530_v12 }
  0xc9   :  { %v11246_v3 = vld [vmem:[%s19771_s1 + $0x18c0] sm:$0xf]  ;;  %v11647_v6 = vor.u32 %v13066_v58, %v11646_v57  ;;  %v12998_v8 = vld [vmem:[%s19771_s1 + $0x19cc] sm:$0xf0]  ;;  %6624 = vmatpush.bf16.msra.mxu1 %v11391_v1  ;;  %6593 = vmatmul.bf16.vlgmr.msrb.gmra.mxu2 %v14528_v11 }
  0xca   :  { %v11374_v5 = vld [vmem:[%s19771_s1 + $0x19c0] sm:$0xf]  ;;  %v13030_v10 = vld [vmem:[%s19771_s1 + $0x1acc] sm:$0xf0]  ;;  %v11247_v17 = vor.u32 %v12966_v4, %v11246_v3  ;;  %6637 = vmatpush.bf16.msra.mxu2 %v11519_v2  ;;  %6606 = vmatmul.bf16.vlgmr.msrb.gmra.mxu3 %v14538_v16 }
  0xcb   :  { %v11502_v9 = vld [vmem:[%s19771_s1 + $0x1ac0] sm:$0xf]  ;;  %v13062_v14 = vld [vmem:[%s19771_s1 + $0x1bcc] sm:$0xf0]  ;;  %v11375_v24 = vor.u32 %v12998_v8, %v11374_v5  ;;  %6650 = vmatpush.bf16.msra.mxu3 %v11647_v6  ;;  %v6361_v6 = vadd.f32 %v6360_v0, %v14500_v53  ;;  %v6373_v8 = vpop.f32.mrf.mxu1 }
  0xcc   :  { %v11630_v13 = vld [vmem:[%s19771_s1 + $0x1bc0] sm:$0xf]  ;;  %v11503_v26 = vor.u32 %v13030_v10, %v11502_v9  ;;  %v12962_v32 = vld [vmem:[%s19771_s1 + $0x18ac] sm:$0xf0]  ;;  %6612 = vmatpush.bf16.msra.mxu0 %v11247_v17 }
  0xcd   :  { %v11230_v27 = vld [vmem:[%s19771_s1 + $0x18a0] sm:$0xf]  ;;  %v11631_v36 = vor.u32 %v13062_v14, %v11630_v13  ;;  %v12994_v39 = vld [vmem:[%s19771_s1 + $0x19ac] sm:$0xf0]  ;;  %6625 = vmatpush.bf16.msra.mxu1 %v11375_v24  ;;  %v6374_v17 = vadd.f32 %v6373_v8, %v6361_v6 }
  0xce   :  { %v11358_v34 = vld [vmem:[%s19771_s1 + $0x19a0] sm:$0xf]  ;;  %v13026_v43 = vld [vmem:[%s19771_s1 + $0x1aac] sm:$0xf0]  ;;  %v11231_v50 = vor.u32 %v12962_v32, %v11230_v27  ;;  %6638 = vmatpush.bf16.msra.mxu2 %v11503_v26 }
  0xcf   :  { %v11486_v40 = vld [vmem:[%s19771_s1 + $0x1aa0] sm:$0xf]  ;;  %v13058_v48 = vld [vmem:[%s19771_s1 + $0x1bac] sm:$0xf0]  ;;  %v11359_v51 = vor.u32 %v12994_v39, %v11358_v34  ;;  %6651 = vmatpush.bf16.msra.mxu3 %v11631_v36  ;;  %v6386_v36 = vpop.f32.mrf.mxu2 }
  0xd0   :  { %v11614_v47 = vld [vmem:[%s19771_s1 + $0x1ba0] sm:$0xf]  ;;  %v11487_v52 = vor.u32 %v13026_v43, %v11486_v40  ;;  %v12958_v55 = vld [vmem:[%s19771_s1 + $0x188c] sm:$0xf0]  ;;  %6613 = vmatpush.bf16.msra.mxu0 %v11231_v50  ;;  %v6399_v50 = vpop.f32.mrf.mxu3 }
  0xd1   :  { %v11214_v54 = vld [vmem:[%s19771_s1 + $0x1880] sm:$0xf]  ;;  %v11615_v57 = vor.u32 %v13058_v48, %v11614_v47  ;;  %v12990_v58 = vld [vmem:[%s19771_s1 + $0x198c] sm:$0xf0]  ;;  %6626 = vmatpush.bf16.msra.mxu1 %v11359_v51  ;;  %v6387_v48 = vadd.f32 %v6386_v36, %v6374_v17 }
  0xd2   :  { %v11342_v56 = vld [vmem:[%s19771_s1 + $0x1980] sm:$0xf]  ;;  %v13022_v60 = vld [vmem:[%s19771_s1 + $0x1a8c] sm:$0xf0]  ;;  %v11215_v63 = vor.u32 %v12958_v55, %v11214_v54  ;;  %6639 = vmatpush.bf16.msra.mxu2 %v11487_v52 }
  0xd3   :  { %v11470_v59 = vld [vmem:[%s19771_s1 + $0x1a80] sm:$0xf]  ;;  %v13054_v62 = vld [vmem:[%s19771_s1 + $0x1b8c] sm:$0xf0]  ;;  %v11343_v1 = vor.u32 %v12990_v58, %v11342_v56  ;;  %6652 = vmatpush.bf16.msra.mxu3 %v11615_v57  ;;  %v14641_v55 = vadd.f32 %v6399_v50, %v6387_v48  ;;  %v6362_v56 = vpop.f32.mrf.mxu0 }
  0xd4   :  { %v11598_v61 = vld [vmem:[%s19771_s1 + $0x1b80] sm:$0xf]  ;;  %v11471_v2 = vor.u32 %v13022_v60, %v11470_v59  ;;  %v12954_v4 = vld [vmem:[%s19771_s1 + $0x186c] sm:$0xf0]  ;;  %6614 = vmatpush.bf16.msra.mxu0 %v11215_v63 }
  0xd5   :  { %v11198_v3 = vld [vmem:[%s19771_s1 + $0x1860] sm:$0xf]  ;;  %v11599_v9 = vor.u32 %v13054_v62, %v11598_v61  ;;  %v12986_v10 = vld [vmem:[%s19771_s1 + $0x196c] sm:$0xf0]  ;;  %6627 = vmatpush.bf16.msra.mxu1 %v11343_v1  ;;  %v6375_v62 = vpop.f32.mrf.mxu1 }
  0xd6   :  { %v11326_v5 = vld [vmem:[%s19771_s1 + $0x1960] sm:$0xf]  ;;  %v13018_v14 = vld [vmem:[%s19771_s1 + $0x1a6c] sm:$0xf0]  ;;  %v11199_v21 = vor.u32 %v12954_v4, %v11198_v3  ;;  %6640 = vmatpush.bf16.msra.mxu2 %v11471_v2 }
  0xd7   :  { %v11454_v13 = vld [vmem:[%s19771_s1 + $0x1a60] sm:$0xf]  ;;  %v13050_v53 = vld [vmem:[%s19771_s1 + $0x1b6c] sm:$0xf0]  ;;  %v11327_v24 = vor.u32 %v12986_v10, %v11326_v5  ;;  %6653 = vmatpush.bf16.msra.mxu3 %v11599_v9 }
  0xd8   :  { %v11582_v15 = vld [vmem:[%s19771_s1 + $0x1b60] sm:$0xf]  ;;  %v11455_v26 = vor.u32 %v13018_v14, %v11454_v13  ;;  %v12950_v32 = vld [vmem:[%s19771_s1 + $0x184c] sm:$0xf0]  ;;  %6615 = vmatpush.bf16.msra.mxu0 %v11199_v21  ;;  %v6388_v21 = vpop.f32.mrf.mxu2 }
  0xd9   :  { %v11182_v27 = vld [vmem:[%s19771_s1 + $0x1840] sm:$0xf]  ;;  %v11583_v39 = vor.u32 %v13050_v53, %v11582_v15  ;;  %v12982_v40 = vld [vmem:[%s19771_s1 + $0x194c] sm:$0xf0]  ;;  %6628 = vmatpush.bf16.msra.mxu1 %v11327_v24 }
  0xda   :  { %v11310_v34 = vld [vmem:[%s19771_s1 + $0x1940] sm:$0xf]  ;;  %v13014_v47 = vld [vmem:[%s19771_s1 + $0x1a4c] sm:$0xf0]  ;;  %v11183_v54 = vor.u32 %v12950_v32, %v11182_v27  ;;  %6641 = vmatpush.bf16.msra.mxu2 %v11455_v26  ;;  %v30_v32 = vld [vmem:[%s19772_s0 + $0x68] sm:$0xff] }
  0xdb   :  { %v11438_v43 = vld [vmem:[%s19771_s1 + $0x1a40] sm:$0xf]  ;;  %v13046_v52 = vld [vmem:[%s19771_s1 + $0x1b4c] sm:$0xf0]  ;;  %v11311_v57 = vor.u32 %v12982_v40, %v11310_v34  ;;  %6654 = vmatpush.bf16.msra.mxu3 %v11583_v39  ;;  %v6401_v34 = vpop.f32.mrf.mxu3  ;;  %v1110_v62 = vunpack.c.h.b16 %v30_v32 }
  0xdc   :  { %v11566_v51 = vld [vmem:[%s19771_s1 + $0x1b40] sm:$0xf]  ;;  %v11439_v58 = vor.u32 %v13014_v47, %v11438_v43  ;;  %v12946_v60 = vld [vmem:[%s19771_s1 + $0x182c] sm:$0xf0]  ;;  %6616 = vmatpush.bf16.msra.mxu0 %v11183_v54 }
  0xdd   :  { %v11166_v59 = vld [vmem:[%s19771_s1 + $0x1820] sm:$0xf]  ;;  %v11567_v63 = vor.u32 %v13046_v52, %v11566_v51  ;;  %v12978_v0 = vld [vmem:[%s19771_s1 + $0x192c] sm:$0xf0]  ;;  %6629 = vmatpush.bf16.msra.mxu1 %v11311_v57 }
  0xde   :  { %v11294_v61 = vld [vmem:[%s19771_s1 + $0x1920] sm:$0xf]  ;;  %v13010_v2 = vld [vmem:[%s19771_s1 + $0x1a2c] sm:$0xf0]  ;;  %v11167_v6 = vor.u32 %v12946_v60, %v11166_v59  ;;  %6642 = vmatpush.bf16.msra.mxu2 %v11439_v58  ;;  %v1109_v58 = vunpack.c.l.b16 %v30_v32 }
  0xdf   :  { %v11422_v1 = vld [vmem:[%s19771_s1 + $0x1a20] sm:$0xf]  ;;  %v13042_v4 = vld [vmem:[%s19771_s1 + $0x1b2c] sm:$0xf0]  ;;  %v11295_v13 = vor.u32 %v12978_v0, %v11294_v61  ;;  %6655 = vmatpush.bf16.msra.mxu3 %v11567_v63 }
  0xe0   :  { %v11550_v3 = vld [vmem:[%s19771_s1 + $0x1b20] sm:$0xf]  ;;  %v12942_v8 = vld [vmem:[%s19771_s1 + $0x180c] sm:$0xf0]  ;;  %v11423_v14 = vor.u32 %v13010_v2, %v11422_v1  ;;  %6617 = vmatpush.bf16.msra.mxu0 %v11167_v6 }
  0xe1   :  { %v11150_v5 = vld [vmem:[%s19771_s1 + $0x1800] sm:$0xf]  ;;  %v12974_v10 = vld [vmem:[%s19771_s1 + $0x190c] sm:$0xf0]  ;;  %v11551_v24 = vor.u32 %v13042_v4, %v11550_v3  ;;  %6630 = vmatpush.bf16.msra.mxu1 %v11295_v13 }
  0xe2   :  { %v11278_v9 = vld [vmem:[%s19771_s1 + $0x1900] sm:$0xf]  ;;  %v13006_v53 = vld [vmem:[%s19771_s1 + $0x1a0c] sm:$0xf0]  ;;  %v11151_v43 = vor.u32 %v12942_v8, %v11150_v5  ;;  %6643 = vmatpush.bf16.msra.mxu2 %v11423_v14 }
  0xe3   :  { %v11406_v15 = vld [vmem:[%s19771_s1 + $0x1a00] sm:$0xf]  ;;  %v13038_v27 = vld [vmem:[%s19771_s1 + $0x1b0c] sm:$0xf0]  ;;  %v11279_v52 = vor.u32 %v12974_v10, %v11278_v9  ;;  %6656 = vmatpush.bf16.msra.mxu3 %v11551_v24  ;;  %v14741_v10 = vpack.c.b16 %v1109_v58, %v1109_v58 }
  0xe4   :  { %v29_v17 = vld [vmem:[%s19772_s0 + $0x60] sm:$0xff]  ;;  %v13098_v39 = vld [vmem:[%s19771_s1 + $0x1cec] sm:$0xf0]  ;;  %v11407_v54 = vor.u32 %v13006_v53, %v11406_v15  ;;  %6618 = vmatpush.bf16.msra.mxu0 %v11151_v43  ;;  %v14751_v53 = vpack.c.b16 %v1110_v62, %v1110_v62 }
  0xe5   :  { %v11534_v26 = vld [vmem:[%s19771_s1 + $0x1b00] sm:$0xf]  ;;  %v13130_v47 = vld [vmem:[%s19771_s1 + $0x1dec] sm:$0xf0]  ;;  %v1107_v51 = vunpack.c.l.b16 %v29_v17  ;;  %v1108_v59 = vunpack.c.h.b16 %v29_v17  ;;  %6631 = vmatpush.bf16.msra.mxu1 %v11279_v52 }
  0xe6   :  { %v11774_v36 = vld [vmem:[%s19771_s1 + $0x1ce0] sm:$0xf]  ;;  %v13162_v50 = vld [vmem:[%s19771_s1 + $0x1eec] sm:$0xf0]  ;;  %v11535_v60 = vor.u32 %v13038_v27, %v11534_v26  ;;  %6644 = vmatpush.bf16.msra.mxu2 %v11407_v54 }
  0xe7   :  { %v11902_v40 = vld [vmem:[%s19771_s1 + $0x1de0] sm:$0xf]  ;;  %v13194_v57 = vld [vmem:[%s19771_s1 + $0x1fec] sm:$0xf0]  ;;  %v11775_v61 = vor.u32 %v13098_v39, %v11774_v36  ;;  %v14730_v5 = vpack.c.b16 %v1107_v51, %v1107_v51  ;;  %v14743_v13 = vpack.c.b16 %v1108_v59, %v1108_v59 }
  0xe8   :  { %v12030_v48 = vld [vmem:[%s19771_s1 + $0x1ee0] sm:$0xf]  ;;  %v11903_v63 = vor.u32 %v13130_v47, %v11902_v40  ;;  %v13094_v2 = vld [vmem:[%s19771_s1 + $0x1ccc] sm:$0xf0]  ;;  %6657 = vmatpush.bf16.msra.mxu3 %v11535_v60 }
  0xe9   :  { %v12158_v56 = vld [vmem:[%s19771_s1 + $0x1fe0] sm:$0xf]  ;;  %v12031_v0 = vor.u32 %v13162_v50, %v12030_v48  ;;  %v13126_v6 = vld [vmem:[%s19771_s1 + $0x1dcc] sm:$0xf0]  ;;  %6663 = vmatpush.bf16.msrb.mxu0 %v11775_v61  ;;  %6645 = vmatmul.bf16.vlgmr.msra.gmra.mxu2 %v14741_v10  ;;  %v6412_v61 = vpop.f32.mrf.mxu0 }
  0xea   :  { %v11758_v1 = vld [vmem:[%s19771_s1 + $0x1cc0] sm:$0xf]  ;;  %v12159_v4 = vor.u32 %v13194_v57, %v12158_v56  ;;  %v13158_v9 = vld [vmem:[%s19771_s1 + $0x1ecc] sm:$0xf0]  ;;  %6676 = vmatpush.bf16.msrb.mxu1 %v11903_v63  ;;  %6619 = vmatmul.bf16.vlgmr.msra.gmra.mxu0 %v14730_v5 }
  0xeb   :  { %v11886_v3 = vld [vmem:[%s19771_s1 + $0x1dc0] sm:$0xf]  ;;  %v13190_v15 = vld [vmem:[%s19771_s1 + $0x1fcc] sm:$0xf0]  ;;  %v11759_v17 = vor.u32 %v13094_v2, %v11758_v1  ;;  %6689 = vmatpush.bf16.msrb.mxu2 %v12031_v0  ;;  %6632 = vmatmul.bf16.vlgmr.msra.gmra.mxu1 %v14743_v13  ;;  %v6413_v0 = vadd.f32 %v6412_v61, %v14641_v55  ;;  %v6425_v2 = vpop.f32.mrf.mxu1 }
  0xec   :  { %v12014_v8 = vld [vmem:[%s19771_s1 + $0x1ec0] sm:$0xf]  ;;  %v11887_v21 = vor.u32 %v13126_v6, %v11886_v3  ;;  %v13090_v27 = vld [vmem:[%s19771_s1 + $0x1cac] sm:$0xf0]  ;;  %6702 = vmatpush.bf16.msrb.mxu3 %v12159_v4 }
  0xed   :  { %v12142_v14 = vld [vmem:[%s19771_s1 + $0x1fc0] sm:$0xf]  ;;  %v12015_v24 = vor.u32 %v13158_v9, %v12014_v8  ;;  %v13122_v36 = vld [vmem:[%s19771_s1 + $0x1dac] sm:$0xf0]  ;;  %6658 = vmatmul.bf16.vlgmr.msra.gmra.mxu3 %v14751_v53  ;;  %6664 = vmatpush.bf16.msrb.mxu0 %v11759_v17 }
  0xee   :  { %v11742_v26 = vld [vmem:[%s19771_s1 + $0x1ca0] sm:$0xf]  ;;  %v12143_v34 = vor.u32 %v13190_v15, %v12142_v14  ;;  %v13154_v40 = vld [vmem:[%s19771_s1 + $0x1eac] sm:$0xf0]  ;;  %6677 = vmatpush.bf16.msrb.mxu1 %v11887_v21  ;;  %v6426_v14 = vadd.f32 %v6425_v2, %v6413_v0 }
  0xef   :  { %v11870_v32 = vld [vmem:[%s19771_s1 + $0x1da0] sm:$0xf]  ;;  %v13186_v47 = vld [vmem:[%s19771_s1 + $0x1fac] sm:$0xf0]  ;;  %v11743_v48 = vor.u32 %v13090_v27, %v11742_v26  ;;  %6690 = vmatpush.bf16.msrb.mxu2 %v12015_v24 }
  0xf0   :  { %v11998_v39 = vld [vmem:[%s19771_s1 + $0x1ea0] sm:$0xf]  ;;  %v11871_v50 = vor.u32 %v13122_v36, %v11870_v32  ;;  %v13086_v54 = vld [vmem:[%s19771_s1 + $0x1c8c] sm:$0xf0]  ;;  %6703 = vmatpush.bf16.msrb.mxu3 %v12143_v34 }
  0xf1   :  { %v12126_v43 = vld [vmem:[%s19771_s1 + $0x1fa0] sm:$0xf]  ;;  %v11999_v51 = vor.u32 %v13154_v40, %v11998_v39  ;;  %v13118_v58 = vld [vmem:[%s19771_s1 + $0x1d8c] sm:$0xf0]  ;;  %6665 = vmatpush.bf16.msrb.mxu0 %v11743_v48 }
  0xf2   :  { %v11726_v52 = vld [vmem:[%s19771_s1 + $0x1c80] sm:$0xf]  ;;  %v12127_v57 = vor.u32 %v13186_v47, %v12126_v43  ;;  %v13150_v60 = vld [vmem:[%s19771_s1 + $0x1e8c] sm:$0xf0]  ;;  %6678 = vmatpush.bf16.msrb.mxu1 %v11871_v50  ;;  %v6438_v47 = vpop.f32.mrf.mxu2 }
  0xf3   :  { %v11854_v56 = vld [vmem:[%s19771_s1 + $0x1d80] sm:$0xf]  ;;  %v13182_v63 = vld [vmem:[%s19771_s1 + $0x1f8c] sm:$0xf0]  ;;  %v11727_v1 = vor.u32 %v13086_v54, %v11726_v52  ;;  %6691 = vmatpush.bf16.msrb.mxu2 %v11999_v51  ;;  %v6439_v52 = vadd.f32 %v6438_v47, %v6426_v14  ;;  %v6451_v54 = vpop.f32.mrf.mxu3  ;;  %v32_v47 = vld [vmem:[%s19772_s0 + $0x78] sm:$0xff] }
  0xf4   :  { %v11982_v59 = vld [vmem:[%s19771_s1 + $0x1e80] sm:$0xf]  ;;  %v11855_v3 = vor.u32 %v13118_v58, %v11854_v56  ;;  %v13082_v8 = vld [vmem:[%s19771_s1 + $0x1c6c] sm:$0xf0]  ;;  %6704 = vmatpush.bf16.msrb.mxu3 %v12127_v57  ;;  %v6414_v58 = vpop.f32.mrf.mxu0 }
  0xf5   :  { %v12110_v62 = vld [vmem:[%s19771_s1 + $0x1f80] sm:$0xf]  ;;  %v11983_v4 = vor.u32 %v13150_v60, %v11982_v59  ;;  %v13114_v15 = vld [vmem:[%s19771_s1 + $0x1d6c] sm:$0xf0]  ;;  %6666 = vmatpush.bf16.msrb.mxu0 %v11727_v1  ;;  %v6427_v60 = vpop.f32.mrf.mxu1  ;;  %v14854_v61 = vadd.f32 %v6451_v54, %v6439_v52  ;;  %v12232_v52 = vld [vmem:[%s19771_s1 + $0x1e4] sm:$0xf] }
  0xf6   :  { %v11710_v6 = vld [vmem:[%s19771_s1 + $0x1c60] sm:$0xf]  ;;  %v12111_v55 = vor.u32 %v13182_v63, %v12110_v62  ;;  %v13146_v21 = vld [vmem:[%s19771_s1 + $0x1e6c] sm:$0xf0]  ;;  %6679 = vmatpush.bf16.msrb.mxu1 %v11855_v3  ;;  %v12264_v58 = vld [vmem:[%s19771_s1 + $0x2e4] sm:$0xf] }
  0xf7   :  { %v11838_v9 = vld [vmem:[%s19771_s1 + $0x1d60] sm:$0xf]  ;;  %v13178_v26 = vld [vmem:[%s19771_s1 + $0x1f6c] sm:$0xf0]  ;;  %v11711_v27 = vor.u32 %v13082_v8, %v11710_v6  ;;  %6692 = vmatpush.bf16.msrb.mxu2 %v11983_v4 }
  0xf8   :  { %v11966_v17 = vld [vmem:[%s19771_s1 + $0x1e60] sm:$0xf]  ;;  %v11839_v32 = vor.u32 %v13114_v15, %v11838_v9  ;;  %v13078_v39 = vld [vmem:[%s19771_s1 + $0x1c4c] sm:$0xf0]  ;;  %6705 = vmatpush.bf16.msrb.mxu3 %v12111_v55 }
  0xf9   :  { %v12094_v24 = vld [vmem:[%s19771_s1 + $0x1f60] sm:$0xf]  ;;  %v11967_v34 = vor.u32 %v13146_v21, %v11966_v17  ;;  %v13110_v48 = vld [vmem:[%s19771_s1 + $0x1d4c] sm:$0xf0]  ;;  %6667 = vmatpush.bf16.msrb.mxu0 %v11711_v27 }
  0xfa   :  { %v11694_v36 = vld [vmem:[%s19771_s1 + $0x1c40] sm:$0xf]  ;;  %v12095_v43 = vor.u32 %v13178_v26, %v12094_v24  ;;  %v13142_v51 = vld [vmem:[%s19771_s1 + $0x1e4c] sm:$0xf0]  ;;  %6680 = vmatpush.bf16.msrb.mxu1 %v11839_v32 }
  0xfb   :  { %v11822_v40 = vld [vmem:[%s19771_s1 + $0x1d40] sm:$0xf]  ;;  %v13174_v57 = vld [vmem:[%s19771_s1 + $0x1f4c] sm:$0xf0]  ;;  %v11695_v59 = vor.u32 %v13078_v39, %v11694_v36  ;;  %6693 = vmatpush.bf16.msrb.mxu2 %v11967_v34  ;;  %v6453_v54 = vpop.f32.mrf.mxu3 }
  0xfc   :  { %v11950_v50 = vld [vmem:[%s19771_s1 + $0x1e40] sm:$0xf]  ;;  %v11823_v62 = vor.u32 %v13110_v48, %v11822_v40  ;;  %v13074_v1 = vld [vmem:[%s19771_s1 + $0x1c2c] sm:$0xf0]  ;;  %6706 = vmatpush.bf16.msrb.mxu3 %v12095_v43  ;;  %v6440_v48 = vpop.f32.mrf.mxu2  ;;  %v12224_v54 = vld [vmem:[%s19771_s1 + $0x1a4] sm:$0xf] }
  0xfd   :  { %v12078_v56 = vld [vmem:[%s19771_s1 + $0x1f40] sm:$0xf]  ;;  %v11951_v63 = vor.u32 %v13142_v51, %v11950_v50  ;;  %v13106_v4 = vld [vmem:[%s19771_s1 + $0x1d2c] sm:$0xf0]  ;;  %6668 = vmatpush.bf16.msrb.mxu0 %v11695_v59  ;;  %v12200_v50 = vld [vmem:[%s19771_s1 + $0xe4] sm:$0xf] }
  0xfe   :  { %v11678_v0 = vld [vmem:[%s19771_s1 + $0x1c20] sm:$0xf]  ;;  %v12079_v3 = vor.u32 %v13174_v57, %v12078_v56  ;;  %v13138_v8 = vld [vmem:[%s19771_s1 + $0x1e2c] sm:$0xf0]  ;;  %6681 = vmatpush.bf16.msrb.mxu1 %v11823_v62  ;;  %v8192_v51 = vld [vmem:[%s19771_s1 + $0xf0] sm:$0xf0] }
  0xff   :  { %v11806_v2 = vld [vmem:[%s19771_s1 + $0x1d20] sm:$0xf]  ;;  %v13170_v55 = vld [vmem:[%s19771_s1 + $0x1f2c] sm:$0xf0]  ;;  %v11679_v15 = vor.u32 %v13074_v1, %v11678_v0  ;;  %6694 = vmatpush.bf16.msrb.mxu2 %v11951_v63  ;;  %v8320_v57 = vld [vmem:[%s19771_s1 + $0x1f0] sm:$0xf0] }
 0x100   :  { %v11934_v6 = vld [vmem:[%s19771_s1 + $0x1e20] sm:$0xf]  ;;  %v13070_v17 = vld [vmem:[%s19771_s1 + $0x1c0c] sm:$0xf0]  ;;  %v11807_v26 = vor.u32 %v13106_v4, %v11806_v2  ;;  %6707 = vmatpush.bf16.msrb.mxu3 %v12079_v3  ;;  %v8448_v59 = vld [vmem:[%s19771_s1 + $0x2f0] sm:$0xf0]  ;;  %v1113_v2 = vunpack.c.l.b16 %v32_v47 }
 0x101   :  { %v12062_v9 = vld [vmem:[%s19771_s1 + $0x1f20] sm:$0xf]  ;;  %v13102_v24 = vld [vmem:[%s19771_s1 + $0x1d0c] sm:$0xf0]  ;;  %v11935_v27 = vor.u32 %v13138_v8, %v11934_v6  ;;  %6669 = vmatpush.bf16.msrb.mxu0 %v11679_v15  ;;  %v12296_v0 = vld [vmem:[%s19771_s1 + $0x3e4] sm:$0xf]  ;;  %v8195_v6 = vor.u32 %v12200_v50, %v8192_v51  ;;  %v1114_v8 = vunpack.c.h.b16 %v32_v47 }
 0x102   :  { %v11662_v14 = vld [vmem:[%s19771_s1 + $0x1c00] sm:$0xf]  ;;  %v13134_v34 = vld [vmem:[%s19771_s1 + $0x1e0c] sm:$0xf0]  ;;  %v12063_v39 = vor.u32 %v13170_v55, %v12062_v9  ;;  %6682 = vmatpush.bf16.msrb.mxu1 %v11807_v26  ;;  %v8576_v1 = vld [vmem:[%s19771_s1 + $0x3f0] sm:$0xf0]  ;;  %v8323_v9 = vor.u32 %v12232_v52, %v8320_v57  ;;  %v8451_v55 = vor.u32 %v12264_v58, %v8448_v59 }
 0x103   :  { %v11790_v21 = vld [vmem:[%s19771_s1 + $0x1d00] sm:$0xf]  ;;  %v31_v36 = vld [vmem:[%s19772_s0 + $0x70] sm:$0xff]  ;;  %v11663_v56 = vor.u32 %v13070_v17, %v11662_v14  ;;  %6695 = vmatpush.bf16.msrb.mxu2 %v11935_v27  ;;  %v12196_v14 = vld [vmem:[%s19771_s1 + $0xc4] sm:$0xf] }
 0x104   :  { %v11918_v32 = vld [vmem:[%s19771_s1 + $0x1e00] sm:$0xf]  ;;  %v13166_v43 = vld [vmem:[%s19771_s1 + $0x1f0c] sm:$0xf0]  ;;  %v1111_v60 = vunpack.c.l.b16 %v31_v36  ;;  %v11791_v62 = vor.u32 %v13102_v24, %v11790_v21  ;;  %v1112_v3 = vunpack.c.h.b16 %v31_v36  ;;  %6708 = vmatpush.bf16.msrb.mxu3 %v12063_v39  ;;  %v8176_v15 = vld [vmem:[%s19771_s1 + $0xd0] sm:$0xf0]  ;;  %v8579_v21 = vor.u32 %v12296_v0, %v8576_v1 }
 0x105   :  { %v12046_v40 = vld [vmem:[%s19771_s1 + $0x1f00] sm:$0xf]  ;;  %v11919_v63 = vor.u32 %v13134_v34, %v11918_v32  ;;  %v12228_v17 = vld [vmem:[%s19771_s1 + $0x1c4] sm:$0xf]  ;;  %6670 = vmatpush.bf16.msrb.mxu0 %v11663_v56  ;;  %v8304_v26 = vld [vmem:[%s19771_s1 + $0x1d0] sm:$0xf0]  ;;  %v14954_v34 = vpack.c.b16 %v1113_v2, %v1113_v2  ;;  %v8179_v47 = vor.u32 %v12196_v14, %v8176_v15  ;;  %v6464_v14 = vpop.f32.mrf.mxu0 }
 0x106   :  { %v12047_v4 = vor.u32 %v13166_v43, %v12046_v40  ;;  %v14943_v24 = vpack.c.b16 %v1111_v60, %v1111_v60  ;;  %v12260_v27 = vld [vmem:[%s19771_s1 + $0x2c4] sm:$0xf]  ;;  %v8432_v32 = vld [vmem:[%s19771_s1 + $0x2d0] sm:$0xf0]  ;;  %6683 = vmatpush.bf16.msrb.mxu1 %v11791_v62  ;;  %v14956_v36 = vpack.c.b16 %v1112_v3, %v1112_v3  ;;  %v14964_v43 = vpack.c.b16 %v1114_v8, %v1114_v8 }
 0x107   :  { %6696 = vmatpush.bf16.msrb.mxu2 %v11919_v63  ;;  %v12292_v39 = vld [vmem:[%s19771_s1 + $0x3c4] sm:$0xf]  ;;  %v8560_v40 = vld [vmem:[%s19771_s1 + $0x3d0] sm:$0xf0]  ;;  %v8307_v48 = vor.u32 %v12228_v17, %v8304_v26  ;;  %v8435_v50 = vor.u32 %v12260_v27, %v8432_v32  ;;  %v6477_v27 = vpop.f32.mrf.mxu1 }
 0x108   :  { %6709 = vmatpush.bf16.msrb.mxu3 %v12047_v4  ;;  %v12192_v51 = vld [vmem:[%s19771_s1 + $0xa4] sm:$0xf]  ;;  %v8160_v52 = vld [vmem:[%s19771_s1 + $0xb0] sm:$0xf0]  ;;  %6671 = vmatmul.bf16.vlgmr.msrb.gmra.mxu0 %v14943_v24  ;;  %v8563_v56 = vor.u32 %v12292_v39, %v8560_v40 }
 0x109   :  { %6715 = vmatpush.bf16.msra.mxu0 %v8195_v6  ;;  %v8288_v57 = vld [vmem:[%s19771_s1 + $0x1b0] sm:$0xf0]  ;;  %v12256_v58 = vld [vmem:[%s19771_s1 + $0x2a4] sm:$0xf]  ;;  %6684 = vmatmul.bf16.vlgmr.msrb.gmra.mxu1 %v14956_v36  ;;  %v8163_v63 = vor.u32 %v12192_v51, %v8160_v52 }
 0x10a   :  { %6728 = vmatpush.bf16.msra.mxu1 %v8323_v9  ;;  %v8416_v59 = vld [vmem:[%s19771_s1 + $0x2b0] sm:$0xf0]  ;;  %6697 = vmatmul.bf16.vlgmr.msrb.gmra.mxu2 %v14954_v34  ;;  %v12288_v60 = vld [vmem:[%s19771_s1 + $0x3a4] sm:$0xf]  ;;  %v8291_v0 = vor.u32 %v12224_v54, %v8288_v57 }
 0x10b   :  { %6741 = vmatpush.bf16.msra.mxu2 %v8451_v55  ;;  %v8544_v62 = vld [vmem:[%s19771_s1 + $0x3b0] sm:$0xf0]  ;;  %6710 = vmatmul.bf16.vlgmr.msrb.gmra.mxu3 %v14964_v43  ;;  %v8419_v1 = vor.u32 %v12256_v58, %v8416_v59  ;;  %v12188_v2 = vld [vmem:[%s19771_s1 + $0x84] sm:$0xf] }
 0x10c   :  { %6754 = vmatpush.bf16.msra.mxu3 %v8579_v21  ;;  %v8144_v3 = vld [vmem:[%s19771_s1 + $0x90] sm:$0xf0]  ;;  %v12220_v4 = vld [vmem:[%s19771_s1 + $0x184] sm:$0xf]  ;;  %v8547_v6 = vor.u32 %v12288_v60, %v8544_v62  ;;  %v6465_v21 = vadd.f32 %v6464_v14, %v14854_v61 }
 0x10d   :  { %6716 = vmatpush.bf16.msra.mxu0 %v8179_v47  ;;  %v8272_v8 = vld [vmem:[%s19771_s1 + $0x190] sm:$0xf0]  ;;  %v12252_v9 = vld [vmem:[%s19771_s1 + $0x284] sm:$0xf]  ;;  %v8147_v26 = vor.u32 %v12188_v2, %v8144_v3  ;;  %v6490_v2 = vpop.f32.mrf.mxu2 }
 0x10e   :  { %6729 = vmatpush.bf16.msra.mxu1 %v8307_v48  ;;  %v8400_v55 = vld [vmem:[%s19771_s1 + $0x290] sm:$0xf0]  ;;  %v12284_v15 = vld [vmem:[%s19771_s1 + $0x384] sm:$0xf]  ;;  %v8275_v32 = vor.u32 %v12220_v4, %v8272_v8 }
 0x10f   :  { %6742 = vmatpush.bf16.msra.mxu2 %v8435_v50  ;;  %v8528_v17 = vld [vmem:[%s19771_s1 + $0x390] sm:$0xf0]  ;;  %v8403_v39 = vor.u32 %v12252_v9, %v8400_v55  ;;  %v12184_v40 = vld [vmem:[%s19771_s1 + $0x64] sm:$0xf]  ;;  %v6478_v50 = vadd.f32 %v6477_v27, %v6465_v21  ;;  %v6503_v9 = vpop.f32.mrf.mxu3  ;;  %v6479_v21 = vpop.f32.mrf.mxu1 }
 0x110   :  { %6755 = vmatpush.bf16.msra.mxu3 %v8563_v56  ;;  %v8128_v47 = vld [vmem:[%s19771_s1 + $0x70] sm:$0xf0]  ;;  %v12216_v48 = vld [vmem:[%s19771_s1 + $0x164] sm:$0xf]  ;;  %v8531_v61 = vor.u32 %v12284_v15, %v8528_v17  ;;  %v6466_v15 = vpop.f32.mrf.mxu0 }
 0x111   :  { %6717 = vmatpush.bf16.msra.mxu0 %v8163_v63  ;;  %v8256_v51 = vld [vmem:[%s19771_s1 + $0x170] sm:$0xf0]  ;;  %v12248_v52 = vld [vmem:[%s19771_s1 + $0x264] sm:$0xf]  ;;  %v8131_v58 = vor.u32 %v12184_v40, %v8128_v47  ;;  %v6491_v8 = vadd.f32 %v6490_v2, %v6478_v50 }
 0x112   :  { %6730 = vmatpush.bf16.msra.mxu1 %v8291_v0  ;;  %v8384_v54 = vld [vmem:[%s19771_s1 + $0x270] sm:$0xf0]  ;;  %v12280_v56 = vld [vmem:[%s19771_s1 + $0x364] sm:$0xf]  ;;  %v8259_v59 = vor.u32 %v12216_v48, %v8256_v51 }
 0x113   :  { %6743 = vmatpush.bf16.msra.mxu2 %v8419_v1  ;;  %v8512_v57 = vld [vmem:[%s19771_s1 + $0x370] sm:$0xf0]  ;;  %v8387_v60 = vor.u32 %v12248_v52, %v8384_v54  ;;  %v12180_v62 = vld [vmem:[%s19771_s1 + $0x44] sm:$0xf] }
 0x114   :  { %6756 = vmatpush.bf16.msra.mxu3 %v8547_v6  ;;  %v8112_v63 = vld [vmem:[%s19771_s1 + $0x50] sm:$0xf0]  ;;  %v12212_v0 = vld [vmem:[%s19771_s1 + $0x144] sm:$0xf]  ;;  %v8515_v1 = vor.u32 %v12280_v56, %v8512_v57 }
 0x115   :  { %6718 = vmatpush.bf16.msra.mxu0 %v8147_v26  ;;  %v8240_v3 = vld [vmem:[%s19771_s1 + $0x150] sm:$0xf0]  ;;  %v12244_v4 = vld [vmem:[%s19771_s1 + $0x244] sm:$0xf]  ;;  %v8115_v17 = vor.u32 %v12180_v62, %v8112_v63  ;;  %v15067_v26 = vadd.f32 %v6503_v9, %v6491_v8 }
 0x116   :  { %6731 = vmatpush.bf16.msra.mxu1 %v8275_v32  ;;  %v8368_v6 = vld [vmem:[%s19771_s1 + $0x250] sm:$0xf0]  ;;  %v12276_v55 = vld [vmem:[%s19771_s1 + $0x344] sm:$0xf]  ;;  %v8243_v27 = vor.u32 %v12212_v0, %v8240_v3 }
 0x117   :  { %6744 = vmatpush.bf16.msra.mxu2 %v8403_v39  ;;  %v8496_v14 = vld [vmem:[%s19771_s1 + $0x350] sm:$0xf0]  ;;  %v8371_v32 = vor.u32 %v12244_v4, %v8368_v6  ;;  %v12176_v39 = vld [vmem:[%s19771_s1 + $0x24] sm:$0xf]  ;;  %v6492_v6 = vpop.f32.mrf.mxu2 }
 0x118   :  { %6757 = vmatpush.bf16.msra.mxu3 %v8531_v61  ;;  %v8096_v40 = vld [vmem:[%s19771_s1 + $0x30] sm:$0xf0]  ;;  %v12208_v47 = vld [vmem:[%s19771_s1 + $0x124] sm:$0xf]  ;;  %v8499_v48 = vor.u32 %v12276_v55, %v8496_v14  ;;  %v6505_v14 = vpop.f32.mrf.mxu3 }
 0x119   :  { %6719 = vmatpush.bf16.msra.mxu0 %v8131_v58  ;;  %v8224_v61 = vld [vmem:[%s19771_s1 + $0x130] sm:$0xf0]  ;;  %v12240_v50 = vld [vmem:[%s19771_s1 + $0x224] sm:$0xf]  ;;  %v8099_v56 = vor.u32 %v12176_v39, %v8096_v40 }
 0x11a   :  { %6732 = vmatpush.bf16.msra.mxu1 %v8259_v59  ;;  %v8352_v51 = vld [vmem:[%s19771_s1 + $0x230] sm:$0xf0]  ;;  %v12272_v52 = vld [vmem:[%s19771_s1 + $0x324] sm:$0xf]  ;;  %v8227_v59 = vor.u32 %v12208_v47, %v8224_v61 }
 0x11b   :  { %6745 = vmatpush.bf16.msra.mxu2 %v8387_v60  ;;  %v8480_v54 = vld [vmem:[%s19771_s1 + $0x330] sm:$0xf0]  ;;  %v12172_v57 = vld [vmem:[%s19771_s1 + $0x4] sm:$0xf]  ;;  %v8355_v60 = vor.u32 %v12240_v50, %v8352_v51 }
 0x11c   :  { %6758 = vmatpush.bf16.msra.mxu3 %v8515_v1  ;;  %v8080_v58 = vld [vmem:[%s19771_s1 + $0x10] sm:$0xf0]  ;;  %v12204_v62 = vld [vmem:[%s19771_s1 + $0x104] sm:$0xf]  ;;  %v8483_v1 = vor.u32 %v12272_v52, %v8480_v54 }
 0x11d   :  { %6720 = vmatpush.bf16.msra.mxu0 %v8115_v17  ;;  %v8208_v63 = vld [vmem:[%s19771_s1 + $0x110] sm:$0xf0]  ;;  %v12236_v0 = vld [vmem:[%s19771_s1 + $0x204] sm:$0xf]  ;;  %v8083_v15 = vor.u32 %v12172_v57, %v8080_v58 }
 0x11e   :  { %6733 = vmatpush.bf16.msra.mxu1 %v8243_v27  ;;  %v8336_v2 = vld [vmem:[%s19771_s1 + $0x210] sm:$0xf0]  ;;  %v12268_v3 = vld [vmem:[%s19771_s1 + $0x304] sm:$0xf] }
 0x11f   :  { %6746 = vmatpush.bf16.msra.mxu2 %v8371_v32  ;;  %v8464_v4 = vld [vmem:[%s19771_s1 + $0x310] sm:$0xf0]  ;;  %v12328_v8 = vld [vmem:[%s19771_s1 + $0x4e4] sm:$0xf]  ;;  %v8211_v32 = vor.u32 %v12204_v62, %v8208_v63  ;;  %v8339_v39 = vor.u32 %v12236_v0, %v8336_v2 }
 0x120   :  { %6759 = vmatpush.bf16.msra.mxu3 %v8499_v48  ;;  %v8704_v9 = vld [vmem:[%s19771_s1 + $0x4f0] sm:$0xf0]  ;;  %v12360_v55 = vld [vmem:[%s19771_s1 + $0x5e4] sm:$0xf]  ;;  %v8467_v48 = vor.u32 %v12268_v3, %v8464_v4 }
 0x121   :  { %6721 = vmatpush.bf16.msra.mxu0 %v8099_v56  ;;  %v8832_v17 = vld [vmem:[%s19771_s1 + $0x5f0] sm:$0xf0]  ;;  %v12392_v21 = vld [vmem:[%s19771_s1 + $0x6e4] sm:$0xf]  ;;  %v8707_v61 = vor.u32 %v12328_v8, %v8704_v9 }
 0x122   :  { %v8960_v27 = vld [vmem:[%s19771_s1 + $0x6f0] sm:$0xf0]  ;;  %6734 = vmatpush.bf16.msra.mxu1 %v8227_v59  ;;  %v12424_v40 = vld [vmem:[%s19771_s1 + $0x7e4] sm:$0xf]  ;;  %v8835_v50 = vor.u32 %v12360_v55, %v8832_v17 }
 0x123   :  { %6747 = vmatpush.bf16.msra.mxu2 %v8355_v60  ;;  %v9088_v47 = vld [vmem:[%s19771_s1 + $0x7f0] sm:$0xf0]  ;;  %v8963_v51 = vor.u32 %v12392_v21, %v8960_v27  ;;  %v12324_v52 = vld [vmem:[%s19771_s1 + $0x4c4] sm:$0xf] }
 0x124   :  { %6760 = vmatpush.bf16.msra.mxu3 %v8483_v1  ;;  %v8688_v54 = vld [vmem:[%s19771_s1 + $0x4d0] sm:$0xf0]  ;;  %v12356_v56 = vld [vmem:[%s19771_s1 + $0x5c4] sm:$0xf]  ;;  %v9091_v57 = vor.u32 %v12424_v40, %v9088_v47 }
 0x125   :  { %6722 = vmatpush.bf16.msra.mxu0 %v8083_v15  ;;  %v8816_v58 = vld [vmem:[%s19771_s1 + $0x5d0] sm:$0xf0]  ;;  %v12388_v59 = vld [vmem:[%s19771_s1 + $0x6c4] sm:$0xf]  ;;  %v8691_v0 = vor.u32 %v12324_v52, %v8688_v54  ;;  %v6516_v52 = vpop.f32.mrf.mxu0 }
 0x126   :  { %v8944_v60 = vld [vmem:[%s19771_s1 + $0x6d0] sm:$0xf0]  ;;  %6735 = vmatpush.bf16.msra.mxu1 %v8211_v32  ;;  %v12420_v62 = vld [vmem:[%s19771_s1 + $0x7c4] sm:$0xf]  ;;  %v8819_v1 = vor.u32 %v12356_v56, %v8816_v58 }
 0x127   :  { %6748 = vmatpush.bf16.msra.mxu2 %v8339_v39  ;;  %v9072_v63 = vld [vmem:[%s19771_s1 + $0x7d0] sm:$0xf0]  ;;  %v8947_v2 = vor.u32 %v12388_v59, %v8944_v60  ;;  %v12320_v3 = vld [vmem:[%s19771_s1 + $0x4a4] sm:$0xf]  ;;  %v6529_v59 = vpop.f32.mrf.mxu1 }
 0x128   :  { %6761 = vmatpush.bf16.msra.mxu3 %v8467_v48  ;;  %v8672_v4 = vld [vmem:[%s19771_s1 + $0x4b0] sm:$0xf0]  ;;  %v12352_v6 = vld [vmem:[%s19771_s1 + $0x5a4] sm:$0xf]  ;;  %v9075_v8 = vor.u32 %v12420_v62, %v9072_v63  ;;  %6723 = vmatmul.bf16.vlgmr.msra.gmra.mxu0 %v13527_v19 }
 0x129   :  { %6767 = vmatpush.bf16.msrb.mxu0 %v8707_v61  ;;  %v8800_v9 = vld [vmem:[%s19771_s1 + $0x5b0] sm:$0xf0]  ;;  %v12384_v55 = vld [vmem:[%s19771_s1 + $0x6a4] sm:$0xf]  ;;  %v8675_v21 = vor.u32 %v12320_v3, %v8672_v4  ;;  %6736 = vmatmul.bf16.vlgmr.msra.gmra.mxu1 %v13531_v22 }
 0x12a   :  { %6780 = vmatpush.bf16.msrb.mxu1 %v8835_v50  ;;  %v8928_v14 = vld [vmem:[%s19771_s1 + $0x6b0] sm:$0xf0]  ;;  %6749 = vmatmul.bf16.vlgmr.msra.gmra.mxu2 %v13525_v18  ;;  %v12416_v15 = vld [vmem:[%s19771_s1 + $0x7a4] sm:$0xf]  ;;  %v8803_v27 = vor.u32 %v12352_v6, %v8800_v9 }
 0x12b   :  { %6793 = vmatpush.bf16.msrb.mxu2 %v8963_v51  ;;  %v9056_v17 = vld [vmem:[%s19771_s1 + $0x7b0] sm:$0xf0]  ;;  %6762 = vmatmul.bf16.vlgmr.msra.gmra.mxu3 %v13529_v20  ;;  %v8931_v32 = vor.u32 %v12384_v55, %v8928_v14  ;;  %v12316_v39 = vld [vmem:[%s19771_s1 + $0x484] sm:$0xf] }
 0x12c   :  { %6806 = vmatpush.bf16.msrb.mxu3 %v9091_v57  ;;  %v8656_v40 = vld [vmem:[%s19771_s1 + $0x490] sm:$0xf0]  ;;  %v12348_v47 = vld [vmem:[%s19771_s1 + $0x584] sm:$0xf]  ;;  %v9059_v48 = vor.u32 %v12416_v15, %v9056_v17  ;;  %v6517_v57 = vadd.f32 %v6516_v52, %v15067_v26 }
 0x12d   :  { %6768 = vmatpush.bf16.msrb.mxu0 %v8691_v0  ;;  %v8784_v61 = vld [vmem:[%s19771_s1 + $0x590] sm:$0xf0]  ;;  %v12380_v50 = vld [vmem:[%s19771_s1 + $0x684] sm:$0xf]  ;;  %v8659_v58 = vor.u32 %v12316_v39, %v8656_v40  ;;  %v6542_v39 = vpop.f32.mrf.mxu2 }
 0x12e   :  { %6781 = vmatpush.bf16.msrb.mxu1 %v8819_v1  ;;  %v8912_v51 = vld [vmem:[%s19771_s1 + $0x690] sm:$0xf0]  ;;  %v12412_v54 = vld [vmem:[%s19771_s1 + $0x784] sm:$0xf]  ;;  %v8787_v60 = vor.u32 %v12348_v47, %v8784_v61 }
 0x12f   :  { %6794 = vmatpush.bf16.msrb.mxu2 %v8947_v2  ;;  %v9040_v56 = vld [vmem:[%s19771_s1 + $0x790] sm:$0xf0]  ;;  %v8915_v62 = vor.u32 %v12380_v50, %v8912_v51  ;;  %v12312_v63 = vld [vmem:[%s19771_s1 + $0x464] sm:$0xf]  ;;  %v6530_v2 = vadd.f32 %v6529_v59, %v6517_v57  ;;  %v6555_v50 = vpop.f32.mrf.mxu3  ;;  %v6531_v57 = vpop.f32.mrf.mxu1 }
 0x130   :  { %6807 = vmatpush.bf16.msrb.mxu3 %v9075_v8  ;;  %v8640_v0 = vld [vmem:[%s19771_s1 + $0x470] sm:$0xf0]  ;;  %v12344_v1 = vld [vmem:[%s19771_s1 + $0x564] sm:$0xf]  ;;  %v9043_v26 = vor.u32 %v12412_v54, %v9040_v56  ;;  %v6518_v54 = vpop.f32.mrf.mxu0 }
 0x131   :  { %6769 = vmatpush.bf16.msrb.mxu0 %v8675_v21  ;;  %v8768_v3 = vld [vmem:[%s19771_s1 + $0x570] sm:$0xf0]  ;;  %v12376_v4 = vld [vmem:[%s19771_s1 + $0x664] sm:$0xf]  ;;  %v8643_v55 = vor.u32 %v12312_v63, %v8640_v0  ;;  %v6543_v61 = vadd.f32 %v6542_v39, %v6530_v2 }
 0x132   :  { %6782 = vmatpush.bf16.msrb.mxu1 %v8803_v27  ;;  %v8896_v6 = vld [vmem:[%s19771_s1 + $0x670] sm:$0xf0]  ;;  %v12408_v8 = vld [vmem:[%s19771_s1 + $0x764] sm:$0xf]  ;;  %v8771_v14 = vor.u32 %v12344_v1, %v8768_v3 }
 0x133   :  { %6795 = vmatpush.bf16.msrb.mxu2 %v8931_v32  ;;  %v9024_v9 = vld [vmem:[%s19771_s1 + $0x770] sm:$0xf0]  ;;  %v8899_v15 = vor.u32 %v12376_v4, %v8896_v6  ;;  %v12308_v17 = vld [vmem:[%s19771_s1 + $0x444] sm:$0xf] }
 0x134   :  { %6808 = vmatpush.bf16.msrb.mxu3 %v9059_v48  ;;  %v8624_v21 = vld [vmem:[%s19771_s1 + $0x450] sm:$0xf0]  ;;  %v12340_v27 = vld [vmem:[%s19771_s1 + $0x544] sm:$0xf]  ;;  %v9027_v32 = vor.u32 %v12408_v8, %v9024_v9 }
 0x135   :  { %6770 = vmatpush.bf16.msrb.mxu0 %v8659_v58  ;;  %v8752_v40 = vld [vmem:[%s19771_s1 + $0x550] sm:$0xf0]  ;;  %v12372_v47 = vld [vmem:[%s19771_s1 + $0x644] sm:$0xf]  ;;  %v8627_v56 = vor.u32 %v12308_v17, %v8624_v21  ;;  %v15266_v58 = vadd.f32 %v6555_v50, %v6543_v61 }
 0x136   :  { %6783 = vmatpush.bf16.msrb.mxu1 %v8787_v60  ;;  %v8880_v48 = vld [vmem:[%s19771_s1 + $0x650] sm:$0xf0]  ;;  %v12404_v51 = vld [vmem:[%s19771_s1 + $0x744] sm:$0xf]  ;;  %v8755_v59 = vor.u32 %v12340_v27, %v8752_v40 }
 0x137   :  { %6796 = vmatpush.bf16.msrb.mxu2 %v8915_v62  ;;  %v9008_v52 = vld [vmem:[%s19771_s1 + $0x750] sm:$0xf0]  ;;  %v8883_v60 = vor.u32 %v12372_v47, %v8880_v48  ;;  %v12304_v62 = vld [vmem:[%s19771_s1 + $0x424] sm:$0xf]  ;;  %v6544_v48 = vpop.f32.mrf.mxu2 }
 0x138   :  { %6809 = vmatpush.bf16.msrb.mxu3 %v9043_v26  ;;  %v8608_v63 = vld [vmem:[%s19771_s1 + $0x430] sm:$0xf0]  ;;  %v12336_v0 = vld [vmem:[%s19771_s1 + $0x524] sm:$0xf]  ;;  %v9011_v1 = vor.u32 %v12404_v51, %v9008_v52  ;;  %v6557_v52 = vpop.f32.mrf.mxu3 }
 0x139   :  { %6771 = vmatpush.bf16.msrb.mxu0 %v8643_v55  ;;  %v8736_v26 = vld [vmem:[%s19771_s1 + $0x530] sm:$0xf0]  ;;  %v12368_v2 = vld [vmem:[%s19771_s1 + $0x624] sm:$0xf]  ;;  %v8611_v8 = vor.u32 %v12304_v62, %v8608_v63 }
 0x13a   :  { %6784 = vmatpush.bf16.msrb.mxu1 %v8771_v14  ;;  %v8864_v3 = vld [vmem:[%s19771_s1 + $0x630] sm:$0xf0]  ;;  %v12400_v4 = vld [vmem:[%s19771_s1 + $0x724] sm:$0xf]  ;;  %v8739_v14 = vor.u32 %v12336_v0, %v8736_v26 }
 0x13b   :  { %6797 = vmatpush.bf16.msrb.mxu2 %v8899_v15  ;;  %v8992_v6 = vld [vmem:[%s19771_s1 + $0x730] sm:$0xf0]  ;;  %v12300_v9 = vld [vmem:[%s19771_s1 + $0x404] sm:$0xf]  ;;  %v8867_v15 = vor.u32 %v12368_v2, %v8864_v3 }
 0x13c   :  { %6810 = vmatpush.bf16.msrb.mxu3 %v9027_v32  ;;  %v8592_v55 = vld [vmem:[%s19771_s1 + $0x410] sm:$0xf0]  ;;  %v12332_v17 = vld [vmem:[%s19771_s1 + $0x504] sm:$0xf]  ;;  %v8995_v32 = vor.u32 %v12400_v4, %v8992_v6 }
 0x13d   :  { %6772 = vmatpush.bf16.msrb.mxu0 %v8627_v56  ;;  %v8720_v21 = vld [vmem:[%s19771_s1 + $0x510] sm:$0xf0]  ;;  %v12364_v27 = vld [vmem:[%s19771_s1 + $0x604] sm:$0xf]  ;;  %v8595_v54 = vor.u32 %v12300_v9, %v8592_v55 }
 0x13e   :  { %6785 = vmatpush.bf16.msrb.mxu1 %v8755_v59  ;;  %v8848_v39 = vld [vmem:[%s19771_s1 + $0x610] sm:$0xf0]  ;;  %v12396_v40 = vld [vmem:[%s19771_s1 + $0x704] sm:$0xf] }
 0x13f   :  { %6798 = vmatpush.bf16.msrb.mxu2 %v8883_v60  ;;  %v8976_v47 = vld [vmem:[%s19771_s1 + $0x710] sm:$0xf0]  ;;  %v12456_v61 = vld [vmem:[%s19771_s1 + $0x8e4] sm:$0xf]  ;;  %v8723_v60 = vor.u32 %v12332_v17, %v8720_v21  ;;  %v8851_v62 = vor.u32 %v12364_v27, %v8848_v39 }
 0x140   :  { %6811 = vmatpush.bf16.msrb.mxu3 %v9011_v1  ;;  %v9216_v50 = vld [vmem:[%s19771_s1 + $0x8f0] sm:$0xf0]  ;;  %v12488_v51 = vld [vmem:[%s19771_s1 + $0x9e4] sm:$0xf]  ;;  %v8979_v1 = vor.u32 %v12396_v40, %v8976_v47 }
 0x141   :  { %6773 = vmatpush.bf16.msrb.mxu0 %v8611_v8  ;;  %v9344_v56 = vld [vmem:[%s19771_s1 + $0x9f0] sm:$0xf0]  ;;  %v12520_v57 = vld [vmem:[%s19771_s1 + $0xae4] sm:$0xf]  ;;  %v9219_v26 = vor.u32 %v12456_v61, %v9216_v50 }
 0x142   :  { %v9472_v59 = vld [vmem:[%s19771_s1 + $0xaf0] sm:$0xf0]  ;;  %6786 = vmatpush.bf16.msrb.mxu1 %v8739_v14  ;;  %v12552_v63 = vld [vmem:[%s19771_s1 + $0xbe4] sm:$0xf]  ;;  %v9347_v2 = vor.u32 %v12488_v51, %v9344_v56 }
 0x143   :  { %6799 = vmatpush.bf16.msrb.mxu2 %v8867_v15  ;;  %v9600_v0 = vld [vmem:[%s19771_s1 + $0xbf0] sm:$0xf0]  ;;  %v9475_v3 = vor.u32 %v12520_v57, %v9472_v59  ;;  %v12452_v4 = vld [vmem:[%s19771_s1 + $0x8c4] sm:$0xf] }
 0x144   :  { %6812 = vmatpush.bf16.msrb.mxu3 %v8995_v32  ;;  %v9200_v6 = vld [vmem:[%s19771_s1 + $0x8d0] sm:$0xf0]  ;;  %v12484_v8 = vld [vmem:[%s19771_s1 + $0x9c4] sm:$0xf]  ;;  %v9603_v9 = vor.u32 %v12552_v63, %v9600_v0 }
 0x145   :  { %6774 = vmatpush.bf16.msrb.mxu0 %v8595_v54  ;;  %v9328_v55 = vld [vmem:[%s19771_s1 + $0x9d0] sm:$0xf0]  ;;  %v12516_v14 = vld [vmem:[%s19771_s1 + $0xac4] sm:$0xf]  ;;  %v9203_v27 = vor.u32 %v12452_v4, %v9200_v6  ;;  %v6568_v4 = vpop.f32.mrf.mxu0 }
 0x146   :  { %v9456_v15 = vld [vmem:[%s19771_s1 + $0xad0] sm:$0xf0]  ;;  %6787 = vmatpush.bf16.msrb.mxu1 %v8723_v60  ;;  %v12548_v17 = vld [vmem:[%s19771_s1 + $0xbc4] sm:$0xf]  ;;  %v9331_v32 = vor.u32 %v12484_v8, %v9328_v55 }
 0x147   :  { %6800 = vmatpush.bf16.msrb.mxu2 %v8851_v62  ;;  %v9584_v21 = vld [vmem:[%s19771_s1 + $0xbd0] sm:$0xf0]  ;;  %v9459_v39 = vor.u32 %v12516_v14, %v9456_v15  ;;  %v12448_v40 = vld [vmem:[%s19771_s1 + $0x8a4] sm:$0xf]  ;;  %v6581_v14 = vpop.f32.mrf.mxu1 }
 0x148   :  { %6813 = vmatpush.bf16.msrb.mxu3 %v8979_v1  ;;  %v9184_v47 = vld [vmem:[%s19771_s1 + $0x8b0] sm:$0xf0]  ;;  %v12480_v48 = vld [vmem:[%s19771_s1 + $0x9a4] sm:$0xf]  ;;  %v9587_v61 = vor.u32 %v12548_v17, %v9584_v21  ;;  %6775 = vmatmul.bf16.vlgmr.msrb.gmra.mxu0 %v13689_v41 }
 0x149   :  { %6819 = vmatpush.bf16.msra.mxu0 %v9219_v26  ;;  %v9312_v50 = vld [vmem:[%s19771_s1 + $0x9b0] sm:$0xf0]  ;;  %v12512_v51 = vld [vmem:[%s19771_s1 + $0xaa4] sm:$0xf]  ;;  %v9187_v57 = vor.u32 %v12448_v40, %v9184_v47  ;;  %6788 = vmatmul.bf16.vlgmr.msrb.gmra.mxu1 %v13693_v44 }
 0x14a   :  { %6832 = vmatpush.bf16.msra.mxu1 %v9347_v2  ;;  %6801 = vmatmul.bf16.vlgmr.msrb.gmra.mxu2 %v13681_v38  ;;  %v9440_v52 = vld [vmem:[%s19771_s1 + $0xab0] sm:$0xf0]  ;;  %v12544_v54 = vld [vmem:[%s19771_s1 + $0xba4] sm:$0xf]  ;;  %v9315_v59 = vor.u32 %v12480_v48, %v9312_v50 }
 0x14b   :  { %6845 = vmatpush.bf16.msra.mxu2 %v9475_v3  ;;  %v9568_v56 = vld [vmem:[%s19771_s1 + $0xbb0] sm:$0xf0]  ;;  %6814 = vmatmul.bf16.vlgmr.msrb.gmra.mxu3 %v13691_v42  ;;  %v9443_v60 = vor.u32 %v12512_v51, %v9440_v52  ;;  %v12444_v62 = vld [vmem:[%s19771_s1 + $0x884] sm:$0xf] }
 0x14c   :  { %6858 = vmatpush.bf16.msra.mxu3 %v9603_v9  ;;  %v9168_v63 = vld [vmem:[%s19771_s1 + $0x890] sm:$0xf0]  ;;  %v12476_v0 = vld [vmem:[%s19771_s1 + $0x984] sm:$0xf]  ;;  %v9571_v1 = vor.u32 %v12544_v54, %v9568_v56  ;;  %v6569_v9 = vadd.f32 %v6568_v4, %v15266_v58 }
 0x14d   :  { %6820 = vmatpush.bf16.msra.mxu0 %v9203_v27  ;;  %v9296_v26 = vld [vmem:[%s19771_s1 + $0x990] sm:$0xf0]  ;;  %v12508_v2 = vld [vmem:[%s19771_s1 + $0xa84] sm:$0xf]  ;;  %v9171_v55 = vor.u32 %v12444_v62, %v9168_v63  ;;  %v6594_v62 = vpop.f32.mrf.mxu2 }
 0x14e   :  { %6833 = vmatpush.bf16.msra.mxu1 %v9331_v32  ;;  %v9424_v3 = vld [vmem:[%s19771_s1 + $0xa90] sm:$0xf0]  ;;  %v12540_v6 = vld [vmem:[%s19771_s1 + $0xb84] sm:$0xf]  ;;  %v9299_v15 = vor.u32 %v12476_v0, %v9296_v26 }
 0x14f   :  { %6846 = vmatpush.bf16.msra.mxu2 %v9459_v39  ;;  %v9552_v8 = vld [vmem:[%s19771_s1 + $0xb90] sm:$0xf0]  ;;  %v9427_v17 = vor.u32 %v12508_v2, %v9424_v3  ;;  %v12440_v21 = vld [vmem:[%s19771_s1 + $0x864] sm:$0xf]  ;;  %v6582_v39 = vadd.f32 %v6581_v14, %v6569_v9  ;;  %v6607_v2 = vpop.f32.mrf.mxu3  ;;  %v6583_v9 = vpop.f32.mrf.mxu1 }
 0x150   :  { %6859 = vmatpush.bf16.msra.mxu3 %v9587_v61  ;;  %v9152_v27 = vld [vmem:[%s19771_s1 + $0x870] sm:$0xf0]  ;;  %v12472_v32 = vld [vmem:[%s19771_s1 + $0x964] sm:$0xf]  ;;  %v9555_v58 = vor.u32 %v12540_v6, %v9552_v8  ;;  %v6570_v6 = vpop.f32.mrf.mxu0 }
 0x151   :  { %6821 = vmatpush.bf16.msra.mxu0 %v9187_v57  ;;  %v9280_v40 = vld [vmem:[%s19771_s1 + $0x970] sm:$0xf0]  ;;  %v12504_v47 = vld [vmem:[%s19771_s1 + $0xa64] sm:$0xf]  ;;  %v9155_v51 = vor.u32 %v12440_v21, %v9152_v27  ;;  %v6595_v26 = vadd.f32 %v6594_v62, %v6582_v39 }
 0x152   :  { %6834 = vmatpush.bf16.msra.mxu1 %v9315_v59  ;;  %v9408_v48 = vld [vmem:[%s19771_s1 + $0xa70] sm:$0xf0]  ;;  %v12536_v61 = vld [vmem:[%s19771_s1 + $0xb64] sm:$0xf]  ;;  %v9283_v52 = vor.u32 %v12472_v32, %v9280_v40 }
 0x153   :  { %6847 = vmatpush.bf16.msra.mxu2 %v9443_v60  ;;  %v9536_v50 = vld [vmem:[%s19771_s1 + $0xb70] sm:$0xf0]  ;;  %v9411_v54 = vor.u32 %v12504_v47, %v9408_v48  ;;  %v12436_v56 = vld [vmem:[%s19771_s1 + $0x844] sm:$0xf] }
 0x154   :  { %6860 = vmatpush.bf16.msra.mxu3 %v9571_v1  ;;  %v9136_v57 = vld [vmem:[%s19771_s1 + $0x850] sm:$0xf0]  ;;  %v12468_v59 = vld [vmem:[%s19771_s1 + $0x944] sm:$0xf]  ;;  %v9539_v60 = vor.u32 %v12536_v61, %v9536_v50 }
 0x155   :  { %6822 = vmatpush.bf16.msra.mxu0 %v9171_v55  ;;  %v9264_v63 = vld [vmem:[%s19771_s1 + $0x950] sm:$0xf0]  ;;  %v12500_v0 = vld [vmem:[%s19771_s1 + $0xa44] sm:$0xf]  ;;  %v9139_v8 = vor.u32 %v12436_v56, %v9136_v57  ;;  %v15465_v55 = vadd.f32 %v6607_v2, %v6595_v26 }
 0x156   :  { %6835 = vmatpush.bf16.msra.mxu1 %v9299_v15  ;;  %v9392_v1 = vld [vmem:[%s19771_s1 + $0xa50] sm:$0xf0]  ;;  %v12532_v3 = vld [vmem:[%s19771_s1 + $0xb44] sm:$0xf]  ;;  %v9267_v14 = vor.u32 %v12468_v59, %v9264_v63 }
 0x157   :  { %6848 = vmatpush.bf16.msra.mxu2 %v9427_v17  ;;  %v9520_v4 = vld [vmem:[%s19771_s1 + $0xb50] sm:$0xf0]  ;;  %v9395_v15 = vor.u32 %v12500_v0, %v9392_v1  ;;  %v12432_v17 = vld [vmem:[%s19771_s1 + $0x824] sm:$0xf]  ;;  %v6596_v1 = vpop.f32.mrf.mxu2 }
 0x158   :  { %6861 = vmatpush.bf16.msra.mxu3 %v9555_v58  ;;  %v9120_v21 = vld [vmem:[%s19771_s1 + $0x830] sm:$0xf0]  ;;  %v12464_v27 = vld [vmem:[%s19771_s1 + $0x924] sm:$0xf]  ;;  %v9523_v32 = vor.u32 %v12532_v3, %v9520_v4  ;;  %v6609_v4 = vpop.f32.mrf.mxu3 }
 0x159   :  { %6823 = vmatpush.bf16.msra.mxu0 %v9155_v51  ;;  %v9248_v58 = vld [vmem:[%s19771_s1 + $0x930] sm:$0xf0]  ;;  %v12496_v39 = vld [vmem:[%s19771_s1 + $0xa24] sm:$0xf]  ;;  %v9123_v61 = vor.u32 %v12432_v17, %v9120_v21 }
 0x15a   :  { %6836 = vmatpush.bf16.msra.mxu1 %v9283_v52  ;;  %v9376_v40 = vld [vmem:[%s19771_s1 + $0xa30] sm:$0xf0]  ;;  %v12528_v47 = vld [vmem:[%s19771_s1 + $0xb24] sm:$0xf]  ;;  %v9251_v52 = vor.u32 %v12464_v27, %v9248_v58 }
 0x15b   :  { %6849 = vmatpush.bf16.msra.mxu2 %v9411_v54  ;;  %v9504_v48 = vld [vmem:[%s19771_s1 + $0xb30] sm:$0xf0]  ;;  %v12428_v50 = vld [vmem:[%s19771_s1 + $0x804] sm:$0xf]  ;;  %v9379_v54 = vor.u32 %v12496_v39, %v9376_v40 }
 0x15c   :  { %6862 = vmatpush.bf16.msra.mxu3 %v9539_v60  ;;  %v9104_v51 = vld [vmem:[%s19771_s1 + $0x810] sm:$0xf0]  ;;  %v12460_v56 = vld [vmem:[%s19771_s1 + $0x904] sm:$0xf]  ;;  %v9507_v60 = vor.u32 %v12528_v47, %v9504_v48 }
 0x15d   :  { %6824 = vmatpush.bf16.msra.mxu0 %v9139_v8  ;;  %v9232_v57 = vld [vmem:[%s19771_s1 + $0x910] sm:$0xf0]  ;;  %v12492_v59 = vld [vmem:[%s19771_s1 + $0xa04] sm:$0xf]  ;;  %v9107_v6 = vor.u32 %v12428_v50, %v9104_v51 }
 0x15e   :  { %6837 = vmatpush.bf16.msra.mxu1 %v9267_v14  ;;  %v9360_v62 = vld [vmem:[%s19771_s1 + $0xa10] sm:$0xf0]  ;;  %v12524_v63 = vld [vmem:[%s19771_s1 + $0xb04] sm:$0xf] }
 0x15f   :  { %6850 = vmatpush.bf16.msra.mxu2 %v9395_v15  ;;  %v9488_v0 = vld [vmem:[%s19771_s1 + $0xb10] sm:$0xf0]  ;;  %v12584_v26 = vld [vmem:[%s19771_s1 + $0xce4] sm:$0xf]  ;;  %v9235_v15 = vor.u32 %v12460_v56, %v9232_v57  ;;  %v9363_v17 = vor.u32 %v12492_v59, %v9360_v62 }
 0x160   :  { %6863 = vmatpush.bf16.msra.mxu3 %v9523_v32  ;;  %v9728_v2 = vld [vmem:[%s19771_s1 + $0xcf0] sm:$0xf0]  ;;  %v12616_v3 = vld [vmem:[%s19771_s1 + $0xde4] sm:$0xf]  ;;  %v9491_v32 = vor.u32 %v12524_v63, %v9488_v0 }
 0x161   :  { %6825 = vmatpush.bf16.msra.mxu0 %v9123_v61  ;;  %v9856_v8 = vld [vmem:[%s19771_s1 + $0xdf0] sm:$0xf0]  ;;  %v12648_v9 = vld [vmem:[%s19771_s1 + $0xee4] sm:$0xf]  ;;  %v9731_v58 = vor.u32 %v12584_v26, %v9728_v2 }
 0x162   :  { %v9984_v14 = vld [vmem:[%s19771_s1 + $0xef0] sm:$0xf0]  ;;  %6838 = vmatpush.bf16.msra.mxu1 %v9251_v52  ;;  %v12680_v21 = vld [vmem:[%s19771_s1 + $0xfe4] sm:$0xf]  ;;  %v9859_v39 = vor.u32 %v12616_v3, %v9856_v8 }
 0x163   :  { %6851 = vmatpush.bf16.msra.mxu2 %v9379_v54  ;;  %v10112_v27 = vld [vmem:[%s19771_s1 + $0xff0] sm:$0xf0]  ;;  %v9987_v40 = vor.u32 %v12648_v9, %v9984_v14  ;;  %v12580_v47 = vld [vmem:[%s19771_s1 + $0xcc4] sm:$0xf] }
 0x164   :  { %6864 = vmatpush.bf16.msra.mxu3 %v9507_v60  ;;  %v9712_v48 = vld [vmem:[%s19771_s1 + $0xcd0] sm:$0xf0]  ;;  %v12612_v61 = vld [vmem:[%s19771_s1 + $0xdc4] sm:$0xf]  ;;  %v10115_v50 = vor.u32 %v12680_v21, %v10112_v27 }
 0x165   :  { %6826 = vmatpush.bf16.msra.mxu0 %v9107_v6  ;;  %v9840_v51 = vld [vmem:[%s19771_s1 + $0xdd0] sm:$0xf0]  ;;  %v12644_v52 = vld [vmem:[%s19771_s1 + $0xec4] sm:$0xf]  ;;  %v9715_v59 = vor.u32 %v12580_v47, %v9712_v48 }
 0x166   :  { %v9968_v54 = vld [vmem:[%s19771_s1 + $0xed0] sm:$0xf0]  ;;  %6839 = vmatpush.bf16.msra.mxu1 %v9235_v15  ;;  %v12676_v56 = vld [vmem:[%s19771_s1 + $0xfc4] sm:$0xf]  ;;  %v9843_v60 = vor.u32 %v12612_v61, %v9840_v51 }
 0x167   :  { %6852 = vmatpush.bf16.msra.mxu2 %v9363_v17  ;;  %v10096_v57 = vld [vmem:[%s19771_s1 + $0xfd0] sm:$0xf0]  ;;  %v9971_v62 = vor.u32 %v12644_v52, %v9968_v54  ;;  %v12576_v63 = vld [vmem:[%s19771_s1 + $0xca4] sm:$0xf]  ;;  %v6620_v47 = vpop.f32.mrf.mxu0 }
 0x168   :  { %6865 = vmatpush.bf16.msra.mxu3 %v9491_v32  ;;  %v9696_v0 = vld [vmem:[%s19771_s1 + $0xcb0] sm:$0xf0]  ;;  %v12608_v1 = vld [vmem:[%s19771_s1 + $0xda4] sm:$0xf]  ;;  %6827 = vmatmul.bf16.vlgmr.msra.gmra.mxu0 %v13882_v25  ;;  %v10099_v26 = vor.u32 %v12676_v56, %v10096_v57  ;;  %v6633_v52 = vpop.f32.mrf.mxu1 }
 0x169   :  { %6871 = vmatpush.bf16.msrb.mxu0 %v9731_v58  ;;  %v9824_v2 = vld [vmem:[%s19771_s1 + $0xdb0] sm:$0xf0]  ;;  %v12640_v3 = vld [vmem:[%s19771_s1 + $0xea4] sm:$0xf]  ;;  %6840 = vmatmul.bf16.vlgmr.msra.gmra.mxu1 %v13895_v30  ;;  %v9699_v9 = vor.u32 %v12576_v63, %v9696_v0 }
 0x16a   :  { %6884 = vmatpush.bf16.msrb.mxu1 %v9859_v39  ;;  %v9952_v4 = vld [vmem:[%s19771_s1 + $0xeb0] sm:$0xf0]  ;;  %6853 = vmatmul.bf16.vlgmr.msra.gmra.mxu2 %v13893_v29  ;;  %v12672_v6 = vld [vmem:[%s19771_s1 + $0xfa4] sm:$0xf]  ;;  %v9827_v14 = vor.u32 %v12608_v1, %v9824_v2 }
 0x16b   :  { %6897 = vmatpush.bf16.msrb.mxu2 %v9987_v40  ;;  %v10080_v8 = vld [vmem:[%s19771_s1 + $0xfb0] sm:$0xf0]  ;;  %6866 = vmatmul.bf16.vlgmr.msra.gmra.mxu3 %v13903_v33  ;;  %v9955_v15 = vor.u32 %v12640_v3, %v9952_v4  ;;  %v12572_v17 = vld [vmem:[%s19771_s1 + $0xc84] sm:$0xf] }
 0x16c   :  { %6910 = vmatpush.bf16.msrb.mxu3 %v10115_v50  ;;  %v9680_v21 = vld [vmem:[%s19771_s1 + $0xc90] sm:$0xf0]  ;;  %v12604_v27 = vld [vmem:[%s19771_s1 + $0xd84] sm:$0xf]  ;;  %v10083_v32 = vor.u32 %v12672_v6, %v10080_v8  ;;  %v6621_v50 = vadd.f32 %v6620_v47, %v15465_v55 }
 0x16d   :  { %6872 = vmatpush.bf16.msrb.mxu0 %v9715_v59  ;;  %v9808_v58 = vld [vmem:[%s19771_s1 + $0xd90] sm:$0xf0]  ;;  %v12636_v39 = vld [vmem:[%s19771_s1 + $0xe84] sm:$0xf]  ;;  %v9683_v51 = vor.u32 %v12572_v17, %v9680_v21  ;;  %v6646_v17 = vpop.f32.mrf.mxu2 }
 0x16e   :  { %6885 = vmatpush.bf16.msrb.mxu1 %v9843_v60  ;;  %v9936_v40 = vld [vmem:[%s19771_s1 + $0xe90] sm:$0xf0]  ;;  %v12668_v48 = vld [vmem:[%s19771_s1 + $0xf84] sm:$0xf]  ;;  %v9811_v54 = vor.u32 %v12604_v27, %v9808_v58 }
 0x16f   :  { %6898 = vmatpush.bf16.msrb.mxu2 %v9971_v62  ;;  %v10064_v61 = vld [vmem:[%s19771_s1 + $0xf90] sm:$0xf0]  ;;  %v9939_v56 = vor.u32 %v12636_v39, %v9936_v40  ;;  %v12568_v57 = vld [vmem:[%s19771_s1 + $0xc64] sm:$0xf]  ;;  %v6634_v62 = vadd.f32 %v6633_v52, %v6621_v50 }
 0x170   :  { %6911 = vmatpush.bf16.msrb.mxu3 %v10099_v26  ;;  %v9664_v59 = vld [vmem:[%s19771_s1 + $0xc70] sm:$0xf0]  ;;  %v12600_v60 = vld [vmem:[%s19771_s1 + $0xd64] sm:$0xf]  ;;  %v10067_v55 = vor.u32 %v12668_v48, %v10064_v61  ;;  %v6659_v39 = vpop.f32.mrf.mxu3  ;;  %v6622_v48 = vpop.f32.mrf.mxu0 }
 0x171   :  { %6873 = vmatpush.bf16.msrb.mxu0 %v9699_v9  ;;  %v9792_v63 = vld [vmem:[%s19771_s1 + $0xd70] sm:$0xf0]  ;;  %v12632_v0 = vld [vmem:[%s19771_s1 + $0xe64] sm:$0xf]  ;;  %v9667_v3 = vor.u32 %v12568_v57, %v9664_v59  ;;  %v6647_v58 = vadd.f32 %v6646_v17, %v6634_v62  ;;  %v6635_v50 = vpop.f32.mrf.mxu1 }
 0x172   :  { %6886 = vmatpush.bf16.msrb.mxu1 %v9827_v14  ;;  %v9920_v1 = vld [vmem:[%s19771_s1 + $0xe70] sm:$0xf0]  ;;  %v12664_v26 = vld [vmem:[%s19771_s1 + $0xf64] sm:$0xf]  ;;  %v9795_v4 = vor.u32 %v12600_v60, %v9792_v63 }
 0x173   :  { %6899 = vmatpush.bf16.msrb.mxu2 %v9955_v15  ;;  %v10048_v2 = vld [vmem:[%s19771_s1 + $0xf70] sm:$0xf0]  ;;  %v9923_v6 = vor.u32 %v12632_v0, %v9920_v1  ;;  %v12564_v8 = vld [vmem:[%s19771_s1 + $0xc44] sm:$0xf] }
 0x174   :  { %6912 = vmatpush.bf16.msrb.mxu3 %v10083_v32  ;;  %v9648_v9 = vld [vmem:[%s19771_s1 + $0xc50] sm:$0xf0]  ;;  %v12596_v14 = vld [vmem:[%s19771_s1 + $0xd44] sm:$0xf]  ;;  %v10051_v15 = vor.u32 %v12664_v26, %v10048_v2 }
 0x175   :  { %6874 = vmatpush.bf16.msrb.mxu0 %v9683_v51  ;;  %v9776_v21 = vld [vmem:[%s19771_s1 + $0xd50] sm:$0xf0]  ;;  %v12628_v27 = vld [vmem:[%s19771_s1 + $0xe44] sm:$0xf]  ;;  %v9651_v61 = vor.u32 %v12564_v8, %v9648_v9  ;;  %v15664_v51 = vadd.f32 %v6659_v39, %v6647_v58 }
 0x176   :  { %6887 = vmatpush.bf16.msrb.mxu1 %v9811_v54  ;;  %v9904_v32 = vld [vmem:[%s19771_s1 + $0xe50] sm:$0xf0]  ;;  %v12660_v40 = vld [vmem:[%s19771_s1 + $0xf44] sm:$0xf]  ;;  %v9779_v52 = vor.u32 %v12596_v14, %v9776_v21 }
 0x177   :  { %6900 = vmatpush.bf16.msrb.mxu2 %v9939_v56  ;;  %v10032_v47 = vld [vmem:[%s19771_s1 + $0xf50] sm:$0xf0]  ;;  %v9907_v54 = vor.u32 %v12628_v27, %v9904_v32  ;;  %v12560_v56 = vld [vmem:[%s19771_s1 + $0xc24] sm:$0xf]  ;;  %v6648_v32 = vpop.f32.mrf.mxu2 }
 0x178   :  { %6913 = vmatpush.bf16.msrb.mxu3 %v10067_v55  ;;  %v9632_v57 = vld [vmem:[%s19771_s1 + $0xc30] sm:$0xf0]  ;;  %v12592_v59 = vld [vmem:[%s19771_s1 + $0xd24] sm:$0xf]  ;;  %v10035_v60 = vor.u32 %v12660_v40, %v10032_v47  ;;  %v6661_v47 = vpop.f32.mrf.mxu3 }
 0x179   :  { %6875 = vmatpush.bf16.msrb.mxu0 %v9667_v3  ;;  %v9760_v55 = vld [vmem:[%s19771_s1 + $0xd30] sm:$0xf0]  ;;  %v12624_v62 = vld [vmem:[%s19771_s1 + $0xe24] sm:$0xf]  ;;  %v9635_v26 = vor.u32 %v12560_v56, %v9632_v57 }
 0x17a   :  { %6888 = vmatpush.bf16.msrb.mxu1 %v9795_v4  ;;  %v9888_v63 = vld [vmem:[%s19771_s1 + $0xe30] sm:$0xf0]  ;;  %v12656_v0 = vld [vmem:[%s19771_s1 + $0xf24] sm:$0xf]  ;;  %v9763_v4 = vor.u32 %v12592_v59, %v9760_v55 }
 0x17b   :  { %6901 = vmatpush.bf16.msrb.mxu2 %v9923_v6  ;;  %v10016_v1 = vld [vmem:[%s19771_s1 + $0xf30] sm:$0xf0]  ;;  %v12556_v2 = vld [vmem:[%s19771_s1 + $0xc04] sm:$0xf]  ;;  %v9891_v6 = vor.u32 %v12624_v62, %v9888_v63 }
 0x17c   :  { %6914 = vmatpush.bf16.msrb.mxu3 %v10051_v15  ;;  %v9616_v3 = vld [vmem:[%s19771_s1 + $0xc10] sm:$0xf0]  ;;  %v12588_v8 = vld [vmem:[%s19771_s1 + $0xd04] sm:$0xf]  ;;  %v10019_v15 = vor.u32 %v12656_v0, %v10016_v1 }
 0x17d   :  { %6876 = vmatpush.bf16.msrb.mxu0 %v9651_v61  ;;  %v9744_v9 = vld [vmem:[%s19771_s1 + $0xd10] sm:$0xf0]  ;;  %v12620_v14 = vld [vmem:[%s19771_s1 + $0xe04] sm:$0xf]  ;;  %v9619_v48 = vor.u32 %v12556_v2, %v9616_v3 }
 0x17e   :  { %6889 = vmatpush.bf16.msrb.mxu1 %v9779_v52  ;;  %v9872_v17 = vld [vmem:[%s19771_s1 + $0xe10] sm:$0xf0]  ;;  %v12652_v21 = vld [vmem:[%s19771_s1 + $0xf04] sm:$0xf] }
 0x17f   :  { %6902 = vmatpush.bf16.msrb.mxu2 %v9907_v54  ;;  %v10000_v27 = vld [vmem:[%s19771_s1 + $0xf10] sm:$0xf0]  ;;  %v12712_v58 = vld [vmem:[%s19771_s1 + $0x10e4] sm:$0xf]  ;;  %v9747_v54 = vor.u32 %v12588_v8, %v9744_v9  ;;  %v9875_v56 = vor.u32 %v12620_v14, %v9872_v17 }
 0x180   :  { %6915 = vmatpush.bf16.msrb.mxu3 %v10035_v60  ;;  %v10240_v39 = vld [vmem:[%s19771_s1 + $0x10f0] sm:$0xf0]  ;;  %v12744_v40 = vld [vmem:[%s19771_s1 + $0x11e4] sm:$0xf]  ;;  %v10003_v60 = vor.u32 %v12652_v21, %v10000_v27 }
 0x181   :  { %6877 = vmatpush.bf16.msrb.mxu0 %v9635_v26  ;;  %v10368_v61 = vld [vmem:[%s19771_s1 + $0x11f0] sm:$0xf0]  ;;  %v12776_v50 = vld [vmem:[%s19771_s1 + $0x12e4] sm:$0xf]  ;;  %v10243_v55 = vor.u32 %v12712_v58, %v10240_v39 }
 0x182   :  { %v10496_v52 = vld [vmem:[%s19771_s1 + $0x12f0] sm:$0xf0]  ;;  %6890 = vmatpush.bf16.msrb.mxu1 %v9763_v4  ;;  %v12808_v57 = vld [vmem:[%s19771_s1 + $0x13e4] sm:$0xf]  ;;  %v10371_v62 = vor.u32 %v12744_v40, %v10368_v61 }
 0x183   :  { %6903 = vmatpush.bf16.msrb.mxu2 %v9891_v6  ;;  %v10624_v59 = vld [vmem:[%s19771_s1 + $0x13f0] sm:$0xf0]  ;;  %v10499_v63 = vor.u32 %v12776_v50, %v10496_v52  ;;  %v12708_v0 = vld [vmem:[%s19771_s1 + $0x10c4] sm:$0xf] }
 0x184   :  { %6916 = vmatpush.bf16.msrb.mxu3 %v10019_v15  ;;  %v10224_v1 = vld [vmem:[%s19771_s1 + $0x10d0] sm:$0xf0]  ;;  %v12740_v26 = vld [vmem:[%s19771_s1 + $0x11c4] sm:$0xf]  ;;  %v10627_v2 = vor.u32 %v12808_v57, %v10624_v59 }
 0x185   :  { %6878 = vmatpush.bf16.msrb.mxu0 %v9619_v48  ;;  %v10352_v3 = vld [vmem:[%s19771_s1 + $0x11d0] sm:$0xf0]  ;;  %v12772_v4 = vld [vmem:[%s19771_s1 + $0x12c4] sm:$0xf]  ;;  %v10227_v14 = vor.u32 %v12708_v0, %v10224_v1  ;;  %v6672_v0 = vpop.f32.mrf.mxu0 }
 0x186   :  { %v10480_v6 = vld [vmem:[%s19771_s1 + $0x12d0] sm:$0xf0]  ;;  %6891 = vmatpush.bf16.msrb.mxu1 %v9747_v54  ;;  %v12804_v8 = vld [vmem:[%s19771_s1 + $0x13c4] sm:$0xf]  ;;  %v10355_v15 = vor.u32 %v12740_v26, %v10352_v3 }
 0x187   :  { %6904 = vmatpush.bf16.msrb.mxu2 %v9875_v56  ;;  %v10608_v9 = vld [vmem:[%s19771_s1 + $0x13d0] sm:$0xf0]  ;;  %v10483_v17 = vor.u32 %v12772_v4, %v10480_v6  ;;  %v12704_v21 = vld [vmem:[%s19771_s1 + $0x10a4] sm:$0xf]  ;;  %v6685_v4 = vpop.f32.mrf.mxu1 }
 0x188   :  { %6917 = vmatpush.bf16.msrb.mxu3 %v10003_v60  ;;  %v10208_v27 = vld [vmem:[%s19771_s1 + $0x10b0] sm:$0xf0]  ;;  %v12736_v32 = vld [vmem:[%s19771_s1 + $0x11a4] sm:$0xf]  ;;  %6879 = vmatmul.bf16.vlgmr.msrb.gmra.mxu0 %v14092_v23  ;;  %v10611_v58 = vor.u32 %v12804_v8, %v10608_v9 }
 0x189   :  { %6923 = vmatpush.bf16.msra.mxu0 %v10243_v55  ;;  %v10336_v39 = vld [vmem:[%s19771_s1 + $0x11b0] sm:$0xf0]  ;;  %v12768_v40 = vld [vmem:[%s19771_s1 + $0x12a4] sm:$0xf]  ;;  %6892 = vmatmul.bf16.vlgmr.msrb.gmra.mxu1 %v14105_v31  ;;  %v10211_v50 = vor.u32 %v12704_v21, %v10208_v27 }
 0x18a   :  { %6936 = vmatpush.bf16.msra.mxu1 %v10371_v62  ;;  %v10464_v47 = vld [vmem:[%s19771_s1 + $0x12b0] sm:$0xf0]  ;;  %6905 = vmatmul.bf16.vlgmr.msrb.gmra.mxu2 %v14103_v28  ;;  %v12800_v48 = vld [vmem:[%s19771_s1 + $0x13a4] sm:$0xf]  ;;  %v10339_v52 = vor.u32 %v12736_v32, %v10336_v39 }
 0x18b   :  { %6949 = vmatpush.bf16.msra.mxu2 %v10499_v63  ;;  %v10592_v61 = vld [vmem:[%s19771_s1 + $0x13b0] sm:$0xf0]  ;;  %6918 = vmatmul.bf16.vlgmr.msrb.gmra.mxu3 %v14113_v35  ;;  %v10467_v54 = vor.u32 %v12768_v40, %v10464_v47  ;;  %v12700_v56 = vld [vmem:[%s19771_s1 + $0x1084] sm:$0xf] }
 0x18c   :  { %6962 = vmatpush.bf16.msra.mxu3 %v10627_v2  ;;  %v10192_v57 = vld [vmem:[%s19771_s1 + $0x1090] sm:$0xf0]  ;;  %v12732_v59 = vld [vmem:[%s19771_s1 + $0x1184] sm:$0xf]  ;;  %v10595_v60 = vor.u32 %v12800_v48, %v10592_v61  ;;  %v6673_v2 = vadd.f32 %v6672_v0, %v15664_v51 }
 0x18d   :  { %6924 = vmatpush.bf16.msra.mxu0 %v10227_v14  ;;  %v10320_v55 = vld [vmem:[%s19771_s1 + $0x1190] sm:$0xf0]  ;;  %v12764_v62 = vld [vmem:[%s19771_s1 + $0x1284] sm:$0xf]  ;;  %v10195_v3 = vor.u32 %v12700_v56, %v10192_v57  ;;  %v6698_v56 = vpop.f32.mrf.mxu2 }
 0x18e   :  { %6937 = vmatpush.bf16.msra.mxu1 %v10355_v15  ;;  %v10448_v63 = vld [vmem:[%s19771_s1 + $0x1290] sm:$0xf0]  ;;  %v12796_v1 = vld [vmem:[%s19771_s1 + $0x1384] sm:$0xf]  ;;  %v10323_v6 = vor.u32 %v12732_v59, %v10320_v55 }
 0x18f   :  { %6950 = vmatpush.bf16.msra.mxu2 %v10483_v17  ;;  %v10576_v26 = vld [vmem:[%s19771_s1 + $0x1390] sm:$0xf0]  ;;  %v10451_v8 = vor.u32 %v12764_v62, %v10448_v63  ;;  %v12696_v9 = vld [vmem:[%s19771_s1 + $0x1064] sm:$0xf]  ;;  %v6686_v17 = vadd.f32 %v6685_v4, %v6673_v2  ;;  %v6711_v62 = vpop.f32.mrf.mxu3  ;;  %v6687_v2 = vpop.f32.mrf.mxu1 }
 0x190   :  { %6963 = vmatpush.bf16.msra.mxu3 %v10611_v58  ;;  %v10176_v14 = vld [vmem:[%s19771_s1 + $0x1070] sm:$0xf0]  ;;  %v12728_v15 = vld [vmem:[%s19771_s1 + $0x1164] sm:$0xf]  ;;  %v10579_v51 = vor.u32 %v12796_v1, %v10576_v26  ;;  %v6674_v1 = vpop.f32.mrf.mxu0 }
 0x191   :  { %6925 = vmatpush.bf16.msra.mxu0 %v10211_v50  ;;  %v10304_v21 = vld [vmem:[%s19771_s1 + $0x1170] sm:$0xf0]  ;;  %v12760_v27 = vld [vmem:[%s19771_s1 + $0x1264] sm:$0xf]  ;;  %v10179_v40 = vor.u32 %v12696_v9, %v10176_v14  ;;  %v6699_v55 = vadd.f32 %v6698_v56, %v6686_v17 }
 0x192   :  { %6938 = vmatpush.bf16.msra.mxu1 %v10339_v52  ;;  %v10432_v32 = vld [vmem:[%s19771_s1 + $0x1270] sm:$0xf0]  ;;  %v12792_v58 = vld [vmem:[%s19771_s1 + $0x1364] sm:$0xf]  ;;  %v10307_v47 = vor.u32 %v12728_v15, %v10304_v21 }
 0x193   :  { %6951 = vmatpush.bf16.msra.mxu2 %v10467_v54  ;;  %v10560_v39 = vld [vmem:[%s19771_s1 + $0x1370] sm:$0xf0]  ;;  %v10435_v48 = vor.u32 %v12760_v27, %v10432_v32  ;;  %v12692_v61 = vld [vmem:[%s19771_s1 + $0x1044] sm:$0xf] }
 0x194   :  { %6964 = vmatpush.bf16.msra.mxu3 %v10595_v60  ;;  %v10160_v50 = vld [vmem:[%s19771_s1 + $0x1050] sm:$0xf0]  ;;  %v12724_v52 = vld [vmem:[%s19771_s1 + $0x1144] sm:$0xf]  ;;  %v10563_v54 = vor.u32 %v12792_v58, %v10560_v39 }
 0x195   :  { %6926 = vmatpush.bf16.msra.mxu0 %v10195_v3  ;;  %v10288_v57 = vld [vmem:[%s19771_s1 + $0x1150] sm:$0xf0]  ;;  %v12756_v59 = vld [vmem:[%s19771_s1 + $0x1244] sm:$0xf]  ;;  %v10163_v26 = vor.u32 %v12692_v61, %v10160_v50  ;;  %v15863_v3 = vadd.f32 %v6711_v62, %v6699_v55 }
 0x196   :  { %6939 = vmatpush.bf16.msra.mxu1 %v10323_v6  ;;  %v10416_v60 = vld [vmem:[%s19771_s1 + $0x1250] sm:$0xf0]  ;;  %v12788_v63 = vld [vmem:[%s19771_s1 + $0x1344] sm:$0xf]  ;;  %v10291_v4 = vor.u32 %v12724_v52, %v10288_v57 }
 0x197   :  { %6952 = vmatpush.bf16.msra.mxu2 %v10451_v8  ;;  %v10544_v0 = vld [vmem:[%s19771_s1 + $0x1350] sm:$0xf0]  ;;  %v10419_v6 = vor.u32 %v12756_v59, %v10416_v60  ;;  %v12688_v8 = vld [vmem:[%s19771_s1 + $0x1024] sm:$0xf]  ;;  %v6700_v60 = vpop.f32.mrf.mxu2 }
 0x198   :  { %6965 = vmatpush.bf16.msra.mxu3 %v10579_v51  ;;  %v10144_v9 = vld [vmem:[%s19771_s1 + $0x1030] sm:$0xf0]  ;;  %v12720_v14 = vld [vmem:[%s19771_s1 + $0x1124] sm:$0xf]  ;;  %v10547_v15 = vor.u32 %v12788_v63, %v10544_v0  ;;  %v6713_v0 = vpop.f32.mrf.mxu3 }
 0x199   :  { %6927 = vmatpush.bf16.msra.mxu0 %v10179_v40  ;;  %v10272_v51 = vld [vmem:[%s19771_s1 + $0x1130] sm:$0xf0]  ;;  %v12752_v17 = vld [vmem:[%s19771_s1 + $0x1224] sm:$0xf]  ;;  %v10147_v58 = vor.u32 %v12688_v8, %v10144_v9 }
 0x19a   :  { %6940 = vmatpush.bf16.msra.mxu1 %v10307_v47  ;;  %v10400_v21 = vld [vmem:[%s19771_s1 + $0x1230] sm:$0xf0]  ;;  %v12784_v27 = vld [vmem:[%s19771_s1 + $0x1324] sm:$0xf]  ;;  %v10275_v47 = vor.u32 %v12720_v14, %v10272_v51 }
 0x19b   :  { %6953 = vmatpush.bf16.msra.mxu2 %v10435_v48  ;;  %v10528_v32 = vld [vmem:[%s19771_s1 + $0x1330] sm:$0xf0]  ;;  %v12684_v39 = vld [vmem:[%s19771_s1 + $0x1004] sm:$0xf]  ;;  %v10403_v48 = vor.u32 %v12752_v17, %v10400_v21 }
 0x19c   :  { %6966 = vmatpush.bf16.msra.mxu3 %v10563_v54  ;;  %v10128_v40 = vld [vmem:[%s19771_s1 + $0x1010] sm:$0xf0]  ;;  %v12716_v61 = vld [vmem:[%s19771_s1 + $0x1104] sm:$0xf]  ;;  %v10531_v54 = vor.u32 %v12784_v27, %v10528_v32 }
 0x19d   :  { %6928 = vmatpush.bf16.msra.mxu0 %v10163_v26  ;;  %v10256_v50 = vld [vmem:[%s19771_s1 + $0x1110] sm:$0xf0]  ;;  %v12748_v52 = vld [vmem:[%s19771_s1 + $0x1204] sm:$0xf]  ;;  %v10131_v1 = vor.u32 %v12684_v39, %v10128_v40 }
 0x19e   :  { %6941 = vmatpush.bf16.msra.mxu1 %v10291_v4  ;;  %v10384_v56 = vld [vmem:[%s19771_s1 + $0x1210] sm:$0xf0]  ;;  %v12780_v57 = vld [vmem:[%s19771_s1 + $0x1304] sm:$0xf] }
 0x19f   :  { %6954 = vmatpush.bf16.msra.mxu2 %v10419_v6  ;;  %v10512_v59 = vld [vmem:[%s19771_s1 + $0x1310] sm:$0xf0]  ;;  %v12840_v55 = vld [vmem:[%s19771_s1 + $0x14e4] sm:$0xf]  ;;  %v10259_v6 = vor.u32 %v12716_v61, %v10256_v50  ;;  %v10387_v8 = vor.u32 %v12748_v52, %v10384_v56 }
 0x1a0   :  { %6967 = vmatpush.bf16.msra.mxu3 %v10547_v15  ;;  %v10752_v62 = vld [vmem:[%s19771_s1 + $0x14f0] sm:$0xf0]  ;;  %v12872_v63 = vld [vmem:[%s19771_s1 + $0x15e4] sm:$0xf]  ;;  %v10515_v15 = vor.u32 %v12780_v57, %v10512_v59 }
 0x1a1   :  { %6929 = vmatpush.bf16.msra.mxu0 %v10147_v58  ;;  %v10880_v26 = vld [vmem:[%s19771_s1 + $0x15f0] sm:$0xf0]  ;;  %v12904_v2 = vld [vmem:[%s19771_s1 + $0x16e4] sm:$0xf]  ;;  %v10755_v51 = vor.u32 %v12840_v55, %v10752_v62 }
 0x1a2   :  { %v11008_v4 = vld [vmem:[%s19771_s1 + $0x16f0] sm:$0xf0]  ;;  %6942 = vmatpush.bf16.msra.mxu1 %v10275_v47  ;;  %v12936_v9 = vld [vmem:[%s19771_s1 + $0x17e4] sm:$0xf]  ;;  %v10883_v17 = vor.u32 %v12872_v63, %v10880_v26 }
 0x1a3   :  { %6955 = vmatpush.bf16.msra.mxu2 %v10403_v48  ;;  %v11136_v14 = vld [vmem:[%s19771_s1 + $0x17f0] sm:$0xf0]  ;;  %v11011_v21 = vor.u32 %v12904_v2, %v11008_v4  ;;  %v12836_v27 = vld [vmem:[%s19771_s1 + $0x14c4] sm:$0xf] }
 0x1a4   :  { %6968 = vmatpush.bf16.msra.mxu3 %v10531_v54  ;;  %v10736_v32 = vld [vmem:[%s19771_s1 + $0x14d0] sm:$0xf0]  ;;  %v12868_v58 = vld [vmem:[%s19771_s1 + $0x15c4] sm:$0xf]  ;;  %v11139_v39 = vor.u32 %v12936_v9, %v11136_v14 }
 0x1a5   :  { %6930 = vmatpush.bf16.msra.mxu0 %v10131_v1  ;;  %v10864_v40 = vld [vmem:[%s19771_s1 + $0x15d0] sm:$0xf0]  ;;  %v12900_v47 = vld [vmem:[%s19771_s1 + $0x16c4] sm:$0xf]  ;;  %v10739_v52 = vor.u32 %v12836_v27, %v10736_v32 }
 0x1a6   :  { %v10992_v48 = vld [vmem:[%s19771_s1 + $0x16d0] sm:$0xf0]  ;;  %6943 = vmatpush.bf16.msra.mxu1 %v10259_v6  ;;  %v12932_v61 = vld [vmem:[%s19771_s1 + $0x17c4] sm:$0xf]  ;;  %v10867_v54 = vor.u32 %v12868_v58, %v10864_v40 }
 0x1a7   :  { %6956 = vmatpush.bf16.msra.mxu2 %v10387_v8  ;;  %v11120_v50 = vld [vmem:[%s19771_s1 + $0x17d0] sm:$0xf0]  ;;  %v10995_v56 = vor.u32 %v12900_v47, %v10992_v48  ;;  %v12832_v57 = vld [vmem:[%s19771_s1 + $0x14a4] sm:$0xf]  ;;  %v6724_v47 = vpop.f32.mrf.mxu0 }
 0x1a8   :  { %6969 = vmatpush.bf16.msra.mxu3 %v10515_v15  ;;  %v10720_v59 = vld [vmem:[%s19771_s1 + $0x14b0] sm:$0xf0]  ;;  %v12864_v60 = vld [vmem:[%s19771_s1 + $0x15a4] sm:$0xf]  ;;  %6931 = vmatmul.bf16.vlgmr.msra.gmra.mxu0 %v14302_v37  ;;  %v11123_v55 = vor.u32 %v12932_v61, %v11120_v50  ;;  %v13197_v15 = vld [vmem:[%s19773_s2] sm:$0xf] }
 0x1a9   :  { %6975 = vmatpush.bf16.msrb.mxu0 %v10755_v51  ;;  %v10848_v62 = vld [vmem:[%s19771_s1 + $0x15b0] sm:$0xf0]  ;;  %v12896_v63 = vld [vmem:[%s19771_s1 + $0x16a4] sm:$0xf]  ;;  %6944 = vmatmul.bf16.vlgmr.msra.gmra.mxu1 %v14315_v46  ;;  %v10723_v2 = vor.u32 %v12832_v57, %v10720_v59  ;;  %v1060_v51 = vperm.slane %v13197_v15, 1  ;;  %v6737_v57 = vpop.f32.mrf.mxu1 }
 0x1aa   :  { %6988 = vmatpush.bf16.msrb.mxu1 %v10883_v17  ;;  %v10976_v0 = vld [vmem:[%s19771_s1 + $0x16b0] sm:$0xf0]  ;;  %6957 = vmatmul.bf16.vlgmr.msra.gmra.mxu2 %v14313_v45  ;;  %v12928_v1 = vld [vmem:[%s19771_s1 + $0x17a4] sm:$0xf]  ;;  %v10851_v6 = vor.u32 %v12864_v60, %v10848_v62 }
 0x1ab   :  { %7001 = vmatpush.bf16.msrb.mxu2 %v11011_v21  ;;  %v11104_v26 = vld [vmem:[%s19771_s1 + $0x17b0] sm:$0xf0]  ;;  %6970 = vmatmul.bf16.vlgmr.msra.gmra.mxu3 %v14323_v49  ;;  %v12828_v4 = vld [vmem:[%s19771_s1 + $0x1484] sm:$0xf]  ;;  %v10979_v8 = vor.u32 %v12896_v63, %v10976_v0 }
 0x1ac   :  { %7014 = vmatpush.bf16.msrb.mxu3 %v11139_v39  ;;  %v10704_v9 = vld [vmem:[%s19771_s1 + $0x1490] sm:$0xf0]  ;;  %v12860_v14 = vld [vmem:[%s19771_s1 + $0x1584] sm:$0xf]  ;;  %v11107_v17 = vor.u32 %v12928_v1, %v11104_v26 }
 0x1ad   :  { %6976 = vmatpush.bf16.msrb.mxu0 %v10739_v52  ;;  %v10832_v21 = vld [vmem:[%s19771_s1 + $0x1590] sm:$0xf0]  ;;  %v12892_v27 = vld [vmem:[%s19771_s1 + $0x1684] sm:$0xf]  ;;  %v10707_v40 = vor.u32 %v12828_v4, %v10704_v9 }
 0x1ae   :  { %6989 = vmatpush.bf16.msrb.mxu1 %v10867_v54  ;;  %v10960_v32 = vld [vmem:[%s19771_s1 + $0x1690] sm:$0xf0]  ;;  %v12924_v58 = vld [vmem:[%s19771_s1 + $0x1784] sm:$0xf]  ;;  %v10835_v48 = vor.u32 %v12860_v14, %v10832_v21  ;;  %v6750_v14 = vpop.f32.mrf.mxu2 }
 0x1af   :  { %7002 = vmatpush.bf16.msrb.mxu2 %v10995_v56  ;;  %v11088_v39 = vld [vmem:[%s19771_s1 + $0x1790] sm:$0xf0]  ;;  %v10963_v61 = vor.u32 %v12892_v27, %v10960_v32  ;;  %v12824_v50 = vld [vmem:[%s19771_s1 + $0x1464] sm:$0xf]  ;;  %v6725_v56 = vadd.f32 %v6724_v47, %v1060_v51  ;;  %v6763_v32 = vpop.f32.mrf.mxu3 }
 0x1b0   :  { %7015 = vmatpush.bf16.msrb.mxu3 %v11123_v55  ;;  %v10688_v52 = vld [vmem:[%s19771_s1 + $0x1470] sm:$0xf0]  ;;  %v12856_v54 = vld [vmem:[%s19771_s1 + $0x1564] sm:$0xf]  ;;  %v11091_v59 = vor.u32 %v12924_v58, %v11088_v39 }
 0x1b1   :  { %6977 = vmatpush.bf16.msrb.mxu0 %v10723_v2  ;;  %v10816_v60 = vld [vmem:[%s19771_s1 + $0x1570] sm:$0xf0]  ;;  %v12888_v55 = vld [vmem:[%s19771_s1 + $0x1664] sm:$0xf]  ;;  %v6738_v1 = vadd.f32 %v6737_v57, %v6725_v56  ;;  %v10691_v26 = vor.u32 %v12824_v50, %v10688_v52  ;;  %v6739_v57 = vpop.f32.mrf.mxu1 }
 0x1b2   :  { %6990 = vmatpush.bf16.msrb.mxu1 %v10851_v6  ;;  %v10944_v62 = vld [vmem:[%s19771_s1 + $0x1670] sm:$0xf0]  ;;  %v12920_v63 = vld [vmem:[%s19771_s1 + $0x1764] sm:$0xf]  ;;  %v10819_v2 = vor.u32 %v12856_v54, %v10816_v60 }
 0x1b3   :  { %7003 = vmatpush.bf16.msrb.mxu2 %v10979_v8  ;;  %v11072_v0 = vld [vmem:[%s19771_s1 + $0x1770] sm:$0xf0]  ;;  %v10947_v4 = vor.u32 %v12888_v55, %v10944_v62  ;;  %v12820_v6 = vld [vmem:[%s19771_s1 + $0x1444] sm:$0xf]  ;;  %v6751_v27 = vadd.f32 %v6750_v14, %v6738_v1 }
 0x1b4   :  { %7016 = vmatpush.bf16.msrb.mxu3 %v11107_v17  ;;  %v10672_v8 = vld [vmem:[%s19771_s1 + $0x1450] sm:$0xf0]  ;;  %v12852_v9 = vld [vmem:[%s19771_s1 + $0x1544] sm:$0xf]  ;;  %v11075_v15 = vor.u32 %v12920_v63, %v11072_v0 }
 0x1b5   :  { %6978 = vmatpush.bf16.msrb.mxu0 %v10707_v40  ;;  %v10800_v51 = vld [vmem:[%s19771_s1 + $0x1550] sm:$0xf0]  ;;  %v12884_v17 = vld [vmem:[%s19771_s1 + $0x1644] sm:$0xf]  ;;  %v10675_v40 = vor.u32 %v12820_v6, %v10672_v8  ;;  %v16064_v47 = vadd.f32 %v6763_v32, %v6751_v27 }
 0x1b6   :  { %6991 = vmatpush.bf16.msrb.mxu1 %v10835_v48  ;;  %v10928_v21 = vld [vmem:[%s19771_s1 + $0x1650] sm:$0xf0]  ;;  %v12916_v58 = vld [vmem:[%s19771_s1 + $0x1744] sm:$0xf]  ;;  %v6726_v48 = vpop.f32.mrf.mxu0 }
 0x1b7   :  { %7004 = vmatpush.bf16.msrb.mxu2 %v10963_v61  ;;  %v11056_v39 = vld [vmem:[%s19771_s1 + $0x1750] sm:$0xf0]  ;;  %v10803_v61 = vor.u32 %v12852_v9, %v10800_v51  ;;  %v10931_v50 = vor.u32 %v12884_v17, %v10928_v21  ;;  %v12816_v52 = vld [vmem:[%s19771_s1 + $0x1424] sm:$0xf]  ;;  %v6765_v32 = vpop.f32.mrf.mxu3 }
 0x1b8   :  { %7017 = vmatpush.bf16.msrb.mxu3 %v11091_v59  ;;  %v10656_v54 = vld [vmem:[%s19771_s1 + $0x1430] sm:$0xf0]  ;;  %v12848_v56 = vld [vmem:[%s19771_s1 + $0x1524] sm:$0xf]  ;;  %v11059_v59 = vor.u32 %v12916_v58, %v11056_v39 }
 0x1b9   :  { %6979 = vmatpush.bf16.msrb.mxu0 %v10691_v26  ;;  %v10784_v60 = vld [vmem:[%s19771_s1 + $0x1530] sm:$0xf0]  ;;  %v12880_v55 = vld [vmem:[%s19771_s1 + $0x1624] sm:$0xf]  ;;  %v10659_v1 = vor.u32 %v12816_v52, %v10656_v54 }
 0x1ba   :  { %6992 = vmatpush.bf16.msrb.mxu1 %v10819_v2  ;;  %v10912_v62 = vld [vmem:[%s19771_s1 + $0x1630] sm:$0xf0]  ;;  %v12912_v63 = vld [vmem:[%s19771_s1 + $0x1724] sm:$0xf] }
 0x1bb   :  { %7005 = vmatpush.bf16.msrb.mxu2 %v10947_v4  ;;  %v11040_v0 = vld [vmem:[%s19771_s1 + $0x1730] sm:$0xf0]  ;;  %v12812_v26 = vld [vmem:[%s19771_s1 + $0x1404] sm:$0xf]  ;;  %v10787_v4 = vor.u32 %v12848_v56, %v10784_v60  ;;  %v10915_v6 = vor.u32 %v12880_v55, %v10912_v62 }
 0x1bc   :  { %7018 = vmatpush.bf16.msrb.mxu3 %v11075_v15  ;;  %v10640_v2 = vld [vmem:[%s19771_s1 + $0x1410] sm:$0xf0]  ;;  %v12844_v8 = vld [vmem:[%s19771_s1 + $0x1504] sm:$0xf]  ;;  %v6752_v15 = vpop.f32.mrf.mxu2  ;;  %v11043_v51 = vor.u32 %v12912_v63, %v11040_v0 }
 0x1bd   :  { %6980 = vmatpush.bf16.msrb.mxu0 %v10675_v40  ;;  %v10768_v9 = vld [vmem:[%s19771_s1 + $0x1510] sm:$0xf0]  ;;  %v12876_v14 = vld [vmem:[%s19771_s1 + $0x1604] sm:$0xf]  ;;  %v10643_v48 = vor.u32 %v12812_v26, %v10640_v2 }
 0x1be   :  { %6993 = vmatpush.bf16.msrb.mxu1 %v10803_v61  ;;  %v10896_v17 = vld [vmem:[%s19771_s1 + $0x1610] sm:$0xf0]  ;;  %v12908_v21 = vld [vmem:[%s19771_s1 + $0x1704] sm:$0xf]  ;;  %v10771_v54 = vor.u32 %v12844_v8, %v10768_v9 }
 0x1bf   :  { %7006 = vmatpush.bf16.msrb.mxu2 %v10931_v50  ;;  %v11024_v27 = vld [vmem:[%s19771_s1 + $0x1710] sm:$0xf0]  ;;  %v12968_v58 = vld [vmem:[%s19771_s1 + $0x18e4] sm:$0xf]  ;;  %v10899_v56 = vor.u32 %v12876_v14, %v10896_v17 }
 0x1c0   :  { %7019 = vmatpush.bf16.msrb.mxu3 %v11059_v59  ;;  %v11264_v39 = vld [vmem:[%s19771_s1 + $0x18f0] sm:$0xf0]  ;;  %v13000_v40 = vld [vmem:[%s19771_s1 + $0x19e4] sm:$0xf]  ;;  %v11027_v60 = vor.u32 %v12908_v21, %v11024_v27 }
 0x1c1   :  { %6981 = vmatpush.bf16.msrb.mxu0 %v10659_v1  ;;  %v11392_v61 = vld [vmem:[%s19771_s1 + $0x19f0] sm:$0xf0]  ;;  %v13032_v50 = vld [vmem:[%s19771_s1 + $0x1ae4] sm:$0xf]  ;;  %v11267_v55 = vor.u32 %v12968_v58, %v11264_v39 }
 0x1c2   :  { %v11520_v52 = vld [vmem:[%s19771_s1 + $0x1af0] sm:$0xf0]  ;;  %6994 = vmatpush.bf16.msrb.mxu1 %v10787_v4  ;;  %v13064_v57 = vld [vmem:[%s19771_s1 + $0x1be4] sm:$0xf]  ;;  %v11395_v62 = vor.u32 %v13000_v40, %v11392_v61 }
 0x1c3   :  { %7007 = vmatpush.bf16.msrb.mxu2 %v10915_v6  ;;  %v11648_v59 = vld [vmem:[%s19771_s1 + $0x1bf0] sm:$0xf0]  ;;  %v11523_v63 = vor.u32 %v13032_v50, %v11520_v52  ;;  %v12964_v0 = vld [vmem:[%s19771_s1 + $0x18c4] sm:$0xf] }
 0x1c4   :  { %7020 = vmatpush.bf16.msrb.mxu3 %v11043_v51  ;;  %v11248_v1 = vld [vmem:[%s19771_s1 + $0x18d0] sm:$0xf0]  ;;  %v12996_v26 = vld [vmem:[%s19771_s1 + $0x19c4] sm:$0xf]  ;;  %v11651_v2 = vor.u32 %v13064_v57, %v11648_v59 }
 0x1c5   :  { %6982 = vmatpush.bf16.msrb.mxu0 %v10643_v48  ;;  %v11376_v4 = vld [vmem:[%s19771_s1 + $0x19d0] sm:$0xf0]  ;;  %v13028_v6 = vld [vmem:[%s19771_s1 + $0x1ac4] sm:$0xf]  ;;  %v11251_v15 = vor.u32 %v12964_v0, %v11248_v1 }
 0x1c6   :  { %v11504_v8 = vld [vmem:[%s19771_s1 + $0x1ad0] sm:$0xf0]  ;;  %6995 = vmatpush.bf16.msrb.mxu1 %v10771_v54  ;;  %v13060_v9 = vld [vmem:[%s19771_s1 + $0x1bc4] sm:$0xf]  ;;  %v11379_v51 = vor.u32 %v12996_v26, %v11376_v4  ;;  %v6776_v4 = vpop.f32.mrf.mxu0 }
 0x1c7   :  { %7008 = vmatpush.bf16.msrb.mxu2 %v10899_v56  ;;  %v11632_v14 = vld [vmem:[%s19771_s1 + $0x1bd0] sm:$0xf0]  ;;  %v11507_v17 = vor.u32 %v13028_v6, %v11504_v8  ;;  %v12960_v21 = vld [vmem:[%s19771_s1 + $0x18a4] sm:$0xf] }
 0x1c8   :  { %7021 = vmatpush.bf16.msrb.mxu3 %v11027_v60  ;;  %v11232_v27 = vld [vmem:[%s19771_s1 + $0x18b0] sm:$0xf0]  ;;  %v12992_v32 = vld [vmem:[%s19771_s1 + $0x19a4] sm:$0xf]  ;;  %6983 = vmatmul.bf16.vlgmr.msrb.gmra.mxu0 %v14517_v7  ;;  %v11635_v58 = vor.u32 %v13060_v9, %v11632_v14 }
 0x1c9   :  { %7027 = vmatpush.bf16.msra.mxu0 %v11267_v55  ;;  %v11360_v39 = vld [vmem:[%s19771_s1 + $0x19b0] sm:$0xf0]  ;;  %v13024_v40 = vld [vmem:[%s19771_s1 + $0x1aa4] sm:$0xf]  ;;  %6996 = vmatmul.bf16.vlgmr.msrb.gmra.mxu1 %v14530_v12  ;;  %v11235_v52 = vor.u32 %v12960_v21, %v11232_v27 }
 0x1ca   :  { %7040 = vmatpush.bf16.msra.mxu1 %v11395_v62  ;;  %v11488_v48 = vld [vmem:[%s19771_s1 + $0x1ab0] sm:$0xf0]  ;;  %7009 = vmatmul.bf16.vlgmr.msrb.gmra.mxu2 %v14528_v11  ;;  %v13056_v61 = vld [vmem:[%s19771_s1 + $0x1ba4] sm:$0xf]  ;;  %v11363_v54 = vor.u32 %v12992_v32, %v11360_v39 }
 0x1cb   :  { %7053 = vmatpush.bf16.msra.mxu2 %v11523_v63  ;;  %v11616_v50 = vld [vmem:[%s19771_s1 + $0x1bb0] sm:$0xf0]  ;;  %7022 = vmatmul.bf16.vlgmr.msrb.gmra.mxu3 %v14538_v16  ;;  %v11491_v56 = vor.u32 %v13024_v40, %v11488_v48  ;;  %v12956_v57 = vld [vmem:[%s19771_s1 + $0x1884] sm:$0xf] }
 0x1cc   :  { %7066 = vmatpush.bf16.msra.mxu3 %v11651_v2  ;;  %v11216_v59 = vld [vmem:[%s19771_s1 + $0x1890] sm:$0xf0]  ;;  %v12988_v60 = vld [vmem:[%s19771_s1 + $0x1984] sm:$0xf]  ;;  %v11619_v55 = vor.u32 %v13056_v61, %v11616_v50 }
 0x1cd   :  { %7028 = vmatpush.bf16.msra.mxu0 %v11251_v15  ;;  %v11344_v62 = vld [vmem:[%s19771_s1 + $0x1990] sm:$0xf0]  ;;  %v13020_v63 = vld [vmem:[%s19771_s1 + $0x1a84] sm:$0xf]  ;;  %v11219_v2 = vor.u32 %v12956_v57, %v11216_v59  ;;  %v6802_v57 = vpop.f32.mrf.mxu2 }
 0x1ce   :  { %7041 = vmatpush.bf16.msra.mxu1 %v11379_v51  ;;  %v11472_v0 = vld [vmem:[%s19771_s1 + $0x1a90] sm:$0xf0]  ;;  %v13052_v1 = vld [vmem:[%s19771_s1 + $0x1b84] sm:$0xf]  ;;  %v11347_v6 = vor.u32 %v12988_v60, %v11344_v62  ;;  %v6777_v51 = vadd.f32 %v6776_v4, %v16064_v47 }
 0x1cf   :  { %7054 = vmatpush.bf16.msra.mxu2 %v11507_v17  ;;  %v11600_v26 = vld [vmem:[%s19771_s1 + $0x1b90] sm:$0xf0]  ;;  %v11475_v8 = vor.u32 %v13020_v63, %v11472_v0  ;;  %v12952_v9 = vld [vmem:[%s19771_s1 + $0x1864] sm:$0xf]  ;;  %v6789_v17 = vpop.f32.mrf.mxu1  ;;  %v6815_v0 = vpop.f32.mrf.mxu3 }
 0x1d0   :  { %7067 = vmatpush.bf16.msra.mxu3 %v11635_v58  ;;  %v11200_v14 = vld [vmem:[%s19771_s1 + $0x1870] sm:$0xf0]  ;;  %v12984_v15 = vld [vmem:[%s19771_s1 + $0x1964] sm:$0xf]  ;;  %v11603_v21 = vor.u32 %v13052_v1, %v11600_v26  ;;  %v6790_v40 = vadd.f32 %v6789_v17, %v6777_v51 }
 0x1d1   :  { %7029 = vmatpush.bf16.msra.mxu0 %v11235_v52  ;;  %v11328_v27 = vld [vmem:[%s19771_s1 + $0x1970] sm:$0xf0]  ;;  %v13016_v32 = vld [vmem:[%s19771_s1 + $0x1a64] sm:$0xf]  ;;  %v11203_v48 = vor.u32 %v12952_v9, %v11200_v14 }
 0x1d2   :  { %7042 = vmatpush.bf16.msra.mxu1 %v11363_v54  ;;  %v11456_v58 = vld [vmem:[%s19771_s1 + $0x1a70] sm:$0xf0]  ;;  %v13048_v39 = vld [vmem:[%s19771_s1 + $0x1b64] sm:$0xf]  ;;  %v11331_v61 = vor.u32 %v12984_v15, %v11328_v27  ;;  %v6803_v63 = vadd.f32 %v6802_v57, %v6790_v40 }
 0x1d3   :  { %7055 = vmatpush.bf16.msra.mxu2 %v11491_v56  ;;  %v11584_v47 = vld [vmem:[%s19771_s1 + $0x1b70] sm:$0xf0]  ;;  %v11459_v50 = vor.u32 %v13016_v32, %v11456_v58  ;;  %v12948_v52 = vld [vmem:[%s19771_s1 + $0x1844] sm:$0xf] }
 0x1d4   :  { %7068 = vmatpush.bf16.msra.mxu3 %v11619_v55  ;;  %v11184_v54 = vld [vmem:[%s19771_s1 + $0x1850] sm:$0xf0]  ;;  %v12980_v56 = vld [vmem:[%s19771_s1 + $0x1944] sm:$0xf]  ;;  %v11587_v59 = vor.u32 %v13048_v39, %v11584_v47  ;;  %v16263_v4 = vadd.f32 %v6815_v0, %v6803_v63 }
 0x1d5   :  { %7030 = vmatpush.bf16.msra.mxu0 %v11219_v2  ;;  %v11312_v60 = vld [vmem:[%s19771_s1 + $0x1950] sm:$0xf0]  ;;  %v13012_v55 = vld [vmem:[%s19771_s1 + $0x1a44] sm:$0xf]  ;;  %v11187_v2 = vor.u32 %v12948_v52, %v11184_v54 }
 0x1d6   :  { %7043 = vmatpush.bf16.msra.mxu1 %v11347_v6  ;;  %v11440_v62 = vld [vmem:[%s19771_s1 + $0x1a50] sm:$0xf0]  ;;  %v13044_v1 = vld [vmem:[%s19771_s1 + $0x1b44] sm:$0xf]  ;;  %v6778_v6 = vpop.f32.mrf.mxu0 }
 0x1d7   :  { %7056 = vmatpush.bf16.msra.mxu2 %v11475_v8  ;;  %v11568_v26 = vld [vmem:[%s19771_s1 + $0x1b50] sm:$0xf0]  ;;  %v11315_v8 = vor.u32 %v12980_v56, %v11312_v60  ;;  %v11443_v9 = vor.u32 %v13012_v55, %v11440_v62  ;;  %v12944_v14 = vld [vmem:[%s19771_s1 + $0x1824] sm:$0xf]  ;;  %v6791_v17 = vpop.f32.mrf.mxu1  ;;  %v6817_v0 = vpop.f32.mrf.mxu3 }
 0x1d8   :  { %7069 = vmatpush.bf16.msra.mxu3 %v11603_v21  ;;  %v11168_v15 = vld [vmem:[%s19771_s1 + $0x1830] sm:$0xf0]  ;;  %v12976_v51 = vld [vmem:[%s19771_s1 + $0x1924] sm:$0xf]  ;;  %v11571_v21 = vor.u32 %v13044_v1, %v11568_v26 }
 0x1d9   :  { %7031 = vmatpush.bf16.msra.mxu0 %v11203_v48  ;;  %v11296_v27 = vld [vmem:[%s19771_s1 + $0x1930] sm:$0xf0]  ;;  %v13008_v32 = vld [vmem:[%s19771_s1 + $0x1a24] sm:$0xf]  ;;  %v11171_v40 = vor.u32 %v12944_v14, %v11168_v15 }
 0x1da   :  { %7044 = vmatpush.bf16.msra.mxu1 %v11331_v61  ;;  %v11424_v58 = vld [vmem:[%s19771_s1 + $0x1a30] sm:$0xf0]  ;;  %v13040_v39 = vld [vmem:[%s19771_s1 + $0x1b24] sm:$0xf] }
 0x1db   :  { %7057 = vmatpush.bf16.msra.mxu2 %v11459_v50  ;;  %v11552_v47 = vld [vmem:[%s19771_s1 + $0x1b30] sm:$0xf0]  ;;  %v12940_v48 = vld [vmem:[%s19771_s1 + $0x1804] sm:$0xf]  ;;  %v11299_v50 = vor.u32 %v12976_v51, %v11296_v27  ;;  %v11427_v52 = vor.u32 %v13008_v32, %v11424_v58 }
 0x1dc   :  { %7070 = vmatpush.bf16.msra.mxu3 %v11587_v59  ;;  %v11152_v61 = vld [vmem:[%s19771_s1 + $0x1810] sm:$0xf0]  ;;  %v12972_v54 = vld [vmem:[%s19771_s1 + $0x1904] sm:$0xf]  ;;  %v6804_v59 = vpop.f32.mrf.mxu2  ;;  %v11555_v60 = vor.u32 %v13040_v39, %v11552_v47 }
 0x1dd   :  { %7032 = vmatpush.bf16.msra.mxu0 %v11187_v2  ;;  %v11280_v56 = vld [vmem:[%s19771_s1 + $0x1910] sm:$0xf0]  ;;  %v13004_v57 = vld [vmem:[%s19771_s1 + $0x1a04] sm:$0xf]  ;;  %v11155_v6 = vor.u32 %v12940_v48, %v11152_v61 }
 0x1de   :  { %7045 = vmatpush.bf16.msra.mxu1 %v11315_v8  ;;  %v11408_v55 = vld [vmem:[%s19771_s1 + $0x1a10] sm:$0xf0]  ;;  %v13036_v62 = vld [vmem:[%s19771_s1 + $0x1b04] sm:$0xf]  ;;  %v11283_v15 = vor.u32 %v12972_v54, %v11280_v56 }
 0x1df   :  { %7058 = vmatpush.bf16.msra.mxu2 %v11443_v9  ;;  %v11536_v63 = vld [vmem:[%s19771_s1 + $0x1b10] sm:$0xf0]  ;;  %v13096_v1 = vld [vmem:[%s19771_s1 + $0x1ce4] sm:$0xf]  ;;  %v11411_v51 = vor.u32 %v13004_v57, %v11408_v55 }
 0x1e0   :  { %7071 = vmatpush.bf16.msra.mxu3 %v11571_v21  ;;  %v11776_v26 = vld [vmem:[%s19771_s1 + $0x1cf0] sm:$0xf0]  ;;  %v13128_v2 = vld [vmem:[%s19771_s1 + $0x1de4] sm:$0xf]  ;;  %v11539_v27 = vor.u32 %v13036_v62, %v11536_v63 }
 0x1e1   :  { %7033 = vmatpush.bf16.msra.mxu0 %v11171_v40  ;;  %v11904_v8 = vld [vmem:[%s19771_s1 + $0x1df0] sm:$0xf0]  ;;  %v13160_v9 = vld [vmem:[%s19771_s1 + $0x1ee4] sm:$0xf]  ;;  %v11779_v32 = vor.u32 %v13096_v1, %v11776_v26 }
 0x1e2   :  { %v12032_v14 = vld [vmem:[%s19771_s1 + $0x1ef0] sm:$0xf0]  ;;  %7046 = vmatpush.bf16.msra.mxu1 %v11299_v50  ;;  %v13192_v17 = vld [vmem:[%s19771_s1 + $0x1fe4] sm:$0xf]  ;;  %v11907_v58 = vor.u32 %v13128_v2, %v11904_v8 }
 0x1e3   :  { %7059 = vmatpush.bf16.msra.mxu2 %v11427_v52  ;;  %v12160_v21 = vld [vmem:[%s19771_s1 + $0x1ff0] sm:$0xf0]  ;;  %v12035_v39 = vor.u32 %v13160_v9, %v12032_v14  ;;  %v13092_v47 = vld [vmem:[%s19771_s1 + $0x1cc4] sm:$0xf] }
 0x1e4   :  { %7072 = vmatpush.bf16.msra.mxu3 %v11555_v60  ;;  %v11760_v40 = vld [vmem:[%s19771_s1 + $0x1cd0] sm:$0xf0]  ;;  %v13124_v48 = vld [vmem:[%s19771_s1 + $0x1dc4] sm:$0xf]  ;;  %v12163_v61 = vor.u32 %v13192_v17, %v12160_v21 }
 0x1e5   :  { %7034 = vmatpush.bf16.msra.mxu0 %v11155_v6  ;;  %v11888_v50 = vld [vmem:[%s19771_s1 + $0x1dd0] sm:$0xf0]  ;;  %v13156_v52 = vld [vmem:[%s19771_s1 + $0x1ec4] sm:$0xf]  ;;  %v11763_v59 = vor.u32 %v13092_v47, %v11760_v40  ;;  %v6828_v40 = vpop.f32.mrf.mxu0 }
 0x1e6   :  { %v12016_v54 = vld [vmem:[%s19771_s1 + $0x1ed0] sm:$0xf0]  ;;  %7047 = vmatpush.bf16.msra.mxu1 %v11283_v15  ;;  %v13188_v56 = vld [vmem:[%s19771_s1 + $0x1fc4] sm:$0xf]  ;;  %v11891_v60 = vor.u32 %v13124_v48, %v11888_v50  ;;  %v6829_v50 = vadd.f32 %v6828_v40, %v16263_v4 }
 0x1e7   :  { %7060 = vmatpush.bf16.msra.mxu2 %v11411_v51  ;;  %v12144_v57 = vld [vmem:[%s19771_s1 + $0x1fd0] sm:$0xf0]  ;;  %v12019_v55 = vor.u32 %v13156_v52, %v12016_v54  ;;  %v13088_v62 = vld [vmem:[%s19771_s1 + $0x1ca4] sm:$0xf]  ;;  %v6841_v54 = vpop.f32.mrf.mxu1 }
 0x1e8   :  { %7073 = vmatpush.bf16.msra.mxu3 %v11539_v27  ;;  %v11744_v63 = vld [vmem:[%s19771_s1 + $0x1cb0] sm:$0xf0]  ;;  %v13120_v0 = vld [vmem:[%s19771_s1 + $0x1da4] sm:$0xf]  ;;  %7035 = vmatmul.bf16.vlgmr.msra.gmra.mxu0 %v14730_v5  ;;  %v12147_v1 = vor.u32 %v13188_v56, %v12144_v57 }
 0x1e9   :  { %7079 = vmatpush.bf16.msrb.mxu0 %v11779_v32  ;;  %v11872_v26 = vld [vmem:[%s19771_s1 + $0x1db0] sm:$0xf0]  ;;  %v13152_v2 = vld [vmem:[%s19771_s1 + $0x1ea4] sm:$0xf]  ;;  %7048 = vmatmul.bf16.vlgmr.msra.gmra.mxu1 %v14743_v13  ;;  %v11747_v14 = vor.u32 %v13088_v62, %v11744_v63  ;;  %v6842_v62 = vadd.f32 %v6841_v54, %v6829_v50 }
 0x1ea   :  { %7092 = vmatpush.bf16.msrb.mxu1 %v11907_v58  ;;  %v12000_v6 = vld [vmem:[%s19771_s1 + $0x1eb0] sm:$0xf0]  ;;  %7061 = vmatmul.bf16.vlgmr.msra.gmra.mxu2 %v14741_v10  ;;  %v13184_v8 = vld [vmem:[%s19771_s1 + $0x1fa4] sm:$0xf]  ;;  %v11875_v15 = vor.u32 %v13120_v0, %v11872_v26 }
 0x1eb   :  { %7105 = vmatpush.bf16.msrb.mxu2 %v12035_v39  ;;  %v12128_v9 = vld [vmem:[%s19771_s1 + $0x1fb0] sm:$0xf0]  ;;  %7074 = vmatmul.bf16.vlgmr.msra.gmra.mxu3 %v14751_v53  ;;  %v12003_v51 = vor.u32 %v13152_v2, %v12000_v6  ;;  %v13084_v17 = vld [vmem:[%s19771_s1 + $0x1c84] sm:$0xf] }
 0x1ec   :  { %7118 = vmatpush.bf16.msrb.mxu3 %v12163_v61  ;;  %v11728_v21 = vld [vmem:[%s19771_s1 + $0x1c90] sm:$0xf0]  ;;  %v13116_v27 = vld [vmem:[%s19771_s1 + $0x1d84] sm:$0xf]  ;;  %v12131_v32 = vor.u32 %v13184_v8, %v12128_v9 }
 0x1ed   :  { %7080 = vmatpush.bf16.msrb.mxu0 %v11763_v59  ;;  %v11856_v58 = vld [vmem:[%s19771_s1 + $0x1d90] sm:$0xf0]  ;;  %v13148_v39 = vld [vmem:[%s19771_s1 + $0x1e84] sm:$0xf]  ;;  %v11731_v52 = vor.u32 %v13084_v17, %v11728_v21  ;;  %v6854_v21 = vpop.f32.mrf.mxu2 }
 0x1ee   :  { %7093 = vmatpush.bf16.msrb.mxu1 %v11891_v60  ;;  %v11984_v47 = vld [vmem:[%s19771_s1 + $0x1e90] sm:$0xf0]  ;;  %v13180_v48 = vld [vmem:[%s19771_s1 + $0x1f84] sm:$0xf]  ;;  %v11859_v56 = vor.u32 %v13116_v27, %v11856_v58 }
 0x1ef   :  { %7106 = vmatpush.bf16.msrb.mxu2 %v12019_v55  ;;  %v12112_v61 = vld [vmem:[%s19771_s1 + $0x1f90] sm:$0xf0]  ;;  %v11987_v57 = vor.u32 %v13148_v39, %v11984_v47  ;;  %v13080_v59 = vld [vmem:[%s19771_s1 + $0x1c64] sm:$0xf]  ;;  %v6855_v39 = vadd.f32 %v6854_v21, %v6842_v62  ;;  %v6867_v47 = vpop.f32.mrf.mxu3 }
 0x1f0   :  { %7119 = vmatpush.bf16.msrb.mxu3 %v12147_v1  ;;  %v11712_v60 = vld [vmem:[%s19771_s1 + $0x1c70] sm:$0xf0]  ;;  %v13112_v55 = vld [vmem:[%s19771_s1 + $0x1d64] sm:$0xf]  ;;  %v12115_v4 = vor.u32 %v13180_v48, %v12112_v61  ;;  %v6830_v61 = vpop.f32.mrf.mxu0 }
 0x1f1   :  { %7081 = vmatpush.bf16.msrb.mxu0 %v11747_v14  ;;  %v11840_v63 = vld [vmem:[%s19771_s1 + $0x1d70] sm:$0xf0]  ;;  %v13144_v0 = vld [vmem:[%s19771_s1 + $0x1e64] sm:$0xf]  ;;  %v11715_v6 = vor.u32 %v13080_v59, %v11712_v60  ;;  %v16462_v54 = vadd.f32 %v6867_v47, %v6855_v39  ;;  %v8198_v47 = vld [vmem:[%s19771_s1 + $0xe8] sm:$0xf] }
 0x1f2   :  { %7094 = vmatpush.bf16.msrb.mxu1 %v11875_v15  ;;  %v11968_v1 = vld [vmem:[%s19771_s1 + $0x1e70] sm:$0xf0]  ;;  %v13176_v26 = vld [vmem:[%s19771_s1 + $0x1f64] sm:$0xf]  ;;  %v11843_v8 = vor.u32 %v13112_v55, %v11840_v63 }
 0x1f3   :  { %7107 = vmatpush.bf16.msrb.mxu2 %v12003_v51  ;;  %v12096_v2 = vld [vmem:[%s19771_s1 + $0x1f70] sm:$0xf0]  ;;  %v11971_v9 = vor.u32 %v13144_v0, %v11968_v1  ;;  %v13076_v14 = vld [vmem:[%s19771_s1 + $0x1c44] sm:$0xf] }
 0x1f4   :  { %7120 = vmatpush.bf16.msrb.mxu3 %v12131_v32  ;;  %v11696_v15 = vld [vmem:[%s19771_s1 + $0x1c50] sm:$0xf0]  ;;  %v13108_v51 = vld [vmem:[%s19771_s1 + $0x1d44] sm:$0xf]  ;;  %v12099_v17 = vor.u32 %v13176_v26, %v12096_v2 }
 0x1f5   :  { %7082 = vmatpush.bf16.msrb.mxu0 %v11731_v52  ;;  %v11824_v27 = vld [vmem:[%s19771_s1 + $0x1d50] sm:$0xf0]  ;;  %v13140_v32 = vld [vmem:[%s19771_s1 + $0x1e44] sm:$0xf]  ;;  %v11699_v50 = vor.u32 %v13076_v14, %v11696_v15  ;;  %v6843_v52 = vpop.f32.mrf.mxu1  ;;  %v6856_v39 = vpop.f32.mrf.mxu2 }
 0x1f6   :  { %7095 = vmatpush.bf16.msrb.mxu1 %v11859_v56  ;;  %v11952_v58 = vld [vmem:[%s19771_s1 + $0x1e50] sm:$0xf0]  ;;  %v13172_v40 = vld [vmem:[%s19771_s1 + $0x1f44] sm:$0xf]  ;;  %v11827_v56 = vor.u32 %v13108_v51, %v11824_v27  ;;  %v12235_v52 = vld [vmem:[%s19771_s1 + $0x1f4] sm:$0xf0] }
 0x1f7   :  { %7108 = vmatpush.bf16.msrb.mxu2 %v11987_v57  ;;  %v12080_v48 = vld [vmem:[%s19771_s1 + $0x1f50] sm:$0xf0]  ;;  %v11955_v57 = vor.u32 %v13140_v32, %v11952_v58  ;;  %v13072_v59 = vld [vmem:[%s19771_s1 + $0x1c24] sm:$0xf]  ;;  %v6869_v61 = vpop.f32.mrf.mxu3  ;;  %v12195_v39 = vld [vmem:[%s19771_s1 + $0xb4] sm:$0xf0] }
 0x1f8   :  { %7121 = vmatpush.bf16.msrb.mxu3 %v12115_v4  ;;  %v11680_v60 = vld [vmem:[%s19771_s1 + $0x1c30] sm:$0xf0]  ;;  %v13104_v55 = vld [vmem:[%s19771_s1 + $0x1d24] sm:$0xf]  ;;  %v12083_v4 = vor.u32 %v13172_v40, %v12080_v48  ;;  %v12203_v40 = vld [vmem:[%s19771_s1 + $0xf4] sm:$0xf0] }
 0x1f9   :  { %7083 = vmatpush.bf16.msrb.mxu0 %v11715_v6  ;;  %v11808_v62 = vld [vmem:[%s19771_s1 + $0x1d30] sm:$0xf0]  ;;  %v13136_v63 = vld [vmem:[%s19771_s1 + $0x1e24] sm:$0xf]  ;;  %v11683_v2 = vor.u32 %v13072_v59, %v11680_v60  ;;  %v8326_v48 = vld [vmem:[%s19771_s1 + $0x1e8] sm:$0xf] }
 0x1fa   :  { %7096 = vmatpush.bf16.msrb.mxu1 %v11843_v8  ;;  %v11936_v0 = vld [vmem:[%s19771_s1 + $0x1e30] sm:$0xf0]  ;;  %v13168_v1 = vld [vmem:[%s19771_s1 + $0x1f24] sm:$0xf]  ;;  %v8422_v61 = vld [vmem:[%s19771_s1 + $0x2a8] sm:$0xf] }
 0x1fb   :  { %7109 = vmatpush.bf16.msrb.mxu2 %v11971_v9  ;;  %v12064_v26 = vld [vmem:[%s19771_s1 + $0x1f30] sm:$0xf0]  ;;  %v13068_v6 = vld [vmem:[%s19771_s1 + $0x1c04] sm:$0xf]  ;;  %v11811_v9 = vor.u32 %v13104_v55, %v11808_v62  ;;  %v11939_v14 = vor.u32 %v13136_v63, %v11936_v0  ;;  %v8582_v55 = vld [vmem:[%s19771_s1 + $0x3e8] sm:$0xf]  ;;  %v8199_v63 = vor.u32 %v12203_v40, %v8198_v47  ;;  %v8327_v0 = vor.u32 %v12235_v52, %v8326_v48 }
 0x1fc   :  { %7122 = vmatpush.bf16.msrb.mxu3 %v12099_v17  ;;  %v11664_v8 = vld [vmem:[%s19771_s1 + $0x1c10] sm:$0xf0]  ;;  %v13100_v15 = vld [vmem:[%s19771_s1 + $0x1d04] sm:$0xf]  ;;  %v12067_v21 = vor.u32 %v13168_v1, %v12064_v26  ;;  %v8182_v26 = vld [vmem:[%s19771_s1 + $0xc8] sm:$0xf] }
 0x1fd   :  { %7084 = vmatpush.bf16.msrb.mxu0 %v11699_v50  ;;  %v11792_v51 = vld [vmem:[%s19771_s1 + $0x1d10] sm:$0xf0]  ;;  %v13132_v17 = vld [vmem:[%s19771_s1 + $0x1e04] sm:$0xf]  ;;  %v11667_v50 = vor.u32 %v13068_v6, %v11664_v8  ;;  %v8310_v6 = vld [vmem:[%s19771_s1 + $0x1c8] sm:$0xf] }
 0x1fe   :  { %7097 = vmatpush.bf16.msrb.mxu1 %v11827_v56  ;;  %v11920_v27 = vld [vmem:[%s19771_s1 + $0x1e10] sm:$0xf0]  ;;  %v13164_v32 = vld [vmem:[%s19771_s1 + $0x1f04] sm:$0xf]  ;;  %v8454_v56 = vld [vmem:[%s19771_s1 + $0x2e8] sm:$0xf]  ;;  %v11795_v59 = vor.u32 %v13100_v15, %v11792_v51 }
 0x1ff   :  { %7110 = vmatpush.bf16.msrb.mxu2 %v11955_v57  ;;  %v12048_v58 = vld [vmem:[%s19771_s1 + $0x1f10] sm:$0xf0]  ;;  %v12267_v57 = vld [vmem:[%s19771_s1 + $0x2f4] sm:$0xf0]  ;;  %v11923_v60 = vor.u32 %v13132_v17, %v11920_v27  ;;  %v8566_v51 = vld [vmem:[%s19771_s1 + $0x3c8] sm:$0xf] }
 0x200   :  { %7123 = vmatpush.bf16.msrb.mxu3 %v12083_v4  ;;  %v12299_v4 = vld [vmem:[%s19771_s1 + $0x3f4] sm:$0xf0]  ;;  %v12051_v62 = vor.u32 %v13164_v32, %v12048_v58  ;;  %v8455_v1 = vor.u32 %v12267_v57, %v8454_v56  ;;  %v8166_v58 = vld [vmem:[%s19771_s1 + $0xa8] sm:$0xf] }
 0x201   :  { %7085 = vmatpush.bf16.msrb.mxu0 %v11683_v2  ;;  %v12199_v2 = vld [vmem:[%s19771_s1 + $0xd4] sm:$0xf0]  ;;  %v8583_v8 = vor.u32 %v12299_v4, %v8582_v55  ;;  %v8294_v47 = vld [vmem:[%s19771_s1 + $0x1a8] sm:$0xf]  ;;  %v8167_v57 = vor.u32 %v12195_v39, %v8166_v58 }
 0x202   :  { %7098 = vmatpush.bf16.msrb.mxu1 %v11811_v9  ;;  %v12231_v9 = vld [vmem:[%s19771_s1 + $0x1d4] sm:$0xf0]  ;;  %v8550_v52 = vld [vmem:[%s19771_s1 + $0x3a8] sm:$0xf] }
 0x203   :  { %7111 = vmatpush.bf16.msrb.mxu2 %v11939_v14  ;;  %v8438_v14 = vld [vmem:[%s19771_s1 + $0x2c8] sm:$0xf]  ;;  %v12263_v15 = vld [vmem:[%s19771_s1 + $0x2d4] sm:$0xf0]  ;;  %v8311_v27 = vor.u32 %v12231_v9, %v8310_v6 }
 0x204   :  { %7124 = vmatpush.bf16.msrb.mxu3 %v12067_v21  ;;  %v12295_v17 = vld [vmem:[%s19771_s1 + $0x3d4] sm:$0xf0]  ;;  %v8183_v21 = vor.u32 %v12199_v2, %v8182_v26  ;;  %v8439_v32 = vor.u32 %v12263_v15, %v8438_v14  ;;  %v8150_v55 = vld [vmem:[%s19771_s1 + $0x88] sm:$0xf] }
 0x205   :  { %7086 = vmatpush.bf16.msrb.mxu0 %v11667_v50  ;;  %v8567_v40 = vor.u32 %v12295_v17, %v8566_v51  ;;  %v12227_v48 = vld [vmem:[%s19771_s1 + $0x1b4] sm:$0xf0]  ;;  %v6880_v2 = vpop.f32.mrf.mxu0  ;;  %v8534_v6 = vld [vmem:[%s19771_s1 + $0x388] sm:$0xf] }
 0x206   :  { %7099 = vmatpush.bf16.msrb.mxu1 %v11795_v59  ;;  %v12259_v50 = vld [vmem:[%s19771_s1 + $0x2b4] sm:$0xf0]  ;;  %v8295_v59 = vor.u32 %v12227_v48, %v8294_v47  ;;  %v6881_v9 = vadd.f32 %v6880_v2, %v16462_v54  ;;  %v6893_v15 = vpop.f32.mrf.mxu1  ;;  %v8390_v47 = vld [vmem:[%s19771_s1 + $0x268] sm:$0xf] }
 0x207   :  { %7112 = vmatpush.bf16.msrb.mxu2 %v11923_v60  ;;  %v12291_v56 = vld [vmem:[%s19771_s1 + $0x3b4] sm:$0xf0]  ;;  %v8423_v60 = vor.u32 %v12259_v50, %v8422_v61  ;;  %v8518_v48 = vld [vmem:[%s19771_s1 + $0x368] sm:$0xf] }
 0x208   :  { %7125 = vmatpush.bf16.msrb.mxu3 %v12051_v62  ;;  %7087 = vmatmul.bf16.vlgmr.msrb.gmra.mxu0 %v14943_v24  ;;  %v12191_v4 = vld [vmem:[%s19771_s1 + $0x94] sm:$0xf0]  ;;  %v8278_v62 = vld [vmem:[%s19771_s1 + $0x188] sm:$0xf]  ;;  %v6894_v58 = vadd.f32 %v6893_v15, %v6881_v9 }
 0x209   :  { %7131 = vmatpush.bf16.msra.mxu0 %v8199_v63  ;;  %7100 = vmatmul.bf16.vlgmr.msrb.gmra.mxu1 %v14956_v36  ;;  %v8551_v63 = vor.u32 %v12291_v56, %v8550_v52  ;;  %v12255_v26 = vld [vmem:[%s19771_s1 + $0x294] sm:$0xf0]  ;;  %v8151_v14 = vor.u32 %v12191_v4, %v8150_v55  ;;  %v8502_v2 = vld [vmem:[%s19771_s1 + $0x348] sm:$0xf] }
 0x20a   :  { %7144 = vmatpush.bf16.msra.mxu1 %v8327_v0  ;;  %7113 = vmatmul.bf16.vlgmr.msrb.gmra.mxu2 %v14954_v34  ;;  %v12223_v0 = vld [vmem:[%s19771_s1 + $0x194] sm:$0xf0] }
 0x20b   :  { %7157 = vmatpush.bf16.msra.mxu2 %v8455_v1  ;;  %7126 = vmatmul.bf16.vlgmr.msrb.gmra.mxu3 %v14964_v43  ;;  %v8406_v1 = vld [vmem:[%s19771_s1 + $0x288] sm:$0xf]  ;;  %v8279_v51 = vor.u32 %v12223_v0, %v8278_v62  ;;  %v12219_v39 = vld [vmem:[%s19771_s1 + $0x174] sm:$0xf0] }
 0x20c   :  { %7170 = vmatpush.bf16.msra.mxu3 %v8583_v8  ;;  %v12287_v8 = vld [vmem:[%s19771_s1 + $0x394] sm:$0xf0]  ;;  %v8407_v17 = vor.u32 %v12255_v26, %v8406_v1 }
 0x20d   :  { %7132 = vmatpush.bf16.msra.mxu0 %v8183_v21  ;;  %v8134_v21 = vld [vmem:[%s19771_s1 + $0x68] sm:$0xf]  ;;  %v8535_v54 = vor.u32 %v12287_v8, %v8534_v6  ;;  %v12283_v61 = vld [vmem:[%s19771_s1 + $0x374] sm:$0xf0]  ;;  %v6906_v4 = vpop.f32.mrf.mxu2  ;;  %v6882_v8 = vpop.f32.mrf.mxu0 }
 0x20e   :  { %7145 = vmatpush.bf16.msra.mxu1 %v8311_v27  ;;  %v12187_v27 = vld [vmem:[%s19771_s1 + $0x74] sm:$0xf0]  ;;  %v8519_v55 = vor.u32 %v12283_v61, %v8518_v48  ;;  %v6907_v1 = vadd.f32 %v6906_v4, %v6894_v58  ;;  %v6919_v26 = vpop.f32.mrf.mxu3 }
 0x20f   :  { %7158 = vmatpush.bf16.msra.mxu2 %v8439_v32  ;;  %v8262_v32 = vld [vmem:[%s19771_s1 + $0x168] sm:$0xf]  ;;  %v8135_v50 = vor.u32 %v12187_v27, %v8134_v21  ;;  %v12215_v62 = vld [vmem:[%s19771_s1 + $0x154] sm:$0xf0] }
 0x210   :  { %7171 = vmatpush.bf16.msra.mxu3 %v8567_v40  ;;  %v12251_v40 = vld [vmem:[%s19771_s1 + $0x274] sm:$0xf0]  ;;  %v8263_v52 = vor.u32 %v12219_v39, %v8262_v32  ;;  %v16661_v15 = vadd.f32 %v6919_v26, %v6907_v1  ;;  %v8102_v21 = vld [vmem:[%s19771_s1 + $0x28] sm:$0xf] }
 0x211   :  { %7133 = vmatpush.bf16.msra.mxu0 %v8167_v57  ;;  %v8391_v56 = vor.u32 %v12251_v40, %v8390_v47  ;;  %v8118_v57 = vld [vmem:[%s19771_s1 + $0x48] sm:$0xf]  ;;  %v12247_v0 = vld [vmem:[%s19771_s1 + $0x254] sm:$0xf0] }
 0x212   :  { %7146 = vmatpush.bf16.msra.mxu1 %v8295_v59  ;;  %v12183_v59 = vld [vmem:[%s19771_s1 + $0x54] sm:$0xf0]  ;;  %v8230_v32 = vld [vmem:[%s19771_s1 + $0x128] sm:$0xf] }
 0x213   :  { %7159 = vmatpush.bf16.msra.mxu2 %v8423_v60  ;;  %v8246_v60 = vld [vmem:[%s19771_s1 + $0x148] sm:$0xf]  ;;  %v12279_v6 = vld [vmem:[%s19771_s1 + $0x354] sm:$0xf0]  ;;  %v8119_v9 = vor.u32 %v12183_v59, %v8118_v57 }
 0x214   :  { %7172 = vmatpush.bf16.msra.mxu3 %v8551_v63  ;;  %v8374_v63 = vld [vmem:[%s19771_s1 + $0x248] sm:$0xf]  ;;  %v12179_v27 = vld [vmem:[%s19771_s1 + $0x34] sm:$0xf0] }
 0x215   :  { %7134 = vmatpush.bf16.msra.mxu0 %v8151_v14  ;;  %v6895_v14 = vpop.f32.mrf.mxu1  ;;  %v12211_v58 = vld [vmem:[%s19771_s1 + $0x134] sm:$0xf0]  ;;  %v8358_v39 = vld [vmem:[%s19771_s1 + $0x228] sm:$0xf]  ;;  %v8103_v61 = vor.u32 %v12179_v27, %v8102_v21  ;;  %v6908_v1 = vpop.f32.mrf.mxu2 }
 0x216   :  { %7147 = vmatpush.bf16.msra.mxu1 %v8279_v51  ;;  %v8247_v51 = vor.u32 %v12215_v62, %v8246_v60  ;;  %v12243_v47 = vld [vmem:[%s19771_s1 + $0x234] sm:$0xf0]  ;;  %v8486_v40 = vld [vmem:[%s19771_s1 + $0x328] sm:$0xf]  ;;  %v6921_v8 = vpop.f32.mrf.mxu3 }
 0x217   :  { %7160 = vmatpush.bf16.msra.mxu2 %v8407_v17  ;;  %v8375_v17 = vor.u32 %v12247_v0, %v8374_v63  ;;  %v12275_v48 = vld [vmem:[%s19771_s1 + $0x334] sm:$0xf0]  ;;  %v8359_v57 = vor.u32 %v12243_v47, %v8358_v39  ;;  %v8214_v59 = vld [vmem:[%s19771_s1 + $0x108] sm:$0xf] }
 0x218   :  { %7173 = vmatpush.bf16.msra.mxu3 %v8535_v54  ;;  %v8503_v54 = vor.u32 %v12279_v6, %v8502_v2  ;;  %v12207_v60 = vld [vmem:[%s19771_s1 + $0x114] sm:$0xf0]  ;;  %v8487_v4 = vor.u32 %v12275_v48, %v8486_v40  ;;  %v8470_v63 = vld [vmem:[%s19771_s1 + $0x308] sm:$0xf] }
 0x219   :  { %7135 = vmatpush.bf16.msra.mxu0 %v8135_v50  ;;  %v8086_v50 = vld [vmem:[%s19771_s1 + $0x8] sm:$0xf]  ;;  %v12239_v62 = vld [vmem:[%s19771_s1 + $0x214] sm:$0xf0]  ;;  %v8215_v21 = vor.u32 %v12207_v60, %v8214_v59 }
 0x21a   :  { %7148 = vmatpush.bf16.msra.mxu1 %v8263_v52  ;;  %v12175_v52 = vld [vmem:[%s19771_s1 + $0x14] sm:$0xf0]  ;;  %v8710_v26 = vld [vmem:[%s19771_s1 + $0x4e8] sm:$0xf] }
 0x21b   :  { %7161 = vmatpush.bf16.msra.mxu2 %v8391_v56  ;;  %v8231_v56 = vor.u32 %v12211_v58, %v8230_v32  ;;  %v12271_v0 = vld [vmem:[%s19771_s1 + $0x314] sm:$0xf0]  ;;  %v8838_v6 = vld [vmem:[%s19771_s1 + $0x5e8] sm:$0xf] }
 0x21c   :  { %7174 = vmatpush.bf16.msra.mxu3 %v8519_v55  ;;  %v8342_v55 = vld [vmem:[%s19771_s1 + $0x208] sm:$0xf]  ;;  %v12331_v2 = vld [vmem:[%s19771_s1 + $0x4f4] sm:$0xf0]  ;;  %v8471_v58 = vor.u32 %v12271_v0, %v8470_v63 }
 0x21d   :  { %7136 = vmatpush.bf16.msra.mxu0 %v8119_v9  ;;  %v8087_v9 = vor.u32 %v12175_v52, %v8086_v50  ;;  %v12363_v14 = vld [vmem:[%s19771_s1 + $0x5f4] sm:$0xf0]  ;;  %v8343_v27 = vor.u32 %v12239_v62, %v8342_v55  ;;  %v9094_v32 = vld [vmem:[%s19771_s1 + $0x7e8] sm:$0xf]  ;;  %v8711_v39 = vor.u32 %v12331_v2, %v8710_v26 }
 0x21e   :  { %7149 = vmatpush.bf16.msra.mxu1 %v8247_v51  ;;  %v8966_v51 = vld [vmem:[%s19771_s1 + $0x6e8] sm:$0xf]  ;;  %v8839_v47 = vor.u32 %v12363_v14, %v8838_v6  ;;  %v12391_v59 = vld [vmem:[%s19771_s1 + $0x6d4] sm:$0xf0] }
 0x21f   :  { %7162 = vmatpush.bf16.msra.mxu2 %v8375_v17  ;;  %v12395_v17 = vld [vmem:[%s19771_s1 + $0x6f4] sm:$0xf0]  ;;  %v8694_v48 = vld [vmem:[%s19771_s1 + $0x4c8] sm:$0xf] }
 0x220   :  { %7175 = vmatpush.bf16.msra.mxu3 %v8503_v54  ;;  %v12427_v54 = vld [vmem:[%s19771_s1 + $0x7f4] sm:$0xf0]  ;;  %v8967_v40 = vor.u32 %v12395_v17, %v8966_v51  ;;  %v8822_v50 = vld [vmem:[%s19771_s1 + $0x5c8] sm:$0xf] }
 0x221   :  { %7137 = vmatpush.bf16.msra.mxu0 %v8103_v61  ;;  %v12327_v61 = vld [vmem:[%s19771_s1 + $0x4d4] sm:$0xf0]  ;;  %v9095_v52 = vor.u32 %v12427_v54, %v9094_v32  ;;  %v9078_v60 = vld [vmem:[%s19771_s1 + $0x7c8] sm:$0xf] }
 0x222   :  { %7150 = vmatpush.bf16.msra.mxu1 %v8231_v56  ;;  %v12359_v56 = vld [vmem:[%s19771_s1 + $0x5d4] sm:$0xf0]  ;;  %v8678_v0 = vld [vmem:[%s19771_s1 + $0x4a8] sm:$0xf] }
 0x223   :  { %7163 = vmatpush.bf16.msra.mxu2 %v8359_v57  ;;  %v8950_v57 = vld [vmem:[%s19771_s1 + $0x6c8] sm:$0xf]  ;;  %v12423_v55 = vld [vmem:[%s19771_s1 + $0x7d4] sm:$0xf0]  ;;  %v8823_v62 = vor.u32 %v12359_v56, %v8822_v50 }
 0x224   :  { %7176 = vmatpush.bf16.msra.mxu3 %v8487_v4  ;;  %v8695_v4 = vor.u32 %v12327_v61, %v8694_v48  ;;  %v8951_v63 = vor.u32 %v12391_v59, %v8950_v57  ;;  %v12323_v1 = vld [vmem:[%s19771_s1 + $0x4b4] sm:$0xf0]  ;;  %v8806_v26 = vld [vmem:[%s19771_s1 + $0x5a8] sm:$0xf]  ;;  %v9079_v2 = vor.u32 %v12423_v55, %v9078_v60 }
 0x225   :  { %7138 = vmatpush.bf16.msra.mxu0 %v8087_v9  ;;  %v12355_v6 = vld [vmem:[%s19771_s1 + $0x5b4] sm:$0xf0]  ;;  %v8934_v8 = vld [vmem:[%s19771_s1 + $0x6a8] sm:$0xf]  ;;  %v8679_v17 = vor.u32 %v12323_v1, %v8678_v0  ;;  %v6932_v61 = vpop.f32.mrf.mxu0 }
 0x226   :  { %7151 = vmatpush.bf16.msra.mxu1 %v8215_v21  ;;  %v12387_v9 = vld [vmem:[%s19771_s1 + $0x6b4] sm:$0xf0]  ;;  %v9062_v14 = vld [vmem:[%s19771_s1 + $0x7a8] sm:$0xf]  ;;  %v8807_v21 = vor.u32 %v12355_v6, %v8806_v26  ;;  %v6933_v56 = vadd.f32 %v6932_v61, %v16661_v15  ;;  %v6945_v59 = vpop.f32.mrf.mxu1 }
 0x227   :  { %7164 = vmatpush.bf16.msra.mxu2 %v8343_v27  ;;  %v12419_v51 = vld [vmem:[%s19771_s1 + $0x7b4] sm:$0xf0]  ;;  %v8935_v27 = vor.u32 %v12387_v9, %v8934_v8  ;;  %v8662_v32 = vld [vmem:[%s19771_s1 + $0x488] sm:$0xf] }
 0x228   :  { %7177 = vmatpush.bf16.msra.mxu3 %v8471_v58  ;;  %7139 = vmatmul.bf16.vlgmr.msra.gmra.mxu0 %v13527_v19  ;;  %v12319_v54 = vld [vmem:[%s19771_s1 + $0x494] sm:$0xf0]  ;;  %v8790_v58 = vld [vmem:[%s19771_s1 + $0x588] sm:$0xf]  ;;  %v6946_v0 = vadd.f32 %v6945_v59, %v6933_v56 }
 0x229   :  { %7183 = vmatpush.bf16.msrb.mxu0 %v8711_v39  ;;  %7152 = vmatmul.bf16.vlgmr.msra.gmra.mxu1 %v13531_v22  ;;  %v9063_v39 = vor.u32 %v12419_v51, %v9062_v14  ;;  %v12383_v48 = vld [vmem:[%s19771_s1 + $0x694] sm:$0xf0]  ;;  %v9046_v50 = vld [vmem:[%s19771_s1 + $0x788] sm:$0xf]  ;;  %v8663_v57 = vor.u32 %v12319_v54, %v8662_v32 }
 0x22a   :  { %7196 = vmatpush.bf16.msrb.mxu1 %v8839_v47  ;;  %7165 = vmatmul.bf16.vlgmr.msra.gmra.mxu2 %v13525_v18  ;;  %v12351_v47 = vld [vmem:[%s19771_s1 + $0x594] sm:$0xf0]  ;;  %v8902_v26 = vld [vmem:[%s19771_s1 + $0x668] sm:$0xf] }
 0x22b   :  { %7209 = vmatpush.bf16.msrb.mxu2 %v8967_v40  ;;  %7178 = vmatmul.bf16.vlgmr.msra.gmra.mxu3 %v13529_v20  ;;  %v8918_v40 = vld [vmem:[%s19771_s1 + $0x688] sm:$0xf]  ;;  %v8791_v60 = vor.u32 %v12351_v47, %v8790_v58  ;;  %v12347_v1 = vld [vmem:[%s19771_s1 + $0x574] sm:$0xf0] }
 0x22c   :  { %7222 = vmatpush.bf16.msrb.mxu3 %v9095_v52  ;;  %v12415_v52 = vld [vmem:[%s19771_s1 + $0x794] sm:$0xf0]  ;;  %v8919_v55 = vor.u32 %v12383_v48, %v8918_v40  ;;  %v9030_v6 = vld [vmem:[%s19771_s1 + $0x768] sm:$0xf] }
 0x22d   :  { %7184 = vmatpush.bf16.msrb.mxu0 %v8695_v4  ;;  %v8646_v4 = vld [vmem:[%s19771_s1 + $0x468] sm:$0xf]  ;;  %v9047_v15 = vor.u32 %v12415_v52, %v9046_v50  ;;  %v12411_v8 = vld [vmem:[%s19771_s1 + $0x774] sm:$0xf0]  ;;  %v6958_v54 = vpop.f32.mrf.mxu2  ;;  %v6934_v52 = vpop.f32.mrf.mxu0 }
 0x22e   :  { %7197 = vmatpush.bf16.msrb.mxu1 %v8823_v62  ;;  %v12315_v62 = vld [vmem:[%s19771_s1 + $0x474] sm:$0xf0]  ;;  %v9031_v32 = vor.u32 %v12411_v8, %v9030_v6  ;;  %v6959_v40 = vadd.f32 %v6958_v54, %v6946_v0  ;;  %v6971_v48 = vpop.f32.mrf.mxu3  ;;  %v9014_v61 = vld [vmem:[%s19771_s1 + $0x748] sm:$0xf] }
 0x22f   :  { %7210 = vmatpush.bf16.msrb.mxu2 %v8951_v63  ;;  %v8774_v63 = vld [vmem:[%s19771_s1 + $0x568] sm:$0xf]  ;;  %v8647_v9 = vor.u32 %v12315_v62, %v8646_v4  ;;  %v12343_v58 = vld [vmem:[%s19771_s1 + $0x554] sm:$0xf0] }
 0x230   :  { %7223 = vmatpush.bf16.msrb.mxu3 %v9079_v2  ;;  %v12379_v2 = vld [vmem:[%s19771_s1 + $0x674] sm:$0xf0]  ;;  %v8775_v14 = vor.u32 %v12347_v1, %v8774_v63  ;;  %v16860_v59 = vadd.f32 %v6971_v48, %v6959_v40  ;;  %v8614_v4 = vld [vmem:[%s19771_s1 + $0x428] sm:$0xf] }
 0x231   :  { %7185 = vmatpush.bf16.msrb.mxu0 %v8679_v17  ;;  %v8903_v51 = vor.u32 %v12379_v2, %v8902_v26  ;;  %v8630_v17 = vld [vmem:[%s19771_s1 + $0x448] sm:$0xf]  ;;  %v12375_v47 = vld [vmem:[%s19771_s1 + $0x654] sm:$0xf0] }
 0x232   :  { %7198 = vmatpush.bf16.msrb.mxu1 %v8807_v21  ;;  %v12311_v21 = vld [vmem:[%s19771_s1 + $0x454] sm:$0xf0]  ;;  %v8742_v63 = vld [vmem:[%s19771_s1 + $0x528] sm:$0xf] }
 0x233   :  { %7211 = vmatpush.bf16.msrb.mxu2 %v8935_v27  ;;  %v8758_v27 = vld [vmem:[%s19771_s1 + $0x548] sm:$0xf]  ;;  %v12407_v50 = vld [vmem:[%s19771_s1 + $0x754] sm:$0xf0]  ;;  %v8631_v56 = vor.u32 %v12311_v21, %v8630_v17 }
 0x234   :  { %7224 = vmatpush.bf16.msrb.mxu3 %v9063_v39  ;;  %v8886_v39 = vld [vmem:[%s19771_s1 + $0x648] sm:$0xf]  ;;  %v12307_v62 = vld [vmem:[%s19771_s1 + $0x434] sm:$0xf0] }
 0x235   :  { %7186 = vmatpush.bf16.msrb.mxu0 %v8663_v57  ;;  %v6947_v57 = vpop.f32.mrf.mxu1  ;;  %v12339_v0 = vld [vmem:[%s19771_s1 + $0x534] sm:$0xf0]  ;;  %v8870_v1 = vld [vmem:[%s19771_s1 + $0x628] sm:$0xf]  ;;  %v8615_v8 = vor.u32 %v12307_v62, %v8614_v4  ;;  %v6960_v40 = vpop.f32.mrf.mxu2 }
 0x236   :  { %7199 = vmatpush.bf16.msrb.mxu1 %v8791_v60  ;;  %v8759_v60 = vor.u32 %v12343_v58, %v8758_v27  ;;  %v12371_v26 = vld [vmem:[%s19771_s1 + $0x634] sm:$0xf0]  ;;  %v8998_v2 = vld [vmem:[%s19771_s1 + $0x728] sm:$0xf]  ;;  %v6973_v52 = vpop.f32.mrf.mxu3 }
 0x237   :  { %7212 = vmatpush.bf16.msrb.mxu2 %v8919_v55  ;;  %v8887_v55 = vor.u32 %v12375_v47, %v8886_v39  ;;  %v12403_v6 = vld [vmem:[%s19771_s1 + $0x734] sm:$0xf0]  ;;  %v8871_v17 = vor.u32 %v12371_v26, %v8870_v1  ;;  %v8726_v21 = vld [vmem:[%s19771_s1 + $0x508] sm:$0xf] }
 0x238   :  { %7225 = vmatpush.bf16.msrb.mxu3 %v9047_v15  ;;  %v9015_v15 = vor.u32 %v12407_v50, %v9014_v61  ;;  %v12335_v27 = vld [vmem:[%s19771_s1 + $0x514] sm:$0xf0]  ;;  %v8999_v54 = vor.u32 %v12403_v6, %v8998_v2  ;;  %v8982_v39 = vld [vmem:[%s19771_s1 + $0x708] sm:$0xf] }
 0x239   :  { %7187 = vmatpush.bf16.msrb.mxu0 %v8647_v9  ;;  %v8598_v9 = vld [vmem:[%s19771_s1 + $0x408] sm:$0xf]  ;;  %v12367_v58 = vld [vmem:[%s19771_s1 + $0x614] sm:$0xf0]  ;;  %v8727_v4 = vor.u32 %v12335_v27, %v8726_v21 }
 0x23a   :  { %7200 = vmatpush.bf16.msrb.mxu1 %v8775_v14  ;;  %v12303_v14 = vld [vmem:[%s19771_s1 + $0x414] sm:$0xf0]  ;;  %v9222_v48 = vld [vmem:[%s19771_s1 + $0x8e8] sm:$0xf] }
 0x23b   :  { %7213 = vmatpush.bf16.msrb.mxu2 %v8903_v51  ;;  %v8743_v51 = vor.u32 %v12339_v0, %v8742_v63  ;;  %v12399_v47 = vld [vmem:[%s19771_s1 + $0x714] sm:$0xf0]  ;;  %v9350_v50 = vld [vmem:[%s19771_s1 + $0x9e8] sm:$0xf] }
 0x23c   :  { %7226 = vmatpush.bf16.msrb.mxu3 %v9031_v32  ;;  %v8854_v32 = vld [vmem:[%s19771_s1 + $0x608] sm:$0xf]  ;;  %v12459_v61 = vld [vmem:[%s19771_s1 + $0x8f4] sm:$0xf0]  ;;  %v8983_v0 = vor.u32 %v12399_v47, %v8982_v39 }
 0x23d   :  { %7188 = vmatpush.bf16.msrb.mxu0 %v8631_v56  ;;  %v8599_v56 = vor.u32 %v12303_v14, %v8598_v9  ;;  %v12491_v57 = vld [vmem:[%s19771_s1 + $0x9f4] sm:$0xf0]  ;;  %v8855_v62 = vor.u32 %v12367_v58, %v8854_v32  ;;  %v9606_v63 = vld [vmem:[%s19771_s1 + $0xbe8] sm:$0xf]  ;;  %v9223_v1 = vor.u32 %v12459_v61, %v9222_v48 }
 0x23e   :  { %7201 = vmatpush.bf16.msrb.mxu1 %v8759_v60  ;;  %v9478_v60 = vld [vmem:[%s19771_s1 + $0xae8] sm:$0xf]  ;;  %v9351_v26 = vor.u32 %v12491_v57, %v9350_v50  ;;  %v12519_v21 = vld [vmem:[%s19771_s1 + $0xad4] sm:$0xf0] }
 0x23f   :  { %7214 = vmatpush.bf16.msrb.mxu2 %v8887_v55  ;;  %v12523_v55 = vld [vmem:[%s19771_s1 + $0xaf4] sm:$0xf0]  ;;  %v9206_v6 = vld [vmem:[%s19771_s1 + $0x8c8] sm:$0xf] }
 0x240   :  { %7227 = vmatpush.bf16.msrb.mxu3 %v9015_v15  ;;  %v12555_v15 = vld [vmem:[%s19771_s1 + $0xbf4] sm:$0xf0]  ;;  %v9479_v2 = vor.u32 %v12523_v55, %v9478_v60  ;;  %v9334_v9 = vld [vmem:[%s19771_s1 + $0x9c8] sm:$0xf] }
 0x241   :  { %7189 = vmatpush.bf16.msrb.mxu0 %v8615_v8  ;;  %v12455_v8 = vld [vmem:[%s19771_s1 + $0x8d4] sm:$0xf0]  ;;  %v9607_v14 = vor.u32 %v12555_v15, %v9606_v63  ;;  %v9590_v27 = vld [vmem:[%s19771_s1 + $0xbc8] sm:$0xf] }
 0x242   :  { %7202 = vmatpush.bf16.msrb.mxu1 %v8743_v51  ;;  %v12487_v51 = vld [vmem:[%s19771_s1 + $0x9d4] sm:$0xf0]  ;;  %v9190_v47 = vld [vmem:[%s19771_s1 + $0x8a8] sm:$0xf] }
 0x243   :  { %7215 = vmatpush.bf16.msrb.mxu2 %v8871_v17  ;;  %v9462_v17 = vld [vmem:[%s19771_s1 + $0xac8] sm:$0xf]  ;;  %v12551_v32 = vld [vmem:[%s19771_s1 + $0xbd4] sm:$0xf0]  ;;  %v9335_v58 = vor.u32 %v12487_v51, %v9334_v9 }
 0x244   :  { %7228 = vmatpush.bf16.msrb.mxu3 %v8999_v54  ;;  %v9207_v54 = vor.u32 %v12455_v8, %v9206_v6  ;;  %v9463_v39 = vor.u32 %v12519_v21, %v9462_v17  ;;  %v12451_v40 = vld [vmem:[%s19771_s1 + $0x8b4] sm:$0xf0]  ;;  %v9318_v48 = vld [vmem:[%s19771_s1 + $0x9a8] sm:$0xf]  ;;  %v9591_v61 = vor.u32 %v12551_v32, %v9590_v27 }
 0x245   :  { %7190 = vmatpush.bf16.msrb.mxu0 %v8599_v56  ;;  %v12483_v50 = vld [vmem:[%s19771_s1 + $0x9b4] sm:$0xf0]  ;;  %v9446_v52 = vld [vmem:[%s19771_s1 + $0xaa8] sm:$0xf]  ;;  %v9191_v55 = vor.u32 %v12451_v40, %v9190_v47  ;;  %v17004_v8 = vpop.f32.mrf.mxu0 }
 0x246   :  { %7203 = vmatpush.bf16.msrb.mxu1 %v8727_v4  ;;  %v12515_v56 = vld [vmem:[%s19771_s1 + $0xab4] sm:$0xf0]  ;;  %v9574_v57 = vld [vmem:[%s19771_s1 + $0xba8] sm:$0xf]  ;;  %v9319_v4 = vor.u32 %v12483_v50, %v9318_v48  ;;  %v17012_v17 = vpop.f32.mrf.mxu1 }
 0x247   :  { %7216 = vmatpush.bf16.msrb.mxu2 %v8855_v62  ;;  %v12547_v60 = vld [vmem:[%s19771_s1 + $0xbb4] sm:$0xf0]  ;;  %v9447_v62 = vor.u32 %v12515_v56, %v9446_v52  ;;  %v9174_v63 = vld [vmem:[%s19771_s1 + $0x888] sm:$0xf] }
 0x248   :  { %7229 = vmatpush.bf16.msrb.mxu3 %v8983_v0  ;;  %7191 = vmatmul.bf16.vlgmr.msrb.gmra.mxu0 %v13689_v41  ;;  %v12447_v15 = vld [vmem:[%s19771_s1 + $0x894] sm:$0xf0]  ;;  %v9302_v0 = vld [vmem:[%s19771_s1 + $0x988] sm:$0xf] }
 0x249   :  { %7235 = vmatpush.bf16.msra.mxu0 %v9223_v1  ;;  %7204 = vmatmul.bf16.vlgmr.msrb.gmra.mxu1 %v13693_v44  ;;  %v9575_v1 = vor.u32 %v12547_v60, %v9574_v57  ;;  %v12511_v6 = vld [vmem:[%s19771_s1 + $0xa94] sm:$0xf0]  ;;  %v9558_v9 = vld [vmem:[%s19771_s1 + $0xb88] sm:$0xf]  ;;  %v9175_v51 = vor.u32 %v12447_v15, %v9174_v63 }
 0x24a   :  { %7248 = vmatpush.bf16.msra.mxu1 %v9351_v26  ;;  %7217 = vmatmul.bf16.vlgmr.msrb.gmra.mxu2 %v13681_v38  ;;  %v12479_v26 = vld [vmem:[%s19771_s1 + $0x994] sm:$0xf0]  ;;  %v9158_v32 = vld [vmem:[%s19771_s1 + $0x868] sm:$0xf] }
 0x24b   :  { %7261 = vmatpush.bf16.msra.mxu2 %v9479_v2  ;;  %7230 = vmatmul.bf16.vlgmr.msrb.gmra.mxu3 %v13691_v42  ;;  %v9430_v2 = vld [vmem:[%s19771_s1 + $0xa88] sm:$0xf]  ;;  %v9303_v21 = vor.u32 %v12479_v26, %v9302_v0  ;;  %v12475_v47 = vld [vmem:[%s19771_s1 + $0x974] sm:$0xf0] }
 0x24c   :  { %7274 = vmatpush.bf16.msra.mxu3 %v9607_v14  ;;  %v12543_v14 = vld [vmem:[%s19771_s1 + $0xb94] sm:$0xf0]  ;;  %v9431_v27 = vor.u32 %v12511_v6, %v9430_v2  ;;  %v9414_v40 = vld [vmem:[%s19771_s1 + $0xa68] sm:$0xf] }
 0x24d   :  { %7236 = vmatpush.bf16.msra.mxu0 %v9207_v54  ;;  %v12443_v54 = vld [vmem:[%s19771_s1 + $0x874] sm:$0xf0]  ;;  %v9142_v60 = vld [vmem:[%s19771_s1 + $0x848] sm:$0xf]  ;;  %v17047_v63 = vpop.f32.mrf.mxu2 }
 0x24e   :  { %7249 = vmatpush.bf16.msra.mxu1 %v9335_v58  ;;  %v9286_v58 = vld [vmem:[%s19771_s1 + $0x968] sm:$0xf]  ;;  %v12507_v48 = vld [vmem:[%s19771_s1 + $0xa74] sm:$0xf0]  ;;  %v9159_v52 = vor.u32 %v12443_v54, %v9158_v32  ;;  %v17058_v26 = vpop.f32.mrf.mxu3 }
 0x24f   :  { %7262 = vmatpush.bf16.msra.mxu2 %v9463_v39  ;;  %v9559_v39 = vor.u32 %v12543_v14, %v9558_v9  ;;  %v12539_v50 = vld [vmem:[%s19771_s1 + $0xb74] sm:$0xf0]  ;;  %v9287_v56 = vor.u32 %v12475_v47, %v9286_v58  ;;  %v9415_v57 = vor.u32 %v12507_v48, %v9414_v40  ;;  %v9398_v0 = vld [vmem:[%s19771_s1 + $0xa48] sm:$0xf]  ;;  %v6986_v9 = vpop.f32.mrf.mxu0 }
 0x250   :  { %7275 = vmatpush.bf16.msra.mxu3 %v9591_v61  ;;  %v9542_v61 = vld [vmem:[%s19771_s1 + $0xb68] sm:$0xf]  ;;  %v12471_v15 = vld [vmem:[%s19771_s1 + $0x954] sm:$0xf0] }
 0x251   :  { %7237 = vmatpush.bf16.msra.mxu0 %v9191_v55  ;;  %v12439_v55 = vld [vmem:[%s19771_s1 + $0x854] sm:$0xf0]  ;;  %v9526_v2 = vld [vmem:[%s19771_s1 + $0xb48] sm:$0xf] }
 0x252   :  { %7250 = vmatpush.bf16.msra.mxu1 %v9319_v4  ;;  %v9270_v4 = vld [vmem:[%s19771_s1 + $0x948] sm:$0xf]  ;;  %v12535_v6 = vld [vmem:[%s19771_s1 + $0xb54] sm:$0xf0]  ;;  %v9143_v14 = vor.u32 %v12439_v55, %v9142_v60 }
 0x253   :  { %7263 = vmatpush.bf16.msra.mxu2 %v9447_v62  ;;  %v9543_v62 = vor.u32 %v12539_v50, %v9542_v61  ;;  %v9126_v32 = vld [vmem:[%s19771_s1 + $0x828] sm:$0xf]  ;;  %v12435_v54 = vld [vmem:[%s19771_s1 + $0x834] sm:$0xf0] }
 0x254   :  { %7276 = vmatpush.bf16.msra.mxu3 %v9575_v1  ;;  %v12503_v1 = vld [vmem:[%s19771_s1 + $0xa54] sm:$0xf0]  ;;  %v9254_v58 = vld [vmem:[%s19771_s1 + $0x928] sm:$0xf] }
 0x255   :  { %7238 = vmatpush.bf16.msra.mxu0 %v9175_v51  ;;  %v6999_v51 = vpop.f32.mrf.mxu1  ;;  %v12467_v47 = vld [vmem:[%s19771_s1 + $0x934] sm:$0xf0]  ;;  %v9382_v40 = vld [vmem:[%s19771_s1 + $0xa28] sm:$0xf]  ;;  %v7012_v9 = vpop.f32.mrf.mxu2 }
 0x256   :  { %7251 = vmatpush.bf16.msra.mxu1 %v9303_v21  ;;  %v9271_v21 = vor.u32 %v12471_v15, %v9270_v4  ;;  %v12499_v48 = vld [vmem:[%s19771_s1 + $0xa34] sm:$0xf0]  ;;  %v9510_v61 = vld [vmem:[%s19771_s1 + $0xb28] sm:$0xf]  ;;  %v9255_v60 = vor.u32 %v12467_v47, %v9254_v58 }
 0x257   :  { %7264 = vmatpush.bf16.msra.mxu2 %v9431_v27  ;;  %v9399_v27 = vor.u32 %v12503_v1, %v9398_v0  ;;  %v12531_v50 = vld [vmem:[%s19771_s1 + $0xb34] sm:$0xf0]  ;;  %v9383_v55 = vor.u32 %v12499_v48, %v9382_v40  ;;  %v9238_v4 = vld [vmem:[%s19771_s1 + $0x908] sm:$0xf] }
 0x258   :  { %7277 = vmatpush.bf16.msra.mxu3 %v9559_v39  ;;  %v9527_v39 = vor.u32 %v12535_v6, %v9526_v2  ;;  %v9366_v15 = vld [vmem:[%s19771_s1 + $0xa08] sm:$0xf]  ;;  %v9511_v0 = vor.u32 %v12531_v50, %v9510_v61  ;;  %v12495_v1 = vld [vmem:[%s19771_s1 + $0xa14] sm:$0xf0] }
 0x259   :  { %7239 = vmatpush.bf16.msra.mxu0 %v9159_v52  ;;  %v9127_v52 = vor.u32 %v12435_v54, %v9126_v32  ;;  %v9494_v2 = vld [vmem:[%s19771_s1 + $0xb08] sm:$0xf]  ;;  %v12527_v6 = vld [vmem:[%s19771_s1 + $0xb14] sm:$0xf0]  ;;  %v9367_v40 = vor.u32 %v12495_v1, %v9366_v15 }
 0x25a   :  { %7252 = vmatpush.bf16.msra.mxu1 %v9287_v56  ;;  %v9110_v56 = vld [vmem:[%s19771_s1 + $0x808] sm:$0xf]  ;;  %v12587_v51 = vld [vmem:[%s19771_s1 + $0xcf4] sm:$0xf0]  ;;  %v9495_v50 = vor.u32 %v12527_v6, %v9494_v2 }
 0x25b   :  { %7265 = vmatpush.bf16.msra.mxu2 %v9415_v57  ;;  %v12431_v57 = vld [vmem:[%s19771_s1 + $0x814] sm:$0xf0]  ;;  %v9990_v58 = vld [vmem:[%s19771_s1 + $0xee8] sm:$0xf] }
 0x25c   :  { %7278 = vmatpush.bf16.msra.mxu3 %v9543_v62  ;;  %v12463_v62 = vld [vmem:[%s19771_s1 + $0x914] sm:$0xf0]  ;;  %v9111_v32 = vor.u32 %v12431_v57, %v9110_v56  ;;  %v10118_v48 = vld [vmem:[%s19771_s1 + $0xfe8] sm:$0xf] }
 0x25d   :  { %7240 = vmatpush.bf16.msra.mxu0 %v9143_v14  ;;  %v9734_v14 = vld [vmem:[%s19771_s1 + $0xce8] sm:$0xf]  ;;  %v12619_v54 = vld [vmem:[%s19771_s1 + $0xdf4] sm:$0xf0]  ;;  %v9239_v47 = vor.u32 %v12463_v62, %v9238_v4 }
 0x25e   :  { %7253 = vmatpush.bf16.msra.mxu1 %v9271_v21  ;;  %v9862_v21 = vld [vmem:[%s19771_s1 + $0xde8] sm:$0xf]  ;;  %v12683_v61 = vld [vmem:[%s19771_s1 + $0xff4] sm:$0xf0] }
 0x25f   :  { %7266 = vmatpush.bf16.msra.mxu2 %v9399_v27  ;;  %v7025_v27 = vpop.f32.mrf.mxu3  ;;  %v9863_v56 = vor.u32 %v12619_v54, %v9862_v21  ;;  %v9846_v4 = vld [vmem:[%s19771_s1 + $0xdc8] sm:$0xf]  ;;  %v10119_v62 = vor.u32 %v12683_v61, %v10118_v48  ;;  %v12615_v15 = vld [vmem:[%s19771_s1 + $0xdd4] sm:$0xf0] }
 0x260   :  { %7279 = vmatpush.bf16.msra.mxu3 %v9527_v39  ;;  %v12651_v39 = vld [vmem:[%s19771_s1 + $0xef4] sm:$0xf0]  ;;  %v10102_v2 = vld [vmem:[%s19771_s1 + $0xfc8] sm:$0xf] }
 0x261   :  { %7241 = vmatpush.bf16.msra.mxu0 %v9127_v52  ;;  %v9735_v52 = vor.u32 %v12587_v51, %v9734_v14  ;;  %v9991_v57 = vor.u32 %v12651_v39, %v9990_v58  ;;  %v12647_v1 = vld [vmem:[%s19771_s1 + $0xed4] sm:$0xf0]  ;;  %v9847_v14 = vor.u32 %v12615_v15, %v9846_v4  ;;  %v9702_v21 = vld [vmem:[%s19771_s1 + $0xca8] sm:$0xf] }
 0x262   :  { %7254 = vmatpush.bf16.msra.mxu1 %v9255_v60  ;;  %v9718_v60 = vld [vmem:[%s19771_s1 + $0xcc8] sm:$0xf]  ;;  %v12679_v6 = vld [vmem:[%s19771_s1 + $0xfd4] sm:$0xf0] }
 0x263   :  { %7267 = vmatpush.bf16.msra.mxu2 %v9383_v55  ;;  %v12583_v55 = vld [vmem:[%s19771_s1 + $0xcd4] sm:$0xf0]  ;;  %v10103_v54 = vor.u32 %v12679_v6, %v10102_v2  ;;  %v9958_v39 = vld [vmem:[%s19771_s1 + $0xea8] sm:$0xf] }
 0x264   :  { %7280 = vmatpush.bf16.msra.mxu3 %v9511_v0  ;;  %v9974_v0 = vld [vmem:[%s19771_s1 + $0xec8] sm:$0xf]  ;;  %v9719_v9 = vor.u32 %v12583_v55, %v9718_v60  ;;  %v12579_v27 = vld [vmem:[%s19771_s1 + $0xcb4] sm:$0xf0] }
 0x265   :  { %7242 = vmatpush.bf16.msra.mxu0 %v9111_v32  ;;  %v9975_v51 = vor.u32 %v12647_v1, %v9974_v0  ;;  %v9830_v32 = vld [vmem:[%s19771_s1 + $0xda8] sm:$0xf]  ;;  %v12611_v58 = vld [vmem:[%s19771_s1 + $0xdb4] sm:$0xf0]  ;;  %v9703_v61 = vor.u32 %v12579_v27, %v9702_v21  ;;  %v17208_v0 = vpop.f32.mrf.mxu0 }
 0x266   :  { %7255 = vmatpush.bf16.msra.mxu1 %v9239_v47  ;;  %v12643_v47 = vld [vmem:[%s19771_s1 + $0xeb4] sm:$0xf0]  ;;  %v9814_v60 = vld [vmem:[%s19771_s1 + $0xd88] sm:$0xf] }
 0x267   :  { %7268 = vmatpush.bf16.msra.mxu2 %v9367_v40  ;;  %v10086_v40 = vld [vmem:[%s19771_s1 + $0xfa8] sm:$0xf]  ;;  %v12675_v48 = vld [vmem:[%s19771_s1 + $0xfb4] sm:$0xf0] }
 0x268   :  { %7281 = vmatpush.bf16.msra.mxu3 %v9495_v50  ;;  %7243 = vmatmul.bf16.vlgmr.msra.gmra.mxu0 %v13882_v25  ;;  %v9831_v50 = vor.u32 %v12611_v58, %v9830_v32  ;;  %v10087_v55 = vor.u32 %v12675_v48, %v10086_v40  ;;  %v12607_v4 = vld [vmem:[%s19771_s1 + $0xd94] sm:$0xf0]  ;;  %v10070_v1 = vld [vmem:[%s19771_s1 + $0xf88] sm:$0xf] }
 0x269   :  { %7287 = vmatpush.bf16.msrb.mxu0 %v9735_v52  ;;  %7256 = vmatmul.bf16.vlgmr.msra.gmra.mxu1 %v13895_v30  ;;  %v9959_v52 = vor.u32 %v12643_v47, %v9958_v39  ;;  %v12639_v15 = vld [vmem:[%s19771_s1 + $0xe94] sm:$0xf0]  ;;  %v9670_v21 = vld [vmem:[%s19771_s1 + $0xc68] sm:$0xf] }
 0x26a   :  { %7300 = vmatpush.bf16.msrb.mxu1 %v9863_v56  ;;  %7269 = vmatmul.bf16.vlgmr.msra.gmra.mxu2 %v13893_v29  ;;  %v9686_v56 = vld [vmem:[%s19771_s1 + $0xc88] sm:$0xf]  ;;  %v12671_v2 = vld [vmem:[%s19771_s1 + $0xf94] sm:$0xf0] }
 0x26b   :  { %7313 = vmatpush.bf16.msrb.mxu2 %v9991_v57  ;;  %7282 = vmatmul.bf16.vlgmr.msra.gmra.mxu3 %v13903_v33  ;;  %v12575_v57 = vld [vmem:[%s19771_s1 + $0xc94] sm:$0xf0]  ;;  %v9798_v32 = vld [vmem:[%s19771_s1 + $0xd68] sm:$0xf] }
 0x26c   :  { %7326 = vmatpush.bf16.msrb.mxu3 %v10119_v62  ;;  %v9942_v62 = vld [vmem:[%s19771_s1 + $0xe88] sm:$0xf]  ;;  %v9687_v6 = vor.u32 %v12575_v57, %v9686_v56  ;;  %v12571_v27 = vld [vmem:[%s19771_s1 + $0xc74] sm:$0xf0] }
 0x26d   :  { %7288 = vmatpush.bf16.msrb.mxu0 %v9719_v9  ;;  %v17216_v9 = vpop.f32.mrf.mxu1  ;;  %v12603_v58 = vld [vmem:[%s19771_s1 + $0xd74] sm:$0xf0]  ;;  %v9926_v39 = vld [vmem:[%s19771_s1 + $0xe68] sm:$0xf] }
 0x26e   :  { %7301 = vmatpush.bf16.msrb.mxu1 %v9847_v14  ;;  %v9815_v14 = vor.u32 %v12607_v4, %v9814_v60  ;;  %v12635_v47 = vld [vmem:[%s19771_s1 + $0xe74] sm:$0xf0]  ;;  %v10054_v40 = vld [vmem:[%s19771_s1 + $0xf68] sm:$0xf]  ;;  %v17251_v4 = vpop.f32.mrf.mxu2 }
 0x26f   :  { %7314 = vmatpush.bf16.msrb.mxu2 %v9975_v51  ;;  %v9943_v51 = vor.u32 %v12639_v15, %v9942_v62  ;;  %v12667_v48 = vld [vmem:[%s19771_s1 + $0xf74] sm:$0xf0]  ;;  %v9654_v56 = vld [vmem:[%s19771_s1 + $0xc48] sm:$0xf] }
 0x270   :  { %7327 = vmatpush.bf16.msrb.mxu3 %v10103_v54  ;;  %v10071_v54 = vor.u32 %v12671_v2, %v10070_v1  ;;  %v12567_v57 = vld [vmem:[%s19771_s1 + $0xc54] sm:$0xf0]  ;;  %v9782_v60 = vld [vmem:[%s19771_s1 + $0xd48] sm:$0xf]  ;;  %v6985_v2 = vadd.f32 %v17004_v8, %v16860_v59 }
 0x271   :  { %7289 = vmatpush.bf16.msrb.mxu0 %v9703_v61  ;;  %v9671_v61 = vor.u32 %v12571_v27, %v9670_v21  ;;  %v12599_v62 = vld [vmem:[%s19771_s1 + $0xd54] sm:$0xf0]  ;;  %v9910_v15 = vld [vmem:[%s19771_s1 + $0xe48] sm:$0xf]  ;;  %v7038_v21 = vpop.f32.mrf.mxu0  ;;  %v9655_v27 = vor.u32 %v12567_v57, %v9654_v56 }
 0x272   :  { %7302 = vmatpush.bf16.msrb.mxu1 %v9831_v50  ;;  %v9799_v50 = vor.u32 %v12603_v58, %v9798_v32  ;;  %v12631_v1 = vld [vmem:[%s19771_s1 + $0xe54] sm:$0xf0]  ;;  %v9638_v59 = vld [vmem:[%s19771_s1 + $0xc28] sm:$0xf] }
 0x273   :  { %7315 = vmatpush.bf16.msrb.mxu2 %v9959_v52  ;;  %v9927_v52 = vor.u32 %v12635_v47, %v9926_v39  ;;  %v9911_v58 = vor.u32 %v12631_v1, %v9910_v15  ;;  %v12563_v8 = vld [vmem:[%s19771_s1 + $0xc34] sm:$0xf0]  ;;  %v9766_v39 = vld [vmem:[%s19771_s1 + $0xd28] sm:$0xf] }
 0x274   :  { %7328 = vmatpush.bf16.msrb.mxu3 %v10087_v55  ;;  %v10055_v55 = vor.u32 %v12667_v48, %v10054_v40  ;;  %v12595_v40 = vld [vmem:[%s19771_s1 + $0xd34] sm:$0xf0]  ;;  %v9894_v48 = vld [vmem:[%s19771_s1 + $0xe28] sm:$0xf]  ;;  %v9639_v57 = vor.u32 %v12563_v8, %v9638_v59 }
 0x275   :  { %7290 = vmatpush.bf16.msrb.mxu0 %v9687_v6  ;;  %v17264_v6 = vpop.f32.mrf.mxu3  ;;  %v7051_v32 = vpop.f32.mrf.mxu1  ;;  %v12659_v56 = vld [vmem:[%s19771_s1 + $0xf34] sm:$0xf0]  ;;  %v9750_v1 = vld [vmem:[%s19771_s1 + $0xd08] sm:$0xf] }
 0x276   :  { %7303 = vmatpush.bf16.msrb.mxu1 %v9815_v14  ;;  %v10038_v14 = vld [vmem:[%s19771_s1 + $0xf48] sm:$0xf]  ;;  %v7064_v32 = vpop.f32.mrf.mxu2 }
 0x277   :  { %7316 = vmatpush.bf16.msrb.mxu2 %v9943_v51  ;;  %v12663_v51 = vld [vmem:[%s19771_s1 + $0xf54] sm:$0xf0]  ;;  %v10006_v21 = vld [vmem:[%s19771_s1 + $0xf08] sm:$0xf] }
 0x278   :  { %7329 = vmatpush.bf16.msrb.mxu3 %v10071_v54  ;;  %v9783_v54 = vor.u32 %v12599_v62, %v9782_v60  ;;  %v10039_v47 = vor.u32 %v12663_v51, %v10038_v14  ;;  %v9622_v60 = vld [vmem:[%s19771_s1 + $0xc08] sm:$0xf]  ;;  %v9767_v62 = vor.u32 %v12595_v40, %v9766_v39 }
 0x279   :  { %7291 = vmatpush.bf16.msrb.mxu0 %v9671_v61  ;;  %v12627_v61 = vld [vmem:[%s19771_s1 + $0xe34] sm:$0xf0]  ;;  %v9878_v14 = vld [vmem:[%s19771_s1 + $0xe08] sm:$0xf] }
 0x27a   :  { %7304 = vmatpush.bf16.msrb.mxu1 %v9799_v50  ;;  %v6998_v50 = vadd.f32 %v17012_v17, %v6985_v2  ;;  %v9895_v15 = vor.u32 %v12627_v61, %v9894_v48  ;;  %v12591_v2 = vld [vmem:[%s19771_s1 + $0xd14] sm:$0xf0]  ;;  %v10374_v59 = vld [vmem:[%s19771_s1 + $0x11e8] sm:$0xf] }
 0x27b   :  { %7317 = vmatpush.bf16.msrb.mxu2 %v9927_v52  ;;  %v10022_v52 = vld [vmem:[%s19771_s1 + $0xf28] sm:$0xf]  ;;  %v12779_v48 = vld [vmem:[%s19771_s1 + $0x12f4] sm:$0xf0] }
 0x27c   :  { %7330 = vmatpush.bf16.msrb.mxu3 %v10055_v55  ;;  %v12559_v55 = vld [vmem:[%s19771_s1 + $0xc14] sm:$0xf0]  ;;  %v7011_v17 = vadd.f32 %v17047_v63, %v6998_v50  ;;  %v10023_v51 = vor.u32 %v12659_v56, %v10022_v52  ;;  %v10502_v40 = vld [vmem:[%s19771_s1 + $0x12e8] sm:$0xf]  ;;  %v9751_v50 = vor.u32 %v12591_v2, %v9750_v1 }
 0x27d   :  { %7292 = vmatpush.bf16.msrb.mxu0 %v9655_v27  ;;  %v12623_v63 = vld [vmem:[%s19771_s1 + $0xe14] sm:$0xf0]  ;;  %v7077_v8 = vpop.f32.mrf.mxu3  ;;  %v9623_v39 = vor.u32 %v12559_v55, %v9622_v60  ;;  %v10630_v56 = vld [vmem:[%s19771_s1 + $0x13e8] sm:$0xf]  ;;  %v10503_v33 = vor.u32 %v12779_v48, %v10502_v40 }
 0x27e   :  { %7305 = vmatpush.bf16.msrb.mxu1 %v9783_v54  ;;  %v12655_v27 = vld [vmem:[%s19771_s1 + $0xf14] sm:$0xf0]  ;;  %v10246_v54 = vld [vmem:[%s19771_s1 + $0x10e8] sm:$0xf]  ;;  %v7024_v61 = vadd.f32 %v17058_v26, %v7011_v17  ;;  %v9879_v52 = vor.u32 %v12623_v63, %v9878_v14 }
 0x27f   :  { %7318 = vmatpush.bf16.msrb.mxu2 %v9911_v58  ;;  %v12715_v58 = vld [vmem:[%s19771_s1 + $0x10f4] sm:$0xf0]  ;;  %v10007_v60 = vor.u32 %v12655_v27, %v10006_v21  ;;  %v10230_v26 = vld [vmem:[%s19771_s1 + $0x10c8] sm:$0xf] }
 0x280   :  { %7331 = vmatpush.bf16.msrb.mxu3 %v10039_v47  ;;  %v12747_v47 = vld [vmem:[%s19771_s1 + $0x11f4] sm:$0xf0]  ;;  %v10247_v55 = vor.u32 %v12715_v58, %v10246_v54  ;;  %v7037_v32 = vadd.f32 %v17208_v0, %v7024_v61  ;;  %v10486_v1 = vld [vmem:[%s19771_s1 + $0x12c8] sm:$0xf] }
 0x281   :  { %7293 = vmatpush.bf16.msrb.mxu0 %v9639_v57  ;;  %v12811_v57 = vld [vmem:[%s19771_s1 + $0x13f4] sm:$0xf0]  ;;  %v10375_v8 = vor.u32 %v12747_v47, %v10374_v59  ;;  %v10614_v14 = vld [vmem:[%s19771_s1 + $0x13c8] sm:$0xf] }
 0x282   :  { %7306 = vmatpush.bf16.msrb.mxu1 %v9767_v62  ;;  %v12711_v17 = vld [vmem:[%s19771_s1 + $0x10d4] sm:$0xf0]  ;;  %v10358_v62 = vld [vmem:[%s19771_s1 + $0x11c8] sm:$0xf]  ;;  %v7050_v21 = vadd.f32 %v17216_v9, %v7037_v32 }
 0x283   :  { %7319 = vmatpush.bf16.msrb.mxu2 %v9895_v15  ;;  %v10631_v15 = vor.u32 %v12811_v57, %v10630_v56  ;;  %v12743_v0 = vld [vmem:[%s19771_s1 + $0x11d4] sm:$0xf0]  ;;  %v10231_v63 = vor.u32 %v12711_v17, %v10230_v26  ;;  %v10214_v58 = vld [vmem:[%s19771_s1 + $0x10a8] sm:$0xf] }
 0x284   :  { %7332 = vmatpush.bf16.msrb.mxu3 %v10023_v51  ;;  %v12775_v2 = vld [vmem:[%s19771_s1 + $0x12d4] sm:$0xf0]  ;;  %v10359_v27 = vor.u32 %v12743_v0, %v10358_v62  ;;  %v10470_v47 = vld [vmem:[%s19771_s1 + $0x12a8] sm:$0xf]  ;;  %v7063_v48 = vadd.f32 %v17251_v4, %v7050_v21 }
 0x285   :  { %7294 = vmatpush.bf16.msrb.mxu0 %v9623_v39  ;;  %v12807_v51 = vld [vmem:[%s19771_s1 + $0x13d4] sm:$0xf0]  ;;  %v10487_v54 = vor.u32 %v12775_v2, %v10486_v1  ;;  %v10342_v39 = vld [vmem:[%s19771_s1 + $0x11a8] sm:$0xf] }
 0x286   :  { %7307 = vmatpush.bf16.msrb.mxu1 %v9751_v50  ;;  %v12707_v59 = vld [vmem:[%s19771_s1 + $0x10b4] sm:$0xf0]  ;;  %v10615_v9 = vor.u32 %v12807_v51, %v10614_v14  ;;  %v10598_v61 = vld [vmem:[%s19771_s1 + $0x13a8] sm:$0xf]  ;;  %v7076_v62 = vadd.f32 %v17264_v6, %v7063_v48  ;;  %v7101_v14 = vpop.f32.mrf.mxu1 }
 0x287   :  { %7320 = vmatpush.bf16.msrb.mxu2 %v9879_v52  ;;  %v12771_v40 = vld [vmem:[%s19771_s1 + $0x12b4] sm:$0xf0]  ;;  %v10215_v52 = vor.u32 %v12707_v59, %v10214_v58  ;;  %v10198_v57 = vld [vmem:[%s19771_s1 + $0x1088] sm:$0xf] }
 0x288   :  { %7333 = vmatpush.bf16.msrb.mxu3 %v10007_v60  ;;  %7295 = vmatmul.bf16.vlgmr.msrb.gmra.mxu0 %v14092_v23  ;;  %v12803_v50 = vld [vmem:[%s19771_s1 + $0x13b4] sm:$0xf0]  ;;  %v10471_v4 = vor.u32 %v12771_v40, %v10470_v47  ;;  %v10454_v26 = vld [vmem:[%s19771_s1 + $0x1288] sm:$0xf] }
 0x289   :  { %7339 = vmatpush.bf16.msra.mxu0 %v10247_v55  ;;  %7308 = vmatmul.bf16.vlgmr.msrb.gmra.mxu1 %v14105_v31  ;;  %v12703_v60 = vld [vmem:[%s19771_s1 + $0x1094] sm:$0xf0]  ;;  %v10326_v55 = vld [vmem:[%s19771_s1 + $0x1188] sm:$0xf]  ;;  %v10599_v32 = vor.u32 %v12803_v50, %v10598_v61 }
 0x28a   :  { %7352 = vmatpush.bf16.msra.mxu1 %v10375_v8  ;;  %7321 = vmatmul.bf16.vlgmr.msrb.gmra.mxu2 %v14103_v28  ;;  %v12735_v8 = vld [vmem:[%s19771_s1 + $0x1194] sm:$0xf0]  ;;  %v10582_v0 = vld [vmem:[%s19771_s1 + $0x1388] sm:$0xf]  ;;  %v10199_v2 = vor.u32 %v12703_v60, %v10198_v57 }
 0x28b   :  { %7365 = vmatpush.bf16.msra.mxu2 %v10503_v33  ;;  %v12739_v33 = vld [vmem:[%s19771_s1 + $0x11b4] sm:$0xf0]  ;;  %7334 = vmatmul.bf16.vlgmr.msrb.gmra.mxu3 %v14113_v35  ;;  %v10182_v6 = vld [vmem:[%s19771_s1 + $0x1068] sm:$0xf] }
 0x28c   :  { %7378 = vmatpush.bf16.msra.mxu3 %v10631_v15  ;;  %v10343_v56 = vor.u32 %v12739_v33, %v10342_v39  ;;  %v12767_v17 = vld [vmem:[%s19771_s1 + $0x1294] sm:$0xf0]  ;;  %v7088_v15 = vpop.f32.mrf.mxu0  ;;  %v10438_v39 = vld [vmem:[%s19771_s1 + $0x1268] sm:$0xf] }
 0x28d   :  { %7340 = vmatpush.bf16.msra.mxu0 %v10231_v63  ;;  %v12799_v1 = vld [vmem:[%s19771_s1 + $0x1394] sm:$0xf0]  ;;  %v7089_v51 = vadd.f32 %v7088_v15, %v7076_v62  ;;  %v10327_v63 = vor.u32 %v12735_v8, %v10326_v55  ;;  %v10455_v21 = vor.u32 %v12767_v17, %v10454_v26  ;;  %v10566_v33 = vld [vmem:[%s19771_s1 + $0x1368] sm:$0xf]  ;;  %v7114_v60 = vpop.f32.mrf.mxu2 }
 0x28e   :  { %7353 = vmatpush.bf16.msra.mxu1 %v10359_v27  ;;  %v12699_v27 = vld [vmem:[%s19771_s1 + $0x1074] sm:$0xf0]  ;;  %v10583_v58 = vor.u32 %v12799_v1, %v10582_v0  ;;  %v7127_v17 = vpop.f32.mrf.mxu3  ;;  %v10550_v62 = vld [vmem:[%s19771_s1 + $0x1348] sm:$0xf] }
 0x28f   :  { %7366 = vmatpush.bf16.msra.mxu2 %v10487_v54  ;;  %v10310_v54 = vld [vmem:[%s19771_s1 + $0x1168] sm:$0xf]  ;;  %v12731_v59 = vld [vmem:[%s19771_s1 + $0x1174] sm:$0xf0]  ;;  %v10183_v40 = vor.u32 %v12699_v27, %v10182_v6  ;;  %v7102_v48 = vadd.f32 %v7101_v14, %v7089_v51 }
 0x290   :  { %7379 = vmatpush.bf16.msra.mxu3 %v10615_v9  ;;  %v12763_v9 = vld [vmem:[%s19771_s1 + $0x1274] sm:$0xf0]  ;;  %v10311_v61 = vor.u32 %v12731_v59, %v10310_v54  ;;  %v10278_v27 = vld [vmem:[%s19771_s1 + $0x1128] sm:$0xf] }
 0x291   :  { %7341 = vmatpush.bf16.msra.mxu0 %v10215_v52  ;;  %v12795_v47 = vld [vmem:[%s19771_s1 + $0x1374] sm:$0xf0]  ;;  %v10439_v50 = vor.u32 %v12763_v9, %v10438_v39  ;;  %v10166_v52 = vld [vmem:[%s19771_s1 + $0x1048] sm:$0xf]  ;;  %v7115_v26 = vadd.f32 %v7114_v60, %v7102_v48 }
 0x292   :  { %7354 = vmatpush.bf16.msra.mxu1 %v10343_v56  ;;  %v12695_v56 = vld [vmem:[%s19771_s1 + $0x1054] sm:$0xf0]  ;;  %v10567_v57 = vor.u32 %v12795_v47, %v10566_v33  ;;  %v10406_v59 = vld [vmem:[%s19771_s1 + $0x1228] sm:$0xf] }
 0x293   :  { %7367 = vmatpush.bf16.msra.mxu2 %v10471_v4  ;;  %v10294_v4 = vld [vmem:[%s19771_s1 + $0x1148] sm:$0xf]  ;;  %v12727_v55 = vld [vmem:[%s19771_s1 + $0x1154] sm:$0xf0]  ;;  %v10167_v1 = vor.u32 %v12695_v56, %v10166_v52  ;;  %v17475_v14 = vadd.f32 %v7127_v17, %v7115_v26 }
 0x294   :  { %7380 = vmatpush.bf16.msra.mxu3 %v10599_v32  ;;  %v10422_v32 = vld [vmem:[%s19771_s1 + $0x1248] sm:$0xf]  ;;  %v12759_v8 = vld [vmem:[%s19771_s1 + $0x1254] sm:$0xf0]  ;;  %v7090_v0 = vpop.f32.mrf.mxu0  ;;  %v10295_v51 = vor.u32 %v12727_v55, %v10294_v4 }
 0x295   :  { %7342 = vmatpush.bf16.msra.mxu0 %v10199_v2  ;;  %v12791_v15 = vld [vmem:[%s19771_s1 + $0x1354] sm:$0xf0]  ;;  %v7103_v2 = vpop.f32.mrf.mxu1  ;;  %v7963_v9 = vpack.c.bf16 %v17475_v14, %v15863_v3  ;;  %v10534_v33 = vld [vmem:[%s19771_s1 + $0x1328] sm:$0xf]  ;;  %v7116_v26 = vpop.f32.mrf.mxu2 }
 0x296   :  { %7355 = vmatpush.bf16.msra.mxu1 %v10327_v63  ;;  %v10423_v63 = vor.u32 %v12759_v8, %v10422_v32  ;;  %v12691_v6 = vld [vmem:[%s19771_s1 + $0x1034] sm:$0xf0]  ;;  %v10551_v54 = vor.u32 %v12791_v15, %v10550_v62  ;;  %v10134_v48 = vld [vmem:[%s19771_s1 + $0x1008] sm:$0xf]  ;;  %v7129_v0 = vpop.f32.mrf.mxu3 }
 0x297   :  { %7368 = vmatpush.bf16.msra.mxu2 %v10455_v21  ;;  %v10150_v21 = vld [vmem:[%s19771_s1 + $0x1028] sm:$0xf]  ;;  %v12755_v39 = vld [vmem:[%s19771_s1 + $0x1234] sm:$0xf0]  ;;  %7965 = vst [vmem:[%s19774_s3] sm:$0xff] %v7963_v9 }
 0x298   :  { %7381 = vmatpush.bf16.msra.mxu3 %v10583_v58  ;;  %v12723_v58 = vld [vmem:[%s19771_s1 + $0x1134] sm:$0xf0]  ;;  %v10407_v52 = vor.u32 %v12755_v39, %v10406_v59  ;;  %v10262_v56 = vld [vmem:[%s19771_s1 + $0x1108] sm:$0xf] }
 0x299   :  { %7343 = vmatpush.bf16.msra.mxu0 %v10183_v40  ;;  %v12787_v47 = vld [vmem:[%s19771_s1 + $0x1334] sm:$0xf0]  ;;  %v10151_v40 = vor.u32 %v12691_v6, %v10150_v21  ;;  %v10518_v32 = vld [vmem:[%s19771_s1 + $0x1308] sm:$0xf] }
 0x29a   :  { %7356 = vmatpush.bf16.msra.mxu1 %v10311_v61  ;;  %v12687_v61 = vld [vmem:[%s19771_s1 + $0x1014] sm:$0xf0]  ;;  %v10535_v60 = vor.u32 %v12787_v47, %v10534_v33  ;;  %v10758_v17 = vld [vmem:[%s19771_s1 + $0x14e8] sm:$0xf] }
 0x29b   :  { %7369 = vmatpush.bf16.msra.mxu2 %v10439_v50  ;;  %v10279_v50 = vor.u32 %v12723_v58, %v10278_v27  ;;  %v12719_v4 = vld [vmem:[%s19771_s1 + $0x1114] sm:$0xf0]  ;;  %v10886_v15 = vld [vmem:[%s19771_s1 + $0x15e8] sm:$0xf] }
 0x29c   :  { %7382 = vmatpush.bf16.msra.mxu3 %v10567_v57  ;;  %v10390_v57 = vld [vmem:[%s19771_s1 + $0x1208] sm:$0xf]  ;;  %v12751_v55 = vld [vmem:[%s19771_s1 + $0x1214] sm:$0xf0]  ;;  %v10263_v21 = vor.u32 %v12719_v4, %v10262_v56 }
 0x29d   :  { %7344 = vmatpush.bf16.msra.mxu0 %v10167_v1  ;;  %v12783_v8 = vld [vmem:[%s19771_s1 + $0x1314] sm:$0xf0]  ;;  %v10135_v1 = vor.u32 %v12687_v61, %v10134_v48  ;;  %v10391_v6 = vor.u32 %v12751_v55, %v10390_v57  ;;  %v11142_v27 = vld [vmem:[%s19771_s1 + $0x17e8] sm:$0xf] }
 0x29e   :  { %7357 = vmatpush.bf16.msra.mxu1 %v10295_v51  ;;  %v12843_v62 = vld [vmem:[%s19771_s1 + $0x14f4] sm:$0xf0]  ;;  %v11014_v51 = vld [vmem:[%s19771_s1 + $0x16e8] sm:$0xf]  ;;  %v10519_v58 = vor.u32 %v12783_v8, %v10518_v32 }
 0x29f   :  { %7370 = vmatpush.bf16.msra.mxu2 %v10423_v63  ;;  %v12875_v2 = vld [vmem:[%s19771_s1 + $0x15f4] sm:$0xf0]  ;;  %v10759_v59 = vor.u32 %v12843_v62, %v10758_v17  ;;  %v10742_v33 = vld [vmem:[%s19771_s1 + $0x14c8] sm:$0xf] }
 0x2a0   :  { %7383 = vmatpush.bf16.msra.mxu3 %v10551_v54  ;;  %v12907_v63 = vld [vmem:[%s19771_s1 + $0x16f4] sm:$0xf0]  ;;  %v10887_v39 = vor.u32 %v12875_v2, %v10886_v15  ;;  %v11126_v56 = vld [vmem:[%s19771_s1 + $0x17c8] sm:$0xf] }
 0x2a1   :  { %7345 = vmatpush.bf16.msra.mxu0 %v10151_v40  ;;  %v12939_v54 = vld [vmem:[%s19771_s1 + $0x17f4] sm:$0xf0]  ;;  %v11015_v9 = vor.u32 %v12907_v63, %v11014_v51  ;;  %v10870_v40 = vld [vmem:[%s19771_s1 + $0x15c8] sm:$0xf] }
 0x2a2   :  { %7358 = vmatpush.bf16.msra.mxu1 %v10279_v50  ;;  %v12839_v47 = vld [vmem:[%s19771_s1 + $0x14d4] sm:$0xf0]  ;;  %v11143_v48 = vor.u32 %v12939_v54, %v11142_v27  ;;  %v10998_v50 = vld [vmem:[%s19771_s1 + $0x16c8] sm:$0xf] }
 0x2a3   :  { %7371 = vmatpush.bf16.msra.mxu2 %v10407_v52  ;;  %v12871_v61 = vld [vmem:[%s19771_s1 + $0x15d4] sm:$0xf0]  ;;  %v10743_v57 = vor.u32 %v12839_v47, %v10742_v33  ;;  %v10726_v32 = vld [vmem:[%s19771_s1 + $0x14a8] sm:$0xf] }
 0x2a4   :  { %7384 = vmatpush.bf16.msra.mxu3 %v10535_v60  ;;  %v12903_v52 = vld [vmem:[%s19771_s1 + $0x16d4] sm:$0xf0]  ;;  %v10871_v60 = vor.u32 %v12871_v61, %v10870_v40  ;;  %v10854_v26 = vld [vmem:[%s19771_s1 + $0x15a8] sm:$0xf] }
 0x2a5   :  { %7346 = vmatpush.bf16.msra.mxu0 %v10135_v1  ;;  %v12935_v4 = vld [vmem:[%s19771_s1 + $0x17d4] sm:$0xf0]  ;;  %v10999_v55 = vor.u32 %v12903_v52, %v10998_v50  ;;  %v10982_v15 = vld [vmem:[%s19771_s1 + $0x16a8] sm:$0xf]  ;;  %v7140_v50 = vpop.f32.mrf.mxu0 }
 0x2a6   :  { %7359 = vmatpush.bf16.msra.mxu1 %v10263_v21  ;;  %v12835_v8 = vld [vmem:[%s19771_s1 + $0x14b4] sm:$0xf0]  ;;  %v11127_v17 = vor.u32 %v12935_v4, %v11126_v56  ;;  %v11110_v1 = vld [vmem:[%s19771_s1 + $0x17a8] sm:$0xf] }
 0x2a7   :  { %7372 = vmatpush.bf16.msra.mxu2 %v10391_v6  ;;  %v12867_v62 = vld [vmem:[%s19771_s1 + $0x15b4] sm:$0xf0]  ;;  %v10727_v51 = vor.u32 %v12835_v8, %v10726_v32  ;;  %v10710_v63 = vld [vmem:[%s19771_s1 + $0x1488] sm:$0xf]  ;;  %v7153_v32 = vpop.f32.mrf.mxu1 }
 0x2a8   :  { %7385 = vmatpush.bf16.msra.mxu3 %v10519_v58  ;;  %7347 = vmatmul.bf16.vlgmr.msra.gmra.mxu0 %v14302_v37  ;;  %v12899_v0 = vld [vmem:[%s19771_s1 + $0x16b4] sm:$0xf0]  ;;  %v10855_v21 = vor.u32 %v12867_v62, %v10854_v26  ;;  %v10838_v54 = vld [vmem:[%s19771_s1 + $0x1588] sm:$0xf]  ;;  %v13198_v58 = vld [vmem:[%s19773_s2] sm:$0xf] }
 0x2a9   :  { %7391 = vmatpush.bf16.msrb.mxu0 %v10759_v59  ;;  %7360 = vmatmul.bf16.vlgmr.msra.gmra.mxu1 %v14315_v46  ;;  %v12931_v2 = vld [vmem:[%s19771_s1 + $0x17b4] sm:$0xf0]  ;;  %v10983_v6 = vor.u32 %v12899_v0, %v10982_v15  ;;  %v1061_v59 = vperm.slane %v13198_v58, 2  ;;  %v10966_v33 = vld [vmem:[%s19771_s1 + $0x1688] sm:$0xf] }
 0x2aa   :  { %7404 = vmatpush.bf16.msrb.mxu1 %v10887_v39  ;;  %7373 = vmatmul.bf16.vlgmr.msra.gmra.mxu2 %v14313_v45  ;;  %v12831_v27 = vld [vmem:[%s19771_s1 + $0x1494] sm:$0xf0]  ;;  %v11111_v39 = vor.u32 %v12931_v2, %v11110_v1  ;;  %v11094_v40 = vld [vmem:[%s19771_s1 + $0x1788] sm:$0xf] }
 0x2ab   :  { %7417 = vmatpush.bf16.msrb.mxu2 %v11015_v9  ;;  %7386 = vmatmul.bf16.vlgmr.msra.gmra.mxu3 %v14323_v49  ;;  %v12863_v9 = vld [vmem:[%s19771_s1 + $0x1594] sm:$0xf0]  ;;  %v10711_v61 = vor.u32 %v12831_v27, %v10710_v63  ;;  %v10694_v4 = vld [vmem:[%s19771_s1 + $0x1468] sm:$0xf] }
 0x2ac   :  { %7430 = vmatpush.bf16.msrb.mxu3 %v11143_v48  ;;  %v12895_v47 = vld [vmem:[%s19771_s1 + $0x1694] sm:$0xf0]  ;;  %v10839_v52 = vor.u32 %v12863_v9, %v10838_v54  ;;  %v11078_v15 = vld [vmem:[%s19771_s1 + $0x1768] sm:$0xf] }
 0x2ad   :  { %7392 = vmatpush.bf16.msrb.mxu0 %v10743_v57  ;;  %v12927_v48 = vld [vmem:[%s19771_s1 + $0x1794] sm:$0xf0]  ;;  %v10967_v56 = vor.u32 %v12895_v47, %v10966_v33  ;;  %v10806_v27 = vld [vmem:[%s19771_s1 + $0x1548] sm:$0xf]  ;;  %v7166_v54 = vpop.f32.mrf.mxu2 }
 0x2ae   :  { %7405 = vmatpush.bf16.msrb.mxu1 %v10871_v60  ;;  %v12827_v57 = vld [vmem:[%s19771_s1 + $0x1474] sm:$0xf0]  ;;  %v10822_v60 = vld [vmem:[%s19771_s1 + $0x1568] sm:$0xf]  ;;  %v11095_v8 = vor.u32 %v12927_v48, %v11094_v40  ;;  %v7179_v47 = vpop.f32.mrf.mxu3 }
 0x2af   :  { %7418 = vmatpush.bf16.msrb.mxu2 %v10999_v55  ;;  %v7141_v55 = vadd.f32 %v7140_v50, %v1061_v59  ;;  %v12859_v26 = vld [vmem:[%s19771_s1 + $0x1574] sm:$0xf0]  ;;  %v10695_v2 = vor.u32 %v12827_v57, %v10694_v4  ;;  %v11062_v40 = vld [vmem:[%s19771_s1 + $0x1748] sm:$0xf] }
 0x2b0   :  { %7431 = vmatpush.bf16.msrb.mxu3 %v11127_v17  ;;  %v10950_v17 = vld [vmem:[%s19771_s1 + $0x1668] sm:$0xf]  ;;  %v12891_v62 = vld [vmem:[%s19771_s1 + $0x1674] sm:$0xf0] }
 0x2b1   :  { %7393 = vmatpush.bf16.msrb.mxu0 %v10727_v51  ;;  %v12923_v0 = vld [vmem:[%s19771_s1 + $0x1774] sm:$0xf0]  ;;  %v7154_v1 = vadd.f32 %v7153_v32, %v7141_v55  ;;  %v10823_v51 = vor.u32 %v12859_v26, %v10822_v60  ;;  %v10951_v63 = vor.u32 %v12891_v62, %v10950_v17  ;;  %v10662_v57 = vld [vmem:[%s19771_s1 + $0x1428] sm:$0xf]  ;;  %v7155_v32 = vpop.f32.mrf.mxu1 }
 0x2b2   :  { %7406 = vmatpush.bf16.msrb.mxu1 %v10855_v21  ;;  %v10678_v21 = vld [vmem:[%s19771_s1 + $0x1448] sm:$0xf]  ;;  %v11079_v58 = vor.u32 %v12923_v0, %v11078_v15  ;;  %v12855_v59 = vld [vmem:[%s19771_s1 + $0x1554] sm:$0xf0] }
 0x2b3   :  { %7419 = vmatpush.bf16.msrb.mxu2 %v10983_v6  ;;  %v12823_v6 = vld [vmem:[%s19771_s1 + $0x1454] sm:$0xf0]  ;;  %v7167_v33 = vadd.f32 %v7166_v54, %v7154_v1  ;;  %v10790_v55 = vld [vmem:[%s19771_s1 + $0x1528] sm:$0xf] }
 0x2b4   :  { %7432 = vmatpush.bf16.msrb.mxu3 %v11111_v39  ;;  %v10934_v39 = vld [vmem:[%s19771_s1 + $0x1648] sm:$0xf]  ;;  %v12887_v9 = vld [vmem:[%s19771_s1 + $0x1654] sm:$0xf0] }
 0x2b5   :  { %7394 = vmatpush.bf16.msrb.mxu0 %v10711_v61  ;;  %v12919_v48 = vld [vmem:[%s19771_s1 + $0x1754] sm:$0xf0]  ;;  %v10679_v61 = vor.u32 %v12823_v6, %v10678_v21  ;;  %v17681_v50 = vadd.f32 %v7179_v47, %v7167_v33  ;;  %v10935_v4 = vor.u32 %v12887_v9, %v10934_v39  ;;  %v10918_v17 = vld [vmem:[%s19771_s1 + $0x1628] sm:$0xf] }
 0x2b6   :  { %7407 = vmatpush.bf16.msrb.mxu1 %v10839_v52  ;;  %v7142_v52 = vpop.f32.mrf.mxu0  ;;  %v12819_v60 = vld [vmem:[%s19771_s1 + $0x1434] sm:$0xf0]  ;;  %v11046_v15 = vld [vmem:[%s19771_s1 + $0x1728] sm:$0xf]  ;;  %v7181_v47 = vpop.f32.mrf.mxu3 }
 0x2b7   :  { %7420 = vmatpush.bf16.msrb.mxu2 %v10967_v56  ;;  %v10807_v56 = vor.u32 %v12855_v59, %v10806_v27  ;;  %v12851_v26 = vld [vmem:[%s19771_s1 + $0x1534] sm:$0xf0]  ;;  %v10663_v1 = vor.u32 %v12819_v60, %v10662_v57  ;;  %v10774_v6 = vld [vmem:[%s19771_s1 + $0x1508] sm:$0xf] }
 0x2b8   :  { %7433 = vmatpush.bf16.msrb.mxu3 %v11095_v8  ;;  %v11063_v8 = vor.u32 %v12919_v48, %v11062_v40  ;;  %v12883_v62 = vld [vmem:[%s19771_s1 + $0x1634] sm:$0xf0]  ;;  %v10902_v54 = vld [vmem:[%s19771_s1 + $0x1608] sm:$0xf] }
 0x2b9   :  { %7395 = vmatpush.bf16.msrb.mxu0 %v10695_v2  ;;  %v12915_v0 = vld [vmem:[%s19771_s1 + $0x1734] sm:$0xf0]  ;;  %v10646_v2 = vld [vmem:[%s19771_s1 + $0x1408] sm:$0xf]  ;;  %v10919_v21 = vor.u32 %v12883_v62, %v10918_v17 }
 0x2ba   :  { %7408 = vmatpush.bf16.msrb.mxu1 %v10823_v51  ;;  %v12815_v51 = vld [vmem:[%s19771_s1 + $0x1414] sm:$0xf0]  ;;  %v11047_v59 = vor.u32 %v12915_v0, %v11046_v15  ;;  %v11030_v9 = vld [vmem:[%s19771_s1 + $0x1708] sm:$0xf] }
 0x2bb   :  { %7421 = vmatpush.bf16.msrb.mxu2 %v10951_v63  ;;  %v10791_v63 = vor.u32 %v12851_v26, %v10790_v55  ;;  %v12847_v27 = vld [vmem:[%s19771_s1 + $0x1514] sm:$0xf0]  ;;  %v11270_v40 = vld [vmem:[%s19771_s1 + $0x18e8] sm:$0xf]  ;;  %v10647_v52 = vor.u32 %v12815_v51, %v10646_v2 }
 0x2bc   :  { %7434 = vmatpush.bf16.msrb.mxu3 %v11079_v58  ;;  %v7168_v58 = vpop.f32.mrf.mxu2  ;;  %v12879_v39 = vld [vmem:[%s19771_s1 + $0x1614] sm:$0xf0]  ;;  %v10775_v60 = vor.u32 %v12847_v27, %v10774_v6  ;;  %v11654_v32 = vld [vmem:[%s19771_s1 + $0x1be8] sm:$0xf] }
 0x2bd   :  { %7396 = vmatpush.bf16.msrb.mxu0 %v10679_v61  ;;  %v12911_v33 = vld [vmem:[%s19771_s1 + $0x1714] sm:$0xf0]  ;;  %v11398_v61 = vld [vmem:[%s19771_s1 + $0x19e8] sm:$0xf]  ;;  %v10903_v55 = vor.u32 %v12879_v39, %v10902_v54 }
 0x2be   :  { %7409 = vmatpush.bf16.msrb.mxu1 %v10807_v56  ;;  %v12971_v48 = vld [vmem:[%s19771_s1 + $0x18f4] sm:$0xf0]  ;;  %v11031_v26 = vor.u32 %v12911_v33, %v11030_v9  ;;  %v11254_v0 = vld [vmem:[%s19771_s1 + $0x18c8] sm:$0xf] }
 0x2bf   :  { %7422 = vmatpush.bf16.msrb.mxu2 %v10935_v4  ;;  %v13003_v56 = vld [vmem:[%s19771_s1 + $0x19f4] sm:$0xf0]  ;;  %v11526_v4 = vld [vmem:[%s19771_s1 + $0x1ae8] sm:$0xf]  ;;  %v11271_v17 = vor.u32 %v12971_v48, %v11270_v40 }
 0x2c0   :  { %7435 = vmatpush.bf16.msrb.mxu3 %v11063_v8  ;;  %v13035_v57 = vld [vmem:[%s19771_s1 + $0x1af4] sm:$0xf0]  ;;  %v11399_v62 = vor.u32 %v13003_v56, %v11398_v61  ;;  %v11382_v2 = vld [vmem:[%s19771_s1 + $0x19c8] sm:$0xf] }
 0x2c1   :  { %7397 = vmatpush.bf16.msrb.mxu0 %v10663_v1  ;;  %v13067_v8 = vld [vmem:[%s19771_s1 + $0x1bf4] sm:$0xf0]  ;;  %v11527_v15 = vor.u32 %v13035_v57, %v11526_v4  ;;  %v11638_v27 = vld [vmem:[%s19771_s1 + $0x1bc8] sm:$0xf] }
 0x2c2   :  { %7410 = vmatpush.bf16.msrb.mxu1 %v10791_v63  ;;  %v12967_v1 = vld [vmem:[%s19771_s1 + $0x18d4] sm:$0xf0]  ;;  %v11655_v51 = vor.u32 %v13067_v8, %v11654_v32  ;;  %v11238_v9 = vld [vmem:[%s19771_s1 + $0x18a8] sm:$0xf] }
 0x2c3   :  { %7423 = vmatpush.bf16.msrb.mxu2 %v10919_v21  ;;  %v12999_v63 = vld [vmem:[%s19771_s1 + $0x19d4] sm:$0xf0]  ;;  %v11510_v21 = vld [vmem:[%s19771_s1 + $0x1ac8] sm:$0xf]  ;;  %v11255_v58 = vor.u32 %v12967_v1, %v11254_v0 }
 0x2c4   :  { %7436 = vmatpush.bf16.msrb.mxu3 %v11047_v59  ;;  %v13031_v6 = vld [vmem:[%s19771_s1 + $0x1ad4] sm:$0xf0]  ;;  %v11383_v59 = vor.u32 %v12999_v63, %v11382_v2  ;;  %v11366_v47 = vld [vmem:[%s19771_s1 + $0x19a8] sm:$0xf] }
 0x2c5   :  { %7398 = vmatpush.bf16.msrb.mxu0 %v10647_v52  ;;  %v13063_v54 = vld [vmem:[%s19771_s1 + $0x1bd4] sm:$0xf0]  ;;  %v11511_v39 = vor.u32 %v13031_v6, %v11510_v21  ;;  %v11494_v61 = vld [vmem:[%s19771_s1 + $0x1aa8] sm:$0xf]  ;;  %v7192_v63 = vpop.f32.mrf.mxu0 }
 0x2c6   :  { %7411 = vmatpush.bf16.msrb.mxu1 %v10775_v60  ;;  %v12963_v33 = vld [vmem:[%s19771_s1 + $0x18b4] sm:$0xf0]  ;;  %v11639_v40 = vor.u32 %v13063_v54, %v11638_v27  ;;  %v11622_v56 = vld [vmem:[%s19771_s1 + $0x1ba8] sm:$0xf] }
 0x2c7   :  { %7424 = vmatpush.bf16.msrb.mxu2 %v10903_v55  ;;  %v12995_v48 = vld [vmem:[%s19771_s1 + $0x19b4] sm:$0xf0]  ;;  %v11239_v57 = vor.u32 %v12963_v33, %v11238_v9  ;;  %v11222_v32 = vld [vmem:[%s19771_s1 + $0x1888] sm:$0xf] }
 0x2c8   :  { %7437 = vmatpush.bf16.msrb.mxu3 %v11031_v26  ;;  %7399 = vmatmul.bf16.vlgmr.msrb.gmra.mxu0 %v14517_v7  ;;  %v13027_v52 = vld [vmem:[%s19771_s1 + $0x1ab4] sm:$0xf0]  ;;  %v11367_v60 = vor.u32 %v12995_v48, %v11366_v47  ;;  %v11350_v26 = vld [vmem:[%s19771_s1 + $0x1988] sm:$0xf] }
 0x2c9   :  { %7443 = vmatpush.bf16.msra.mxu0 %v11271_v17  ;;  %7412 = vmatmul.bf16.vlgmr.msrb.gmra.mxu1 %v14530_v12  ;;  %v13059_v4 = vld [vmem:[%s19771_s1 + $0x1bb4] sm:$0xf0]  ;;  %v11495_v55 = vor.u32 %v13027_v52, %v11494_v61  ;;  %v11606_v1 = vld [vmem:[%s19771_s1 + $0x1b88] sm:$0xf] }
 0x2ca   :  { %7456 = vmatpush.bf16.msra.mxu1 %v11399_v62  ;;  %7425 = vmatmul.bf16.vlgmr.msrb.gmra.mxu2 %v14528_v11  ;;  %v12959_v8 = vld [vmem:[%s19771_s1 + $0x1894] sm:$0xf0]  ;;  %v11623_v17 = vor.u32 %v13059_v4, %v11622_v56  ;;  %v11206_v27 = vld [vmem:[%s19771_s1 + $0x1868] sm:$0xf] }
 0x2cb   :  { %7469 = vmatpush.bf16.msra.mxu2 %v11527_v15  ;;  %7438 = vmatmul.bf16.vlgmr.msrb.gmra.mxu3 %v14538_v16  ;;  %v12991_v62 = vld [vmem:[%s19771_s1 + $0x1994] sm:$0xf0]  ;;  %v11478_v15 = vld [vmem:[%s19771_s1 + $0x1a88] sm:$0xf] }
 0x2cc   :  { %7482 = vmatpush.bf16.msra.mxu3 %v11655_v51  ;;  %v13023_v0 = vld [vmem:[%s19771_s1 + $0x1a94] sm:$0xf0]  ;;  %v11223_v51 = vor.u32 %v12959_v8, %v11222_v32  ;;  %v11351_v21 = vor.u32 %v12991_v62, %v11350_v26  ;;  %v11462_v47 = vld [vmem:[%s19771_s1 + $0x1a68] sm:$0xf] }
 0x2cd   :  { %7444 = vmatpush.bf16.msra.mxu0 %v11255_v58  ;;  %v13055_v2 = vld [vmem:[%s19771_s1 + $0x1b94] sm:$0xf0]  ;;  %v11479_v6 = vor.u32 %v13023_v0, %v11478_v15  ;;  %v11334_v58 = vld [vmem:[%s19771_s1 + $0x1968] sm:$0xf]  ;;  %v7218_v32 = vpop.f32.mrf.mxu2 }
 0x2ce   :  { %7457 = vmatpush.bf16.msra.mxu1 %v11383_v59  ;;  %v12955_v54 = vld [vmem:[%s19771_s1 + $0x1874] sm:$0xf0]  ;;  %v7193_v59 = vadd.f32 %v7192_v63, %v17681_v50  ;;  %v11607_v9 = vor.u32 %v13055_v2, %v11606_v1  ;;  %v11590_v48 = vld [vmem:[%s19771_s1 + $0x1b68] sm:$0xf]  ;;  %v7231_v0 = vpop.f32.mrf.mxu3 }
 0x2cf   :  { %7470 = vmatpush.bf16.msra.mxu2 %v11511_v39  ;;  %v7205_v39 = vpop.f32.mrf.mxu1  ;;  %v12987_v33 = vld [vmem:[%s19771_s1 + $0x1974] sm:$0xf0]  ;;  %v11207_v52 = vor.u32 %v12955_v54, %v11206_v27  ;;  %v11574_v1 = vld [vmem:[%s19771_s1 + $0x1b48] sm:$0xf] }
 0x2d0   :  { %7483 = vmatpush.bf16.msra.mxu3 %v11639_v40  ;;  %v13019_v40 = vld [vmem:[%s19771_s1 + $0x1a74] sm:$0xf0]  ;;  %v7206_v61 = vadd.f32 %v7205_v39, %v7193_v59  ;;  %v11335_v56 = vor.u32 %v12987_v33, %v11334_v58  ;;  %v11174_v54 = vld [vmem:[%s19771_s1 + $0x1828] sm:$0xf] }
 0x2d1   :  { %7445 = vmatpush.bf16.msra.mxu0 %v11239_v57  ;;  %v13051_v50 = vld [vmem:[%s19771_s1 + $0x1b74] sm:$0xf0]  ;;  %v11463_v4 = vor.u32 %v13019_v40, %v11462_v47  ;;  %v11190_v57 = vld [vmem:[%s19771_s1 + $0x1848] sm:$0xf] }
 0x2d2   :  { %7458 = vmatpush.bf16.msra.mxu1 %v11367_v60  ;;  %v12951_v60 = vld [vmem:[%s19771_s1 + $0x1854] sm:$0xf0]  ;;  %v11591_v8 = vor.u32 %v13051_v50, %v11590_v48  ;;  %v7219_v15 = vadd.f32 %v7218_v32, %v7206_v61  ;;  %v11302_v59 = vld [vmem:[%s19771_s1 + $0x1928] sm:$0xf] }
 0x2d3   :  { %7471 = vmatpush.bf16.msra.mxu2 %v11495_v55  ;;  %v11318_v55 = vld [vmem:[%s19771_s1 + $0x1948] sm:$0xf]  ;;  %v12983_v26 = vld [vmem:[%s19771_s1 + $0x1954] sm:$0xf0] }
 0x2d4   :  { %7484 = vmatpush.bf16.msra.mxu3 %v11623_v17  ;;  %v11446_v17 = vld [vmem:[%s19771_s1 + $0x1a48] sm:$0xf]  ;;  %v13015_v62 = vld [vmem:[%s19771_s1 + $0x1a54] sm:$0xf0]  ;;  %v17880_v63 = vadd.f32 %v7231_v0, %v7219_v15 }
 0x2d5   :  { %7446 = vmatpush.bf16.msra.mxu0 %v11223_v51  ;;  %v13047_v2 = vld [vmem:[%s19771_s1 + $0x1b54] sm:$0xf0]  ;;  %v11191_v51 = vor.u32 %v12951_v60, %v11190_v57  ;;  %v11447_v27 = vor.u32 %v13015_v62, %v11446_v17  ;;  %v11430_v47 = vld [vmem:[%s19771_s1 + $0x1a28] sm:$0xf] }
 0x2d6   :  { %7459 = vmatpush.bf16.msra.mxu1 %v11351_v21  ;;  %v7194_v21 = vpop.f32.mrf.mxu0  ;;  %v12947_v58 = vld [vmem:[%s19771_s1 + $0x1834] sm:$0xf0]  ;;  %v11558_v48 = vld [vmem:[%s19771_s1 + $0x1b28] sm:$0xf]  ;;  %v7233_v0 = vpop.f32.mrf.mxu3 }
 0x2d7   :  { %7472 = vmatpush.bf16.msra.mxu2 %v11479_v6  ;;  %v11319_v6 = vor.u32 %v12983_v26, %v11318_v55  ;;  %v7207_v39 = vpop.f32.mrf.mxu1  ;;  %v12979_v33 = vld [vmem:[%s19771_s1 + $0x1934] sm:$0xf0]  ;;  %v11175_v61 = vor.u32 %v12947_v58, %v11174_v54  ;;  %v11286_v60 = vld [vmem:[%s19771_s1 + $0x1908] sm:$0xf] }
 0x2d8   :  { %7485 = vmatpush.bf16.msra.mxu3 %v11607_v9  ;;  %v11575_v9 = vor.u32 %v13047_v2, %v11574_v1  ;;  %v13011_v40 = vld [vmem:[%s19771_s1 + $0x1a34] sm:$0xf0]  ;;  %v11414_v32 = vld [vmem:[%s19771_s1 + $0x1a08] sm:$0xf] }
 0x2d9   :  { %7447 = vmatpush.bf16.msra.mxu0 %v11207_v52  ;;  %v13043_v50 = vld [vmem:[%s19771_s1 + $0x1b34] sm:$0xf0]  ;;  %v11158_v52 = vld [vmem:[%s19771_s1 + $0x1808] sm:$0xf]  ;;  %v11431_v57 = vor.u32 %v13011_v40, %v11430_v47 }
 0x2da   :  { %7460 = vmatpush.bf16.msra.mxu1 %v11335_v56  ;;  %v12943_v56 = vld [vmem:[%s19771_s1 + $0x1814] sm:$0xf0]  ;;  %v11559_v26 = vor.u32 %v13043_v50, %v11558_v48  ;;  %v11542_v62 = vld [vmem:[%s19771_s1 + $0x1b08] sm:$0xf] }
 0x2db   :  { %7473 = vmatpush.bf16.msra.mxu2 %v11463_v4  ;;  %v11303_v4 = vor.u32 %v12979_v33, %v11302_v59  ;;  %v12975_v55 = vld [vmem:[%s19771_s1 + $0x1914] sm:$0xf0]  ;;  %v11782_v1 = vld [vmem:[%s19771_s1 + $0x1ce8] sm:$0xf]  ;;  %v11159_v21 = vor.u32 %v12943_v56, %v11158_v52 }
 0x2dc   :  { %7486 = vmatpush.bf16.msra.mxu3 %v11591_v8  ;;  %v7220_v8 = vpop.f32.mrf.mxu2  ;;  %v13007_v17 = vld [vmem:[%s19771_s1 + $0x1a14] sm:$0xf0]  ;;  %v11287_v58 = vor.u32 %v12975_v55, %v11286_v60  ;;  %v12166_v39 = vld [vmem:[%s19771_s1 + $0x1fe8] sm:$0xf] }
 0x2dd   :  { %7448 = vmatpush.bf16.msra.mxu0 %v11191_v51  ;;  %v13039_v15 = vld [vmem:[%s19771_s1 + $0x1b14] sm:$0xf0]  ;;  %v11910_v51 = vld [vmem:[%s19771_s1 + $0x1de8] sm:$0xf]  ;;  %v11415_v59 = vor.u32 %v13007_v17, %v11414_v32 }
 0x2de   :  { %7461 = vmatpush.bf16.msra.mxu1 %v11319_v6  ;;  %v13099_v2 = vld [vmem:[%s19771_s1 + $0x1cf4] sm:$0xf0]  ;;  %v11543_v33 = vor.u32 %v13039_v15, %v11542_v62  ;;  %v11766_v50 = vld [vmem:[%s19771_s1 + $0x1cc8] sm:$0xf] }
 0x2df   :  { %7474 = vmatpush.bf16.msra.mxu2 %v11447_v27  ;;  %v13131_v6 = vld [vmem:[%s19771_s1 + $0x1df4] sm:$0xf0]  ;;  %v12038_v27 = vld [vmem:[%s19771_s1 + $0x1ee8] sm:$0xf]  ;;  %v11783_v47 = vor.u32 %v13099_v2, %v11782_v1 }
 0x2e0   :  { %7487 = vmatpush.bf16.msra.mxu3 %v11575_v9  ;;  %v13163_v54 = vld [vmem:[%s19771_s1 + $0x1ef4] sm:$0xf0]  ;;  %v11911_v40 = vor.u32 %v13131_v6, %v11910_v51  ;;  %v11894_v52 = vld [vmem:[%s19771_s1 + $0x1dc8] sm:$0xf] }
 0x2e1   :  { %7449 = vmatpush.bf16.msra.mxu0 %v11175_v61  ;;  %v13195_v9 = vld [vmem:[%s19771_s1 + $0x1ff4] sm:$0xf0]  ;;  %v12039_v48 = vor.u32 %v13163_v54, %v12038_v27  ;;  %v12150_v55 = vld [vmem:[%s19771_s1 + $0x1fc8] sm:$0xf] }
 0x2e2   :  { %7462 = vmatpush.bf16.msra.mxu1 %v11303_v4  ;;  %v13095_v61 = vld [vmem:[%s19771_s1 + $0x1cd4] sm:$0xf0]  ;;  %v12167_v56 = vor.u32 %v13195_v9, %v12166_v39  ;;  %v11750_v62 = vld [vmem:[%s19771_s1 + $0x1ca8] sm:$0xf] }
 0x2e3   :  { %7475 = vmatpush.bf16.msra.mxu2 %v11431_v57  ;;  %v13127_v4 = vld [vmem:[%s19771_s1 + $0x1dd4] sm:$0xf0]  ;;  %v12022_v57 = vld [vmem:[%s19771_s1 + $0x1ec8] sm:$0xf]  ;;  %v11767_v8 = vor.u32 %v13095_v61, %v11766_v50 }
 0x2e4   :  { %7488 = vmatpush.bf16.msra.mxu3 %v11559_v26  ;;  %v13159_v60 = vld [vmem:[%s19771_s1 + $0x1ed4] sm:$0xf0]  ;;  %v11895_v26 = vor.u32 %v13127_v4, %v11894_v52  ;;  %v11878_v0 = vld [vmem:[%s19771_s1 + $0x1da8] sm:$0xf] }
 0x2e5   :  { %7450 = vmatpush.bf16.msra.mxu0 %v11159_v21  ;;  %v13191_v32 = vld [vmem:[%s19771_s1 + $0x1fd4] sm:$0xf0]  ;;  %v12023_v17 = vor.u32 %v13159_v60, %v12022_v57  ;;  %v12006_v51 = vld [vmem:[%s19771_s1 + $0x1ea8] sm:$0xf]  ;;  %v7244_v61 = vpop.f32.mrf.mxu0 }
 0x2e6   :  { %7463 = vmatpush.bf16.msra.mxu1 %v11287_v58  ;;  %v13091_v15 = vld [vmem:[%s19771_s1 + $0x1cb4] sm:$0xf0]  ;;  %v12151_v1 = vor.u32 %v13191_v32, %v12150_v55  ;;  %v12134_v6 = vld [vmem:[%s19771_s1 + $0x1fa8] sm:$0xf]  ;;  %v7245_v4 = vadd.f32 %v7244_v61, %v17880_v63  ;;  %v7257_v60 = vpop.f32.mrf.mxu1 }
 0x2e7   :  { %7476 = vmatpush.bf16.msra.mxu2 %v11415_v59  ;;  %v13123_v2 = vld [vmem:[%s19771_s1 + $0x1db4] sm:$0xf0]  ;;  %v11751_v54 = vor.u32 %v13091_v15, %v11750_v62  ;;  %v11734_v39 = vld [vmem:[%s19771_s1 + $0x1c88] sm:$0xf] }
 0x2e8   :  { %7489 = vmatpush.bf16.msra.mxu3 %v11543_v33  ;;  %7451 = vmatmul.bf16.vlgmr.msra.gmra.mxu0 %v14730_v5  ;;  %v13155_v21 = vld [vmem:[%s19771_s1 + $0x1eb4] sm:$0xf0]  ;;  %v11879_v58 = vor.u32 %v13123_v2, %v11878_v0  ;;  %v11862_v33 = vld [vmem:[%s19771_s1 + $0x1d88] sm:$0xf]  ;;  %v7258_v62 = vadd.f32 %v7257_v60, %v7245_v4 }
 0x2e9   :  { %7495 = vmatpush.bf16.msrb.mxu0 %v11783_v47  ;;  %7464 = vmatmul.bf16.vlgmr.msra.gmra.mxu1 %v14743_v13  ;;  %v13187_v27 = vld [vmem:[%s19771_s1 + $0x1fb4] sm:$0xf0]  ;;  %v12007_v59 = vor.u32 %v13155_v21, %v12006_v51  ;;  %v12118_v52 = vld [vmem:[%s19771_s1 + $0x1f88] sm:$0xf] }
 0x2ea   :  { %7508 = vmatpush.bf16.msrb.mxu1 %v11911_v40  ;;  %7477 = vmatmul.bf16.vlgmr.msra.gmra.mxu2 %v14741_v10  ;;  %v13087_v9 = vld [vmem:[%s19771_s1 + $0x1c94] sm:$0xf0]  ;;  %v12135_v47 = vor.u32 %v13187_v27, %v12134_v6  ;;  %v11974_v0 = vld [vmem:[%s19771_s1 + $0x1e68] sm:$0xf] }
 0x2eb   :  { %7521 = vmatpush.bf16.msrb.mxu2 %v12039_v48  ;;  %7490 = vmatmul.bf16.vlgmr.msra.gmra.mxu3 %v14751_v53  ;;  %v13119_v40 = vld [vmem:[%s19771_s1 + $0x1d94] sm:$0xf0]  ;;  %v11990_v48 = vld [vmem:[%s19771_s1 + $0x1e88] sm:$0xf]  ;;  %v11735_v57 = vor.u32 %v13087_v9, %v11734_v39 }
 0x2ec   :  { %7534 = vmatpush.bf16.msrb.mxu3 %v12167_v56  ;;  %v13151_v50 = vld [vmem:[%s19771_s1 + $0x1e94] sm:$0xf0]  ;;  %v11863_v55 = vor.u32 %v13119_v40, %v11862_v33  ;;  %v12102_v2 = vld [vmem:[%s19771_s1 + $0x1f68] sm:$0xf] }
 0x2ed   :  { %7496 = vmatpush.bf16.msrb.mxu0 %v11767_v8  ;;  %v13183_v56 = vld [vmem:[%s19771_s1 + $0x1f94] sm:$0xf0]  ;;  %v11991_v32 = vor.u32 %v13151_v50, %v11990_v48  ;;  %v11718_v8 = vld [vmem:[%s19771_s1 + $0x1c68] sm:$0xf]  ;;  %v7270_v9 = vpop.f32.mrf.mxu2 }
 0x2ee   :  { %7509 = vmatpush.bf16.msrb.mxu1 %v11895_v26  ;;  %v13083_v26 = vld [vmem:[%s19771_s1 + $0x1c74] sm:$0xf0]  ;;  %v12119_v63 = vor.u32 %v13183_v56, %v12118_v52  ;;  %v7271_v48 = vadd.f32 %v7270_v9, %v7258_v62  ;;  %v7283_v50 = vpop.f32.mrf.mxu3  ;;  %v12086_v61 = vld [vmem:[%s19771_s1 + $0x1f48] sm:$0xf]  ;;  %v7246_v56 = vpop.f32.mrf.mxu0 }
 0x2ef   :  { %7522 = vmatpush.bf16.msrb.mxu2 %v12023_v17  ;;  %v11846_v17 = vld [vmem:[%s19771_s1 + $0x1d68] sm:$0xf]  ;;  %v13115_v15 = vld [vmem:[%s19771_s1 + $0x1d74] sm:$0xf0]  ;;  %v11719_v21 = vor.u32 %v13083_v26, %v11718_v8 }
 0x2f0   :  { %7535 = vmatpush.bf16.msrb.mxu3 %v12151_v1  ;;  %v13147_v1 = vld [vmem:[%s19771_s1 + $0x1e74] sm:$0xf0]  ;;  %v11847_v6 = vor.u32 %v13115_v15, %v11846_v17  ;;  %v18079_v60 = vadd.f32 %v7283_v50, %v7271_v48  ;;  %v11686_v8 = vld [vmem:[%s19771_s1 + $0x1c28] sm:$0xf]  ;;  %v12201_v50 = vld [vmem:[%s19771_s1 + $0xec] sm:$0xf] }
 0x2f1   :  { %7497 = vmatpush.bf16.msrb.mxu0 %v11751_v54  ;;  %v13179_v51 = vld [vmem:[%s19771_s1 + $0x1f74] sm:$0xf0]  ;;  %v11975_v27 = vor.u32 %v13147_v1, %v11974_v0  ;;  %v11702_v54 = vld [vmem:[%s19771_s1 + $0x1c48] sm:$0xf] }
 0x2f2   :  { %7510 = vmatpush.bf16.msrb.mxu1 %v11879_v58  ;;  %v13079_v58 = vld [vmem:[%s19771_s1 + $0x1c54] sm:$0xf0]  ;;  %v12103_v39 = vor.u32 %v13179_v51, %v12102_v2  ;;  %v11814_v17 = vld [vmem:[%s19771_s1 + $0x1d28] sm:$0xf] }
 0x2f3   :  { %7523 = vmatpush.bf16.msrb.mxu2 %v12007_v59  ;;  %v11830_v59 = vld [vmem:[%s19771_s1 + $0x1d48] sm:$0xf]  ;;  %v13111_v33 = vld [vmem:[%s19771_s1 + $0x1d54] sm:$0xf0]  ;;  %v11703_v4 = vor.u32 %v13079_v58, %v11702_v54 }
 0x2f4   :  { %7536 = vmatpush.bf16.msrb.mxu3 %v12135_v47  ;;  %v11958_v47 = vld [vmem:[%s19771_s1 + $0x1e48] sm:$0xf]  ;;  %v13143_v40 = vld [vmem:[%s19771_s1 + $0x1e54] sm:$0xf0] }
 0x2f5   :  { %7498 = vmatpush.bf16.msrb.mxu0 %v11735_v57  ;;  %v13175_v52 = vld [vmem:[%s19771_s1 + $0x1f54] sm:$0xf0]  ;;  %v7259_v57 = vpop.f32.mrf.mxu1  ;;  %v11942_v15 = vld [vmem:[%s19771_s1 + $0x1e28] sm:$0xf]  ;;  %v7272_v48 = vpop.f32.mrf.mxu2 }
 0x2f6   :  { %7511 = vmatpush.bf16.msrb.mxu1 %v11863_v55  ;;  %v11831_v55 = vor.u32 %v13111_v33, %v11830_v59  ;;  %v13075_v26 = vld [vmem:[%s19771_s1 + $0x1c34] sm:$0xf0]  ;;  %v12070_v1 = vld [vmem:[%s19771_s1 + $0x1f28] sm:$0xf]  ;;  %v7285_v56 = vpop.f32.mrf.mxu3  ;;  %v8328_v57 = vld [vmem:[%s19771_s1 + $0x1f8] sm:$0xf0] }
 0x2f7   :  { %7524 = vmatpush.bf16.msrb.mxu2 %v11991_v32  ;;  %v11959_v32 = vor.u32 %v13143_v40, %v11958_v47  ;;  %v13107_v62 = vld [vmem:[%s19771_s1 + $0x1d34] sm:$0xf0]  ;;  %v11687_v51 = vor.u32 %v13075_v26, %v11686_v8  ;;  %v11798_v58 = vld [vmem:[%s19771_s1 + $0x1d08] sm:$0xf]  ;;  %v8168_v48 = vld [vmem:[%s19771_s1 + $0xb8] sm:$0xf0] }
 0x2f8   :  { %7537 = vmatpush.bf16.msrb.mxu3 %v12119_v63  ;;  %v12087_v63 = vor.u32 %v13175_v52, %v12086_v61  ;;  %v13139_v0 = vld [vmem:[%s19771_s1 + $0x1e34] sm:$0xf0]  ;;  %v12054_v47 = vld [vmem:[%s19771_s1 + $0x1f08] sm:$0xf]  ;;  %v8200_v61 = vld [vmem:[%s19771_s1 + $0xf8] sm:$0xf0] }
 0x2f9   :  { %7499 = vmatpush.bf16.msrb.mxu0 %v11719_v21  ;;  %v13171_v2 = vld [vmem:[%s19771_s1 + $0x1f34] sm:$0xf0]  ;;  %v11670_v21 = vld [vmem:[%s19771_s1 + $0x1c08] sm:$0xf]  ;;  %v11943_v54 = vor.u32 %v13139_v0, %v11942_v15  ;;  %v12233_v52 = vld [vmem:[%s19771_s1 + $0x1ec] sm:$0xf]  ;;  %v8203_v15 = vor.u32 %v12201_v50, %v8200_v61 }
 0x2fa   :  { %7512 = vmatpush.bf16.msrb.mxu1 %v11847_v6  ;;  %v13071_v6 = vld [vmem:[%s19771_s1 + $0x1c14] sm:$0xf0]  ;;  %v12071_v9 = vor.u32 %v13171_v2, %v12070_v1  ;;  %v8331_v0 = vor.u32 %v12233_v52, %v8328_v57  ;;  %v12197_v2 = vld [vmem:[%s19771_s1 + $0xcc] sm:$0xf]  ;;  %v8296_v52 = vld [vmem:[%s19771_s1 + $0x1b8] sm:$0xf0] }
 0x2fb   :  { %7525 = vmatpush.bf16.msrb.mxu2 %v11975_v27  ;;  %v11815_v27 = vor.u32 %v13107_v62, %v11814_v17  ;;  %v13103_v59 = vld [vmem:[%s19771_s1 + $0x1d14] sm:$0xf0]  ;;  %v12297_v17 = vld [vmem:[%s19771_s1 + $0x3ec] sm:$0xf] }
 0x2fc   :  { %7538 = vmatpush.bf16.msrb.mxu3 %v12103_v39  ;;  %v11926_v39 = vld [vmem:[%s19771_s1 + $0x1e08] sm:$0xf]  ;;  %v13135_v33 = vld [vmem:[%s19771_s1 + $0x1e14] sm:$0xf0]  ;;  %v11799_v8 = vor.u32 %v13103_v59, %v11798_v58  ;;  %v8440_v58 = vld [vmem:[%s19771_s1 + $0x2d8] sm:$0xf0] }
 0x2fd   :  { %7500 = vmatpush.bf16.msrb.mxu0 %v11703_v4  ;;  %v13167_v40 = vld [vmem:[%s19771_s1 + $0x1f14] sm:$0xf0]  ;;  %v11671_v4 = vor.u32 %v13071_v6, %v11670_v21  ;;  %v11927_v26 = vor.u32 %v13135_v33, %v11926_v39  ;;  %v12229_v21 = vld [vmem:[%s19771_s1 + $0x1cc] sm:$0xf]  ;;  %v8568_v39 = vld [vmem:[%s19771_s1 + $0x3d8] sm:$0xf0] }
 0x2fe   :  { %7513 = vmatpush.bf16.msrb.mxu1 %v11831_v55  ;;  %v12265_v55 = vld [vmem:[%s19771_s1 + $0x2ec] sm:$0xf]  ;;  %v12055_v62 = vor.u32 %v13167_v40, %v12054_v47 }
 0x2ff   :  { %7526 = vmatpush.bf16.msrb.mxu2 %v11959_v32  ;;  %v8456_v32 = vld [vmem:[%s19771_s1 + $0x2f8] sm:$0xf0]  ;;  %v12293_v59 = vld [vmem:[%s19771_s1 + $0x3cc] sm:$0xf] }
 0x300   :  { %7539 = vmatpush.bf16.msrb.mxu3 %v12087_v63  ;;  %v8584_v63 = vld [vmem:[%s19771_s1 + $0x3f8] sm:$0xf0]  ;;  %v8459_v1 = vor.u32 %v12265_v55, %v8456_v32  ;;  %v12193_v40 = vld [vmem:[%s19771_s1 + $0xac] sm:$0xf]  ;;  %v8571_v61 = vor.u32 %v12293_v59, %v8568_v39 }
 0x301   :  { %7501 = vmatpush.bf16.msrb.mxu0 %v11687_v51  ;;  %v8184_v51 = vld [vmem:[%s19771_s1 + $0xd8] sm:$0xf0]  ;;  %v8587_v6 = vor.u32 %v12297_v17, %v8584_v63  ;;  %v12225_v50 = vld [vmem:[%s19771_s1 + $0x1ac] sm:$0xf]  ;;  %v8171_v32 = vor.u32 %v12193_v40, %v8168_v48 }
 0x302   :  { %7514 = vmatpush.bf16.msrb.mxu1 %v11815_v27  ;;  %v8312_v27 = vld [vmem:[%s19771_s1 + $0x1d8] sm:$0xf0]  ;;  %v12257_v56 = vld [vmem:[%s19771_s1 + $0x2ac] sm:$0xf] }
 0x303   :  { %7527 = vmatpush.bf16.msrb.mxu2 %v11943_v54  ;;  %v12261_v54 = vld [vmem:[%s19771_s1 + $0x2cc] sm:$0xf]  ;;  %v8315_v33 = vor.u32 %v12229_v21, %v8312_v27  ;;  %v8552_v55 = vld [vmem:[%s19771_s1 + $0x3b8] sm:$0xf0] }
 0x304   :  { %7540 = vmatpush.bf16.msrb.mxu3 %v12071_v9  ;;  %v8187_v9 = vor.u32 %v12197_v2, %v8184_v51  ;;  %v8443_v47 = vor.u32 %v12261_v54, %v8440_v58  ;;  %v12289_v57 = vld [vmem:[%s19771_s1 + $0x3ac] sm:$0xf]  ;;  %v8152_v63 = vld [vmem:[%s19771_s1 + $0x98] sm:$0xf0] }
 0x305   :  { %7502 = vmatpush.bf16.msrb.mxu0 %v11671_v4  ;;  %v8424_v4 = vld [vmem:[%s19771_s1 + $0x2b8] sm:$0xf0]  ;;  %v12189_v17 = vld [vmem:[%s19771_s1 + $0x8c] sm:$0xf]  ;;  %v7296_v51 = vpop.f32.mrf.mxu0 }
 0x306   :  { %7515 = vmatpush.bf16.msrb.mxu1 %v11799_v8  ;;  %v8299_v8 = vor.u32 %v12225_v50, %v8296_v52  ;;  %v8408_v2 = vld [vmem:[%s19771_s1 + $0x298] sm:$0xf0]  ;;  %v12285_v21 = vld [vmem:[%s19771_s1 + $0x38c] sm:$0xf]  ;;  %v7297_v27 = vadd.f32 %v7296_v51, %v18079_v60  ;;  %v8155_v54 = vor.u32 %v12189_v17, %v8152_v63  ;;  %v7309_v58 = vpop.f32.mrf.mxu1 }
 0x307   :  { %7528 = vmatpush.bf16.msrb.mxu2 %v11927_v26  ;;  %v8427_v26 = vor.u32 %v12257_v56, %v8424_v4  ;;  %v8264_v48 = vld [vmem:[%s19771_s1 + $0x178] sm:$0xf0]  ;;  %v12249_v50 = vld [vmem:[%s19771_s1 + $0x26c] sm:$0xf] }
 0x308   :  { %7541 = vmatpush.bf16.msrb.mxu3 %v12055_v62  ;;  %7503 = vmatmul.bf16.vlgmr.msrb.gmra.mxu0 %v14943_v24  ;;  %v12221_v62 = vld [vmem:[%s19771_s1 + $0x18c] sm:$0xf]  ;;  %v7310_v40 = vadd.f32 %v7309_v58, %v7297_v27  ;;  %v8520_v56 = vld [vmem:[%s19771_s1 + $0x378] sm:$0xf0] }
 0x309   :  { %7547 = vmatpush.bf16.msra.mxu0 %v8203_v15  ;;  %7516 = vmatmul.bf16.vlgmr.msrb.gmra.mxu1 %v14956_v36  ;;  %v8555_v15 = vor.u32 %v12289_v57, %v8552_v55  ;;  %v12281_v52 = vld [vmem:[%s19771_s1 + $0x36c] sm:$0xf] }
 0x30a   :  { %7560 = vmatpush.bf16.msra.mxu1 %v8331_v0  ;;  %7529 = vmatmul.bf16.vlgmr.msrb.gmra.mxu2 %v14954_v34  ;;  %v8280_v0 = vld [vmem:[%s19771_s1 + $0x198] sm:$0xf0]  ;;  %v8523_v17 = vor.u32 %v12281_v52, %v8520_v56  ;;  %v12277_v51 = vld [vmem:[%s19771_s1 + $0x34c] sm:$0xf] }
 0x30b   :  { %7573 = vmatpush.bf16.msra.mxu2 %v8459_v1  ;;  %7542 = vmatmul.bf16.vlgmr.msrb.gmra.mxu3 %v14964_v43  ;;  %v12253_v1 = vld [vmem:[%s19771_s1 + $0x28c] sm:$0xf]  ;;  %v8283_v59 = vor.u32 %v12221_v62, %v8280_v0  ;;  %v8248_v62 = vld [vmem:[%s19771_s1 + $0x158] sm:$0xf0] }
 0x30c   :  { %7586 = vmatpush.bf16.msra.mxu3 %v8587_v6  ;;  %v8536_v6 = vld [vmem:[%s19771_s1 + $0x398] sm:$0xf0]  ;;  %v8411_v39 = vor.u32 %v12253_v1, %v8408_v2 }
 0x30d   :  { %7548 = vmatpush.bf16.msra.mxu0 %v8187_v9  ;;  %v12185_v9 = vld [vmem:[%s19771_s1 + $0x6c] sm:$0xf]  ;;  %v8539_v60 = vor.u32 %v12285_v21, %v8536_v6  ;;  %v7322_v63 = vpop.f32.mrf.mxu2  ;;  %v8376_v0 = vld [vmem:[%s19771_s1 + $0x258] sm:$0xf0]  ;;  %v7298_v6 = vpop.f32.mrf.mxu0 }
 0x30e   :  { %7561 = vmatpush.bf16.msra.mxu1 %v8315_v33  ;;  %v8136_v33 = vld [vmem:[%s19771_s1 + $0x78] sm:$0xf0]  ;;  %v7323_v1 = vadd.f32 %v7322_v63, %v7310_v40  ;;  %v7335_v2 = vpop.f32.mrf.mxu3 }
 0x30f   :  { %7574 = vmatpush.bf16.msra.mxu2 %v8443_v47  ;;  %v12217_v47 = vld [vmem:[%s19771_s1 + $0x16c] sm:$0xf]  ;;  %v8139_v4 = vor.u32 %v12185_v9, %v8136_v33  ;;  %v8504_v21 = vld [vmem:[%s19771_s1 + $0x358] sm:$0xf0] }
 0x310   :  { %7587 = vmatpush.bf16.msra.mxu3 %v8571_v61  ;;  %v8392_v61 = vld [vmem:[%s19771_s1 + $0x278] sm:$0xf0]  ;;  %v8267_v57 = vor.u32 %v12217_v47, %v8264_v48  ;;  %v18278_v58 = vadd.f32 %v7335_v2, %v7323_v1  ;;  %v12177_v9 = vld [vmem:[%s19771_s1 + $0x2c] sm:$0xf] }
 0x311   :  { %7549 = vmatpush.bf16.msra.mxu0 %v8171_v32  ;;  %v8395_v55 = vor.u32 %v12249_v50, %v8392_v61  ;;  %v12181_v32 = vld [vmem:[%s19771_s1 + $0x4c] sm:$0xf]  ;;  %v8104_v33 = vld [vmem:[%s19771_s1 + $0x38] sm:$0xf0] }
 0x312   :  { %7562 = vmatpush.bf16.msra.mxu1 %v8299_v8  ;;  %v8120_v8 = vld [vmem:[%s19771_s1 + $0x58] sm:$0xf0]  ;;  %v12209_v47 = vld [vmem:[%s19771_s1 + $0x12c] sm:$0xf]  ;;  %v8107_v56 = vor.u32 %v12177_v9, %v8104_v33 }
 0x313   :  { %7575 = vmatpush.bf16.msra.mxu2 %v8427_v26  ;;  %v12213_v26 = vld [vmem:[%s19771_s1 + $0x14c] sm:$0xf]  ;;  %v8123_v27 = vor.u32 %v12181_v32, %v8120_v8  ;;  %v8232_v40 = vld [vmem:[%s19771_s1 + $0x138] sm:$0xf0] }
 0x314   :  { %7588 = vmatpush.bf16.msra.mxu3 %v8555_v15  ;;  %v12245_v15 = vld [vmem:[%s19771_s1 + $0x24c] sm:$0xf]  ;;  %v8360_v50 = vld [vmem:[%s19771_s1 + $0x238] sm:$0xf0] }
 0x315   :  { %7550 = vmatpush.bf16.msra.mxu0 %v8155_v54  ;;  %v7311_v54 = vpop.f32.mrf.mxu1  ;;  %v12241_v48 = vld [vmem:[%s19771_s1 + $0x22c] sm:$0xf]  ;;  %v8488_v52 = vld [vmem:[%s19771_s1 + $0x338] sm:$0xf0]  ;;  %v7324_v1 = vpop.f32.mrf.mxu2 }
 0x316   :  { %7563 = vmatpush.bf16.msra.mxu1 %v8283_v59  ;;  %v8251_v59 = vor.u32 %v12213_v26, %v8248_v62  ;;  %v12273_v61 = vld [vmem:[%s19771_s1 + $0x32c] sm:$0xf]  ;;  %v8363_v32 = vor.u32 %v12241_v48, %v8360_v50  ;;  %v8216_v26 = vld [vmem:[%s19771_s1 + $0x118] sm:$0xf0]  ;;  %v7337_v6 = vpop.f32.mrf.mxu3 }
 0x317   :  { %7576 = vmatpush.bf16.msra.mxu2 %v8411_v39  ;;  %v8379_v39 = vor.u32 %v12245_v15, %v8376_v0  ;;  %v12205_v8 = vld [vmem:[%s19771_s1 + $0x10c] sm:$0xf]  ;;  %v8491_v63 = vor.u32 %v12273_v61, %v8488_v52  ;;  %v8344_v62 = vld [vmem:[%s19771_s1 + $0x218] sm:$0xf0] }
 0x318   :  { %7589 = vmatpush.bf16.msra.mxu3 %v8539_v60  ;;  %v8507_v60 = vor.u32 %v12277_v51, %v8504_v21  ;;  %v12269_v15 = vld [vmem:[%s19771_s1 + $0x30c] sm:$0xf]  ;;  %v8472_v0 = vld [vmem:[%s19771_s1 + $0x318] sm:$0xf0]  ;;  %v8219_v9 = vor.u32 %v12205_v8, %v8216_v26 }
 0x319   :  { %7551 = vmatpush.bf16.msra.mxu0 %v8139_v4  ;;  %v12173_v4 = vld [vmem:[%s19771_s1 + $0xc] sm:$0xf]  ;;  %v8712_v51 = vld [vmem:[%s19771_s1 + $0x4f8] sm:$0xf0] }
 0x31a   :  { %7564 = vmatpush.bf16.msra.mxu1 %v8267_v57  ;;  %v8088_v57 = vld [vmem:[%s19771_s1 + $0x18] sm:$0xf0]  ;;  %v12329_v2 = vld [vmem:[%s19771_s1 + $0x4ec] sm:$0xf] }
 0x31b   :  { %7577 = vmatpush.bf16.msra.mxu2 %v8395_v55  ;;  %v8235_v55 = vor.u32 %v12209_v47, %v8232_v40  ;;  %v12361_v21 = vld [vmem:[%s19771_s1 + $0x5ec] sm:$0xf]  ;;  %v8840_v54 = vld [vmem:[%s19771_s1 + $0x5f8] sm:$0xf0]  ;;  %v8475_v40 = vor.u32 %v12269_v15, %v8472_v0  ;;  %v8715_v48 = vor.u32 %v12329_v2, %v8712_v51 }
 0x31c   :  { %7590 = vmatpush.bf16.msra.mxu3 %v8523_v17  ;;  %v12237_v17 = vld [vmem:[%s19771_s1 + $0x20c] sm:$0xf]  ;;  %v8843_v50 = vor.u32 %v12361_v21, %v8840_v54  ;;  %v8952_v8 = vld [vmem:[%s19771_s1 + $0x6d8] sm:$0xf0] }
 0x31d   :  { %7552 = vmatpush.bf16.msra.mxu0 %v8123_v27  ;;  %v8091_v27 = vor.u32 %v12173_v4, %v8088_v57  ;;  %v8347_v33 = vor.u32 %v12237_v17, %v8344_v62  ;;  %v12425_v47 = vld [vmem:[%s19771_s1 + $0x7ec] sm:$0xf]  ;;  %v9080_v17 = vld [vmem:[%s19771_s1 + $0x7d8] sm:$0xf0] }
 0x31e   :  { %7565 = vmatpush.bf16.msra.mxu1 %v8251_v59  ;;  %v12393_v59 = vld [vmem:[%s19771_s1 + $0x6ec] sm:$0xf]  ;;  %v8680_v1 = vld [vmem:[%s19771_s1 + $0x4b8] sm:$0xf0] }
 0x31f   :  { %7578 = vmatpush.bf16.msra.mxu2 %v8379_v39  ;;  %v8968_v39 = vld [vmem:[%s19771_s1 + $0x6f8] sm:$0xf0]  ;;  %v12325_v52 = vld [vmem:[%s19771_s1 + $0x4cc] sm:$0xf] }
 0x320   :  { %7591 = vmatpush.bf16.msra.mxu3 %v8507_v60  ;;  %v9096_v60 = vld [vmem:[%s19771_s1 + $0x7f8] sm:$0xf0]  ;;  %v8971_v61 = vor.u32 %v12393_v59, %v8968_v39  ;;  %v12357_v4 = vld [vmem:[%s19771_s1 + $0x5cc] sm:$0xf] }
 0x321   :  { %7553 = vmatpush.bf16.msra.mxu0 %v8107_v56  ;;  %v8696_v56 = vld [vmem:[%s19771_s1 + $0x4d8] sm:$0xf0]  ;;  %v9099_v57 = vor.u32 %v12425_v47, %v9096_v60  ;;  %v12421_v26 = vld [vmem:[%s19771_s1 + $0x7cc] sm:$0xf] }
 0x322   :  { %7566 = vmatpush.bf16.msra.mxu1 %v8235_v55  ;;  %v8824_v55 = vld [vmem:[%s19771_s1 + $0x5d8] sm:$0xf0]  ;;  %v12321_v0 = vld [vmem:[%s19771_s1 + $0x4ac] sm:$0xf]  ;;  %v9083_v51 = vor.u32 %v12421_v26, %v9080_v17 }
 0x323   :  { %7579 = vmatpush.bf16.msra.mxu2 %v8363_v32  ;;  %v12389_v32 = vld [vmem:[%s19771_s1 + $0x6cc] sm:$0xf]  ;;  %v8827_v62 = vor.u32 %v12357_v4, %v8824_v55  ;;  %v8808_v21 = vld [vmem:[%s19771_s1 + $0x5b8] sm:$0xf0]  ;;  %v8683_v39 = vor.u32 %v12321_v0, %v8680_v1 }
 0x324   :  { %7592 = vmatpush.bf16.msra.mxu3 %v8491_v63  ;;  %v8699_v63 = vor.u32 %v12325_v52, %v8696_v56  ;;  %v8955_v15 = vor.u32 %v12389_v32, %v8952_v8  ;;  %v12353_v2 = vld [vmem:[%s19771_s1 + $0x5ac] sm:$0xf]  ;;  %v9064_v59 = vld [vmem:[%s19771_s1 + $0x7b8] sm:$0xf0] }
 0x325   :  { %7554 = vmatpush.bf16.msra.mxu0 %v8091_v27  ;;  %v12385_v6 = vld [vmem:[%s19771_s1 + $0x6ac] sm:$0xf]  ;;  %v8936_v27 = vld [vmem:[%s19771_s1 + $0x6b8] sm:$0xf0] }
 0x326   :  { %7567 = vmatpush.bf16.msra.mxu1 %v8219_v9  ;;  %v12417_v54 = vld [vmem:[%s19771_s1 + $0x7ac] sm:$0xf]  ;;  %v8811_v9 = vor.u32 %v12353_v2, %v8808_v21  ;;  %v8664_v47 = vld [vmem:[%s19771_s1 + $0x498] sm:$0xf0]  ;;  %v7361_v4 = vpop.f32.mrf.mxu1 }
 0x327   :  { %7580 = vmatpush.bf16.msra.mxu2 %v8347_v33  ;;  %v12317_v33 = vld [vmem:[%s19771_s1 + $0x48c] sm:$0xf]  ;;  %v8648_v8 = vld [vmem:[%s19771_s1 + $0x478] sm:$0xf0] }
 0x328   :  { %7593 = vmatpush.bf16.msra.mxu3 %v8475_v40  ;;  %7555 = vmatmul.bf16.vlgmr.msra.gmra.mxu0 %v13527_v19  ;;  %v12349_v19 = vld [vmem:[%s19771_s1 + $0x58c] sm:$0xf]  ;;  %v8920_v40 = vld [vmem:[%s19771_s1 + $0x698] sm:$0xf0]  ;;  %v8667_v56 = vor.u32 %v12317_v33, %v8664_v47 }
 0x329   :  { %7599 = vmatpush.bf16.msrb.mxu0 %v8715_v48  ;;  %7568 = vmatmul.bf16.vlgmr.msra.gmra.mxu1 %v13531_v22  ;;  %v8792_v22 = vld [vmem:[%s19771_s1 + $0x598] sm:$0xf0]  ;;  %v12381_v60 = vld [vmem:[%s19771_s1 + $0x68c] sm:$0xf]  ;;  %v7348_v48 = vpop.f32.mrf.mxu0 }
 0x32a   :  { %7612 = vmatpush.bf16.msrb.mxu1 %v8843_v50  ;;  %7581 = vmatmul.bf16.vlgmr.msra.gmra.mxu2 %v13525_v18  ;;  %v8939_v18 = vor.u32 %v12385_v6, %v8936_v27  ;;  %v12413_v50 = vld [vmem:[%s19771_s1 + $0x78c] sm:$0xf]  ;;  %v7349_v52 = vadd.f32 %v7348_v48, %v18278_v58  ;;  %v8923_v55 = vor.u32 %v12381_v60, %v8920_v40  ;;  %v9032_v1 = vld [vmem:[%s19771_s1 + $0x778] sm:$0xf0] }
 0x32b   :  { %7625 = vmatpush.bf16.msrb.mxu2 %v8971_v61  ;;  %7594 = vmatmul.bf16.vlgmr.msra.gmra.mxu3 %v13529_v20  ;;  %v9067_v20 = vor.u32 %v12417_v54, %v9064_v59  ;;  %v9048_v61 = vld [vmem:[%s19771_s1 + $0x798] sm:$0xf0]  ;;  %v12313_v32 = vld [vmem:[%s19771_s1 + $0x46c] sm:$0xf] }
 0x32c   :  { %7638 = vmatpush.bf16.msrb.mxu3 %v9099_v57  ;;  %v8795_v57 = vor.u32 %v12349_v19, %v8792_v22  ;;  %v12345_v26 = vld [vmem:[%s19771_s1 + $0x56c] sm:$0xf]  ;;  %v9051_v58 = vor.u32 %v12413_v50, %v9048_v61  ;;  %v7362_v17 = vadd.f32 %v7361_v4, %v7349_v52  ;;  %v8651_v2 = vor.u32 %v12313_v32, %v8648_v8  ;;  %v8632_v27 = vld [vmem:[%s19771_s1 + $0x458] sm:$0xf0] }
 0x32d   :  { %7600 = vmatpush.bf16.msrb.mxu0 %v8699_v63  ;;  %v8776_v63 = vld [vmem:[%s19771_s1 + $0x578] sm:$0xf0]  ;;  %v12409_v0 = vld [vmem:[%s19771_s1 + $0x76c] sm:$0xf] }
 0x32e   :  { %7613 = vmatpush.bf16.msrb.mxu1 %v8827_v62  ;;  %v12377_v62 = vld [vmem:[%s19771_s1 + $0x66c] sm:$0xf]  ;;  %v9035_v59 = vor.u32 %v12409_v0, %v9032_v1  ;;  %v8888_v33 = vld [vmem:[%s19771_s1 + $0x658] sm:$0xf0]  ;;  %v7387_v19 = vpop.f32.mrf.mxu3  ;;  %v7363_v48 = vpop.f32.mrf.mxu1 }
 0x32f   :  { %7626 = vmatpush.bf16.msrb.mxu2 %v8955_v15  ;;  %v8904_v15 = vld [vmem:[%s19771_s1 + $0x678] sm:$0xf0]  ;;  %v12309_v6 = vld [vmem:[%s19771_s1 + $0x44c] sm:$0xf] }
 0x330   :  { %7639 = vmatpush.bf16.msrb.mxu3 %v9083_v51  ;;  %v8779_v51 = vor.u32 %v12345_v26, %v8776_v63  ;;  %v8907_v21 = vor.u32 %v12377_v62, %v8904_v15  ;;  %v12341_v54 = vld [vmem:[%s19771_s1 + $0x54c] sm:$0xf]  ;;  %v9016_v22 = vld [vmem:[%s19771_s1 + $0x758] sm:$0xf0]  ;;  %v8635_v40 = vor.u32 %v12309_v6, %v8632_v27 }
 0x331   :  { %7601 = vmatpush.bf16.msrb.mxu0 %v8683_v39  ;;  %v7374_v39 = vpop.f32.mrf.mxu2  ;;  %v7350_v60 = vpop.f32.mrf.mxu0  ;;  %v8616_v4 = vld [vmem:[%s19771_s1 + $0x438] sm:$0xf0]  ;;  %v12369_v8 = vld [vmem:[%s19771_s1 + $0x62c] sm:$0xf] }
 0x332   :  { %7614 = vmatpush.bf16.msrb.mxu1 %v8811_v9  ;;  %v8760_v9 = vld [vmem:[%s19771_s1 + $0x558] sm:$0xf0]  ;;  %v7375_v47 = vadd.f32 %v7374_v39, %v7362_v17  ;;  %v12301_v62 = vld [vmem:[%s19771_s1 + $0x40c] sm:$0xf] }
 0x333   :  { %7627 = vmatpush.bf16.msrb.mxu2 %v8939_v18  ;;  %v12373_v18 = vld [vmem:[%s19771_s1 + $0x64c] sm:$0xf]  ;;  %v8763_v61 = vor.u32 %v12341_v54, %v8760_v9  ;;  %v8744_v32 = vld [vmem:[%s19771_s1 + $0x538] sm:$0xf0] }
 0x334   :  { %7640 = vmatpush.bf16.msrb.mxu3 %v9067_v20  ;;  %v12405_v20 = vld [vmem:[%s19771_s1 + $0x74c] sm:$0xf]  ;;  %v18477_v50 = vadd.f32 %v7387_v19, %v7375_v47  ;;  %v8891_v52 = vor.u32 %v12373_v18, %v8888_v33  ;;  %v8872_v26 = vld [vmem:[%s19771_s1 + $0x638] sm:$0xf0] }
 0x335   :  { %7602 = vmatpush.bf16.msrb.mxu0 %v8667_v56  ;;  %v12305_v56 = vld [vmem:[%s19771_s1 + $0x42c] sm:$0xf]  ;;  %v9000_v17 = vld [vmem:[%s19771_s1 + $0x738] sm:$0xf0]  ;;  %v8875_v1 = vor.u32 %v12369_v8, %v8872_v26 }
 0x336   :  { %7615 = vmatpush.bf16.msrb.mxu1 %v8795_v57  ;;  %v12337_v57 = vld [vmem:[%s19771_s1 + $0x52c] sm:$0xf]  ;;  %v8619_v63 = vor.u32 %v12305_v56, %v8616_v4  ;;  %v8600_v15 = vld [vmem:[%s19771_s1 + $0x418] sm:$0xf0]  ;;  %v7389_v47 = vpop.f32.mrf.mxu3 }
 0x337   :  { %7628 = vmatpush.bf16.msrb.mxu2 %v8923_v55  ;;  %v9019_v55 = vor.u32 %v12405_v20, %v9016_v22  ;;  %v8747_v0 = vor.u32 %v12337_v57, %v8744_v32  ;;  %v8856_v27 = vld [vmem:[%s19771_s1 + $0x618] sm:$0xf0]  ;;  %v12397_v54 = vld [vmem:[%s19771_s1 + $0x70c] sm:$0xf]  ;;  %v8603_v19 = vor.u32 %v12301_v62, %v8600_v15 }
 0x338   :  { %7641 = vmatpush.bf16.msrb.mxu3 %v9051_v58  ;;  %v12401_v58 = vld [vmem:[%s19771_s1 + $0x72c] sm:$0xf]  ;;  %v9224_v18 = vld [vmem:[%s19771_s1 + $0x8f8] sm:$0xf0] }
 0x339   :  { %7603 = vmatpush.bf16.msrb.mxu0 %v8651_v2  ;;  %v12333_v2 = vld [vmem:[%s19771_s1 + $0x50c] sm:$0xf]  ;;  %v9003_v6 = vor.u32 %v12401_v58, %v9000_v17  ;;  %v7376_v39 = vpop.f32.mrf.mxu2  ;;  %v9352_v20 = vld [vmem:[%s19771_s1 + $0x9f8] sm:$0xf0] }
 0x33a   :  { %7616 = vmatpush.bf16.msrb.mxu1 %v8779_v51  ;;  %v8728_v51 = vld [vmem:[%s19771_s1 + $0x518] sm:$0xf0]  ;;  %v12457_v9 = vld [vmem:[%s19771_s1 + $0x8ec] sm:$0xf] }
 0x33b   :  { %7629 = vmatpush.bf16.msrb.mxu2 %v8907_v21  ;;  %v12365_v21 = vld [vmem:[%s19771_s1 + $0x60c] sm:$0xf]  ;;  %v9480_v60 = vld [vmem:[%s19771_s1 + $0xaf8] sm:$0xf0]  ;;  %v9227_v4 = vor.u32 %v12457_v9, %v9224_v18 }
 0x33c   :  { %7642 = vmatpush.bf16.msrb.mxu3 %v9035_v59  ;;  %v8984_v59 = vld [vmem:[%s19771_s1 + $0x718] sm:$0xf0]  ;;  %v12489_v33 = vld [vmem:[%s19771_s1 + $0x9ec] sm:$0xf]  ;;  %v8859_v48 = vor.u32 %v12365_v21, %v8856_v27 }
 0x33d   :  { %7604 = vmatpush.bf16.msrb.mxu0 %v8635_v40  ;;  %v12521_v22 = vld [vmem:[%s19771_s1 + $0xaec] sm:$0xf]  ;;  %v8731_v40 = vor.u32 %v12333_v2, %v8728_v51  ;;  %v8987_v56 = vor.u32 %v12397_v54, %v8984_v59  ;;  %v9355_v57 = vor.u32 %v12489_v33, %v9352_v20  ;;  %v9208_v8 = vld [vmem:[%s19771_s1 + $0x8d8] sm:$0xf0] }
 0x33e   :  { %7617 = vmatpush.bf16.msrb.mxu1 %v8763_v61  ;;  %v12553_v61 = vld [vmem:[%s19771_s1 + $0xbec] sm:$0xf]  ;;  %v9336_v17 = vld [vmem:[%s19771_s1 + $0x9d8] sm:$0xf0] }
 0x33f   :  { %7630 = vmatpush.bf16.msrb.mxu2 %v8891_v52  ;;  %v9608_v52 = vld [vmem:[%s19771_s1 + $0xbf8] sm:$0xf0]  ;;  %v12453_v32 = vld [vmem:[%s19771_s1 + $0x8cc] sm:$0xf] }
 0x340   :  { %7643 = vmatpush.bf16.msrb.mxu3 %v9019_v55  ;;  %v9483_v55 = vor.u32 %v12521_v22, %v9480_v60  ;;  %v12485_v26 = vld [vmem:[%s19771_s1 + $0x9cc] sm:$0xf]  ;;  %v9611_v58 = vor.u32 %v12553_v61, %v9608_v52  ;;  %v9464_v62 = vld [vmem:[%s19771_s1 + $0xad8] sm:$0xf0] }
 0x341   :  { %7605 = vmatpush.bf16.msrb.mxu0 %v8619_v63  ;;  %v12517_v63 = vld [vmem:[%s19771_s1 + $0xacc] sm:$0xf]  ;;  %v9339_v2 = vor.u32 %v12485_v26, %v9336_v17  ;;  %v9320_v59 = vld [vmem:[%s19771_s1 + $0x9b8] sm:$0xf0] }
 0x342   :  { %7618 = vmatpush.bf16.msrb.mxu1 %v8747_v0  ;;  %v12549_v15 = vld [vmem:[%s19771_s1 + $0xbcc] sm:$0xf]  ;;  %v9592_v0 = vld [vmem:[%s19771_s1 + $0xbd8] sm:$0xf0]  ;;  %v9467_v51 = vor.u32 %v12517_v63, %v9464_v62 }
 0x343   :  { %7631 = vmatpush.bf16.msrb.mxu2 %v8875_v1  ;;  %v9211_v1 = vor.u32 %v12453_v32, %v9208_v8  ;;  %v12449_v21 = vld [vmem:[%s19771_s1 + $0x8ac] sm:$0xf]  ;;  %v9595_v54 = vor.u32 %v12549_v15, %v9592_v0  ;;  %v9448_v9 = vld [vmem:[%s19771_s1 + $0xab8] sm:$0xf0] }
 0x344   :  { %7644 = vmatpush.bf16.msrb.mxu3 %v9003_v6  ;;  %v9192_v6 = vld [vmem:[%s19771_s1 + $0x8b8] sm:$0xf0]  ;;  %v12481_v27 = vld [vmem:[%s19771_s1 + $0x9ac] sm:$0xf] }
 0x345   :  { %7606 = vmatpush.bf16.msrb.mxu0 %v8603_v19  ;;  %v12513_v39 = vld [vmem:[%s19771_s1 + $0xaac] sm:$0xf]  ;;  %v9195_v33 = vor.u32 %v12449_v21, %v9192_v6  ;;  %v9323_v47 = vor.u32 %v12481_v27, %v9320_v59  ;;  %v9176_v22 = vld [vmem:[%s19771_s1 + $0x898] sm:$0xf0] }
 0x346   :  { %7619 = vmatpush.bf16.msrb.mxu1 %v8731_v40  ;;  %v12545_v18 = vld [vmem:[%s19771_s1 + $0xbac] sm:$0xf]  ;;  %v9451_v19 = vor.u32 %v12513_v39, %v9448_v9  ;;  %v9432_v40 = vld [vmem:[%s19771_s1 + $0xa98] sm:$0xf0] }
 0x347   :  { %7632 = vmatpush.bf16.msrb.mxu2 %v8859_v48  ;;  %v12445_v20 = vld [vmem:[%s19771_s1 + $0x88c] sm:$0xf]  ;;  %v7400_v48 = vpop.f32.mrf.mxu0  ;;  %v9560_v52 = vld [vmem:[%s19771_s1 + $0xb98] sm:$0xf0] }
 0x348   :  { %7645 = vmatpush.bf16.msrb.mxu3 %v8987_v56  ;;  %7607 = vmatmul.bf16.vlgmr.msrb.gmra.mxu0 %v13689_v41  ;;  %v12477_v41 = vld [vmem:[%s19771_s1 + $0x98c] sm:$0xf]  ;;  %v7401_v56 = vadd.f32 %v7400_v48, %v18477_v50  ;;  %v9160_v26 = vld [vmem:[%s19771_s1 + $0x878] sm:$0xf0] }
 0x349   :  { %7651 = vmatpush.bf16.msra.mxu0 %v9227_v4  ;;  %7620 = vmatmul.bf16.vlgmr.msrb.gmra.mxu1 %v13693_v44  ;;  %v9304_v44 = vld [vmem:[%s19771_s1 + $0x998] sm:$0xf0]  ;;  %v12509_v60 = vld [vmem:[%s19771_s1 + $0xa8c] sm:$0xf]  ;;  %v9179_v4 = vor.u32 %v12445_v20, %v9176_v22 }
 0x34a   :  { %7664 = vmatpush.bf16.msra.mxu1 %v9355_v57  ;;  %7633 = vmatmul.bf16.vlgmr.msrb.gmra.mxu2 %v13681_v38  ;;  %v9576_v38 = vld [vmem:[%s19771_s1 + $0xbb8] sm:$0xf0]  ;;  %v12541_v61 = vld [vmem:[%s19771_s1 + $0xb8c] sm:$0xf]  ;;  %v7413_v57 = vpop.f32.mrf.mxu1  ;;  %v9435_v32 = vor.u32 %v12509_v60, %v9432_v40 }
 0x34b   :  { %7677 = vmatpush.bf16.msra.mxu2 %v9483_v55  ;;  %7646 = vmatmul.bf16.vlgmr.msrb.gmra.mxu3 %v13691_v42  ;;  %v9579_v42 = vor.u32 %v12545_v18, %v9576_v38  ;;  %v9307_v55 = vor.u32 %v12477_v41, %v9304_v44  ;;  %v12441_v8 = vld [vmem:[%s19771_s1 + $0x86c] sm:$0xf]  ;;  %v9563_v50 = vor.u32 %v12541_v61, %v9560_v52  ;;  %v9288_v63 = vld [vmem:[%s19771_s1 + $0x978] sm:$0xf0] }
 0x34c   :  { %7690 = vmatpush.bf16.msra.mxu3 %v9611_v58  ;;  %v12473_v58 = vld [vmem:[%s19771_s1 + $0x96c] sm:$0xf]  ;;  %v7414_v17 = vadd.f32 %v7413_v57, %v7401_v56  ;;  %v9416_v15 = vld [vmem:[%s19771_s1 + $0xa78] sm:$0xf0] }
 0x34d   :  { %7652 = vmatpush.bf16.msra.mxu0 %v9211_v1  ;;  %v12505_v62 = vld [vmem:[%s19771_s1 + $0xa6c] sm:$0xf]  ;;  %v9544_v1 = vld [vmem:[%s19771_s1 + $0xb78] sm:$0xf0]  ;;  %v7426_v39 = vpop.f32.mrf.mxu2 }
 0x34e   :  { %7665 = vmatpush.bf16.msra.mxu1 %v9339_v2  ;;  %v12537_v0 = vld [vmem:[%s19771_s1 + $0xb6c] sm:$0xf]  ;;  %v9163_v2 = vor.u32 %v12441_v8, %v9160_v26  ;;  %v9419_v21 = vor.u32 %v12505_v62, %v9416_v15  ;;  %v9144_v27 = vld [vmem:[%s19771_s1 + $0x858] sm:$0xf0] }
 0x34f   :  { %7678 = vmatpush.bf16.msra.mxu2 %v9467_v51  ;;  %v9291_v51 = vor.u32 %v12473_v58, %v9288_v63  ;;  %v12437_v6 = vld [vmem:[%s19771_s1 + $0x84c] sm:$0xf]  ;;  %v9547_v59 = vor.u32 %v12537_v0, %v9544_v1  ;;  %v9272_v9 = vld [vmem:[%s19771_s1 + $0x958] sm:$0xf0]  ;;  %v7402_v22 = vpop.f32.mrf.mxu0 }
 0x350   :  { %7691 = vmatpush.bf16.msra.mxu3 %v9595_v54  ;;  %v12469_v54 = vld [vmem:[%s19771_s1 + $0x94c] sm:$0xf]  ;;  %v9400_v38 = vld [vmem:[%s19771_s1 + $0xa58] sm:$0xf0]  ;;  %v9147_v41 = vor.u32 %v12437_v6, %v9144_v27 }
 0x351   :  { %7653 = vmatpush.bf16.msra.mxu0 %v9195_v33  ;;  %v12501_v18 = vld [vmem:[%s19771_s1 + $0xa4c] sm:$0xf]  ;;  %v7427_v33 = vadd.f32 %v7426_v39, %v7414_v17  ;;  %v9528_v20 = vld [vmem:[%s19771_s1 + $0xb58] sm:$0xf0]  ;;  %v9275_v60 = vor.u32 %v12469_v54, %v9272_v9 }
 0x352   :  { %7666 = vmatpush.bf16.msra.mxu1 %v9323_v47  ;;  %v7439_v47 = vpop.f32.mrf.mxu3  ;;  %v9403_v40 = vor.u32 %v12501_v18, %v9400_v38  ;;  %v12433_v48 = vld [vmem:[%s19771_s1 + $0x82c] sm:$0xf]  ;;  %v9128_v61 = vld [vmem:[%s19771_s1 + $0x838] sm:$0xf0] }
 0x353   :  { %7679 = vmatpush.bf16.msra.mxu2 %v9451_v19  ;;  %v12533_v19 = vld [vmem:[%s19771_s1 + $0xb4c] sm:$0xf]  ;;  %v18676_v44 = vadd.f32 %v7439_v47, %v7427_v33  ;;  %v9512_v8 = vld [vmem:[%s19771_s1 + $0xb38] sm:$0xf0]  ;;  %v9131_v26 = vor.u32 %v12433_v48, %v9128_v61 }
 0x354   :  { %7692 = vmatpush.bf16.msra.mxu3 %v9579_v42  ;;  %v7415_v42 = vpop.f32.mrf.mxu1  ;;  %v12465_v52 = vld [vmem:[%s19771_s1 + $0x92c] sm:$0xf]  ;;  %v9531_v56 = vor.u32 %v12533_v19, %v9528_v20  ;;  %v9240_v15 = vld [vmem:[%s19771_s1 + $0x918] sm:$0xf0] }
 0x355   :  { %7654 = vmatpush.bf16.msra.mxu0 %v9179_v4  ;;  %v9256_v4 = vld [vmem:[%s19771_s1 + $0x938] sm:$0xf0]  ;;  %v12497_v57 = vld [vmem:[%s19771_s1 + $0xa2c] sm:$0xf]  ;;  %v7428_v6 = vpop.f32.mrf.mxu2 }
 0x356   :  { %7667 = vmatpush.bf16.msra.mxu1 %v9307_v55  ;;  %v9384_v55 = vld [vmem:[%s19771_s1 + $0xa38] sm:$0xf0]  ;;  %v12429_v58 = vld [vmem:[%s19771_s1 + $0x80c] sm:$0xf]  ;;  %v9259_v17 = vor.u32 %v12465_v52, %v9256_v4 }
 0x357   :  { %7680 = vmatpush.bf16.msra.mxu2 %v9435_v32  ;;  %v12529_v32 = vld [vmem:[%s19771_s1 + $0xb2c] sm:$0xf]  ;;  %v9387_v63 = vor.u32 %v12497_v57, %v9384_v55  ;;  %v9736_v54 = vld [vmem:[%s19771_s1 + $0xcf8] sm:$0xf0] }
 0x358   :  { %7693 = vmatpush.bf16.msra.mxu3 %v9563_v50  ;;  %v9112_v50 = vld [vmem:[%s19771_s1 + $0x818] sm:$0xf0]  ;;  %v12461_v62 = vld [vmem:[%s19771_s1 + $0x90c] sm:$0xf]  ;;  %v9515_v1 = vor.u32 %v12529_v32, %v9512_v8 }
 0x359   :  { %7655 = vmatpush.bf16.msra.mxu0 %v9163_v2  ;;  %v12493_v0 = vld [vmem:[%s19771_s1 + $0xa0c] sm:$0xf]  ;;  %v9368_v2 = vld [vmem:[%s19771_s1 + $0xa18] sm:$0xf0]  ;;  %v9115_v9 = vor.u32 %v12429_v58, %v9112_v50  ;;  %v9243_v47 = vor.u32 %v12461_v62, %v9240_v15 }
 0x35a   :  { %7668 = vmatpush.bf16.msra.mxu1 %v9291_v51  ;;  %v12525_v51 = vld [vmem:[%s19771_s1 + $0xb0c] sm:$0xf]  ;;  %v7441_v39 = vpop.f32.mrf.mxu3  ;;  %v9864_v18 = vld [vmem:[%s19771_s1 + $0xdf8] sm:$0xf0]  ;;  %v9371_v19 = vor.u32 %v12493_v0, %v9368_v2 }
 0x35b   :  { %7681 = vmatpush.bf16.msra.mxu2 %v9419_v21  ;;  %v9496_v21 = vld [vmem:[%s19771_s1 + $0xb18] sm:$0xf0]  ;;  %v12585_v27 = vld [vmem:[%s19771_s1 + $0xcec] sm:$0xf] }
 0x35c   :  { %7694 = vmatpush.bf16.msra.mxu3 %v9547_v59  ;;  %v12617_v59 = vld [vmem:[%s19771_s1 + $0xdec] sm:$0xf]  ;;  %v9992_v33 = vld [vmem:[%s19771_s1 + $0xef8] sm:$0xf0]  ;;  %v9739_v42 = vor.u32 %v12585_v27, %v9736_v54 }
 0x35d   :  { %7656 = vmatpush.bf16.msra.mxu0 %v9147_v41  ;;  %v12649_v38 = vld [vmem:[%s19771_s1 + $0xeec] sm:$0xf]  ;;  %v10120_v22 = vld [vmem:[%s19771_s1 + $0xff8] sm:$0xf0]  ;;  %v9499_v41 = vor.u32 %v12525_v51, %v9496_v21  ;;  %v19779_v21 = vld [vmem:[#allocation2_spill] sm:$0xff] }
 0x35e   :  { %7669 = vmatpush.bf16.msra.mxu1 %v9275_v60  ;;  %v12681_v20 = vld [vmem:[%s19771_s1 + $0xfec] sm:$0xf]  ;;  %v9867_v60 = vor.u32 %v12617_v59, %v9864_v18  ;;  %v9720_v61 = vld [vmem:[%s19771_s1 + $0xcd8] sm:$0xf0] }
 0x35f   :  { %7682 = vmatpush.bf16.msra.mxu2 %v9403_v40  ;;  %v9995_v40 = vor.u32 %v12649_v38, %v9992_v33  ;;  %v12581_v48 = vld [vmem:[%s19771_s1 + $0xccc] sm:$0xf]  ;;  %v9848_v4 = vld [vmem:[%s19771_s1 + $0xdd8] sm:$0xf0] }
 0x360   :  { %7695 = vmatpush.bf16.msra.mxu3 %v9531_v56  ;;  %v12613_v52 = vld [vmem:[%s19771_s1 + $0xdcc] sm:$0xf]  ;;  %v10123_v56 = vor.u32 %v12681_v20, %v10120_v22  ;;  %v9976_v55 = vld [vmem:[%s19771_s1 + $0xed8] sm:$0xf0] }
 0x361   :  { %7657 = vmatpush.bf16.msra.mxu0 %v9131_v26  ;;  %v12645_v57 = vld [vmem:[%s19771_s1 + $0xecc] sm:$0xf]  ;;  %v10104_v8 = vld [vmem:[%s19771_s1 + $0xfd8] sm:$0xf0]  ;;  %v9723_v26 = vor.u32 %v12581_v48, %v9720_v61  ;;  %v9851_v58 = vor.u32 %v12613_v52, %v9848_v4 }
 0x362   :  { %7670 = vmatpush.bf16.msra.mxu1 %v9259_v17  ;;  %v12677_v32 = vld [vmem:[%s19771_s1 + $0xfcc] sm:$0xf]  ;;  %v9979_v50 = vor.u32 %v12645_v57, %v9976_v55  ;;  %v9832_v0 = vld [vmem:[%s19771_s1 + $0xdb8] sm:$0xf0] }
 0x363   :  { %7683 = vmatpush.bf16.msra.mxu2 %v9387_v63  ;;  %v12577_v17 = vld [vmem:[%s19771_s1 + $0xcac] sm:$0xf]  ;;  %v9704_v63 = vld [vmem:[%s19771_s1 + $0xcb8] sm:$0xf0]  ;;  %v10107_v15 = vor.u32 %v12677_v32, %v10104_v8 }
 0x364   :  { %7696 = vmatpush.bf16.msra.mxu3 %v9515_v1  ;;  %v12609_v62 = vld [vmem:[%s19771_s1 + $0xdac] sm:$0xf]  ;;  %v9960_v2 = vld [vmem:[%s19771_s1 + $0xeb8] sm:$0xf0]  ;;  %v9707_v6 = vor.u32 %v12577_v17, %v9704_v63 }
 0x365   :  { %7658 = vmatpush.bf16.msra.mxu0 %v9115_v9  ;;  %v12641_v1 = vld [vmem:[%s19771_s1 + $0xeac] sm:$0xf]  ;;  %v10088_v51 = vld [vmem:[%s19771_s1 + $0xfb8] sm:$0xf0]  ;;  %v9835_v27 = vor.u32 %v12609_v62, %v9832_v0  ;;  %v7452_v33 = vpop.f32.mrf.mxu0 }
 0x366   :  { %7671 = vmatpush.bf16.msra.mxu1 %v9243_v47  ;;  %v9963_v54 = vor.u32 %v12641_v1, %v9960_v2  ;;  %v12605_v59 = vld [vmem:[%s19771_s1 + $0xd8c] sm:$0xf]  ;;  %v9816_v9 = vld [vmem:[%s19771_s1 + $0xd98] sm:$0xf0]  ;;  %v7453_v20 = vadd.f32 %v7452_v33, %v18676_v44 }
 0x367   :  { %7684 = vmatpush.bf16.msra.mxu2 %v9371_v19  ;;  %v12637_v18 = vld [vmem:[%s19771_s1 + $0xe8c] sm:$0xf]  ;;  %v9944_v38 = vld [vmem:[%s19771_s1 + $0xe98] sm:$0xf0] }
 0x368   :  { %7697 = vmatpush.bf16.msra.mxu3 %v9499_v41  ;;  %7659 = vmatmul.bf16.vlgmr.msra.gmra.mxu0 %v13882_v25  ;;  %v12673_v25 = vld [vmem:[%s19771_s1 + $0xfac] sm:$0xf]  ;;  %v10072_v19 = vld [vmem:[%s19771_s1 + $0xf98] sm:$0xf0]  ;;  %v7465_v41 = vpop.f32.mrf.mxu1 }
 0x369   :  { %7703 = vmatpush.bf16.msrb.mxu0 %v9739_v42  ;;  %7672 = vmatmul.bf16.vlgmr.msra.gmra.mxu1 %v13895_v30  ;;  %v9688_v30 = vld [vmem:[%s19771_s1 + $0xc98] sm:$0xf0]  ;;  %v10091_v39 = vor.u32 %v12673_v25, %v10088_v51  ;;  %v12669_v47 = vld [vmem:[%s19771_s1 + $0xf8c] sm:$0xf]  ;;  %v9819_v42 = vor.u32 %v12605_v59, %v9816_v9  ;;  %v7466_v52 = vadd.f32 %v7465_v41, %v7453_v20 }
 0x36a   :  { %7716 = vmatpush.bf16.msrb.mxu1 %v9867_v60  ;;  %7685 = vmatmul.bf16.vlgmr.msra.gmra.mxu2 %v13893_v29  ;;  %v12573_v29 = vld [vmem:[%s19771_s1 + $0xc8c] sm:$0xf]  ;;  %v9947_v60 = vor.u32 %v12637_v18, %v9944_v38  ;;  %v9672_v48 = vld [vmem:[%s19771_s1 + $0xc78] sm:$0xf0]  ;;  %v10075_v44 = vor.u32 %v12669_v47, %v10072_v19 }
 0x36b   :  { %7729 = vmatpush.bf16.msrb.mxu2 %v9995_v40  ;;  %7698 = vmatmul.bf16.vlgmr.msra.gmra.mxu3 %v19779_v21  ;;  %v9691_v22 = vor.u32 %v12573_v29, %v9688_v30  ;;  %v12569_v40 = vld [vmem:[%s19771_s1 + $0xc6c] sm:$0xf]  ;;  %v9928_v57 = vld [vmem:[%s19771_s1 + $0xe78] sm:$0xf0] }
 0x36c   :  { %7742 = vmatpush.bf16.msrb.mxu3 %v10123_v56  ;;  %v12601_v61 = vld [vmem:[%s19771_s1 + $0xd6c] sm:$0xf]  ;;  %v9800_v56 = vld [vmem:[%s19771_s1 + $0xd78] sm:$0xf0]  ;;  %v9675_v8 = vor.u32 %v12569_v40, %v9672_v48 }
 0x36d   :  { %7704 = vmatpush.bf16.msrb.mxu0 %v9723_v26  ;;  %v12633_v4 = vld [vmem:[%s19771_s1 + $0xe6c] sm:$0xf]  ;;  %v10056_v32 = vld [vmem:[%s19771_s1 + $0xf78] sm:$0xf0]  ;;  %v9803_v26 = vor.u32 %v12601_v61, %v9800_v56 }
 0x36e   :  { %7717 = vmatpush.bf16.msrb.mxu1 %v9851_v58  ;;  %v12665_v55 = vld [vmem:[%s19771_s1 + $0xf6c] sm:$0xf]  ;;  %v9931_v58 = vor.u32 %v12633_v4, %v9928_v57  ;;  %v9656_v17 = vld [vmem:[%s19771_s1 + $0xc58] sm:$0xf0]  ;;  %v7491_v51 = vpop.f32.mrf.mxu3 }
 0x36f   :  { %7730 = vmatpush.bf16.msrb.mxu2 %v9979_v50  ;;  %v12565_v50 = vld [vmem:[%s19771_s1 + $0xc4c] sm:$0xf]  ;;  %v10059_v62 = vor.u32 %v12665_v55, %v10056_v32  ;;  %v9784_v0 = vld [vmem:[%s19771_s1 + $0xd58] sm:$0xf0] }
 0x370   :  { %7743 = vmatpush.bf16.msrb.mxu3 %v10107_v15  ;;  %v12597_v63 = vld [vmem:[%s19771_s1 + $0xd4c] sm:$0xf]  ;;  %v7478_v15 = vpop.f32.mrf.mxu2  ;;  %v9912_v2 = vld [vmem:[%s19771_s1 + $0xe58] sm:$0xf0]  ;;  %v7467_v29 = vpop.f32.mrf.mxu1 }
 0x371   :  { %7705 = vmatpush.bf16.msrb.mxu0 %v9707_v6  ;;  %v12629_v1 = vld [vmem:[%s19771_s1 + $0xe4c] sm:$0xf]  ;;  %v7479_v25 = vadd.f32 %v7478_v15, %v7466_v52  ;;  %v10040_v6 = vld [vmem:[%s19771_s1 + $0xf58] sm:$0xf0]  ;;  %v9787_v59 = vor.u32 %v12597_v63, %v9784_v0 }
 0x372   :  { %7718 = vmatpush.bf16.msrb.mxu1 %v9835_v27  ;;  %v12661_v21 = vld [vmem:[%s19771_s1 + $0xf4c] sm:$0xf]  ;;  %v7454_v27 = vpop.f32.mrf.mxu0  ;;  %v9640_v18 = vld [vmem:[%s19771_s1 + $0xc38] sm:$0xf0] }
 0x373   :  { %7731 = vmatpush.bf16.msrb.mxu2 %v9963_v54  ;;  %v9659_v54 = vor.u32 %v12565_v50, %v9656_v17  ;;  %v18875_v30 = vadd.f32 %v7491_v51, %v7479_v25  ;;  %v12561_v9 = vld [vmem:[%s19771_s1 + $0xc2c] sm:$0xf]  ;;  %v10043_v33 = vor.u32 %v12661_v21, %v10040_v6  ;;  %v9768_v47 = vld [vmem:[%s19771_s1 + $0xd38] sm:$0xf0] }
 0x374   :  { %7744 = vmatpush.bf16.msrb.mxu3 %v10091_v39  ;;  %v9915_v39 = vor.u32 %v12629_v1, %v9912_v2  ;;  %v12593_v38 = vld [vmem:[%s19771_s1 + $0xd2c] sm:$0xf]  ;;  %v9896_v20 = vld [vmem:[%s19771_s1 + $0xe38] sm:$0xf0] }
 0x375   :  { %7706 = vmatpush.bf16.msrb.mxu0 %v9691_v22  ;;  %v12625_v19 = vld [vmem:[%s19771_s1 + $0xe2c] sm:$0xf]  ;;  %v10024_v41 = vld [vmem:[%s19771_s1 + $0xf38] sm:$0xf0]  ;;  %v9771_v48 = vor.u32 %v12593_v38, %v9768_v47 }
 0x376   :  { %7719 = vmatpush.bf16.msrb.mxu1 %v9819_v42  ;;  %v12657_v22 = vld [vmem:[%s19771_s1 + $0xf2c] sm:$0xf]  ;;  %v9643_v42 = vor.u32 %v12561_v9, %v9640_v18  ;;  %v9624_v40 = vld [vmem:[%s19771_s1 + $0xc18] sm:$0xf0]  ;;  %v9899_v61 = vor.u32 %v12625_v19, %v9896_v20  ;;  %v7493_v17 = vpop.f32.mrf.mxu3 }
 0x377   :  { %7732 = vmatpush.bf16.msrb.mxu2 %v9947_v60  ;;  %v12557_v60 = vld [vmem:[%s19771_s1 + $0xc0c] sm:$0xf]  ;;  %v9752_v52 = vld [vmem:[%s19771_s1 + $0xd18] sm:$0xf0]  ;;  %v10027_v4 = vor.u32 %v12657_v22, %v10024_v41 }
 0x378   :  { %7745 = vmatpush.bf16.msrb.mxu3 %v10075_v44  ;;  %v12589_v44 = vld [vmem:[%s19771_s1 + $0xd0c] sm:$0xf]  ;;  %v9880_v57 = vld [vmem:[%s19771_s1 + $0xe18] sm:$0xf0]  ;;  %v9627_v63 = vor.u32 %v12557_v60, %v9624_v40 }
 0x379   :  { %7707 = vmatpush.bf16.msrb.mxu0 %v9675_v8  ;;  %v12621_v56 = vld [vmem:[%s19771_s1 + $0xe0c] sm:$0xf]  ;;  %v10008_v32 = vld [vmem:[%s19771_s1 + $0xf18] sm:$0xf0]  ;;  %v7480_v8 = vpop.f32.mrf.mxu2  ;;  %v9755_v1 = vor.u32 %v12589_v44, %v9752_v52 }
 0x37a   :  { %7720 = vmatpush.bf16.msrb.mxu1 %v9803_v26  ;;  %v12653_v55 = vld [vmem:[%s19771_s1 + $0xf0c] sm:$0xf]  ;;  %v10504_v0 = vld [vmem:[%s19771_s1 + $0x12f8] sm:$0xf0]  ;;  %v9883_v2 = vor.u32 %v12621_v56, %v9880_v57 }
 0x37b   :  { %7733 = vmatpush.bf16.msrb.mxu2 %v9931_v58  ;;  %v12713_v26 = vld [vmem:[%s19771_s1 + $0x10ec] sm:$0xf]  ;;  %v10248_v58 = vld [vmem:[%s19771_s1 + $0x10f8] sm:$0xf0]  ;;  %v10011_v21 = vor.u32 %v12653_v55, %v10008_v32 }
 0x37c   :  { %7746 = vmatpush.bf16.msrb.mxu3 %v10059_v62  ;;  %v12745_v50 = vld [vmem:[%s19771_s1 + $0x11ec] sm:$0xf]  ;;  %v10376_v62 = vld [vmem:[%s19771_s1 + $0x11f8] sm:$0xf0]  ;;  %v10251_v6 = vor.u32 %v12713_v26, %v10248_v58 }
 0x37d   :  { %7708 = vmatpush.bf16.msrb.mxu0 %v9659_v54  ;;  %v12777_v15 = vld [vmem:[%s19771_s1 + $0x12ec] sm:$0xf]  ;;  %v10632_v51 = vld [vmem:[%s19771_s1 + $0x13f8] sm:$0xf0]  ;;  %v10379_v27 = vor.u32 %v12745_v50, %v10376_v62 }
 0x37e   :  { %7721 = vmatpush.bf16.msrb.mxu1 %v9787_v59  ;;  %v12809_v25 = vld [vmem:[%s19771_s1 + $0x13ec] sm:$0xf]  ;;  %v10507_v54 = vor.u32 %v12777_v15, %v10504_v0  ;;  %v10232_v59 = vld [vmem:[%s19771_s1 + $0x10d8] sm:$0xf0] }
 0x37f   :  { %7734 = vmatpush.bf16.msrb.mxu2 %v9915_v39  ;;  %v12709_v29 = vld [vmem:[%s19771_s1 + $0x10cc] sm:$0xf]  ;;  %v10635_v9 = vor.u32 %v12809_v25, %v10632_v51  ;;  %v10360_v18 = vld [vmem:[%s19771_s1 + $0x11d8] sm:$0xf0] }
 0x380   :  { %7747 = vmatpush.bf16.msrb.mxu3 %v10043_v33  ;;  %v12741_v39 = vld [vmem:[%s19771_s1 + $0x11cc] sm:$0xf]  ;;  %v10488_v33 = vld [vmem:[%s19771_s1 + $0x12d8] sm:$0xf0]  ;;  %v10235_v20 = vor.u32 %v12709_v29, %v10232_v59 }
 0x381   :  { %7709 = vmatpush.bf16.msrb.mxu0 %v9643_v42  ;;  %v12773_v38 = vld [vmem:[%s19771_s1 + $0x12cc] sm:$0xf]  ;;  %v10616_v19 = vld [vmem:[%s19771_s1 + $0x13d8] sm:$0xf0]  ;;  %v10363_v22 = vor.u32 %v12741_v39, %v10360_v18 }
 0x382   :  { %7722 = vmatpush.bf16.msrb.mxu1 %v9771_v48  ;;  %v12805_v47 = vld [vmem:[%s19771_s1 + $0x13cc] sm:$0xf]  ;;  %v10491_v41 = vor.u32 %v12773_v38, %v10488_v33  ;;  %v10216_v60 = vld [vmem:[%s19771_s1 + $0x10b8] sm:$0xf0] }
 0x383   :  { %7735 = vmatpush.bf16.msrb.mxu2 %v9899_v61  ;;  %v12705_v42 = vld [vmem:[%s19771_s1 + $0x10ac] sm:$0xf]  ;;  %v10619_v48 = vor.u32 %v12805_v47, %v10616_v19  ;;  %v10344_v61 = vld [vmem:[%s19771_s1 + $0x11b8] sm:$0xf0] }
 0x384   :  { %7748 = vmatpush.bf16.msrb.mxu3 %v10027_v4  ;;  %v12737_v40 = vld [vmem:[%s19771_s1 + $0x11ac] sm:$0xf]  ;;  %v10472_v52 = vld [vmem:[%s19771_s1 + $0x12b8] sm:$0xf0]  ;;  %v10219_v4 = vor.u32 %v12705_v42, %v10216_v60 }
 0x385   :  { %7710 = vmatpush.bf16.msrb.mxu0 %v9627_v63  ;;  %v12769_v44 = vld [vmem:[%s19771_s1 + $0x12ac] sm:$0xf]  ;;  %v10600_v56 = vld [vmem:[%s19771_s1 + $0x13b8] sm:$0xf0]  ;;  %v10347_v57 = vor.u32 %v12737_v40, %v10344_v61  ;;  %v7504_v50 = vpop.f32.mrf.mxu0 }
 0x386   :  { %7723 = vmatpush.bf16.msrb.mxu1 %v9755_v1  ;;  %v10475_v55 = vor.u32 %v12769_v44, %v10472_v52  ;;  %v12733_v32 = vld [vmem:[%s19771_s1 + $0x118c] sm:$0xf]  ;;  %v10328_v8 = vld [vmem:[%s19771_s1 + $0x1198] sm:$0xf0]  ;;  %v7505_v62 = vadd.f32 %v7504_v50, %v18875_v30  ;;  %v7517_v0 = vpop.f32.mrf.mxu1 }
 0x387   :  { %7736 = vmatpush.bf16.msrb.mxu2 %v9883_v2  ;;  %v12765_v26 = vld [vmem:[%s19771_s1 + $0x128c] sm:$0xf]  ;;  %v10456_v58 = vld [vmem:[%s19771_s1 + $0x1298] sm:$0xf0]  ;;  %v10331_v1 = vor.u32 %v12733_v32, %v10328_v8 }
 0x388   :  { %7749 = vmatpush.bf16.msrb.mxu3 %v10011_v21  ;;  %7711 = vmatmul.bf16.vlgmr.msrb.gmra.mxu0 %v14092_v23  ;;  %v12801_v23 = vld [vmem:[%s19771_s1 + $0x13ac] sm:$0xf]  ;;  %v10584_v63 = vld [vmem:[%s19771_s1 + $0x1398] sm:$0xf0]  ;;  %v10459_v2 = vor.u32 %v12765_v26, %v10456_v58 }
 0x389   :  { %7755 = vmatpush.bf16.msra.mxu0 %v10251_v6  ;;  %7724 = vmatmul.bf16.vlgmr.msrb.gmra.mxu1 %v14105_v31  ;;  %v10200_v31 = vld [vmem:[%s19771_s1 + $0x1098] sm:$0xf0]  ;;  %v12797_v17 = vld [vmem:[%s19771_s1 + $0x138c] sm:$0xf]  ;;  %v7518_v6 = vadd.f32 %v7517_v0, %v7505_v62 }
 0x38a   :  { %7768 = vmatpush.bf16.msra.mxu1 %v10379_v27  ;;  %7737 = vmatmul.bf16.vlgmr.msrb.gmra.mxu2 %v14103_v28  ;;  %v12701_v28 = vld [vmem:[%s19771_s1 + $0x108c] sm:$0xf]  ;;  %v10184_v51 = vld [vmem:[%s19771_s1 + $0x1078] sm:$0xf0]  ;;  %v10587_v30 = vor.u32 %v12797_v17, %v10584_v63 }
 0x38b   :  { %7781 = vmatpush.bf16.msra.mxu2 %v10507_v54  ;;  %7750 = vmatmul.bf16.vlgmr.msrb.gmra.mxu3 %v14113_v35  ;;  %v10603_v35 = vor.u32 %v12801_v23, %v10600_v56  ;;  %v10203_v15 = vor.u32 %v12701_v28, %v10200_v31  ;;  %v12697_v25 = vld [vmem:[%s19771_s1 + $0x106c] sm:$0xf]  ;;  %v10312_v27 = vld [vmem:[%s19771_s1 + $0x1178] sm:$0xf0] }
 0x38c   :  { %7794 = vmatpush.bf16.msra.mxu3 %v10635_v9  ;;  %v12729_v21 = vld [vmem:[%s19771_s1 + $0x116c] sm:$0xf]  ;;  %v10440_v29 = vld [vmem:[%s19771_s1 + $0x1278] sm:$0xf0]  ;;  %v10187_v9 = vor.u32 %v12697_v25, %v10184_v51 }
 0x38d   :  { %7756 = vmatpush.bf16.msra.mxu0 %v10235_v20  ;;  %v12761_v54 = vld [vmem:[%s19771_s1 + $0x126c] sm:$0xf]  ;;  %v10568_v39 = vld [vmem:[%s19771_s1 + $0x1378] sm:$0xf0]  ;;  %v10315_v18 = vor.u32 %v12729_v21, %v10312_v27  ;;  %v7506_v52 = vpop.f32.mrf.mxu0 }
 0x38e   :  { %7769 = vmatpush.bf16.msra.mxu1 %v10363_v22  ;;  %v12793_v59 = vld [vmem:[%s19771_s1 + $0x136c] sm:$0xf]  ;;  %v10443_v38 = vor.u32 %v12761_v54, %v10440_v29  ;;  %v10168_v47 = vld [vmem:[%s19771_s1 + $0x1058] sm:$0xf0]  ;;  %v7530_v22 = vpop.f32.mrf.mxu2  ;;  %v7519_v56 = vpop.f32.mrf.mxu1 }
 0x38f   :  { %7782 = vmatpush.bf16.msra.mxu2 %v10491_v41  ;;  %v12693_v33 = vld [vmem:[%s19771_s1 + $0x104c] sm:$0xf]  ;;  %v10571_v20 = vor.u32 %v12793_v59, %v10568_v39  ;;  %v10296_v41 = vld [vmem:[%s19771_s1 + $0x1158] sm:$0xf0]  ;;  %v7531_v40 = vadd.f32 %v7530_v22, %v7518_v6 }
 0x390   :  { %7795 = vmatpush.bf16.msra.mxu3 %v10619_v48  ;;  %v12725_v19 = vld [vmem:[%s19771_s1 + $0x114c] sm:$0xf]  ;;  %v10424_v60 = vld [vmem:[%s19771_s1 + $0x1258] sm:$0xf0]  ;;  %v7543_v48 = vpop.f32.mrf.mxu3  ;;  %v10171_v23 = vor.u32 %v12693_v33, %v10168_v47 }
 0x391   :  { %7757 = vmatpush.bf16.msra.mxu0 %v10219_v4  ;;  %v12757_v42 = vld [vmem:[%s19771_s1 + $0x124c] sm:$0xf]  ;;  %v10552_v44 = vld [vmem:[%s19771_s1 + $0x1358] sm:$0xf0]  ;;  %v19074_v4 = vadd.f32 %v7543_v48, %v7531_v40 }
 0x392   :  { %7770 = vmatpush.bf16.msra.mxu1 %v10347_v57  ;;  %v12789_v61 = vld [vmem:[%s19771_s1 + $0x134c] sm:$0xf]  ;;  %v10299_v57 = vor.u32 %v12725_v19, %v10296_v41  ;;  %v10152_v31 = vld [vmem:[%s19771_s1 + $0x1038] sm:$0xf0] }
 0x393   :  { %7783 = vmatpush.bf16.msra.mxu2 %v10475_v55  ;;  %v10427_v55 = vor.u32 %v12757_v42, %v10424_v60  ;;  %v12689_v28 = vld [vmem:[%s19771_s1 + $0x102c] sm:$0xf]  ;;  %v10280_v8 = vld [vmem:[%s19771_s1 + $0x1138] sm:$0xf0] }
 0x394   :  { %7796 = vmatpush.bf16.msra.mxu3 %v10603_v35  ;;  %v12721_v32 = vld [vmem:[%s19771_s1 + $0x112c] sm:$0xf]  ;;  %v10555_v35 = vor.u32 %v12789_v61, %v10552_v44  ;;  %v10408_v58 = vld [vmem:[%s19771_s1 + $0x1238] sm:$0xf0]  ;;  %v10155_v63 = vor.u32 %v12689_v28, %v10152_v31 }
 0x395   :  { %7758 = vmatpush.bf16.msra.mxu0 %v10203_v15  ;;  %v12753_v26 = vld [vmem:[%s19771_s1 + $0x122c] sm:$0xf]  ;;  %v10536_v17 = vld [vmem:[%s19771_s1 + $0x1338] sm:$0xf0]  ;;  %v10283_v0 = vor.u32 %v12721_v32, %v10280_v8 }
 0x396   :  { %7771 = vmatpush.bf16.msra.mxu1 %v10331_v1  ;;  %v12785_v50 = vld [vmem:[%s19771_s1 + $0x132c] sm:$0xf]  ;;  %v10136_v15 = vld [vmem:[%s19771_s1 + $0x1018] sm:$0xf0]  ;;  %v10411_v1 = vor.u32 %v12753_v26, %v10408_v58  ;;  %v7532_v54 = vpop.f32.mrf.mxu2 }
 0x397   :  { %7784 = vmatpush.bf16.msra.mxu2 %v10459_v2  ;;  %v12685_v62 = vld [vmem:[%s19771_s1 + $0x100c] sm:$0xf]  ;;  %v10264_v25 = vld [vmem:[%s19771_s1 + $0x1118] sm:$0xf0]  ;;  %v10539_v21 = vor.u32 %v12785_v50, %v10536_v17 }
 0x398   :  { %7797 = vmatpush.bf16.msra.mxu3 %v10587_v30  ;;  %v12717_v2 = vld [vmem:[%s19771_s1 + $0x110c] sm:$0xf]  ;;  %v10392_v30 = vld [vmem:[%s19771_s1 + $0x1218] sm:$0xf0] }
 0x399   :  { %7759 = vmatpush.bf16.msra.mxu0 %v10187_v9  ;;  %v12749_v51 = vld [vmem:[%s19771_s1 + $0x120c] sm:$0xf]  ;;  %v10520_v27 = vld [vmem:[%s19771_s1 + $0x1318] sm:$0xf0]  ;;  %v7545_v9 = vpop.f32.mrf.mxu3  ;;  %v10267_v19 = vor.u32 %v12717_v2, %v10264_v25 }
 0x39a   :  { %7772 = vmatpush.bf16.msra.mxu1 %v10315_v18  ;;  %v12781_v6 = vld [vmem:[%s19771_s1 + $0x130c] sm:$0xf]  ;;  %v10760_v59 = vld [vmem:[%s19771_s1 + $0x14f8] sm:$0xf0]  ;;  %v10139_v18 = vor.u32 %v12685_v62, %v10136_v15 }
 0x39b   :  { %7785 = vmatpush.bf16.msra.mxu2 %v10443_v38  ;;  %v12841_v29 = vld [vmem:[%s19771_s1 + $0x14ec] sm:$0xf]  ;;  %v10888_v38 = vld [vmem:[%s19771_s1 + $0x15f8] sm:$0xf0]  ;;  %v10523_v42 = vor.u32 %v12781_v6, %v10520_v27 }
 0x39c   :  { %7798 = vmatpush.bf16.msra.mxu3 %v10571_v20  ;;  %v12873_v39 = vld [vmem:[%s19771_s1 + $0x15ec] sm:$0xf]  ;;  %v11016_v47 = vld [vmem:[%s19771_s1 + $0x16f8] sm:$0xf0]  ;;  %v10395_v20 = vor.u32 %v12749_v51, %v10392_v30  ;;  %v10763_v60 = vor.u32 %v12841_v29, %v10760_v59 }
 0x39d   :  { %7760 = vmatpush.bf16.msra.mxu0 %v10171_v23  ;;  %v12905_v33 = vld [vmem:[%s19771_s1 + $0x16ec] sm:$0xf]  ;;  %v11144_v41 = vld [vmem:[%s19771_s1 + $0x17f8] sm:$0xf0]  ;;  %v10891_v40 = vor.u32 %v12873_v39, %v10888_v38 }
 0x39e   :  { %7773 = vmatpush.bf16.msra.mxu1 %v10299_v57  ;;  %v12937_v22 = vld [vmem:[%s19771_s1 + $0x17ec] sm:$0xf]  ;;  %v11019_v48 = vor.u32 %v12905_v33, %v11016_v47  ;;  %v10744_v44 = vld [vmem:[%s19771_s1 + $0x14d8] sm:$0xf0] }
 0x39f   :  { %7786 = vmatpush.bf16.msra.mxu2 %v10427_v55  ;;  %v12837_v61 = vld [vmem:[%s19771_s1 + $0x14cc] sm:$0xf]  ;;  %v11147_v23 = vor.u32 %v12937_v22, %v11144_v41  ;;  %v10872_v56 = vld [vmem:[%s19771_s1 + $0x15d8] sm:$0xf0] }
 0x3a0   :  { %7799 = vmatpush.bf16.msra.mxu3 %v10555_v35  ;;  %v12869_v52 = vld [vmem:[%s19771_s1 + $0x15cc] sm:$0xf]  ;;  %v11000_v55 = vld [vmem:[%s19771_s1 + $0x16d8] sm:$0xf0]  ;;  %v10747_v32 = vor.u32 %v12837_v61, %v10744_v44 }
 0x3a1   :  { %7761 = vmatpush.bf16.msra.mxu0 %v10155_v63  ;;  %v12901_v57 = vld [vmem:[%s19771_s1 + $0x16cc] sm:$0xf]  ;;  %v11128_v31 = vld [vmem:[%s19771_s1 + $0x17d8] sm:$0xf0]  ;;  %v10875_v35 = vor.u32 %v12869_v52, %v10872_v56 }
 0x3a2   :  { %7774 = vmatpush.bf16.msra.mxu1 %v10283_v0  ;;  %v12933_v28 = vld [vmem:[%s19771_s1 + $0x17cc] sm:$0xf]  ;;  %v11003_v8 = vor.u32 %v12901_v57, %v11000_v55  ;;  %v10728_v58 = vld [vmem:[%s19771_s1 + $0x14b8] sm:$0xf0] }
 0x3a3   :  { %7787 = vmatpush.bf16.msra.mxu2 %v10411_v1  ;;  %v12833_v26 = vld [vmem:[%s19771_s1 + $0x14ac] sm:$0xf]  ;;  %v11131_v17 = vor.u32 %v12933_v28, %v11128_v31  ;;  %v10856_v63 = vld [vmem:[%s19771_s1 + $0x15b8] sm:$0xf0] }
 0x3a4   :  { %7800 = vmatpush.bf16.msra.mxu3 %v10539_v21  ;;  %v12865_v50 = vld [vmem:[%s19771_s1 + $0x15ac] sm:$0xf]  ;;  %v10984_v15 = vld [vmem:[%s19771_s1 + $0x16b8] sm:$0xf0]  ;;  %v10731_v1 = vor.u32 %v12833_v26, %v10728_v58 }
 0x3a5   :  { %7762 = vmatpush.bf16.msra.mxu0 %v10139_v18  ;;  %v12897_v62 = vld [vmem:[%s19771_s1 + $0x16ac] sm:$0xf]  ;;  %v11112_v0 = vld [vmem:[%s19771_s1 + $0x17b8] sm:$0xf0]  ;;  %v7556_v9 = vpop.f32.mrf.mxu0 }
 0x3a6   :  { %7775 = vmatpush.bf16.msra.mxu1 %v10267_v19  ;;  %v12829_v2 = vld [vmem:[%s19771_s1 + $0x148c] sm:$0xf]  ;;  %v10712_v25 = vld [vmem:[%s19771_s1 + $0x1498] sm:$0xf0]  ;;  %v7569_v22 = vpop.f32.mrf.mxu1 }
 0x3a7   :  { %7788 = vmatpush.bf16.msra.mxu2 %v10395_v20  ;;  %v12861_v51 = vld [vmem:[%s19771_s1 + $0x158c] sm:$0xf]  ;;  %v10840_v6 = vld [vmem:[%s19771_s1 + $0x1598] sm:$0xf0]  ;;  %v10715_v39 = vor.u32 %v12829_v2, %v10712_v25 }
 0x3a8   :  { %7801 = vmatpush.bf16.msra.mxu3 %v10523_v42  ;;  %7763 = vmatmul.bf16.vlgmr.msra.gmra.mxu0 %v14302_v37  ;;  %v12929_v37 = vld [vmem:[%s19771_s1 + $0x17ac] sm:$0xf]  ;;  %v10968_v54 = vld [vmem:[%s19771_s1 + $0x1698] sm:$0xf0]  ;;  %v10843_v18 = vor.u32 %v12861_v51, %v10840_v6 }
 0x3a9   :  { %7807 = vmatpush.bf16.msrb.mxu0 %v10763_v60  ;;  %7776 = vmatmul.bf16.vlgmr.msra.gmra.mxu1 %v14315_v46  ;;  %v10987_v46 = vor.u32 %v12897_v62, %v10984_v15  ;;  %v11115_v30 = vor.u32 %v12929_v37, %v11112_v0  ;;  %v12893_v27 = vld [vmem:[%s19771_s1 + $0x168c] sm:$0xf]  ;;  %v11096_v59 = vld [vmem:[%s19771_s1 + $0x1798] sm:$0xf0] }
 0x3aa   :  { %7820 = vmatpush.bf16.msrb.mxu1 %v10891_v40  ;;  %7789 = vmatmul.bf16.vlgmr.msra.gmra.mxu2 %v14313_v45  ;;  %v10859_v45 = vor.u32 %v12865_v50, %v10856_v63  ;;  %v12925_v29 = vld [vmem:[%s19771_s1 + $0x178c] sm:$0xf]  ;;  %v10971_v38 = vor.u32 %v12893_v27, %v10968_v54  ;;  %v10696_v47 = vld [vmem:[%s19771_s1 + $0x1478] sm:$0xf0] }
 0x3ab   :  { %7833 = vmatpush.bf16.msrb.mxu2 %v11019_v48  ;;  %7802 = vmatmul.bf16.vlgmr.msra.gmra.mxu3 %v14323_v49  ;;  %v13199_v49 = vld [vmem:[%s19773_s2] sm:$0xf]  ;;  %v12825_v33 = vld [vmem:[%s19771_s1 + $0x146c] sm:$0xf]  ;;  %v11099_v41 = vor.u32 %v12925_v29, %v11096_v59  ;;  %v10824_v42 = vld [vmem:[%s19771_s1 + $0x1578] sm:$0xf0] }
 0x3ac   :  { %7846 = vmatpush.bf16.msrb.mxu3 %v11147_v23  ;;  %v1062_v21 = vperm.slane %v13199_v49, 3  ;;  %v12857_v19 = vld [vmem:[%s19771_s1 + $0x156c] sm:$0xf]  ;;  %v10952_v40 = vld [vmem:[%s19771_s1 + $0x1678] sm:$0xf0]  ;;  %v10699_v52 = vor.u32 %v12825_v33, %v10696_v47 }
 0x3ad   :  { %7808 = vmatpush.bf16.msrb.mxu0 %v10747_v32  ;;  %v12889_v60 = vld [vmem:[%s19771_s1 + $0x166c] sm:$0xf]  ;;  %v11080_v61 = vld [vmem:[%s19771_s1 + $0x1778] sm:$0xf0]  ;;  %v10827_v23 = vor.u32 %v12857_v19, %v10824_v42  ;;  %v7582_v31 = vpop.f32.mrf.mxu2  ;;  %v7558_v37 = vpop.f32.mrf.mxu0 }
 0x3ae   :  { %7821 = vmatpush.bf16.msrb.mxu1 %v10875_v35  ;;  %v7557_v20 = vadd.f32 %v7556_v9, %v1062_v21  ;;  %v12921_v48 = vld [vmem:[%s19771_s1 + $0x176c] sm:$0xf]  ;;  %v10955_v56 = vor.u32 %v12889_v60, %v10952_v40  ;;  %v10680_v55 = vld [vmem:[%s19771_s1 + $0x1458] sm:$0xf0]  ;;  %v7595_v50 = vpop.f32.mrf.mxu3  ;;  %v7571_v25 = vpop.f32.mrf.mxu1 }
 0x3af   :  { %7834 = vmatpush.bf16.msrb.mxu2 %v11003_v8  ;;  %v12821_v57 = vld [vmem:[%s19771_s1 + $0x144c] sm:$0xf]  ;;  %v11083_v32 = vor.u32 %v12921_v48, %v11080_v61  ;;  %v10808_v35 = vld [vmem:[%s19771_s1 + $0x1558] sm:$0xf0] }
 0x3b0   :  { %7847 = vmatpush.bf16.msrb.mxu3 %v11131_v17  ;;  %v7570_v44 = vadd.f32 %v7569_v22, %v7557_v20  ;;  %v12853_v28 = vld [vmem:[%s19771_s1 + $0x154c] sm:$0xf]  ;;  %v10936_v26 = vld [vmem:[%s19771_s1 + $0x1658] sm:$0xf0]  ;;  %v10683_v62 = vor.u32 %v12821_v57, %v10680_v55 }
 0x3b1   :  { %7809 = vmatpush.bf16.msrb.mxu0 %v10731_v1  ;;  %v12885_v8 = vld [vmem:[%s19771_s1 + $0x164c] sm:$0xf]  ;;  %v11064_v63 = vld [vmem:[%s19771_s1 + $0x1758] sm:$0xf0]  ;;  %v10811_v0 = vor.u32 %v12853_v28, %v10808_v35 }
 0x3b2   :  { %7822 = vmatpush.bf16.msrb.mxu1 %v10859_v45  ;;  %v7583_v58 = vadd.f32 %v7582_v31, %v7570_v44  ;;  %v12917_v17 = vld [vmem:[%s19771_s1 + $0x174c] sm:$0xf]  ;;  %v10939_v1 = vor.u32 %v12885_v8, %v10936_v26  ;;  %v10664_v45 = vld [vmem:[%s19771_s1 + $0x1438] sm:$0xf0] }
 0x3b3   :  { %7835 = vmatpush.bf16.msrb.mxu2 %v10987_v46  ;;  %v12817_v2 = vld [vmem:[%s19771_s1 + $0x142c] sm:$0xf]  ;;  %v11067_v51 = vor.u32 %v12917_v17, %v11064_v63  ;;  %v10792_v49 = vld [vmem:[%s19771_s1 + $0x1538] sm:$0xf0] }
 0x3b4   :  { %7848 = vmatpush.bf16.msrb.mxu3 %v11115_v30  ;;  %v19275_v15 = vadd.f32 %v7595_v50, %v7583_v58  ;;  %v12849_v46 = vld [vmem:[%s19771_s1 + $0x152c] sm:$0xf]  ;;  %v10920_v30 = vld [vmem:[%s19771_s1 + $0x1638] sm:$0xf0]  ;;  %v10667_v54 = vor.u32 %v12817_v2, %v10664_v45 }
 0x3b5   :  { %7810 = vmatpush.bf16.msrb.mxu0 %v10715_v39  ;;  %v12881_v21 = vld [vmem:[%s19771_s1 + $0x162c] sm:$0xf]  ;;  %v11048_v27 = vld [vmem:[%s19771_s1 + $0x1738] sm:$0xf0]  ;;  %v10795_v39 = vor.u32 %v12849_v46, %v10792_v49  ;;  %v7584_v47 = vpop.f32.mrf.mxu2 }
 0x3b6   :  { %7823 = vmatpush.bf16.msrb.mxu1 %v10843_v18  ;;  %v12913_v6 = vld [vmem:[%s19771_s1 + $0x172c] sm:$0xf]  ;;  %v10648_v59 = vld [vmem:[%s19771_s1 + $0x1418] sm:$0xf0]  ;;  %v10923_v9 = vor.u32 %v12881_v21, %v10920_v30  ;;  %v7597_v42 = vpop.f32.mrf.mxu3 }
 0x3b7   :  { %7836 = vmatpush.bf16.msrb.mxu2 %v10971_v38  ;;  %v12813_v29 = vld [vmem:[%s19771_s1 + $0x140c] sm:$0xf]  ;;  %v10776_v38 = vld [vmem:[%s19771_s1 + $0x1518] sm:$0xf0]  ;;  %v11051_v19 = vor.u32 %v12913_v6, %v11048_v27 }
 0x3b8   :  { %7849 = vmatpush.bf16.msrb.mxu3 %v11099_v41  ;;  %v12845_v18 = vld [vmem:[%s19771_s1 + $0x150c] sm:$0xf]  ;;  %v10904_v20 = vld [vmem:[%s19771_s1 + $0x1618] sm:$0xf0]  ;;  %v10651_v61 = vor.u32 %v12813_v29, %v10648_v59 }
 0x3b9   :  { %7811 = vmatpush.bf16.msrb.mxu0 %v10699_v52  ;;  %v12877_v33 = vld [vmem:[%s19771_s1 + $0x160c] sm:$0xf]  ;;  %v11032_v41 = vld [vmem:[%s19771_s1 + $0x1718] sm:$0xf0] }
 0x3ba   :  { %7824 = vmatpush.bf16.msrb.mxu1 %v10827_v23  ;;  %v12909_v22 = vld [vmem:[%s19771_s1 + $0x170c] sm:$0xf]  ;;  %v11272_v40 = vld [vmem:[%s19771_s1 + $0x18f8] sm:$0xf0]  ;;  %v10907_v57 = vor.u32 %v12877_v33, %v10904_v20 }
 0x3bb   :  { %7837 = vmatpush.bf16.msrb.mxu2 %v10955_v56  ;;  %v12969_v60 = vld [vmem:[%s19771_s1 + $0x18ec] sm:$0xf]  ;;  %v11400_v44 = vld [vmem:[%s19771_s1 + $0x19f8] sm:$0xf0]  ;;  %v10779_v56 = vor.u32 %v12845_v18, %v10776_v38  ;;  %v11035_v31 = vor.u32 %v12909_v22, %v11032_v41 }
 0x3bc   :  { %7850 = vmatpush.bf16.msrb.mxu3 %v11083_v32  ;;  %v13001_v48 = vld [vmem:[%s19771_s1 + $0x19ec] sm:$0xf]  ;;  %v11528_v23 = vld [vmem:[%s19771_s1 + $0x1af8] sm:$0xf0]  ;;  %v11275_v32 = vor.u32 %v12969_v60, %v11272_v40 }
 0x3bd   :  { %7812 = vmatpush.bf16.msrb.mxu0 %v10683_v62  ;;  %v13033_v52 = vld [vmem:[%s19771_s1 + $0x1aec] sm:$0xf]  ;;  %v11656_v28 = vld [vmem:[%s19771_s1 + $0x1bf8] sm:$0xf0]  ;;  %v11403_v35 = vor.u32 %v13001_v48, %v11400_v44 }
 0x3be   :  { %7825 = vmatpush.bf16.msrb.mxu1 %v10811_v0  ;;  %v13065_v55 = vld [vmem:[%s19771_s1 + $0x1bec] sm:$0xf]  ;;  %v11531_v8 = vor.u32 %v13033_v52, %v11528_v23  ;;  %v11256_v58 = vld [vmem:[%s19771_s1 + $0x18d8] sm:$0xf0] }
 0x3bf   :  { %7838 = vmatpush.bf16.msrb.mxu2 %v10939_v1  ;;  %v12965_v26 = vld [vmem:[%s19771_s1 + $0x18cc] sm:$0xf]  ;;  %v11659_v17 = vor.u32 %v13065_v55, %v11656_v28  ;;  %v11384_v63 = vld [vmem:[%s19771_s1 + $0x19d8] sm:$0xf0] }
 0x3c0   :  { %7851 = vmatpush.bf16.msrb.mxu3 %v11067_v51  ;;  %v12997_v50 = vld [vmem:[%s19771_s1 + $0x19cc] sm:$0xf]  ;;  %v11512_v37 = vld [vmem:[%s19771_s1 + $0x1ad8] sm:$0xf0]  ;;  %v11259_v2 = vor.u32 %v12965_v26, %v11256_v58 }
 0x3c1   :  { %7813 = vmatpush.bf16.msrb.mxu0 %v10667_v54  ;;  %v13029_v62 = vld [vmem:[%s19771_s1 + $0x1acc] sm:$0xf]  ;;  %v11640_v1 = vld [vmem:[%s19771_s1 + $0x1bd8] sm:$0xf0]  ;;  %v11387_v45 = vor.u32 %v12997_v50, %v11384_v63 }
 0x3c2   :  { %7826 = vmatpush.bf16.msrb.mxu1 %v10795_v39  ;;  %v13061_v0 = vld [vmem:[%s19771_s1 + $0x1bcc] sm:$0xf]  ;;  %v11515_v46 = vor.u32 %v13029_v62, %v11512_v37  ;;  %v11240_v51 = vld [vmem:[%s19771_s1 + $0x18b8] sm:$0xf0] }
 0x3c3   :  { %7839 = vmatpush.bf16.msrb.mxu2 %v10923_v9  ;;  %v12961_v25 = vld [vmem:[%s19771_s1 + $0x18ac] sm:$0xf]  ;;  %v11643_v21 = vor.u32 %v13061_v0, %v11640_v1  ;;  %v11368_v30 = vld [vmem:[%s19771_s1 + $0x19b8] sm:$0xf0] }
 0x3c4   :  { %7852 = vmatpush.bf16.msrb.mxu3 %v11051_v19  ;;  %v12993_v49 = vld [vmem:[%s19771_s1 + $0x19ac] sm:$0xf]  ;;  %v11496_v27 = vld [vmem:[%s19771_s1 + $0x1ab8] sm:$0xf0]  ;;  %v11243_v29 = vor.u32 %v12961_v25, %v11240_v51 }
 0x3c5   :  { %7814 = vmatpush.bf16.msrb.mxu0 %v10651_v61  ;;  %v13025_v6 = vld [vmem:[%s19771_s1 + $0x1aac] sm:$0xf]  ;;  %v11624_v54 = vld [vmem:[%s19771_s1 + $0x1bb8] sm:$0xf0]  ;;  %v11371_v59 = vor.u32 %v12993_v49, %v11368_v30  ;;  %v7608_v22 = vpop.f32.mrf.mxu0 }
 0x3c6   :  { %7827 = vmatpush.bf16.msrb.mxu1 %v10779_v56  ;;  %v11499_v39 = vor.u32 %v13025_v6, %v11496_v27  ;;  %v12989_v9 = vld [vmem:[%s19771_s1 + $0x198c] sm:$0xf]  ;;  %v11352_v18 = vld [vmem:[%s19771_s1 + $0x1998] sm:$0xf0]  ;;  %v7609_v61 = vadd.f32 %v7608_v22, %v19275_v15  ;;  %v7621_v44 = vpop.f32.mrf.mxu1 }
 0x3c7   :  { %7840 = vmatpush.bf16.msrb.mxu2 %v10907_v57  ;;  %v13021_v38 = vld [vmem:[%s19771_s1 + $0x1a8c] sm:$0xf]  ;;  %v11480_v33 = vld [vmem:[%s19771_s1 + $0x1a98] sm:$0xf0]  ;;  %v11355_v41 = vor.u32 %v12989_v9, %v11352_v18 }
 0x3c8   :  { %7853 = vmatpush.bf16.msrb.mxu3 %v11035_v31  ;;  %7815 = vmatmul.bf16.vlgmr.msrb.gmra.mxu0 %v14517_v7  ;;  %v13057_v7 = vld [vmem:[%s19771_s1 + $0x1bac] sm:$0xf]  ;;  %v11608_v19 = vld [vmem:[%s19771_s1 + $0x1b98] sm:$0xf0]  ;;  %v11483_v42 = vor.u32 %v13021_v38, %v11480_v33  ;;  %v7622_v28 = vadd.f32 %v7621_v44, %v7609_v61 }
 0x3c9   :  { %7859 = vmatpush.bf16.msra.mxu0 %v11275_v32  ;;  %7828 = vmatmul.bf16.vlgmr.msrb.gmra.mxu1 %v14530_v12  ;;  %v11224_v12 = vld [vmem:[%s19771_s1 + $0x1898] sm:$0xf0]  ;;  %v13053_v47 = vld [vmem:[%s19771_s1 + $0x1b8c] sm:$0xf] }
 0x3ca   :  { %7872 = vmatpush.bf16.msra.mxu1 %v11403_v35  ;;  %7841 = vmatmul.bf16.vlgmr.msrb.gmra.mxu2 %v14528_v11  ;;  %v12957_v11 = vld [vmem:[%s19771_s1 + $0x188c] sm:$0xf]  ;;  %v11208_v40 = vld [vmem:[%s19771_s1 + $0x1878] sm:$0xf0]  ;;  %v11611_v52 = vor.u32 %v13053_v47, %v11608_v19 }
 0x3cb   :  { %7885 = vmatpush.bf16.msra.mxu2 %v11531_v8  ;;  %7854 = vmatmul.bf16.vlgmr.msrb.gmra.mxu3 %v14538_v16  ;;  %v11627_v16 = vor.u32 %v13057_v7, %v11624_v54  ;;  %v11227_v20 = vor.u32 %v12957_v11, %v11224_v12  ;;  %v12953_v60 = vld [vmem:[%s19771_s1 + $0x186c] sm:$0xf]  ;;  %v11336_v23 = vld [vmem:[%s19771_s1 + $0x1978] sm:$0xf0] }
 0x3cc   :  { %7898 = vmatpush.bf16.msra.mxu3 %v11659_v17  ;;  %v12985_v48 = vld [vmem:[%s19771_s1 + $0x196c] sm:$0xf]  ;;  %v11464_v57 = vld [vmem:[%s19771_s1 + $0x1a78] sm:$0xf0]  ;;  %v11211_v31 = vor.u32 %v12953_v60, %v11208_v40 }
 0x3cd   :  { %7860 = vmatpush.bf16.msra.mxu0 %v11259_v2  ;;  %v13017_v56 = vld [vmem:[%s19771_s1 + $0x1a6c] sm:$0xf]  ;;  %v11592_v15 = vld [vmem:[%s19771_s1 + $0x1b78] sm:$0xf0]  ;;  %v11339_v32 = vor.u32 %v12985_v48, %v11336_v23  ;;  %v7634_v50 = vpop.f32.mrf.mxu2  ;;  %v7610_v51 = vpop.f32.mrf.mxu0 }
 0x3ce   :  { %7873 = vmatpush.bf16.msra.mxu1 %v11387_v45  ;;  %v13049_v55 = vld [vmem:[%s19771_s1 + $0x1b6c] sm:$0xf]  ;;  %v11467_v35 = vor.u32 %v13017_v56, %v11464_v57  ;;  %v11192_v26 = vld [vmem:[%s19771_s1 + $0x1858] sm:$0xf0]  ;;  %v7635_v0 = vadd.f32 %v7634_v50, %v7622_v28  ;;  %v7647_v1 = vpop.f32.mrf.mxu3  ;;  %v7623_v7 = vpop.f32.mrf.mxu1 }
 0x3cf   :  { %7886 = vmatpush.bf16.msra.mxu2 %v11515_v46  ;;  %v12949_v8 = vld [vmem:[%s19771_s1 + $0x184c] sm:$0xf]  ;;  %v11595_v17 = vor.u32 %v13049_v55, %v11592_v15  ;;  %v11320_v63 = vld [vmem:[%s19771_s1 + $0x1958] sm:$0xf0] }
 0x3d0   :  { %7899 = vmatpush.bf16.msra.mxu3 %v11643_v21  ;;  %v12981_v58 = vld [vmem:[%s19771_s1 + $0x194c] sm:$0xf]  ;;  %v11448_v37 = vld [vmem:[%s19771_s1 + $0x1a58] sm:$0xf0]  ;;  %v11195_v46 = vor.u32 %v12949_v8, %v11192_v26  ;;  %v19474_v25 = vadd.f32 %v7647_v1, %v7635_v0 }
 0x3d1   :  { %7861 = vmatpush.bf16.msra.mxu0 %v11243_v29  ;;  %v13013_v62 = vld [vmem:[%s19771_s1 + $0x1a4c] sm:$0xf]  ;;  %v11576_v45 = vld [vmem:[%s19771_s1 + $0x1b58] sm:$0xf0]  ;;  %v11323_v49 = vor.u32 %v12981_v58, %v11320_v63 }
 0x3d2   :  { %7874 = vmatpush.bf16.msra.mxu1 %v11371_v59  ;;  %v13045_v2 = vld [vmem:[%s19771_s1 + $0x1b4c] sm:$0xf]  ;;  %v11451_v21 = vor.u32 %v13013_v62, %v11448_v37  ;;  %v11176_v6 = vld [vmem:[%s19771_s1 + $0x1838] sm:$0xf0] }
 0x3d3   :  { %7887 = vmatpush.bf16.msra.mxu2 %v11499_v39  ;;  %v12945_v30 = vld [vmem:[%s19771_s1 + $0x182c] sm:$0xf]  ;;  %v11579_v54 = vor.u32 %v13045_v2, %v11576_v45  ;;  %v11304_v29 = vld [vmem:[%s19771_s1 + $0x1938] sm:$0xf0] }
 0x3d4   :  { %7900 = vmatpush.bf16.msra.mxu3 %v11627_v16  ;;  %v12977_v27 = vld [vmem:[%s19771_s1 + $0x192c] sm:$0xf]  ;;  %v11432_v39 = vld [vmem:[%s19771_s1 + $0x1a38] sm:$0xf0]  ;;  %v11179_v9 = vor.u32 %v12945_v30, %v11176_v6 }
 0x3d5   :  { %7862 = vmatpush.bf16.msra.mxu0 %v11227_v20  ;;  %v13009_v59 = vld [vmem:[%s19771_s1 + $0x1a2c] sm:$0xf]  ;;  %v11560_v12 = vld [vmem:[%s19771_s1 + $0x1b38] sm:$0xf0]  ;;  %v11307_v38 = vor.u32 %v12977_v27, %v11304_v29  ;;  %v7636_v22 = vpop.f32.mrf.mxu2 }
 0x3d6   :  { %7875 = vmatpush.bf16.msra.mxu1 %v11355_v41  ;;  %v13041_v11 = vld [vmem:[%s19771_s1 + $0x1b2c] sm:$0xf]  ;;  %v11160_v18 = vld [vmem:[%s19771_s1 + $0x1818] sm:$0xf0]  ;;  %v11435_v33 = vor.u32 %v13009_v59, %v11432_v39  ;;  %v7649_v48 = vpop.f32.mrf.mxu3 }
 0x3d7   :  { %7888 = vmatpush.bf16.msra.mxu2 %v11483_v42  ;;  %v12941_v16 = vld [vmem:[%s19771_s1 + $0x180c] sm:$0xf]  ;;  %v11288_v19 = vld [vmem:[%s19771_s1 + $0x1918] sm:$0xf0]  ;;  %v11563_v41 = vor.u32 %v13041_v11, %v11560_v12 }
 0x3d8   :  { %7901 = vmatpush.bf16.msra.mxu3 %v11611_v52  ;;  %v12973_v47 = vld [vmem:[%s19771_s1 + $0x190c] sm:$0xf]  ;;  %v11416_v42 = vld [vmem:[%s19771_s1 + $0x1a18] sm:$0xf0]  ;;  %v11163_v23 = vor.u32 %v12941_v16, %v11160_v18 }
 0x3d9   :  { %7863 = vmatpush.bf16.msra.mxu0 %v11211_v31  ;;  %v13005_v20 = vld [vmem:[%s19771_s1 + $0x1a0c] sm:$0xf]  ;;  %v11544_v40 = vld [vmem:[%s19771_s1 + $0x1b18] sm:$0xf0]  ;;  %v11291_v15 = vor.u32 %v12973_v47, %v11288_v19 }
 0x3da   :  { %7876 = vmatpush.bf16.msra.mxu1 %v11339_v32  ;;  %v13037_v60 = vld [vmem:[%s19771_s1 + $0x1b0c] sm:$0xf]  ;;  %v11784_v44 = vld [vmem:[%s19771_s1 + $0x1cf8] sm:$0xf0]  ;;  %v11419_v28 = vor.u32 %v13005_v20, %v11416_v42 }
 0x3db   :  { %7889 = vmatpush.bf16.msra.mxu2 %v11467_v35  ;;  %v13097_v61 = vld [vmem:[%s19771_s1 + $0x1cec] sm:$0xf]  ;;  %v11912_v56 = vld [vmem:[%s19771_s1 + $0x1df8] sm:$0xf0]  ;;  %v11547_v35 = vor.u32 %v13037_v60, %v11544_v40 }
 0x3dc   :  { %7902 = vmatpush.bf16.msra.mxu3 %v11595_v17  ;;  %v13129_v52 = vld [vmem:[%s19771_s1 + $0x1dec] sm:$0xf]  ;;  %v12040_v55 = vld [vmem:[%s19771_s1 + $0x1ef8] sm:$0xf0]  ;;  %v11787_v8 = vor.u32 %v13097_v61, %v11784_v44 }
 0x3dd   :  { %7864 = vmatpush.bf16.msra.mxu0 %v11195_v46  ;;  %v13161_v57 = vld [vmem:[%s19771_s1 + $0x1eec] sm:$0xf]  ;;  %v12168_v32 = vld [vmem:[%s19771_s1 + $0x1ff8] sm:$0xf0]  ;;  %v11915_v26 = vor.u32 %v13129_v52, %v11912_v56 }
 0x3de   :  { %7877 = vmatpush.bf16.msra.mxu1 %v11323_v49  ;;  %v13193_v31 = vld [vmem:[%s19771_s1 + $0x1fec] sm:$0xf]  ;;  %v12043_v58 = vor.u32 %v13161_v57, %v12040_v55  ;;  %v11768_v17 = vld [vmem:[%s19771_s1 + $0x1cd8] sm:$0xf0] }
 0x3df   :  { %7890 = vmatpush.bf16.msra.mxu2 %v11451_v21  ;;  %v13093_v50 = vld [vmem:[%s19771_s1 + $0x1ccc] sm:$0xf]  ;;  %v12171_v62 = vor.u32 %v13193_v31, %v12168_v32  ;;  %v11896_v37 = vld [vmem:[%s19771_s1 + $0x1dd8] sm:$0xf0] }
 0x3e0   :  { %7903 = vmatpush.bf16.msra.mxu3 %v11579_v54  ;;  %v13125_v63 = vld [vmem:[%s19771_s1 + $0x1dcc] sm:$0xf]  ;;  %v12024_v1 = vld [vmem:[%s19771_s1 + $0x1ed8] sm:$0xf0]  ;;  %v11771_v46 = vor.u32 %v13093_v50, %v11768_v17 }
 0x3e1   :  { %7865 = vmatpush.bf16.msra.mxu0 %v11179_v9  ;;  %v13157_v0 = vld [vmem:[%s19771_s1 + $0x1ecc] sm:$0xf]  ;;  %v12152_v45 = vld [vmem:[%s19771_s1 + $0x1fd8] sm:$0xf0]  ;;  %v11899_v51 = vor.u32 %v13125_v63, %v11896_v37 }
 0x3e2   :  { %7878 = vmatpush.bf16.msra.mxu1 %v11307_v38  ;;  %v13189_v2 = vld [vmem:[%s19771_s1 + $0x1fcc] sm:$0xf]  ;;  %v12027_v49 = vor.u32 %v13157_v0, %v12024_v1  ;;  %v11752_v30 = vld [vmem:[%s19771_s1 + $0x1cb8] sm:$0xf0] }
 0x3e3   :  { %7891 = vmatpush.bf16.msra.mxu2 %v11435_v33  ;;  %v13089_v21 = vld [vmem:[%s19771_s1 + $0x1cac] sm:$0xf]  ;;  %v12155_v27 = vor.u32 %v13189_v2, %v12152_v45  ;;  %v11880_v7 = vld [vmem:[%s19771_s1 + $0x1db8] sm:$0xf0] }
 0x3e4   :  { %7904 = vmatpush.bf16.msra.mxu3 %v11563_v41  ;;  %v13121_v6 = vld [vmem:[%s19771_s1 + $0x1dac] sm:$0xf]  ;;  %v12008_v29 = vld [vmem:[%s19771_s1 + $0x1eb8] sm:$0xf0]  ;;  %v11755_v39 = vor.u32 %v13089_v21, %v11752_v30 }
 0x3e5   :  { %7866 = vmatpush.bf16.msra.mxu0 %v11163_v23  ;;  %v13153_v54 = vld [vmem:[%s19771_s1 + $0x1eac] sm:$0xf]  ;;  %v12136_v59 = vld [vmem:[%s19771_s1 + $0x1fb8] sm:$0xf0]  ;;  %v11883_v11 = vor.u32 %v13121_v6, %v11880_v7  ;;  %v7660_v33 = vpop.f32.mrf.mxu0 }
 0x3e6   :  { %7879 = vmatpush.bf16.msra.mxu1 %v11291_v15  ;;  %v12011_v12 = vor.u32 %v13153_v54, %v12008_v29  ;;  %v13117_v9 = vld [vmem:[%s19771_s1 + $0x1d8c] sm:$0xf]  ;;  %v11864_v16 = vld [vmem:[%s19771_s1 + $0x1d98] sm:$0xf0]  ;;  %v7661_v20 = vadd.f32 %v7660_v33, %v19474_v25  ;;  %v7673_v41 = vpop.f32.mrf.mxu1 }
 0x3e7   :  { %7892 = vmatpush.bf16.msra.mxu2 %v11419_v28  ;;  %v13149_v18 = vld [vmem:[%s19771_s1 + $0x1e8c] sm:$0xf]  ;;  %v11992_v38 = vld [vmem:[%s19771_s1 + $0x1e98] sm:$0xf0]  ;;  %v11867_v42 = vor.u32 %v13117_v9, %v11864_v16 }
 0x3e8   :  { %7905 = vmatpush.bf16.msra.mxu3 %v11547_v35  ;;  %7867 = vmatmul.bf16.vlgmr.msra.gmra.mxu0 %v14730_v5  ;;  %v13185_v5 = vld [vmem:[%s19771_s1 + $0x1fac] sm:$0xf]  ;;  %v12120_v19 = vld [vmem:[%s19771_s1 + $0x1f98] sm:$0xf0]  ;;  %v11995_v60 = vor.u32 %v13149_v18, %v11992_v38  ;;  %v7674_v44 = vadd.f32 %v7673_v41, %v7661_v20 }
 0x3e9   :  { %7911 = vmatpush.bf16.msrb.mxu0 %v11787_v8  ;;  %7880 = vmatmul.bf16.vlgmr.msra.gmra.mxu1 %v14743_v13  ;;  %v11736_v13 = vld [vmem:[%s19771_s1 + $0x1c98] sm:$0xf0]  ;;  %v13181_v47 = vld [vmem:[%s19771_s1 + $0x1f8c] sm:$0xf] }
 0x3ea   :  { %7924 = vmatpush.bf16.msrb.mxu1 %v11915_v26  ;;  %7893 = vmatmul.bf16.vlgmr.msra.gmra.mxu2 %v14741_v10  ;;  %v13085_v10 = vld [vmem:[%s19771_s1 + $0x1c8c] sm:$0xf]  ;;  %v11720_v48 = vld [vmem:[%s19771_s1 + $0x1c78] sm:$0xf0]  ;;  %v12123_v25 = vor.u32 %v13181_v47, %v12120_v19 }
 0x3eb   :  { %7937 = vmatpush.bf16.msrb.mxu2 %v12043_v58  ;;  %7906 = vmatmul.bf16.vlgmr.msra.gmra.mxu3 %v14751_v53  ;;  %v12139_v53 = vor.u32 %v13185_v5, %v12136_v59  ;;  %v11739_v22 = vor.u32 %v13085_v10, %v11736_v13  ;;  %v13081_v40 = vld [vmem:[%s19771_s1 + $0x1c6c] sm:$0xf]  ;;  %v11848_v52 = vld [vmem:[%s19771_s1 + $0x1d78] sm:$0xf0] }
 0x3ec   :  { %7950 = vmatpush.bf16.msrb.mxu3 %v12171_v62  ;;  %v13113_v61 = vld [vmem:[%s19771_s1 + $0x1d6c] sm:$0xf]  ;;  %v11976_v56 = vld [vmem:[%s19771_s1 + $0x1e78] sm:$0xf0]  ;;  %v11723_v15 = vor.u32 %v13081_v40, %v11720_v48 }
 0x3ed   :  { %7912 = vmatpush.bf16.msrb.mxu0 %v11771_v46  ;;  %v13145_v23 = vld [vmem:[%s19771_s1 + $0x1e6c] sm:$0xf]  ;;  %v12104_v55 = vld [vmem:[%s19771_s1 + $0x1f78] sm:$0xf0]  ;;  %v11851_v28 = vor.u32 %v13113_v61, %v11848_v52  ;;  %v7686_v58 = vpop.f32.mrf.mxu2  ;;  %v7662_v2 = vpop.f32.mrf.mxu0 }
 0x3ee   :  { %7925 = vmatpush.bf16.msrb.mxu1 %v11899_v51  ;;  %v13177_v57 = vld [vmem:[%s19771_s1 + $0x1f6c] sm:$0xf]  ;;  %v11979_v31 = vor.u32 %v13145_v23, %v11976_v56  ;;  %v11704_v35 = vld [vmem:[%s19771_s1 + $0x1c58] sm:$0xf0]  ;;  %v7687_v62 = vadd.f32 %v7686_v58, %v7674_v44  ;;  %v7699_v37 = vpop.f32.mrf.mxu3  ;;  %v7675_v46 = vpop.f32.mrf.mxu1 }
 0x3ef   :  { %7938 = vmatpush.bf16.msrb.mxu2 %v12027_v49  ;;  %v13077_v32 = vld [vmem:[%s19771_s1 + $0x1c4c] sm:$0xf]  ;;  %v12107_v26 = vor.u32 %v13177_v57, %v12104_v55  ;;  %v11832_v50 = vld [vmem:[%s19771_s1 + $0x1d58] sm:$0xf0] }
 0x3f0   :  { %7951 = vmatpush.bf16.msrb.mxu3 %v12155_v27  ;;  %v13109_v8 = vld [vmem:[%s19771_s1 + $0x1d4c] sm:$0xf]  ;;  %v11960_v63 = vld [vmem:[%s19771_s1 + $0x1e58] sm:$0xf0]  ;;  %v11707_v45 = vor.u32 %v13077_v32, %v11704_v35  ;;  %v7700_v51 = vadd.f32 %v7699_v37, %v7687_v62 }
 0x3f1   :  { %7913 = vmatpush.bf16.msrb.mxu0 %v11755_v39  ;;  %v13141_v17 = vld [vmem:[%s19771_s1 + $0x1e4c] sm:$0xf]  ;;  %v12088_v1 = vld [vmem:[%s19771_s1 + $0x1f58] sm:$0xf0]  ;;  %v11835_v49 = vor.u32 %v13109_v8, %v11832_v50 }
 0x3f2   :  { %7926 = vmatpush.bf16.msrb.mxu1 %v11883_v11  ;;  %v13173_v0 = vld [vmem:[%s19771_s1 + $0x1f4c] sm:$0xf]  ;;  %v11963_v21 = vor.u32 %v13141_v17, %v11960_v63  ;;  %v11688_v6 = vld [vmem:[%s19771_s1 + $0x1c38] sm:$0xf0] }
 0x3f3   :  { %7939 = vmatpush.bf16.msrb.mxu2 %v12011_v12  ;;  %v13073_v30 = vld [vmem:[%s19771_s1 + $0x1c2c] sm:$0xf]  ;;  %v12091_v7 = vor.u32 %v13173_v0, %v12088_v1  ;;  %v11816_v54 = vld [vmem:[%s19771_s1 + $0x1d38] sm:$0xf0] }
 0x3f4   :  { %7952 = vmatpush.bf16.msrb.mxu3 %v12139_v53  ;;  %v13105_v27 = vld [vmem:[%s19771_s1 + $0x1d2c] sm:$0xf]  ;;  %v11944_v5 = vld [vmem:[%s19771_s1 + $0x1e38] sm:$0xf0]  ;;  %v11691_v11 = vor.u32 %v13073_v30, %v11688_v6 }
 0x3f5   :  { %7914 = vmatpush.bf16.msrb.mxu0 %v11739_v22  ;;  %v13137_v29 = vld [vmem:[%s19771_s1 + $0x1e2c] sm:$0xf]  ;;  %v12072_v39 = vld [vmem:[%s19771_s1 + $0x1f38] sm:$0xf0]  ;;  %v11819_v12 = vor.u32 %v13105_v27, %v11816_v54  ;;  %v7688_v47 = vpop.f32.mrf.mxu2 }
 0x3f6   :  { %7927 = vmatpush.bf16.msrb.mxu1 %v11867_v42  ;;  %v13169_v59 = vld [vmem:[%s19771_s1 + $0x1f2c] sm:$0xf]  ;;  %v11947_v10 = vor.u32 %v13137_v29, %v11944_v5  ;;  %v11672_v9 = vld [vmem:[%s19771_s1 + $0x1c18] sm:$0xf0]  ;;  %v7701_v22 = vpop.f32.mrf.mxu3  ;;  %v7971_v5 = vlaneseq }
 0x3f7   :  { %7940 = vmatpush.bf16.msrb.mxu2 %v11995_v60  ;;  %v13069_v13 = vld [vmem:[%s19771_s1 + $0x1c0c] sm:$0xf]  ;;  %v12075_v16 = vor.u32 %v13169_v59, %v12072_v39  ;;  %v11800_v18 = vld [vmem:[%s19771_s1 + $0x1d18] sm:$0xf0] }
 0x3f8   :  { %7953 = vmatpush.bf16.msrb.mxu3 %v12123_v25  ;;  %v13101_v53 = vld [vmem:[%s19771_s1 + $0x1d0c] sm:$0xf]  ;;  %v11928_v33 = vld [vmem:[%s19771_s1 + $0x1e18] sm:$0xf0]  ;;  %v11675_v41 = vor.u32 %v13069_v13, %v11672_v9  ;;  %vm19725_vm0 = vcmp.lt.s32.totalorder %v7971_v5, 512 }
 0x3f9   :  { %7915 = vmatpush.bf16.msrb.mxu0 %v11723_v15  ;;  %v13133_v38 = vld [vmem:[%s19771_s1 + $0x1e0c] sm:$0xf]  ;;  %v12056_v20 = vld [vmem:[%s19771_s1 + $0x1f18] sm:$0xf0]  ;;  %v11803_v42 = vor.u32 %v13101_v53, %v11800_v18 }
 0x3fa   :  { %7928 = vmatpush.bf16.msrb.mxu1 %v11851_v28  ;;  %v13165_v19 = vld [vmem:[%s19771_s1 + $0x1f0c] sm:$0xf]  ;;  %v11931_v60 = vor.u32 %v13133_v38, %v11928_v33  ;;  %v7984_v38 = vrot.slane %v17475_v14, 4  ;;  %v8025_v33 = vmul.f32 %v19074_v4, %v19074_v4 }
 0x3fb   :  { %7941 = vmatpush.bf16.msrb.mxu2 %v11979_v31  ;;  %v12059_v40 = vor.u32 %v13165_v19, %v12056_v20  ;;  %v7990_v19 = vrot.slane %v19074_v4, 4 }
 0x3fc   :  { %7954 = vmatpush.bf16.msrb.mxu3 %v12107_v26 }
 0x3fd   :  { %7916 = vmatpush.bf16.msrb.mxu0 %v11707_v45 }
 0x3fe   :  { %7929 = vmatpush.bf16.msrb.mxu1 %v11835_v49 }
 0x3ff   :  { %7942 = vmatpush.bf16.msrb.mxu2 %v11963_v21 }
 0x400   :  { %7955 = vmatpush.bf16.msrb.mxu3 %v12091_v7 }
 0x401   :  { %7917 = vmatpush.bf16.msrb.mxu0 %v11691_v11  ;;  %v13200_v11 = vmov 0.0  }
 0x402   :  { %7930 = vmatpush.bf16.msrb.mxu1 %v11819_v12  ;;  %7975 = vst.msk [vmem:[%s19775_s4] sm:$0xf] %vm19725_vm0, %v13200_v11 }
 0x403   :  { %7943 = vmatpush.bf16.msrb.mxu2 %v11947_v10  ;;  %7976 = vst.msk [vmem:[%s19776_s5] sm:$0xf] %vm19725_vm0, %v13200_v11 }
 0x404   :  { %7956 = vmatpush.bf16.msrb.mxu3 %v12075_v16  ;;  %v8024_v16 = vmul.f32 %v17475_v14, %v17475_v14 }
 0x405   :  { %7918 = vmatpush.bf16.msrb.mxu0 %v11675_v41  ;;  %v7712_v48 = vpop.f32.mrf.mxu0  ;;  %v8023_v41 = vmul.f32 %v15863_v3, %v15863_v3 }
 0x406   :  { %7931 = vmatpush.bf16.msrb.mxu1 %v11803_v42  ;;  %v7713_v61 = vadd.f32 %v7712_v48, %v7700_v51  ;;  %v7725_v25 = vpop.f32.mrf.mxu1  ;;  %v8033_v47 = vrot.slane %v8024_v16, 4 }
 0x407   :  { %7944 = vmatpush.bf16.msrb.mxu2 %v11931_v60  ;;  %v7985_v60 = vadd.f32 %v7984_v38, %v17475_v14 }
 0x408   :  { %7957 = vmatpush.bf16.msrb.mxu3 %v12059_v40  ;;  %7919 = vmatmul.bf16.vlgmr.msrb.gmra.mxu0 %v14943_v24  ;;  %v7726_v44 = vadd.f32 %v7725_v25, %v7713_v61  ;;  %v8039_v40 = vrot.slane %v8025_v33, 4  ;;  %v7978_v61 = vrot.slane %v15863_v3, 4  ;;  %v8034_v25 = vadd.f32 %v8033_v47, %v8024_v16 }
 0x409   :  { %7932 = vmatmul.bf16.vlgmr.msrb.gmra.mxu1 %v14956_v36 }
 0x40a   :  { %7945 = vmatmul.bf16.vlgmr.msrb.gmra.mxu2 %v14954_v34 }
 0x40b   :  { %7958 = vmatmul.bf16.vlgmr.msrb.gmra.mxu3 %v14964_v43 }
 0x40d   :  { %v7738_v52 = vpop.f32.mrf.mxu2  ;;  %v7714_v57 = vpop.f32.mrf.mxu0 }
 0x40e   :  { %v7739_v23 = vadd.f32 %v7738_v52, %v7726_v44  ;;  %v7751_v56 = vpop.f32.mrf.mxu3  ;;  %v7727_v55 = vpop.f32.mrf.mxu1  ;;  %v7991_v44 = vadd.f32 %v7990_v19, %v19074_v4  ;;  %v8027_v52 = vrot.slane %v8023_v41, 4 }
 0x40f   :  { %v7979_v55 = vadd.f32 %v7978_v61, %v15863_v3 }
 0x410   :  { %v7752_v15 = vadd.f32 %v7751_v56, %v7739_v23  ;;  %v7986_v23 = vrot.slane %v7985_v60, 2  ;;  %v8040_v56 = vadd.f32 %v8039_v40, %v8025_v33  ;;  %v8028_v14 = vadd.f32 %v8027_v52, %v8023_v41  ;;  %v7977_v41 = vld [vmem:[%s19775_s4] sm:$0xf] }
 0x415   :  { %v7740_v28 = vpop.f32.mrf.mxu2 }
 0x416   :  { %v7753_v31 = vpop.f32.mrf.mxu3 }
 0x417   :  { %v7992_v31 = vrot.slane %v7991_v44, 2 }
 0x425   :  { %v7764_v32 = vpop.f32.mrf.mxu0 }
 0x426   :  { %v7765_v24 = vadd.f32 %v7764_v32, %v7752_v15  ;;  %v7777_v35 = vpop.f32.mrf.mxu1  ;;  %v8035_v15 = vrot.slane %v8034_v25, 2 }
 0x428   :  { %v7778_v36 = vadd.f32 %v7777_v35, %v7765_v24 }
 0x42d   :  { %v7790_v8 = vpop.f32.mrf.mxu2  ;;  %v7766_v43 = vpop.f32.mrf.mxu0 }
 0x42e   :  { %v7791_v34 = vadd.f32 %v7790_v8, %v7778_v36  ;;  %v7803_v26 = vpop.f32.mrf.mxu3  ;;  %v7779_v58 = vpop.f32.mrf.mxu1  ;;  %v7987_v8 = vadd.f32 %v7986_v23, %v7985_v60  ;;  %v7980_v43 = vrot.slane %v7979_v55, 2 }
 0x42f   :  { %v8036_v58 = vadd.f32 %v8035_v15, %v8034_v25  ;;  %v8022_v25 = vld [vmem:[%s19776_s5] sm:$0xf] }
 0x430   :  { %v7804_v50 = vadd.f32 %v7803_v26, %v7791_v34  ;;  %v8041_v34 = vrot.slane %v8040_v56, 2  ;;  %v7988_v3 = vrot.slane %v7987_v8, 1 }
 0x435   :  { %v7792_v17 = vpop.f32.mrf.mxu2 }
 0x436   :  { %v7805_v63 = vpop.f32.mrf.mxu3 }
 0x445   :  { %v7816_v62 = vpop.f32.mrf.mxu0 }
 0x446   :  { %v7829_v37 = vpop.f32.mrf.mxu1  ;;  %v7817_v30 = vadd.f32 %v7816_v62, %v7804_v50  ;;  %v7993_v50 = vadd.f32 %v7992_v31, %v7991_v44 }
 0x448   :  { %v7830_v29 = vadd.f32 %v7829_v37, %v7817_v30  ;;  %v8029_v37 = vrot.slane %v8028_v14, 2 }
 0x44d   :  { %v7842_v0 = vpop.f32.mrf.mxu2  ;;  %v7818_v2 = vpop.f32.mrf.mxu0 }
 0x44e   :  { %v7855_v1 = vpop.f32.mrf.mxu3  ;;  %v7831_v45 = vpop.f32.mrf.mxu1  ;;  %v7843_v59 = vadd.f32 %v7842_v0, %v7830_v29  ;;  %v8042_v0 = vadd.f32 %v8041_v34, %v8040_v56 }
 0x44f   :  { %v7981_v45 = vadd.f32 %v7980_v43, %v7979_v55 }
 0x450   :  { %v7856_v13 = vadd.f32 %v7855_v1, %v7843_v59 }
 0x451   :  { %v7982_v5 = vrot.slane %v7981_v45, 1 }
 0x453   :  { %v7983_v38 = vadd.f32 %v7982_v5, %v7981_v45 }
 0x455   :  { %v7844_v46 = vpop.f32.mrf.mxu2 }
 0x456   :  { %v7857_v51 = vpop.f32.mrf.mxu3  ;;  %v8037_v46 = vrot.slane %v8036_v58, 1 }
 0x458   :  { %v8038_v59 = vadd.f32 %v8037_v46, %v8036_v58 }
 0x45a   :  { %v8055_v33 = vrot.slane %v8038_v59, 7 }
 0x465   :  { %v7868_v49 = vpop.f32.mrf.mxu0 }
 0x466   :  { %v7881_v21 = vpop.f32.mrf.mxu1  ;;  %v7869_v9 = vadd.f32 %v7868_v49, %v7856_v13  ;;  %v7994_v49 = vrot.slane %v7993_v50, 1 }
 0x468   :  { %v7882_v53 = vadd.f32 %v7881_v21, %v7869_v9  ;;  %v7995_v11 = vadd.f32 %v7994_v49, %v7993_v50 }
 0x46a   :  { %v8007_v47 = vrot.slane %v7995_v11, 6 }
 0x46d   :  { %v7894_v6 = vpop.f32.mrf.mxu2  ;;  %v7870_v7 = vpop.f32.mrf.mxu0 }
 0x46e   :  { %v7907_v27 = vpop.f32.mrf.mxu3  ;;  %v7883_v54 = vpop.f32.mrf.mxu1  ;;  %v7895_v18 = vadd.f32 %v7894_v6, %v7882_v53  ;;  %v8043_v7 = vrot.slane %v8042_v0, 1 }
 0x470   :  { %v7908_v20 = vadd.f32 %v7907_v27, %v7895_v18  ;;  %v8030_v27 = vadd.f32 %v8029_v37, %v8028_v14  ;;  %v8044_v53 = vadd.f32 %v8043_v7, %v8042_v0 }
 0x472   :  { %v8031_v13 = vrot.slane %v8030_v27, 1  ;;  %v8056_v60 = vrot.slane %v8044_v53, 6 }
 0x475   :  { %v7896_v12 = vpop.f32.mrf.mxu2 }
 0x476   :  { %v7909_v10 = vpop.f32.mrf.mxu3 }
 0x485   :  { %v7920_v22 = vpop.f32.mrf.mxu0 }
 0x486   :  { %v7933_v42 = vpop.f32.mrf.mxu1  ;;  %v7921_v48 = vadd.f32 %v7920_v22, %v7908_v20  ;;  %v8032_v22 = vadd.f32 %v8031_v13, %v8030_v27 }
 0x488   :  { %v7934_v57 = vadd.f32 %v7933_v42, %v7921_v48  ;;  %v8058_v44 = vsel %vm8009_vm1, %v8032_v22, %v8055_v33 }
 0x48d   :  { %v7946_v28 = vpop.f32.mrf.mxu2  ;;  %v7922_v35 = vpop.f32.mrf.mxu0 }
 0x48e   :  { %v7947_v32 = vadd.f32 %v7946_v28, %v7934_v57  ;;  %v7959_v24 = vpop.f32.mrf.mxu3  ;;  %v7935_v36 = vpop.f32.mrf.mxu1 }
 0x490   :  { %v7960_v26 = vadd.f32 %v7959_v24, %v7947_v32 }
 0x492   :  { %v7964_v17 = vpack.c.bf16 %v7960_v26, %v19074_v4  ;;  %v7996_v63 = vrot.slane %v7960_v26, 4  ;;  %v8026_v62 = vmul.f32 %v7960_v26, %v7960_v26  ;;  %v7989_v4 = vadd.f32 %v7988_v3, %v7987_v8 }
 0x494   :  { %7966 = vst [vmem:[%s19774_s3 + $0x8] sm:$0xff] %v7964_v17  ;;  %v7997_v1 = vadd.f32 %v7996_v63, %v7960_v26  ;;  %v8045_v2 = vrot.slane %v8026_v62, 4  ;;  %v8006_v9 = vrot.slane %v7989_v4, 7 }
 0x495   :  { %v7948_v51 = vpop.f32.mrf.mxu2 }
 0x496   :  { %v7998_v21 = vrot.slane %v7997_v1, 2  ;;  %v8046_v30 = vadd.f32 %v8045_v2, %v8026_v62  ;;  %v7961_v6 = vpop.f32.mrf.mxu3  ;;  %v8010_v42 = vsel %vm8009_vm1, %v7983_v38, %v8006_v9 }
 0x498   :  { %v7999_v54 = vadd.f32 %v7998_v21, %v7997_v1  ;;  %v8047_v29 = vrot.slane %v8046_v30, 2 }
 0x49a   :  { %v8000_v12 = vrot.slane %v7999_v54, 1  ;;  %v8048_v10 = vadd.f32 %v8047_v29, %v8046_v30 }
 0x49c   :  { %v8001_v16 = vadd.f32 %v8000_v12, %v7999_v54  ;;  %v8049_v18 = vrot.slane %v8048_v10, 1 }
 0x49e   :  { %v8008_v19 = vrot.slane %v8001_v16, 5  ;;  %v8050_v20 = vadd.f32 %v8049_v18, %v8048_v10 }
 0x4a0   :  { %v8012_v40 = vsel %vm8011_vm2, %v8007_v47, %v8008_v19  ;;  %v8057_v48 = vrot.slane %v8050_v20, 5 }
 0x4a1   :  { %v8014_v61 = vsel %vm8013_vm3, %v8010_v42, %v8012_v40 }
 0x4a2   :  { %v8016_v52 = vadd.f32 %v8014_v61, %v7977_v41  ;;  %v8059_v23 = vsel %vm8011_vm2, %v8056_v60, %v8057_v48 }
 0x4a3   :  { %v8060_v56 = vsel %vm8013_vm3, %v8058_v44, %v8059_v23 }
 0x4a4   :  { %8021 = vst.msk [vmem:[%s19775_s4] sm:$0xf] %vm19725_vm0, %v8016_v52  ;;  %v8062_v57 = vadd.f32 %v8060_v56, %v8022_v25 }
 0x4a6   :  { %8063 = vst.msk [vmem:[%s19776_s5] sm:$0xf] %vm19725_vm0, %v8062_v57 }

</bundles_post_ra>
